<compile_context>
chip_gen: v7x
topology: tpu7x:2x2x1
jax: 0.10.0
libtpu: 0.0.40
codegen_flags: <defaults>
</compile_context>

<pallas_src>
import jax
import jax.numpy as jnp
from jax.experimental import pallas as pl
from jax.experimental.pallas import tpu as pltpu

MNIST_NUM_CLASSES = 10
_VMEM_LIMIT = 32 * 1024 * 1024  # explicit scoped-VMEM budget; safe on v5e/v6e/v7x


def _round_up(x, m):
    return ((x + m - 1) // m) * m


# ----------------------------------------------------------------------------
# Pallas kernel 1: conv-as-matmul + bias + ReLU with the 2x2 max-pool fused as a
# 4-step max reduction over the pool-window-position grid axis.
# ----------------------------------------------------------------------------
def _conv_pool_kernel(p_ref, w_ref, b_ref, o_ref, acc_ref):
    # p_ref: (1, TM, K) bf16 patches for pool-window position p = program_id(1)
    # w_ref: (K, Cout) bf16, b_ref: (1, Cout) f32
    # acc_ref: (TM, Cout) f32 running max across the 4 positions (fused max-pool)
    # o_ref: (TM, Cout) bf16 pooled output (block constant across the p axis)
    p = pl.program_id(1)
    y = jnp.dot(p_ref[0], w_ref[...], preferred_element_type=jnp.float32)
    y = jnp.maximum(y + b_ref[...], 0.0)

    @pl.when(p == 0)
    def _():
        acc_ref[...] = y

    @pl.when(p > 0)
    def _():
        acc_ref[...] = jnp.maximum(acc_ref[...], y)

    @pl.when(p == pl.num_programs(1) - 1)
    def _():
        o_ref[...] = acc_ref[...].astype(o_ref.dtype)


def conv_relu_pool(patches, wmat, bias, *, tm):
    # patches: (4, M, K) bf16 where M = N * (H//2) * (W//2) pooled output positions.
    # Returns (M, Cout) bf16 = maxpool2(relu(conv + bias)) in pooled-row-major NHWC order.
    _, m, k = patches.shape
    cout = wmat.shape[1]
    m8 = _round_up(m, 8)
    if m8 != m:
        patches = jnp.pad(patches, ((0, 0), (0, m8 - m), (0, 0)))
    tm = min(tm, m8)
    out = pl.pallas_call(
        _conv_pool_kernel,
        out_shape=jax.ShapeDtypeStruct((m8, cout), jnp.bfloat16),
        grid=(pl.cdiv(m8, tm), 4),
        in_specs=[
            pl.BlockSpec((1, tm, k), lambda i, p: (p, i, 0)),
            pl.BlockSpec((k, cout), lambda i, p: (0, 0)),
            pl.BlockSpec((1, cout), lambda i, p: (0, 0)),
        ],
        out_specs=pl.BlockSpec((tm, cout), lambda i, p: (i, 0)),
        scratch_shapes=[pltpu.VMEM((tm, cout), jnp.float32)],
        compiler_params=pltpu.CompilerParams(
            dimension_semantics=("parallel", "arbitrary"),
            vmem_limit_bytes=_VMEM_LIMIT,
        ),
    )(patches, wmat, bias)
    return out[:m]


# ----------------------------------------------------------------------------
# Pallas kernel 2: fc1 (bf16 weight, f32 accum) on a (batch, hidden-half) parallel grid
# ----------------------------------------------------------------------------
def _fc1_kernel(x_ref, w_ref, b_ref, h_ref):
    h = jnp.dot(x_ref[...], w_ref[...], preferred_element_type=jnp.float32) + b_ref[...]
    h_ref[...] = h.astype(h_ref.dtype)


def fc1(x_bf, w1, b1, *, tb=512, hsplits=2):
    # hsplits=2 parallel steps over the hidden axis -> both v7x TensorCores stream half the
    # 6.3 MB bf16 weight each; on single-TC chips the two steps just run back-to-back.
    n, kin = x_bf.shape
    hpad = w1.shape[1]
    hs = hpad // hsplits
    tb = min(tb, n)
    return pl.pallas_call(
        _fc1_kernel,
        out_shape=jax.ShapeDtypeStruct((n, hpad), jnp.bfloat16),
        grid=(pl.cdiv(n, tb), hsplits),
        in_specs=[
            pl.BlockSpec((tb, kin), lambda i, j: (i, 0)),
            pl.BlockSpec((kin, hs), lambda i, j: (0, j)),
            pl.BlockSpec((1, hs), lambda i, j: (0, j)),
        ],
        out_specs=pl.BlockSpec((tb, hs), lambda i, j: (i, j)),
        compiler_params=pltpu.CompilerParams(
            dimension_semantics=("parallel", "parallel"),
            vmem_limit_bytes=_VMEM_LIMIT,
        ),
    )(x_bf, w1, b1)


# ----------------------------------------------------------------------------
# Pallas kernel 3: fc2 + softmax over dim=0 (batch axis couples rows -> gridless, tiny)
# ----------------------------------------------------------------------------
def _fc2_softmax_kernel(h_ref, w2_ref, b2_ref, o_ref):
    y = jnp.dot(h_ref[...], w2_ref[...], preferred_element_type=jnp.float32) + b2_ref[...]
    # nn.Softmax(dim=0): normalize over the batch axis.
    y = y - jnp.max(y, axis=0, keepdims=True)
    e = jnp.exp(y)
    o_ref[...] = (e / jnp.sum(e, axis=0, keepdims=True)).astype(o_ref.dtype)


def fc2_softmax(h, w2, b2):
    n = h.shape[0]
    ncls = w2.shape[1]
    return pl.pallas_call(
        _fc2_softmax_kernel,
        out_shape=jax.ShapeDtypeStruct((n, ncls), jnp.float32),
        in_specs=[pl.BlockSpec(memory_space=pltpu.MemorySpace.VMEM)] * 3,
        out_specs=pl.BlockSpec(memory_space=pltpu.MemorySpace.VMEM),
        compiler_params=pltpu.CompilerParams(vmem_limit_bytes=_VMEM_LIMIT),
    )(h, w2, b2)


# ----------------------------------------------------------------------------
# Glue (plain JAX): pool-position-grouped im2col, layout plumbing
# ----------------------------------------------------------------------------
def im2col_pooled(x_nhwc, kh, kw, pad):
    """Patches for a stride-1 kh x kw conv, grouped by 2x2 pool-window position.

    Returns (4, N*(H//2)*(W//2), C*kh*kw) in the input dtype; axis 0 indexes the position
    inside each 2x2 pool window so the conv kernel can fuse the max-pool as a 4-step max.
    K ordering is c*(kh*kw) + i*kw + j, matching the PyTorch conv weight flatten.
    """
    n, h, w, c = x_nhwc.shape
    xp = jnp.pad(x_nhwc, ((0, 0), (pad, pad), (pad, pad), (0, 0)))
    hp, wp = h // 2, w // 2
    groups = []
    for dh in range(2):
        for dw in range(2):
            cols = [xp[:, dh + i: dh + i + h: 2, dw + j: dw + j + w: 2, :]
                    for i in range(kh) for j in range(kw)]
            p = jnp.stack(cols, axis=-1)                    # (N, H/2, W/2, C, kh*kw)
            groups.append(p.reshape(n * hp * wp, c * kh * kw))
    return jnp.stack(groups, axis=0)                        # (4, N*H/2*W/2, C*kh*kw)


@jax.jit
def forward(x_nchw, params):
    n = x_nchw.shape[0]
    x = jnp.transpose(x_nchw, (0, 2, 3, 1)).astype(jnp.bfloat16)     # NCHW -> NHWC, bf16 stream

    # layer1: conv(1->32, k5, p2) + ReLU + maxpool2, fused in one Pallas kernel
    p1 = im2col_pooled(x, 5, 5, 2)                                   # (4, N*196, 25) bf16
    y1 = conv_relu_pool(p1, params["w1"], params["b1"], tm=8192)     # (N*196, 32) bf16
    y1 = y1.reshape(n, 14, 14, 32)                                   # NHWC

    # layer2: conv(32->64, k5, p2) + ReLU + maxpool2, fused
    p2 = im2col_pooled(y1, 5, 5, 2)                                  # (4, N*49, 800) bf16
    y2 = conv_relu_pool(p2, params["w2"], params["b2"], tm=2048)     # (N*49, 64) bf16

    # Flatten in NHWC order (fc1 weight rows were permuted at init to match PyTorch's
    # NCHW x.reshape(N, -1) semantics exactly). Activations stay bf16 into the head.
    flat = y2.reshape(n, 64 * 7 * 7)                                 # (N, 3136) bf16

    # TODO(synk): nn.Dropout() is stochastic in train mode; implemented as identity (eval).
    h = fc1(flat, params["wf1"], params["bf1"])                      # (N, 1024) bf16
    return fc2_softmax(h, params["wf2"], params["bf2"])              # (N, 10) f32


def init_params(key):
    k = jax.random.split(key, 8)
    s = 0.02
    hdim, hpad = 1000, 1024            # fc1 hidden padded to a lane multiple (zero cols/rows)

    # PyTorch Conv2d weight (Cout, Cin, KH, KW) -> matmul layout (Cin*KH*KW, Cout), bf16
    w1_t = s * jax.random.normal(k[0], (32, 1, 5, 5), jnp.float32)
    w2_t = s * jax.random.normal(k[1], (64, 32, 5, 5), jnp.float32)
    # PyTorch Linear weight (out, in) -> matmul layout (in, out)
    wf1_t = s * jax.random.normal(k[2], (hdim, 7 * 7 * 64), jnp.float32)
    wf2_t = s * jax.random.normal(k[3], (MNIST_NUM_CLASSES, hdim), jnp.float32)
    b1 = s * jax.random.normal(k[4], (32,), jnp.float32)
    b2 = s * jax.random.normal(k[5], (64,), jnp.float32)
    bf1 = s * jax.random.normal(k[6], (hdim,), jnp.float32)
    bf2 = s * jax.random.normal(k[7], (MNIST_NUM_CLASSES,), jnp.float32)

    # fc1: PyTorch flattens NCHW (row index c*49 + h*7 + w); our activations flatten NHWC
    # ((h*7 + w)*64 + c). Permute weight rows ONCE here, zero-pad hidden 1000->1024, store bf16
    # (f32 accumulation happens inside the kernel).
    wf1 = wf1_t.T                                                               # (3136_nchw, 1000)
    wf1 = jnp.transpose(wf1.reshape(64, 49, hdim), (1, 0, 2)).reshape(49 * 64, hdim)
    wf1 = jnp.pad(wf1, ((0, 0), (0, hpad - hdim))).astype(jnp.bfloat16)         # (3136, 1024) bf16
    wf2 = jnp.pad(wf2_t.T, ((0, hpad - hdim), (0, 0))).astype(jnp.bfloat16)     # (1024, 10) bf16

    return {
        "w1": w1_t.reshape(32, 25).T.astype(jnp.bfloat16),        # (25, 32) bf16
        "b1": b1.reshape(1, 32),                                  # f32
        "w2": w2_t.reshape(64, 32 * 25).T.astype(jnp.bfloat16),   # (800, 64) bf16
        "b2": b2.reshape(1, 64),                                  # f32
        "wf1": wf1,                                               # (3136, 1024) bf16, NHWC rows
        "bf1": jnp.pad(bf1, (0, hpad - hdim)).reshape(1, hpad),   # (1, 1024) f32
        "wf2": wf2,                                               # (1024, 10) bf16
        "bf2": bf2.reshape(1, MNIST_NUM_CLASSES),                 # (1, 10) f32
    }


if __name__ == "__main__":
    key = jax.random.PRNGKey(0)
    kx, kp = jax.random.split(key)
    params = init_params(kp)
    # MNIST-shaped input (fc1 requires 28x28 spatial): batch=2, NCHW like the PyTorch module.
    x = jax.random.normal(kx, (2, 1, 28, 28), jnp.float32)

    out = forward(x, params)
    out = jax.block_until_ready(out)

    assert out.shape == (2, MNIST_NUM_CLASSES)
    assert bool(jnp.all(jnp.isfinite(out)))
    # softmax over dim=0: every column sums to 1 across the batch
    assert bool(jnp.allclose(jnp.sum(out, axis=0), 1.0, atol=1e-5))
    print("KERNEL_OK")
</pallas_src>

<mosaic_0001>
module attributes {stable_mosaic.version = 11 : i64} {
  func.func @_conv_pool_kernel(%arg0: i32, %arg1: i32, %arg2: memref<1x392x25xbf16, #tpu.memory_space<vmem>>, %arg3: memref<25x32xbf16, #tpu.memory_space<vmem>>, %arg4: memref<1x32xf32, #tpu.memory_space<vmem>>, %arg5: memref<392x32xbf16, #tpu.memory_space<vmem>>, %arg6: memref<392x32xf32, #tpu.memory_space<vmem>>) attributes {dimension_semantics = [#tpu.dimension_semantics<parallel>, #tpu.dimension_semantics<arbitrary>], iteration_bounds = array<i64: 1, 4>, scalar_prefetch = 0 : i64, scratch_operands = 1 : i64, tpu.core_type = #tpu.core_type<tc>, window_params = [{transform_indices = @transform_0, window_bounds = array<i64: 1, 392, 25>}, {pipeline_mode = #tpu.pipeline_mode<synchronous>, transform_indices = @transform_1, window_bounds = array<i64: 25, 32>}, {pipeline_mode = #tpu.pipeline_mode<synchronous>, transform_indices = @transform_2, window_bounds = array<i64: 1, 32>}, {transform_indices = @transform_3, window_bounds = array<i64: 392, 32>}]} {
    %c0 = arith.constant 0 : index
    %c0_0 = arith.constant 0 : index
    %c0_1 = arith.constant 0 : index
    %0 = vector.load %arg2[%c0, %c0_0, %c0_1] : memref<1x392x25xbf16, #tpu.memory_space<vmem>>, vector<1x392x25xbf16>
    %1 = vector.shape_cast %0 : vector<1x392x25xbf16> to vector<392x25xbf16>
    %c0_2 = arith.constant 0 : index
    %c0_3 = arith.constant 0 : index
    %2 = vector.load %arg3[%c0_2, %c0_3] : memref<25x32xbf16, #tpu.memory_space<vmem>>, vector<25x32xbf16>
    %cst = arith.constant dense<0.000000e+00> : vector<392x32xf32>
    %3 = tpu.matmul %1, %2, %cst {dimension_numbers = #tpu.dot_dimension_numbers<[1], [0], [0], [1], [0, 0, 1, 1], [], []>} : vector<392x25xbf16>, vector<25x32xbf16>, vector<392x32xf32> -> vector<392x32xf32>
    %c0_4 = arith.constant 0 : index
    %c0_5 = arith.constant 0 : index
    %4 = vector.load %arg4[%c0_4, %c0_5] : memref<1x32xf32, #tpu.memory_space<vmem>>, vector<1x32xf32>
    %5 = vector.broadcast %4 : vector<1x32xf32> to vector<392x32xf32>
    %6 = arith.addf %3, %5 : vector<392x32xf32>
    %cst_6 = arith.constant 0.000000e+00 : f32
    %7 = vector.broadcast %cst_6 : f32 to vector<392x32xf32>
    %8 = arith.maximumf %6, %7 : vector<392x32xf32>
    %c0_i32 = arith.constant 0 : i32
    %9 = arith.cmpi eq, %arg1, %c0_i32 : i32
    %10 = arith.extui %9 : i1 to i32
    %c0_i32_7 = arith.constant 0 : i32
    %11 = arith.cmpi ne, %10, %c0_i32_7 : i32
    scf.if %11 {
      %c0_11 = arith.constant 0 : index
      %c0_12 = arith.constant 0 : index
      %18 = vector.load %arg6[%c0_11, %c0_12] : memref<392x32xf32, #tpu.memory_space<vmem>>, vector<392x32xf32>
      tpu.vector_store %arg6[%c0_11, %c0_12], %8 {strides = array<i32>} : memref<392x32xf32, #tpu.memory_space<vmem>>, vector<392x32xf32>,
    } else {
    }
    %c0_i32_8 = arith.constant 0 : i32
    %12 = arith.cmpi sgt, %arg1, %c0_i32_8 : i32
    %13 = arith.extui %12 : i1 to i32
    %c0_i32_9 = arith.constant 0 : i32
    %14 = arith.cmpi ne, %13, %c0_i32_9 : i32
    scf.if %14 {
      %c0_11 = arith.constant 0 : index
      %c0_12 = arith.constant 0 : index
      %18 = vector.load %arg6[%c0_11, %c0_12] : memref<392x32xf32, #tpu.memory_space<vmem>>, vector<392x32xf32>
      %19 = arith.maximumf %18, %8 : vector<392x32xf32>
      %c0_13 = arith.constant 0 : index
      %c0_14 = arith.constant 0 : index
      %20 = vector.load %arg6[%c0_13, %c0_14] : memref<392x32xf32, #tpu.memory_space<vmem>>, vector<392x32xf32>
      tpu.vector_store %arg6[%c0_13, %c0_14], %19 {strides = array<i32>} : memref<392x32xf32, #tpu.memory_space<vmem>>, vector<392x32xf32>,
    } else {
    }
    %c3_i32 = arith.constant 3 : i32
    %15 = arith.cmpi eq, %arg1, %c3_i32 : i32
    %16 = arith.extui %15 : i1 to i32
    %c0_i32_10 = arith.constant 0 : i32
    %17 = arith.cmpi ne, %16, %c0_i32_10 : i32
    scf.if %17 {
      %c0_11 = arith.constant 0 : index
      %c0_12 = arith.constant 0 : index
      %18 = vector.load %arg6[%c0_11, %c0_12] : memref<392x32xf32, #tpu.memory_space<vmem>>, vector<392x32xf32>
      %19 = arith.truncf %18 : vector<392x32xf32> to vector<392x32xbf16>
      %c0_13 = arith.constant 0 : index
      %c0_14 = arith.constant 0 : index
      %20 = vector.load %arg5[%c0_13, %c0_14] : memref<392x32xbf16, #tpu.memory_space<vmem>>, vector<392x32xbf16>
      tpu.vector_store %arg5[%c0_13, %c0_14], %19 {strides = array<i32>} : memref<392x32xbf16, #tpu.memory_space<vmem>>, vector<392x32xbf16>,
    } else {
    }
    return
  }
  func.func @transform_0(%arg0: i32, %arg1: i32) -> (i32, i32, i32) {
    %c0_i32 = arith.constant 0 : i32
    %c0_i32_0 = arith.constant 0 : i32
    return %arg1, %arg0, %c0_i32 : i32, i32, i32
  }
  func.func @transform_1(%arg0: i32, %arg1: i32) -> (i32, i32) {
    %c0_i32 = arith.constant 0 : i32
    %c0_i32_0 = arith.constant 0 : i32
    %c0_i32_1 = arith.constant 0 : i32
    return %c0_i32, %c0_i32_0 : i32, i32
  }
  func.func @transform_2(%arg0: i32, %arg1: i32) -> (i32, i32) {
    %c0_i32 = arith.constant 0 : i32
    %c0_i32_0 = arith.constant 0 : i32
    %c0_i32_1 = arith.constant 0 : i32
    return %c0_i32, %c0_i32_0 : i32, i32
  }
  func.func @transform_3(%arg0: i32, %arg1: i32) -> (i32, i32) {
    %c0_i32 = arith.constant 0 : i32
    %c0_i32_0 = arith.constant 0 : i32
    return %arg0, %c0_i32 : i32, i32
  }
}

module attributes {stable_mosaic.version = 11 : i64} {
  func.func @_conv_pool_kernel(%arg0: i32, %arg1: i32, %arg2: memref<1x104x800xbf16, #tpu.memory_space<vmem>>, %arg3: memref<800x64xbf16, #tpu.memory_space<vmem>>, %arg4: memref<1x64xf32, #tpu.memory_space<vmem>>, %arg5: memref<104x64xbf16, #tpu.memory_space<vmem>>, %arg6: memref<104x64xf32, #tpu.memory_space<vmem>>) attributes {dimension_semantics = [#tpu.dimension_semantics<parallel>, #tpu.dimension_semantics<arbitrary>], iteration_bounds = array<i64: 1, 4>, scalar_prefetch = 0 : i64, scratch_operands = 1 : i64, tpu.core_type = #tpu.core_type<tc>, window_params = [{transform_indices = @transform_0, window_bounds = array<i64: 1, 104, 800>}, {pipeline_mode = #tpu.pipeline_mode<synchronous>, transform_indices = @transform_1, window_bounds = array<i64: 800, 64>}, {pipeline_mode = #tpu.pipeline_mode<synchronous>, transform_indices = @transform_2, window_bounds = array<i64: 1, 64>}, {transform_indices = @transform_3, window_bounds = array<i64: 104, 64>}]} {
    %c0 = arith.constant 0 : index
    %c0_0 = arith.constant 0 : index
    %c0_1 = arith.constant 0 : index
    %0 = vector.load %arg2[%c0, %c0_0, %c0_1] : memref<1x104x800xbf16, #tpu.memory_space<vmem>>, vector<1x104x800xbf16>
    %1 = vector.shape_cast %0 : vector<1x104x800xbf16> to vector<104x800xbf16>
    %c0_2 = arith.constant 0 : index
    %c0_3 = arith.constant 0 : index
    %2 = vector.load %arg3[%c0_2, %c0_3] : memref<800x64xbf16, #tpu.memory_space<vmem>>, vector<800x64xbf16>
    %cst = arith.constant dense<0.000000e+00> : vector<104x64xf32>
    %3 = tpu.matmul %1, %2, %cst {dimension_numbers = #tpu.dot_dimension_numbers<[1], [0], [0], [1], [0, 0, 1, 1], [], []>} : vector<104x800xbf16>, vector<800x64xbf16>, vector<104x64xf32> -> vector<104x64xf32>
    %c0_4 = arith.constant 0 : index
    %c0_5 = arith.constant 0 : index
    %4 = vector.load %arg4[%c0_4, %c0_5] : memref<1x64xf32, #tpu.memory_space<vmem>>, vector<1x64xf32>
    %5 = vector.broadcast %4 : vector<1x64xf32> to vector<104x64xf32>
    %6 = arith.addf %3, %5 : vector<104x64xf32>
    %cst_6 = arith.constant 0.000000e+00 : f32
    %7 = vector.broadcast %cst_6 : f32 to vector<104x64xf32>
    %8 = arith.maximumf %6, %7 : vector<104x64xf32>
    %c0_i32 = arith.constant 0 : i32
    %9 = arith.cmpi eq, %arg1, %c0_i32 : i32
    %10 = arith.extui %9 : i1 to i32
    %c0_i32_7 = arith.constant 0 : i32
    %11 = arith.cmpi ne, %10, %c0_i32_7 : i32
    scf.if %11 {
      %c0_11 = arith.constant 0 : index
      %c0_12 = arith.constant 0 : index
      %18 = vector.load %arg6[%c0_11, %c0_12] : memref<104x64xf32, #tpu.memory_space<vmem>>, vector<104x64xf32>
      tpu.vector_store %arg6[%c0_11, %c0_12], %8 {strides = array<i32>} : memref<104x64xf32, #tpu.memory_space<vmem>>, vector<104x64xf32>,
    } else {
    }
    %c0_i32_8 = arith.constant 0 : i32
    %12 = arith.cmpi sgt, %arg1, %c0_i32_8 : i32
    %13 = arith.extui %12 : i1 to i32
    %c0_i32_9 = arith.constant 0 : i32
    %14 = arith.cmpi ne, %13, %c0_i32_9 : i32
    scf.if %14 {
      %c0_11 = arith.constant 0 : index
      %c0_12 = arith.constant 0 : index
      %18 = vector.load %arg6[%c0_11, %c0_12] : memref<104x64xf32, #tpu.memory_space<vmem>>, vector<104x64xf32>
      %19 = arith.maximumf %18, %8 : vector<104x64xf32>
      %c0_13 = arith.constant 0 : index
      %c0_14 = arith.constant 0 : index
      %20 = vector.load %arg6[%c0_13, %c0_14] : memref<104x64xf32, #tpu.memory_space<vmem>>, vector<104x64xf32>
      tpu.vector_store %arg6[%c0_13, %c0_14], %19 {strides = array<i32>} : memref<104x64xf32, #tpu.memory_space<vmem>>, vector<104x64xf32>,
    } else {
    }
    %c3_i32 = arith.constant 3 : i32
    %15 = arith.cmpi eq, %arg1, %c3_i32 : i32
    %16 = arith.extui %15 : i1 to i32
    %c0_i32_10 = arith.constant 0 : i32
    %17 = arith.cmpi ne, %16, %c0_i32_10 : i32
    scf.if %17 {
      %c0_11 = arith.constant 0 : index
      %c0_12 = arith.constant 0 : index
      %18 = vector.load %arg6[%c0_11, %c0_12] : memref<104x64xf32, #tpu.memory_space<vmem>>, vector<104x64xf32>
      %19 = arith.truncf %18 : vector<104x64xf32> to vector<104x64xbf16>
      %c0_13 = arith.constant 0 : index
      %c0_14 = arith.constant 0 : index
      %20 = vector.load %arg5[%c0_13, %c0_14] : memref<104x64xbf16, #tpu.memory_space<vmem>>, vector<104x64xbf16>
      tpu.vector_store %arg5[%c0_13, %c0_14], %19 {strides = array<i32>} : memref<104x64xbf16, #tpu.memory_space<vmem>>, vector<104x64xbf16>,
    } else {
    }
    return
  }
  func.func @transform_0(%arg0: i32, %arg1: i32) -> (i32, i32, i32) {
    %c0_i32 = arith.constant 0 : i32
    %c0_i32_0 = arith.constant 0 : i32
    return %arg1, %arg0, %c0_i32 : i32, i32, i32
  }
  func.func @transform_1(%arg0: i32, %arg1: i32) -> (i32, i32) {
    %c0_i32 = arith.constant 0 : i32
    %c0_i32_0 = arith.constant 0 : i32
    %c0_i32_1 = arith.constant 0 : i32
    return %c0_i32, %c0_i32_0 : i32, i32
  }
  func.func @transform_2(%arg0: i32, %arg1: i32) -> (i32, i32) {
    %c0_i32 = arith.constant 0 : i32
    %c0_i32_0 = arith.constant 0 : i32
    %c0_i32_1 = arith.constant 0 : i32
    return %c0_i32, %c0_i32_0 : i32, i32
  }
  func.func @transform_3(%arg0: i32, %arg1: i32) -> (i32, i32) {
    %c0_i32 = arith.constant 0 : i32
    %c0_i32_0 = arith.constant 0 : i32
    return %arg0, %c0_i32 : i32, i32
  }
}

module attributes {stable_mosaic.version = 11 : i64} {
  func.func @_fc1_kernel(%arg0: i32, %arg1: i32, %arg2: memref<2x3136xbf16, #tpu.memory_space<vmem>>, %arg3: memref<3136x512xbf16, #tpu.memory_space<vmem>>, %arg4: memref<1x512xf32, #tpu.memory_space<vmem>>, %arg5: memref<2x512xbf16, #tpu.memory_space<vmem>>) attributes {dimension_semantics = [#tpu.dimension_semantics<parallel>, #tpu.dimension_semantics<parallel>], iteration_bounds = array<i64: 1, 2>, scalar_prefetch = 0 : i64, scratch_operands = 0 : i64, tpu.core_type = #tpu.core_type<tc>, window_params = [{transform_indices = @transform_0, window_bounds = array<i64: 2, 3136>}, {transform_indices = @transform_1, window_bounds = array<i64: 3136, 512>}, {transform_indices = @transform_2, window_bounds = array<i64: 1, 512>}, {transform_indices = @transform_3, window_bounds = array<i64: 2, 512>}]} {
    %c0 = arith.constant 0 : index
    %c0_0 = arith.constant 0 : index
    %0 = vector.load %arg2[%c0, %c0_0] : memref<2x3136xbf16, #tpu.memory_space<vmem>>, vector<2x3136xbf16>
    %c0_1 = arith.constant 0 : index
    %c0_2 = arith.constant 0 : index
    %1 = vector.load %arg3[%c0_1, %c0_2] : memref<3136x512xbf16, #tpu.memory_space<vmem>>, vector<3136x512xbf16>
    %cst = arith.constant dense<0.000000e+00> : vector<2x512xf32>
    %2 = tpu.matmul %0, %1, %cst {dimension_numbers = #tpu.dot_dimension_numbers<[1], [0], [0], [1], [0, 0, 1, 1], [], []>} : vector<2x3136xbf16>, vector<3136x512xbf16>, vector<2x512xf32> -> vector<2x512xf32>
    %c0_3 = arith.constant 0 : index
    %c0_4 = arith.constant 0 : index
    %3 = vector.load %arg4[%c0_3, %c0_4] : memref<1x512xf32, #tpu.memory_space<vmem>>, vector<1x512xf32>
    %4 = vector.broadcast %3 : vector<1x512xf32> to vector<2x512xf32>
    %5 = arith.addf %2, %4 : vector<2x512xf32>
    %6 = arith.truncf %5 : vector<2x512xf32> to vector<2x512xbf16>
    %c0_5 = arith.constant 0 : index
    %c0_6 = arith.constant 0 : index
    %7 = vector.load %arg5[%c0_5, %c0_6] : memref<2x512xbf16, #tpu.memory_space<vmem>>, vector<2x512xbf16>
    tpu.vector_store %arg5[%c0_5, %c0_6], %6 {strides = array<i32>} : memref<2x512xbf16, #tpu.memory_space<vmem>>, vector<2x512xbf16>,
    return
  }
  func.func @transform_0(%arg0: i32, %arg1: i32) -> (i32, i32) {
    %c0_i32 = arith.constant 0 : i32
    %c0_i32_0 = arith.constant 0 : i32
    return %arg0, %c0_i32 : i32, i32
  }
  func.func @transform_1(%arg0: i32, %arg1: i32) -> (i32, i32) {
    %c0_i32 = arith.constant 0 : i32
    %c0_i32_0 = arith.constant 0 : i32
    return %c0_i32, %arg1 : i32, i32
  }
  func.func @transform_2(%arg0: i32, %arg1: i32) -> (i32, i32) {
    %c0_i32 = arith.constant 0 : i32
    %c0_i32_0 = arith.constant 0 : i32
    return %c0_i32, %arg1 : i32, i32
  }
  func.func @transform_3(%arg0: i32, %arg1: i32) -> (i32, i32) {
    %c0_i32 = arith.constant 0 : i32
    return %arg0, %arg1 : i32, i32
  }
}

module attributes {stable_mosaic.version = 11 : i64} {
  func.func @_fc2_softmax_kernel(%arg0: memref<2x1024xbf16, #tpu.memory_space<vmem>>, %arg1: memref<1024x10xbf16, #tpu.memory_space<vmem>>, %arg2: memref<1x10xf32, #tpu.memory_space<vmem>>, %arg3: memref<2x10xf32, #tpu.memory_space<vmem>>) attributes {dimension_semantics = [], scalar_prefetch = 0 : i64, scratch_operands = 0 : i64, tpu.core_type = #tpu.core_type<tc>} {
    %c0 = arith.constant 0 : index
    %c0_0 = arith.constant 0 : index
    %0 = vector.load %arg0[%c0, %c0_0] : memref<2x1024xbf16, #tpu.memory_space<vmem>>, vector<2x1024xbf16>
    %c0_1 = arith.constant 0 : index
    %c0_2 = arith.constant 0 : index
    %1 = vector.load %arg1[%c0_1, %c0_2] : memref<1024x10xbf16, #tpu.memory_space<vmem>>, vector<1024x10xbf16>
    %cst = arith.constant dense<0.000000e+00> : vector<2x10xf32>
    %2 = tpu.matmul %0, %1, %cst {dimension_numbers = #tpu.dot_dimension_numbers<[1], [0], [0], [1], [0, 0, 1, 1], [], []>} : vector<2x1024xbf16>, vector<1024x10xbf16>, vector<2x10xf32> -> vector<2x10xf32>
    %c0_3 = arith.constant 0 : index
    %c0_4 = arith.constant 0 : index
    %3 = vector.load %arg2[%c0_3, %c0_4] : memref<1x10xf32, #tpu.memory_space<vmem>>, vector<1x10xf32>
    %4 = vector.broadcast %3 : vector<1x10xf32> to vector<2x10xf32>
    %5 = arith.addf %2, %4 : vector<2x10xf32>
    %cst_5 = arith.constant dense<0xFF800000> : vector<10xf32>
    %6 = vector.multi_reduction <maximumf>, %5, %cst_5 [0] : vector<2x10xf32> to vector<10xf32>
    %7 = vector.shape_cast %6 : vector<10xf32> to vector<1x10xf32>
    %8 = vector.broadcast %7 : vector<1x10xf32> to vector<2x10xf32>
    %9 = arith.subf %5, %8 : vector<2x10xf32>
    %10 = math.exp %9 : vector<2x10xf32>
    %cst_6 = arith.constant dense<0.000000e+00> : vector<10xf32>
    %11 = vector.multi_reduction <add>, %10, %cst_6 [0] : vector<2x10xf32> to vector<10xf32>
    %12 = vector.shape_cast %11 : vector<10xf32> to vector<1x10xf32>
    %13 = vector.broadcast %12 : vector<1x10xf32> to vector<2x10xf32>
    %14 = arith.divf %10, %13 : vector<2x10xf32>
    %c0_7 = arith.constant 0 : index
    %c0_8 = arith.constant 0 : index
    %15 = vector.load %arg3[%c0_7, %c0_8] : memref<2x10xf32, #tpu.memory_space<vmem>>, vector<2x10xf32>
    tpu.vector_store %arg3[%c0_7, %c0_8], %14 {strides = array<i32>} : memref<2x10xf32, #tpu.memory_space<vmem>>, vector<2x10xf32>,
    return
  }
}

</mosaic_0001>

<bundles_post_ra>
// kernel: forward.4
= control target key start
LH: loop header
LB: loop body
LE: loop exit
PB: predicated region body
PF: predicated region fallthrough
CT: control target
= control target key end

     0   :  { %s1733_s12 = smov 0   ;;  %s1735_s13 = smov 0   ;;  %s2573_s0 = inlined_call_operand.vmem [shape: bf16[4,392,25], index: 0, kind: input, shape index: {}]   ;;  %s2574_s1 = inlined_call_operand.vmem [shape: bf16[25,32], index: 1, kind: input, shape index: {}]   ;;  %s2575_s2 = inlined_call_operand.vmem [shape: f32[1,32], index: 2, kind: input, shape index: {}]   ;;  %s2576_s3 = inlined_call_operand.vmem [shape: bf16[392,32], index: 3, kind: output, shape index: {}]  }
   0x1   :  { %s1737_s14 = smov 0  }
   0x2 LB: > { %s22_s15 = sadd.s32 1, %s1704_s13  ;;  %p1336_p0 = scmp.ge.s32.totalorder %s1708_s14, 1  ;;  %s1708_s14 = sphi %s1737_s14, %s13_s14   ;;  %s1704_s13 = sphi %s1735_s13, %s2677_s13   ;;  %s1700_s12 = sphi %s1733_s12, %s2676_s12  }
   0x3   : > { %p23_p1 = scmp.ge.s32.totalorder %s22_s15, 4  ;;  %p156_p2 = scmp.lt.s32.totalorder %s1708_s14, 5 }
   0x5   : > { %s2679_s15 = smov (%p23_p1, %s22_s15), 0  ;;  %p157_p3 = pnand %p1336_p0, %p156_p2 }
   0x7   : > { %160 = sbr.rel (%p157_p3) target bundleno = 413 (0x19d), region = 32 }
   0xe   : > { %v1659_v0 = vld [vmem:[%s2574_s1] sm:$0xff]   ;;  %v1710_v1 = vmov 0.0   ;;  %v1660_v2 = vld [vmem:[%s2574_s1 + $0x8] sm:$0x1f]   ;;  %vm471_vm0 = vcmask 1043456   ;;  %vm472_vm1 = vcmask 1044480  }
   0xf   : > { %1523 = vmatprep.subr.bf16.mxu0 %v1710_v1  ;;  %1627 = vmatprep.subr.bf16.mxu1 %v1710_v1  ;;  %p185_p4 = scmp.lt.s32.totalorder %s1700_s12, 3  ;;  %v1711_v3 = vmov 65535   ;;  %vm1712_vm2 = vmmov 0   ;;  %vm395_vm3 = vcmask 203776   ;;  %v1873_v32 = vld [vmem:[%s2575_s2] ss:$0 sm:$0xff] }
  0x10   : > { %1524 = vmatpush3.bf16.msra.mxu0 %v1659_v0  ;;  %1629 = vmatpush3.bf16.msra.mxu1 %v1659_v0  ;;  %v473_v4 = vsel %vm471_vm0, 4294967295, %v1711_v3  ;;  %p1391_p5 = scmp.ne.s32.totalorder %s1700_s12, 0 }
  0x11   : > { %1525 = vmatprep.subr.bf16.mxu0 %v1710_v1  ;;  %1527 = vmatprep.mubr.msk.bf16.mxu0 %vm1712_vm2, %v1710_v1  ;;  %v474_v5 = vsel %vm472_vm1, %v473_v4, 0  ;;  %s186_s20 = scalar_select %p185_p4, %s1700_s12, 3 }
  0x12   : > { %1628 = vmatprep.subr.bf16.mxu1 %v1710_v1  ;;  %1579 = vmatprep.mubr.msk.bf16.mxu1 %vm1712_vm2, %v1710_v1  ;;  %v476_v6 = vand.u32 %v1660_v2, %v474_v5  ;;  %vm763_vm4 = vcmask (!%p1391_p5), 261120  }
  0x13   : > { %s1631_s21 = smul.u32 196, %s186_s20 }
  0x14   : > { %1526 = vmatpush3.bf16.msra.mxu0 %v476_v6  ;;  %1630 = vmatpush3.bf16.msra.mxu1 %v476_v6 }
  0x15   : > { %s1772_s24 = scalar_lea.vmem %s2573_s0, %s1631_s21 }
  0x16   : > { %v1661_v7 = vld [vmem:[%s1772_s24] sm:$0xff]   ;;  %v1662_v8 = vld [vmem:[%s1772_s24 + $0x68] sm:$0xff]   ;;  %v1664_v10 = vld [vmem:[%s1772_s24 + $0x70] sm:$0xff]  }
  0x17   : > { %1528 = vmatmul.mubr.msk.bf16.vlgmr.msra.gmra.mrb[0].mxu0 %vm395_vm3, %v1661_v7  ;;  %1580 = vmatmul.mubr.msk.bf16.vlgmr.msra.gmra.mrb[0].mxu1 %vm395_vm3, %v1662_v8  ;;  %v1663_v9 = vld [vmem:[%s1772_s24 + $0x8] sm:$0xff]   ;;  %v1665_v11 = vld [vmem:[%s1772_s24 + $0x10] sm:$0xff]   ;;  %v1666_v12 = vld [vmem:[%s1772_s24 + $0x78] sm:$0xff]  }
  0x18   : > { %1531 = vmatprep.mubr.msk.bf16.mxu0 %vm1712_vm2, %v1710_v1  ;;  %1583 = vmatprep.mubr.msk.bf16.mxu1 %vm1712_vm2, %v1710_v1  ;;  %v1667_v13 = vld [vmem:[%s1772_s24 + $0x18] sm:$0xff]   ;;  %v1668_v14 = vld [vmem:[%s1772_s24 + $0x80] sm:$0xff]   ;;  %v1670_v16 = vld [vmem:[%s1772_s24 + $0x88] sm:$0xff]  }
  0x19   : > { %v1669_v15 = vld [vmem:[%s1772_s24 + $0x20] sm:$0xff]   ;;  %v1671_v17 = vld [vmem:[%s1772_s24 + $0x28] sm:$0xff]   ;;  %v1672_v18 = vld [vmem:[%s1772_s24 + $0x90] sm:$0xff]  }
  0x1a   : > { %v1673_v19 = vld [vmem:[%s1772_s24 + $0x30] sm:$0xff]   ;;  %v1674_v20 = vld [vmem:[%s1772_s24 + $0x98] sm:$0xff]   ;;  %v1676_v22 = vld [vmem:[%s1772_s24 + $0xa0] sm:$0xff]  }
  0x1b   : > { %v1675_v21 = vld [vmem:[%s1772_s24 + $0x38] sm:$0xff]   ;;  %v1677_v23 = vld [vmem:[%s1772_s24 + $0x40] sm:$0xff]   ;;  %v1678_v24 = vld [vmem:[%s1772_s24 + $0xa8] sm:$0xff]  }
  0x1c   : > { %v1679_v25 = vld [vmem:[%s1772_s24 + $0x48] sm:$0xff]   ;;  %v1680_v26 = vld [vmem:[%s1772_s24 + $0xb0] sm:$0xff]   ;;  %v1682_v28 = vld [vmem:[%s1772_s24 + $0xb8] sm:$0xff]  }
  0x1d   : > { %v1681_v27 = vld [vmem:[%s1772_s24 + $0x50] sm:$0xff]   ;;  %v1683_v29 = vld [vmem:[%s1772_s24 + $0x58] sm:$0xff]   ;;  %v1684_v30 = vld [vmem:[%s1772_s24 + $0xc0] ss:$0 sps:$4 sm:$0xff]  }
  0x1e   : > { %v1685_v31 = vld [vmem:[%s1772_s24 + $0x60] sm:$0xff]  }
  0x1f   : > { %1532 = vmatmul.mubr.msk.bf16.gmra.mrb[4].mxu0 %vm395_vm3, %v1663_v9  ;;  %1584 = vmatmul.mubr.msk.bf16.gmra.mrb[4].mxu1 %vm395_vm3, %v1664_v10 }
  0x20   : > { %1535 = vmatprep.mubr.msk.bf16.mxu0 %vm1712_vm2, %v1710_v1  ;;  %1587 = vmatprep.mubr.msk.bf16.mxu1 %vm1712_vm2, %v1710_v1 }
  0x27   : > { %1536 = vmatmul.mubr.msk.bf16.gmra.mrb[8].mxu0 %vm395_vm3, %v1665_v11  ;;  %1588 = vmatmul.mubr.msk.bf16.gmra.mrb[8].mxu1 %vm395_vm3, %v1666_v12 }
  0x28   : > { %1539 = vmatprep.mubr.msk.bf16.mxu0 %vm1712_vm2, %v1710_v1  ;;  %1591 = vmatprep.mubr.msk.bf16.mxu1 %vm1712_vm2, %v1710_v1 }
  0x2f   : > { %1540 = vmatmul.mubr.msk.bf16.gmra.mrb[12].mxu0 %vm395_vm3, %v1667_v13  ;;  %1592 = vmatmul.mubr.msk.bf16.gmra.mrb[12].mxu1 %vm395_vm3, %v1668_v14 }
  0x30   : > { %1543 = vmatprep.mubr.msk.bf16.mxu0 %vm1712_vm2, %v1710_v1  ;;  %1595 = vmatprep.mubr.msk.bf16.mxu1 %vm1712_vm2, %v1710_v1 }
  0x37   : > { %1544 = vmatmul.mubr.msk.bf16.gmra.mrb[16].mxu0 %vm395_vm3, %v1669_v15  ;;  %1596 = vmatmul.mubr.msk.bf16.gmra.mrb[16].mxu1 %vm395_vm3, %v1670_v16 }
  0x38   : > { %1547 = vmatprep.mubr.msk.bf16.mxu0 %vm1712_vm2, %v1710_v1  ;;  %1599 = vmatprep.mubr.msk.bf16.mxu1 %vm1712_vm2, %v1710_v1 }
  0x3f   : > { %1548 = vmatmul.mubr.msk.bf16.gmra.mrb[20].mxu0 %vm395_vm3, %v1671_v17  ;;  %1600 = vmatmul.mubr.msk.bf16.gmra.mrb[20].mxu1 %vm395_vm3, %v1672_v18 }
  0x40   : > { %1551 = vmatprep.mubr.msk.bf16.mxu0 %vm1712_vm2, %v1710_v1  ;;  %1603 = vmatprep.mubr.msk.bf16.mxu1 %vm1712_vm2, %v1710_v1 }
  0x47   : > { %1552 = vmatmul.mubr.msk.bf16.gmra.mrb[24].mxu0 %vm395_vm3, %v1673_v19  ;;  %1604 = vmatmul.mubr.msk.bf16.gmra.mrb[24].mxu1 %vm395_vm3, %v1674_v20 }
  0x48   : > { %1555 = vmatprep.mubr.msk.bf16.mxu0 %vm1712_vm2, %v1710_v1  ;;  %1607 = vmatprep.mubr.msk.bf16.mxu1 %vm1712_vm2, %v1710_v1 }
  0x4f   : > { %1556 = vmatmul.mubr.msk.bf16.gmra.mrb[28].mxu0 %vm395_vm3, %v1675_v21  ;;  %1608 = vmatmul.mubr.msk.bf16.gmra.mrb[28].mxu1 %vm395_vm3, %v1676_v22 }
  0x50   : > { %1559 = vmatprep.mubr.msk.bf16.mxu0 %vm1712_vm2, %v1710_v1  ;;  %1611 = vmatprep.mubr.msk.bf16.mxu1 %vm1712_vm2, %v1710_v1 }
  0x57   : > { %1560 = vmatmul.mubr.msk.bf16.gmra.mrb[32].mxu0 %vm395_vm3, %v1677_v23  ;;  %1612 = vmatmul.mubr.msk.bf16.gmra.mrb[32].mxu1 %vm395_vm3, %v1678_v24 }
  0x58   : > { %1563 = vmatprep.mubr.msk.bf16.mxu0 %vm1712_vm2, %v1710_v1  ;;  %1615 = vmatprep.mubr.msk.bf16.mxu1 %vm1712_vm2, %v1710_v1 }
  0x5f   : > { %1564 = vmatmul.mubr.msk.bf16.gmra.mrb[36].mxu0 %vm395_vm3, %v1679_v25  ;;  %1616 = vmatmul.mubr.msk.bf16.gmra.mrb[36].mxu1 %vm395_vm3, %v1680_v26 }
  0x60   : > { %1567 = vmatprep.mubr.msk.bf16.mxu0 %vm1712_vm2, %v1710_v1  ;;  %1619 = vmatprep.mubr.msk.bf16.mxu1 %vm1712_vm2, %v1710_v1 }
  0x67   : > { %1568 = vmatmul.mubr.msk.bf16.gmra.mrb[40].mxu0 %vm395_vm3, %v1681_v27  ;;  %1620 = vmatmul.mubr.msk.bf16.gmra.mrb[40].mxu1 %vm395_vm3, %v1682_v28 }
  0x68   : > { %1571 = vmatprep.mubr.msk.bf16.mxu0 %vm1712_vm2, %v1710_v1  ;;  %1623 = vmatprep.mubr.msk.bf16.mxu1 %vm1712_vm2, %v1710_v1 }
  0x6f   : > { %1572 = vmatmul.mubr.msk.bf16.gmra.mrb[44].mxu0 %vm395_vm3, %v1683_v29  ;;  %1624 = vmatmul.mubr.msk.bf16.gmra.mrb[44].mxu1 %vm395_vm3, %v1684_v30 }
  0x70   : > { %1575 = vmatprep.mubr.msk.bf16.mxu0 %vm1712_vm2, %v1710_v1 }
  0x77   : > { %1576 = vmatmul.mubr.msk.bf16.gmra.mrb[48].mxu0 %vm395_vm3, %v1685_v31 }
  0xea   : > { %v512_v33 = vpop.f32.mrb[0].mxu0  ;;  %v616_v36 = vpop.f32.mrb[0].mxu1 }
  0xeb   : > { %v1876_v34 = vadd.f32 %v1873_v32, %v512_v33  ;;  %v1529_v35 = vpop.f32.mrb[1].mxu0  ;;  %v1879_v38 = vadd.f32 %v1873_v32, %v616_v36  ;;  %v1581_v39 = vpop.f32.mrb[1].mxu1 }
  0xec   : > { %v515_v37 = vpop.f32.mrb[2].mxu0  ;;  %v619_v43 = vpop.f32.mrb[2].mxu1 }
  0xed   : > { %v710_v40 = vmax.f32 %v1876_v34, 0.0  ;;  %v1883_v41 = vadd.f32 %v1873_v32, %v515_v37  ;;  %v1530_v42 = vpop.f32.mrb[3].mxu0  ;;  %v1887_v45 = vadd.f32 %v1873_v32, %v619_v43  ;;  %v1582_v46 = vpop.f32.mrb[3].mxu1 }
  0xef   : > { %v711_v47 = vmax.f32 %v1883_v41, 0.0  ;;  %764 = vst.msk [vmem:[#allocation2] sm:$0xff] (!%p1391_p5), %vm763_vm4, %v710_v40 }
  0xf1   : > { %765 = vst.msk [vmem:[#allocation2 + $0x8] sm:$0xff] (!%p1391_p5), %vm763_vm4, %v711_v47 }
  0xf2   : > { %v520_v49 = vpop.f32.mrb[4].mxu0  ;;  %v624_v52 = vpop.f32.mrb[4].mxu1 }
  0xf3   : > { %v1892_v50 = vadd.f32 %v1873_v32, %v520_v49  ;;  %v1533_v51 = vpop.f32.mrb[5].mxu0  ;;  %v1895_v54 = vadd.f32 %v1873_v32, %v624_v52  ;;  %v1585_v55 = vpop.f32.mrb[5].mxu1 }
  0xf4   : > { %v523_v53 = vpop.f32.mrb[6].mxu0  ;;  %v627_v59 = vpop.f32.mrb[6].mxu1 }
  0xf5   : > { %v712_v56 = vmax.f32 %v1892_v50, 0.0  ;;  %v1899_v57 = vadd.f32 %v1873_v32, %v523_v53  ;;  %v1534_v58 = vpop.f32.mrb[7].mxu0  ;;  %v1903_v61 = vadd.f32 %v1873_v32, %v627_v59  ;;  %v1586_v62 = vpop.f32.mrb[7].mxu1 }
  0xf7   : > { %v713_v63 = vmax.f32 %v1899_v57, 0.0  ;;  %766 = vst.msk [vmem:[#allocation2 + $0x10] sm:$0xff] (!%p1391_p5), %vm763_vm4, %v712_v56 }
  0xf9   : > { %767 = vst.msk [vmem:[#allocation2 + $0x18] sm:$0xff] (!%p1391_p5), %vm763_vm4, %v713_v63 }
  0xfa   : > { %v528_v1 = vpop.f32.mrb[8].mxu0  ;;  %v632_v4 = vpop.f32.mrb[8].mxu1 }
  0xfb   : > { %v1908_v2 = vadd.f32 %v1873_v32, %v528_v1  ;;  %v1537_v3 = vpop.f32.mrb[9].mxu0  ;;  %v1911_v6 = vadd.f32 %v1873_v32, %v632_v4  ;;  %v1589_v7 = vpop.f32.mrb[9].mxu1 }
  0xfc   : > { %v531_v5 = vpop.f32.mrb[10].mxu0  ;;  %v635_v11 = vpop.f32.mrb[10].mxu1 }
  0xfd   : > { %v1915_v9 = vadd.f32 %v1873_v32, %v531_v5  ;;  %v1538_v10 = vpop.f32.mrb[11].mxu0  ;;  %v1919_v13 = vadd.f32 %v1873_v32, %v635_v11  ;;  %v1590_v14 = vpop.f32.mrb[11].mxu1 }
 0x102   : > { %v536_v17 = vpop.f32.mrb[12].mxu0  ;;  %v640_v20 = vpop.f32.mrb[12].mxu1 }
 0x103   : > { %v1924_v18 = vadd.f32 %v1873_v32, %v536_v17  ;;  %v1541_v19 = vpop.f32.mrb[13].mxu0  ;;  %v1927_v22 = vadd.f32 %v1873_v32, %v640_v20  ;;  %v1593_v23 = vpop.f32.mrb[13].mxu1 }
 0x104   : > { %v539_v21 = vpop.f32.mrb[14].mxu0  ;;  %v643_v27 = vpop.f32.mrb[14].mxu1 }
 0x105   : > { %v1931_v25 = vadd.f32 %v1873_v32, %v539_v21  ;;  %v1542_v26 = vpop.f32.mrb[15].mxu0  ;;  %v1935_v29 = vadd.f32 %v1873_v32, %v643_v27  ;;  %v1594_v30 = vpop.f32.mrb[15].mxu1 }
 0x10a   : > { %v544_v35 = vpop.f32.mrb[16].mxu0  ;;  %v648_v39 = vpop.f32.mrb[16].mxu1 }
 0x10b   : > { %v1940_v36 = vadd.f32 %v1873_v32, %v544_v35  ;;  %v1545_v37 = vpop.f32.mrb[17].mxu0  ;;  %v1943_v43 = vadd.f32 %v1873_v32, %v648_v39  ;;  %v1597_v46 = vpop.f32.mrb[17].mxu1 }
 0x10c   : > { %v547_v42 = vpop.f32.mrb[18].mxu0  ;;  %v651_v53 = vpop.f32.mrb[18].mxu1 }
 0x10d   : > { %v1947_v51 = vadd.f32 %v1873_v32, %v547_v42  ;;  %v1546_v52 = vpop.f32.mrb[19].mxu0  ;;  %v1951_v58 = vadd.f32 %v1873_v32, %v651_v53  ;;  %v1598_v59 = vpop.f32.mrb[19].mxu1 }
 0x112   : > { %v552_v3 = vpop.f32.mrb[20].mxu0  ;;  %v656_v7 = vpop.f32.mrb[20].mxu1 }
 0x113   : > { %v1956_v4 = vadd.f32 %v1873_v32, %v552_v3  ;;  %v1549_v5 = vpop.f32.mrb[21].mxu0  ;;  %v1959_v11 = vadd.f32 %v1873_v32, %v656_v7  ;;  %v1601_v14 = vpop.f32.mrb[21].mxu1 }
 0x114   : > { %v555_v10 = vpop.f32.mrb[22].mxu0  ;;  %v659_v21 = vpop.f32.mrb[22].mxu1 }
 0x115   : > { %v1963_v19 = vadd.f32 %v1873_v32, %v555_v10  ;;  %v1550_v20 = vpop.f32.mrb[23].mxu0  ;;  %v1967_v26 = vadd.f32 %v1873_v32, %v659_v21  ;;  %v1602_v27 = vpop.f32.mrb[23].mxu1 }
 0x11a   : > { %v560_v37 = vpop.f32.mrb[24].mxu0  ;;  %v664_v46 = vpop.f32.mrb[24].mxu1 }
 0x11b   : > { %v1972_v39 = vadd.f32 %v1873_v32, %v560_v37  ;;  %v1553_v42 = vpop.f32.mrb[25].mxu0  ;;  %v1975_v53 = vadd.f32 %v1873_v32, %v664_v46  ;;  %v1605_v59 = vpop.f32.mrb[25].mxu1 }
 0x11c   : > { %v563_v52 = vpop.f32.mrb[26].mxu0  ;;  %v667_v10 = vpop.f32.mrb[26].mxu1 }
 0x11d   : > { %v1979_v5 = vadd.f32 %v1873_v32, %v563_v52  ;;  %v1554_v7 = vpop.f32.mrb[27].mxu0  ;;  %v1983_v20 = vadd.f32 %v1873_v32, %v667_v10  ;;  %v1606_v21 = vpop.f32.mrb[27].mxu1 }
 0x122   : > { %v568_v42 = vpop.f32.mrb[28].mxu0  ;;  %v672_v35 = vpop.f32.mrb[28].mxu1 }
 0x123   : > { %v1988_v46 = vadd.f32 %v1873_v32, %v568_v42  ;;  %v1557_v59 = vpop.f32.mrb[29].mxu0  ;;  %v1991_v7 = vadd.f32 %v1873_v32, %v672_v35  ;;  %v1609_v23 = vpop.f32.mrb[29].mxu1 }
 0x124   : > { %v571_v52 = vpop.f32.mrb[30].mxu0  ;;  %v675_v1 = vpop.f32.mrb[30].mxu1 }
 0x125   : > { %v1995_v10 = vadd.f32 %v1873_v32, %v571_v52  ;;  %v1558_v21 = vpop.f32.mrb[31].mxu0  ;;  %v1999_v55 = vadd.f32 %v1873_v32, %v675_v1  ;;  %v1610_v42 = vpop.f32.mrb[31].mxu1 }
 0x12a   : > { %v576_v35 = vpop.f32.mrb[32].mxu0  ;;  %v680_v16 = vpop.f32.mrb[32].mxu1 }
 0x12b   : > { %v2004_v23 = vadd.f32 %v1873_v32, %v576_v35  ;;  %v1561_v28 = vpop.f32.mrb[33].mxu0  ;;  %v2007_v21 = vadd.f32 %v1873_v32, %v680_v16  ;;  %v1613_v12 = vpop.f32.mrb[33].mxu1 }
 0x12c   : > { %v579_v52 = vpop.f32.mrb[34].mxu0  ;;  %v683_v0 = vpop.f32.mrb[34].mxu1 }
 0x12d   : > { %v2011_v1 = vadd.f32 %v1873_v32, %v579_v52  ;;  %v1562_v42 = vpop.f32.mrb[35].mxu0  ;;  %v2015_v60 = vadd.f32 %v1873_v32, %v683_v0  ;;  %v1614_v35 = vpop.f32.mrb[35].mxu1 }
 0x132   : > { %v584_v16 = vpop.f32.mrb[36].mxu0  ;;  %v688_v37 = vpop.f32.mrb[36].mxu1 }
 0x133   : > { %v2020_v12 = vadd.f32 %v1873_v32, %v584_v16  ;;  %v1565_v44 = vpop.f32.mrb[37].mxu0  ;;  %v2023_v42 = vadd.f32 %v1873_v32, %v688_v37  ;;  %v1617_v59 = vpop.f32.mrb[37].mxu1 }
 0x134   : > { %v587_v52 = vpop.f32.mrb[38].mxu0  ;;  %v691_v28 = vpop.f32.mrb[38].mxu1 }
 0x135   : > { %v2027_v0 = vadd.f32 %v1873_v32, %v587_v52  ;;  %v1566_v35 = vpop.f32.mrb[39].mxu0  ;;  %v2031_v14 = vadd.f32 %v1873_v32, %v691_v28  ;;  %v1618_v16 = vpop.f32.mrb[39].mxu1 }
 0x13a   : > { %v592_v37 = vpop.f32.mrb[40].mxu0  ;;  %v696_v3 = vpop.f32.mrb[40].mxu1 }
 0x13b   : > { %v2036_v59 = vadd.f32 %v1873_v32, %v592_v37  ;;  %v1569_v33 = vpop.f32.mrb[41].mxu0  ;;  %v2039_v35 = vadd.f32 %v1873_v32, %v696_v3  ;;  %v1621_v30 = vpop.f32.mrb[41].mxu1 }
 0x13c   : > { %v595_v52 = vpop.f32.mrb[42].mxu0  ;;  %v699_v44 = vpop.f32.mrb[42].mxu1 }
 0x13d   : > { %2584 = vst [vmem:[#allocation3_spill] sm:$0xff] %v2039_v35  ;;  %v2043_v28 = vadd.f32 %v1873_v32, %v595_v52  ;;  %v1570_v16 = vpop.f32.mrb[43].mxu0  ;;  %v2047_v17 = vadd.f32 %v1873_v32, %v699_v44  ;;  %v1622_v37 = vpop.f32.mrb[43].mxu1 }
 0x13f   : > { %2585 = vst [vmem:[#allocation4_spill] sm:$0xff] %v2047_v17 }
 0x142   : > { %v600_v3 = vpop.f32.mrb[44].mxu0  ;;  %v704_v49 = vpop.f32.mrb[44].mxu1 }
 0x143   : > { %v2052_v30 = vadd.f32 %v1873_v32, %v600_v3  ;;  %v1573_v48 = vpop.f32.mrb[45].mxu0  ;;  %v2055_v16 = vadd.f32 %v1873_v32, %v704_v49  ;;  %v1625_v31 = vpop.f32.mrb[45].mxu1 }
 0x144   : > { %v603_v52 = vpop.f32.mrb[46].mxu0  ;;  %v707_v33 = vpop.f32.mrb[46].mxu1 }
 0x145   : > { %2586 = vst [vmem:[#allocation5_spill] sm:$0xff] %v2055_v16  ;;  %v2059_v44 = vadd.f32 %v1873_v32, %v603_v52  ;;  %v1574_v37 = vpop.f32.mrb[47].mxu0  ;;  %v2578_v62 = vmax.f32 %v2055_v16, 0.0  ;;  %v1626_v24 = vpop.f32.mrb[47].mxu1  ;;  %v2591_v33 = vmax.f32 (!%p1391_p5), %v1940_v36, 0.0 }
 0x146   : > { %v2590_v24 = vmax.f32 (!%p1391_p5), %v1931_v25, 0.0 }
 0x147   : > { %v2580_v3 = vmax.f32 %v2059_v44, 0.0  ;;  %772 = vst.msk [vmem:[#allocation2 + $0x40] sm:$0xff] (!%p1391_p5), %vm763_vm4, %v2591_v33  ;;  %v2598_v33 = vmax.f32 (!%p1391_p5), %v1995_v10, 0.0  ;;  %812 = vst.msk [vmem:[#allocation2 + $0x180] sm:$0xff] (!%p1391_p5), %vm763_vm4, %v2578_v62 }
 0x148   : > { %771 = vst.msk [vmem:[#allocation2 + $0x38] sm:$0xff] (!%p1391_p5), %vm763_vm4, %v2590_v24  ;;  %v2597_v24 = vmax.f32 (!%p1391_p5), %v1988_v46, 0.0 }
 0x149   : > { %762 = sbr.rel (%p1391_p5) target bundleno = 352 (0x160), region = 36  ;;  %779 = vst.msk [vmem:[#allocation2 + $0x78] sm:$0xff] (!%p1391_p5), %vm763_vm4, %v2598_v33  ;;  %v2605_v33 = vmax.f32 (!%p1391_p5), %v2052_v30, 0.0  ;;  %787 = vst.msk [vmem:[#allocation2 + $0xb8] sm:$0xff] (!%p1391_p5), %vm763_vm4, %v2580_v3 }
 0x14a   : > { %v608_v15 = vpop.f32.mrb[48].mxu0  ;;  %778 = vst.msk [vmem:[#allocation2 + $0x70] sm:$0xff] (!%p1391_p5), %vm763_vm4, %v2597_v24  ;;  %v2604_v24 = vmax.f32 (!%p1391_p5), %v2043_v28, 0.0 }
 0x14b   : > { %v2064_v48 = vadd.f32 %v1873_v32, %v608_v15  ;;  %v1577_v8 = vpop.f32.mrb[49].mxu0  ;;  %v2589_v15 = vmax.f32 (!%p1391_p5), %v1924_v18, 0.0  ;;  %786 = vst.msk [vmem:[#allocation2 + $0xb0] sm:$0xff] (!%p1391_p5), %vm763_vm4, %v2605_v33  ;;  %v2612_v33 = vmax.f32 (!%p1391_p5), %v1927_v22, 0.0 }
 0x14c   : > { %v611_v49 = vpop.f32.mrb[50].mxu0  ;;  %v2588_v8 = vmax.f32 (!%p1391_p5), %v1915_v9, 0.0  ;;  %785 = vst.msk [vmem:[#allocation2 + $0xa8] sm:$0xff] (!%p1391_p5), %vm763_vm4, %v2604_v24  ;;  %v2611_v24 = vmax.f32 (!%p1391_p5), %v1919_v13, 0.0 }
 0x14d   : > { %v2579_v31 = vmax.f32 %v2064_v48, 0.0  ;;  %v2068_v27 = vadd.f32 %v1873_v32, %v611_v49  ;;  %v1578_v52 = vpop.f32.mrb[51].mxu0  ;;  %v2587_v32 = vmax.f32 (!%p1391_p5), %v1908_v2, 0.0  ;;  %770 = vst.msk [vmem:[#allocation2 + $0x30] sm:$0xff] (!%p1391_p5), %vm763_vm4, %v2589_v15  ;;  %v2592_v49 = vmax.f32 (!%p1391_p5), %v1947_v51, 0.0  ;;  %796 = vst.msk [vmem:[#allocation2 + $0x100] sm:$0xff] (!%p1391_p5), %vm763_vm4, %v2612_v33 }
 0x14e   : > { %769 = vst.msk [vmem:[#allocation2 + $0x28] sm:$0xff] (!%p1391_p5), %vm763_vm4, %v2588_v8  ;;  %v2593_v52 = vmax.f32 (!%p1391_p5), %v1956_v4, 0.0  ;;  %v2595_v8 = vmax.f32 (!%p1391_p5), %v1972_v39, 0.0  ;;  %v2596_v15 = vmax.f32 (!%p1391_p5), %v1979_v5, 0.0  ;;  %795 = vst.msk [vmem:[#allocation2 + $0xf8] sm:$0xff] (!%p1391_p5), %vm763_vm4, %v2611_v24  ;;  %v2618_v24 = vmax.f32 (!%p1391_p5), %v1975_v53, 0.0 }
 0x14f   : > { %v2577_v37 = vmax.f32 %v2068_v27, 0.0  ;;  %768 = vst.msk [vmem:[#allocation2 + $0x20] sm:$0xff] (!%p1391_p5), %vm763_vm4, %v2587_v32  ;;  %773 = vst.msk [vmem:[#allocation2 + $0x48] sm:$0xff] (!%p1391_p5), %vm763_vm4, %v2592_v49  ;;  %v2594_v32 = vmax.f32 (!%p1391_p5), %v1963_v19, 0.0  ;;  %v2599_v49 = vmax.f32 (!%p1391_p5), %v2004_v23, 0.0  ;;  %v2619_v33 = vmax.f32 (!%p1391_p5), %v1983_v20, 0.0 }
 0x150   : > { %774 = vst.msk [vmem:[#allocation2 + $0x50] sm:$0xff] %vm763_vm4, %v2593_v52  ;;  %776 = vst.msk [vmem:[#allocation2 + $0x60] sm:$0xff] %vm763_vm4, %v2595_v8  ;;  %v2600_v52 = vmax.f32 %v2011_v1, 0.0  ;;  %v2602_v8 = vmax.f32 %v2027_v0, 0.0 }
 0x151   : > { %775 = vst.msk [vmem:[#allocation2 + $0x58] sm:$0xff] %vm763_vm4, %v2594_v32  ;;  %777 = vst.msk [vmem:[#allocation2 + $0x68] sm:$0xff] %vm763_vm4, %v2596_v15  ;;  %v2601_v32 = vmax.f32 %v2020_v12, 0.0  ;;  %v2603_v15 = vmax.f32 %v2036_v59, 0.0 }
 0x152   : > { %780 = vst.msk [vmem:[#allocation2 + $0x80] sm:$0xff] %vm763_vm4, %v2599_v49  ;;  %781 = vst.msk [vmem:[#allocation2 + $0x88] sm:$0xff] %vm763_vm4, %v2600_v52  ;;  %v2606_v49 = vmax.f32 %v1879_v38, 0.0  ;;  %v2607_v52 = vmax.f32 %v1887_v45, 0.0 }
 0x153   : > { %782 = vst.msk [vmem:[#allocation2 + $0x90] sm:$0xff] %vm763_vm4, %v2601_v32  ;;  %783 = vst.msk [vmem:[#allocation2 + $0x98] sm:$0xff] %vm763_vm4, %v2602_v8  ;;  %v2608_v32 = vmax.f32 %v1895_v54, 0.0  ;;  %v2609_v8 = vmax.f32 %v1903_v61, 0.0 }
 0x154   : > { %784 = vst.msk [vmem:[#allocation2 + $0xa0] sm:$0xff] %vm763_vm4, %v2603_v15  ;;  %788 = vst.msk [vmem:[#allocation2 + $0xc0] sm:$0xff] %vm763_vm4, %v2579_v31  ;;  %v2610_v15 = vmax.f32 %v1911_v6, 0.0 }
 0x155   : > { %789 = vst.msk [vmem:[#allocation2 + $0xc8] sm:$0xff] %vm763_vm4, %v2577_v37  ;;  %790 = vst.msk [vmem:[#allocation2 + $0xd0] sm:$0xff] %vm763_vm4, %v2606_v49  ;;  %v2613_v49 = vmax.f32 %v1935_v29, 0.0 }
 0x156   : > { %791 = vst.msk [vmem:[#allocation2 + $0xd8] sm:$0xff] %vm763_vm4, %v2607_v52  ;;  %792 = vst.msk [vmem:[#allocation2 + $0xe0] sm:$0xff] %vm763_vm4, %v2608_v32  ;;  %v2614_v52 = vmax.f32 %v1943_v43, 0.0  ;;  %v2615_v32 = vmax.f32 %v1951_v58, 0.0 }
 0x157   : > { %793 = vst.msk [vmem:[#allocation2 + $0xe8] sm:$0xff] %vm763_vm4, %v2609_v8  ;;  %794 = vst.msk [vmem:[#allocation2 + $0xf0] sm:$0xff] %vm763_vm4, %v2610_v15  ;;  %v2616_v8 = vmax.f32 %v1959_v11, 0.0  ;;  %v2617_v15 = vmax.f32 %v1967_v26, 0.0 }
 0x158   : > { %797 = vst.msk [vmem:[#allocation2 + $0x108] sm:$0xff] %vm763_vm4, %v2613_v49  ;;  %798 = vst.msk [vmem:[#allocation2 + $0x110] sm:$0xff] %vm763_vm4, %v2614_v52  ;;  %v2620_v49 = vmax.f32 %v1991_v7, 0.0  ;;  %v2621_v52 = vmax.f32 %v1999_v55, 0.0 }
 0x159   : > { %799 = vst.msk [vmem:[#allocation2 + $0x118] sm:$0xff] %vm763_vm4, %v2615_v32  ;;  %800 = vst.msk [vmem:[#allocation2 + $0x120] sm:$0xff] %vm763_vm4, %v2616_v8  ;;  %v2622_v32 = vmax.f32 %v2007_v21, 0.0  ;;  %v2623_v8 = vmax.f32 %v2015_v60, 0.0 }
 0x15a   : > { %801 = vst.msk [vmem:[#allocation2 + $0x128] sm:$0xff] %vm763_vm4, %v2617_v15  ;;  %802 = vst.msk [vmem:[#allocation2 + $0x130] sm:$0xff] %vm763_vm4, %v2618_v24  ;;  %v2624_v15 = vmax.f32 %v2023_v42, 0.0  ;;  %v2625_v24 = vmax.f32 %v2031_v14, 0.0 }
 0x15b   : > { %803 = vst.msk [vmem:[#allocation2 + $0x138] sm:$0xff] %vm763_vm4, %v2619_v33  ;;  %804 = vst.msk [vmem:[#allocation2 + $0x140] sm:$0xff] %vm763_vm4, %v2620_v49  ;;  %v2626_v33 = vmax.f32 %v2039_v35, 0.0  ;;  %v2627_v49 = vmax.f32 %v2047_v17, 0.0 }
 0x15c   : > { %805 = vst.msk [vmem:[#allocation2 + $0x148] sm:$0xff] %vm763_vm4, %v2621_v52  ;;  %806 = vst.msk [vmem:[#allocation2 + $0x150] sm:$0xff] %vm763_vm4, %v2622_v32 }
 0x15d   : > { %807 = vst.msk [vmem:[#allocation2 + $0x158] sm:$0xff] %vm763_vm4, %v2623_v8  ;;  %808 = vst.msk [vmem:[#allocation2 + $0x160] sm:$0xff] %vm763_vm4, %v2624_v15 }
 0x15e   : > { %809 = vst.msk [vmem:[#allocation2 + $0x168] sm:$0xff] %vm763_vm4, %v2625_v24  ;;  %810 = vst.msk [vmem:[#allocation2 + $0x170] sm:$0xff] %vm763_vm4, %v2626_v33 }
 0x15f   : > { %811 = vst.msk [vmem:[#allocation2 + $0x178] sm:$0xff] %vm763_vm4, %v2627_v49 }
 0x160 PF: > { %p1392_p6 = scmp.le.s32.totalorder %s1700_s12, 0 }
 0x161   : > { %v817_v52 = vld [vmem:[#allocation2] sm:$0xff] (!%p1392_p6)  ;;  %vm915_vm5 = vcmask (!%p1392_p6), 261120   ;;  %v818_v32 = vld [vmem:[#allocation2 + $0x8] sm:$0xff] (!%p1392_p6)  ;;  %v819_v8 = vld [vmem:[#allocation2 + $0x10] sm:$0xff] (!%p1392_p6)  ;;  %v2628_v3 = vmax.f32 (!%p1392_p6), %v1908_v2, 0.0  ;;  %v2629_v17 = vmax.f32 (!%p1392_p6), %v1915_v9, 0.0 }
 0x162   : > { %816 = sbr.rel (%p1392_p6) target bundleno = 383 (0x17f), region = 40  ;;  %v866_v15 = vmax.f32 (!%p1392_p6), %v817_v52, %v710_v40  ;;  %v867_v24 = vmax.f32 (!%p1392_p6), %v818_v32, %v711_v47  ;;  %v868_v33 = vmax.f32 (!%p1392_p6), %v819_v8, %v712_v56  ;;  %v820_v49 = vld [vmem:[#allocation2 + $0x18] sm:$0xff] (!%p1392_p6)  ;;  %v825_v52 = vld [vmem:[#allocation2 + $0x40] sm:$0xff] (!%p1392_p6)  ;;  %v2630_v41 = vmax.f32 (!%p1392_p6), %v1924_v18, 0.0  ;;  %v830_v8 = vld [vmem:[#allocation2 + $0x68] sm:$0xff] (!%p1392_p6) }
 0x163   : > { %v869_v31 = vmax.f32 (!%p1392_p6), %v820_v49, %v713_v63  ;;  %v824_v40 = vld [vmem:[#allocation2 + $0x38] sm:$0xff] (!%p1392_p6)  ;;  %v2631_v50 = vmax.f32 (!%p1392_p6), %v1931_v25, 0.0  ;;  %v2632_v57 = vmax.f32 (!%p1392_p6), %v1940_v36, 0.0  ;;  %v2634_v18 = vmax.f32 (!%p1392_p6), %v1956_v4, 0.0  ;;  %v834_v49 = vld [vmem:[#allocation2 + $0x88] sm:$0xff] (!%p1392_p6) }
 0x164   : > { %v823_v34 = vld [vmem:[#allocation2 + $0x30] sm:$0xff] (!%p1392_p6)  ;;  %916 = vst.msk [vmem:[#allocation2] sm:$0xff] (!%p1392_p6), %vm915_vm5, %v866_v15  ;;  %917 = vst.msk [vmem:[#allocation2 + $0x8] sm:$0xff] (!%p1392_p6), %vm915_vm5, %v867_v24  ;;  %v2635_v25 = vmax.f32 (!%p1392_p6), %v1963_v19, 0.0  ;;  %v2638_v4 = vmax.f32 (!%p1392_p6), %v1988_v46, 0.0  ;;  %v832_v19 = vld [vmem:[#allocation2 + $0x78] sm:$0xff] (!%p1392_p6) }
 0x165   : > { %v822_v62 = vld [vmem:[#allocation2 + $0x28] sm:$0xff] (!%p1392_p6)  ;;  %918 = vst.msk [vmem:[#allocation2 + $0x10] sm:$0xff] (!%p1392_p6), %vm915_vm5, %v868_v33  ;;  %v872_v47 = vmax.f32 (!%p1392_p6), %v823_v34, %v2630_v41  ;;  %v873_v56 = vmax.f32 (!%p1392_p6), %v824_v40, %v2631_v50  ;;  %v874_v63 = vmax.f32 (!%p1392_p6), %v825_v52, %v2632_v57  ;;  %919 = vst.msk [vmem:[#allocation2 + $0x18] sm:$0xff] (!%p1392_p6), %vm915_vm5, %v869_v31  ;;  %v831_v15 = vld [vmem:[#allocation2 + $0x70] sm:$0xff] (!%p1392_p6)  ;;  %v2639_v34 = vmax.f32 (!%p1392_p6), %v1995_v10, 0.0 }
 0x166   : > { %v821_v37 = vld [vmem:[#allocation2 + $0x20] sm:$0xff] (!%p1392_p6)  ;;  %v871_v35 = vmax.f32 (!%p1392_p6), %v822_v62, %v2629_v17  ;;  %v826_v2 = vld [vmem:[#allocation2 + $0x48] sm:$0xff] (!%p1392_p6)  ;;  %v828_v62 = vld [vmem:[#allocation2 + $0x58] sm:$0xff] (!%p1392_p6)  ;;  %v2633_v17 = vmax.f32 (!%p1392_p6), %v1947_v51, 0.0  ;;  %v2637_v51 = vmax.f32 (!%p1392_p6), %v1979_v5, 0.0  ;;  %v880_v24 = vmax.f32 (!%p1392_p6), %v831_v15, %v2638_v4 }
 0x167   : > { %v870_v16 = vmax.f32 (!%p1392_p6), %v821_v37, %v2628_v3  ;;  %v827_v9 = vld [vmem:[#allocation2 + $0x50] sm:$0xff] (!%p1392_p6)  ;;  %v877_v32 = vmax.f32 (!%p1392_p6), %v828_v62, %v2635_v25  ;;  %v829_v36 = vld [vmem:[#allocation2 + $0x60] sm:$0xff] (!%p1392_p6)  ;;  %922 = vst.msk [vmem:[#allocation2 + $0x30] sm:$0xff] (!%p1392_p6), %vm915_vm5, %v872_v47  ;;  %923 = vst.msk [vmem:[#allocation2 + $0x38] sm:$0xff] (!%p1392_p6), %vm915_vm5, %v873_v56  ;;  %v881_v40 = vmax.f32 (!%p1392_p6), %v832_v19, %v2639_v34  ;;  %v2641_v5 = vmax.f32 (!%p1392_p6), %v2011_v1, 0.0 }
 0x168   : > { %921 = vst.msk [vmem:[#allocation2 + $0x28] sm:$0xff] (!%p1392_p6), %vm915_vm5, %v871_v35  ;;  %v875_v3 = vmax.f32 (!%p1392_p6), %v826_v2, %v2633_v17  ;;  %v876_v37 = vmax.f32 (!%p1392_p6), %v827_v9, %v2634_v18  ;;  %924 = vst.msk [vmem:[#allocation2 + $0x40] sm:$0xff] (!%p1392_p6), %vm915_vm5, %v874_v63  ;;  %v2636_v35 = vmax.f32 (!%p1392_p6), %v1972_v39, 0.0  ;;  %v879_v31 = vmax.f32 (!%p1392_p6), %v830_v8, %v2637_v51  ;;  %v833_v33 = vld [vmem:[#allocation2 + $0x80] sm:$0xff] (!%p1392_p6)  ;;  %v835_v46 = vld [vmem:[#allocation2 + $0x90] sm:$0xff] (!%p1392_p6) }
 0x169   : > { %920 = vst.msk [vmem:[#allocation2 + $0x20] sm:$0xff] %vm915_vm5, %v870_v16  ;;  %927 = vst.msk [vmem:[#allocation2 + $0x58] sm:$0xff] %vm915_vm5, %v877_v32  ;;  %v2640_v39 = vmax.f32 %v2004_v23, 0.0  ;;  %v883_v41 = vmax.f32 %v834_v49, %v2641_v5  ;;  %v836_v47 = vld [vmem:[#allocation2 + $0x98] sm:$0xff]  ;;  %v837_v50 = vld [vmem:[#allocation2 + $0xa0] sm:$0xff]  ;;  %v2642_v56 = vmax.f32 %v2020_v12, 0.0 }
 0x16a   : > { %v878_v16 = vmax.f32 %v829_v36, %v2636_v35  ;;  %925 = vst.msk [vmem:[#allocation2 + $0x48] sm:$0xff] %vm915_vm5, %v875_v3  ;;  %926 = vst.msk [vmem:[#allocation2 + $0x50] sm:$0xff] %vm915_vm5, %v876_v37  ;;  %v2643_v10 = vmax.f32 %v2027_v0, 0.0  ;;  %v2644_v23 = vmax.f32 %v2036_v59, 0.0  ;;  %v838_v1 = vld [vmem:[#allocation2 + $0xa8] sm:$0xff]  ;;  %v839_v9 = vld [vmem:[#allocation2 + $0xb0] sm:$0xff] }
 0x16b   : > { %v882_v52 = vmax.f32 %v833_v33, %v2640_v39  ;;  %929 = vst.msk [vmem:[#allocation2 + $0x68] sm:$0xff] %vm915_vm5, %v879_v31  ;;  %930 = vst.msk [vmem:[#allocation2 + $0x70] sm:$0xff] %vm915_vm5, %v880_v24  ;;  %v884_v57 = vmax.f32 %v835_v46, %v2642_v56  ;;  %v840_v62 = vld [vmem:[#allocation2 + $0xb8] sm:$0xff]  ;;  %v2645_v17 = vmax.f32 %v2043_v28, 0.0  ;;  %v2646_v12 = vmax.f32 %v2052_v30, 0.0  ;;  %v841_v59 = vld [vmem:[#allocation2 + $0xc0] sm:$0xff] }
 0x16c   : > { %928 = vst.msk [vmem:[#allocation2 + $0x60] sm:$0xff] %vm915_vm5, %v878_v16  ;;  %v885_v63 = vmax.f32 %v836_v47, %v2643_v10  ;;  %v886_v2 = vmax.f32 %v837_v50, %v2644_v23  ;;  %931 = vst.msk [vmem:[#allocation2 + $0x78] sm:$0xff] %vm915_vm5, %v881_v40  ;;  %v2647_v0 = vmax.f32 %v2059_v44, 0.0  ;;  %v842_v25 = vld [vmem:[#allocation2 + $0xc8] sm:$0xff]  ;;  %v843_v32 = vld [vmem:[#allocation2 + $0xd0] sm:$0xff]  ;;  %v2648_v36 = vmax.f32 %v2064_v48, 0.0 }
 0x16d   : > { %932 = vst.msk [vmem:[#allocation2 + $0x80] sm:$0xff] %vm915_vm5, %v882_v52  ;;  %933 = vst.msk [vmem:[#allocation2 + $0x88] sm:$0xff] %vm915_vm5, %v883_v41  ;;  %v887_v3 = vmax.f32 %v838_v1, %v2645_v17  ;;  %v888_v18 = vmax.f32 %v839_v9, %v2646_v12  ;;  %v2649_v28 = vmax.f32 %v2068_v27, 0.0  ;;  %v2650_v30 = vmax.f32 %v1879_v38, 0.0  ;;  %v844_v44 = vld [vmem:[#allocation2 + $0xd8] sm:$0xff]  ;;  %v845_v16 = vld [vmem:[#allocation2 + $0xe0] sm:$0xff] }
 0x16e   : > { %v889_v37 = vmax.f32 %v840_v62, %v2647_v0  ;;  %934 = vst.msk [vmem:[#allocation2 + $0x90] sm:$0xff] %vm915_vm5, %v884_v57  ;;  %935 = vst.msk [vmem:[#allocation2 + $0x98] sm:$0xff] %vm915_vm5, %v885_v63  ;;  %v890_v8 = vmax.f32 %v841_v59, %v2648_v36  ;;  %v846_v51 = vld [vmem:[#allocation2 + $0xe8] sm:$0xff]  ;;  %v2651_v31 = vmax.f32 %v1887_v45, 0.0  ;;  %v2652_v48 = vmax.f32 %v1895_v54, 0.0  ;;  %v847_v38 = vld [vmem:[#allocation2 + $0xf0] sm:$0xff] }
 0x16f   : > { %936 = vst.msk [vmem:[#allocation2 + $0xa0] sm:$0xff] %vm915_vm5, %v886_v2  ;;  %v891_v15 = vmax.f32 %v842_v25, %v2649_v28  ;;  %v892_v35 = vmax.f32 %v843_v32, %v2650_v30  ;;  %937 = vst.msk [vmem:[#allocation2 + $0xa8] sm:$0xff] %vm915_vm5, %v887_v3  ;;  %v2653_v27 = vmax.f32 %v1903_v61, 0.0  ;;  %v848_v33 = vld [vmem:[#allocation2 + $0xf8] sm:$0xff]  ;;  %v849_v49 = vld [vmem:[#allocation2 + $0x100] sm:$0xff]  ;;  %v2654_v34 = vmax.f32 %v1911_v6, 0.0 }
 0x170   : > { %938 = vst.msk [vmem:[#allocation2 + $0xb0] sm:$0xff] %vm915_vm5, %v888_v18  ;;  %939 = vst.msk [vmem:[#allocation2 + $0xb8] sm:$0xff] %vm915_vm5, %v889_v37  ;;  %v893_v4 = vmax.f32 %v844_v44, %v2651_v31  ;;  %v894_v24 = vmax.f32 %v845_v16, %v2652_v48  ;;  %v2655_v45 = vmax.f32 %v1919_v13, 0.0  ;;  %v2656_v54 = vmax.f32 %v1927_v22, 0.0  ;;  %v850_v61 = vld [vmem:[#allocation2 + $0x108] sm:$0xff]  ;;  %v851_v5 = vld [vmem:[#allocation2 + $0x110] sm:$0xff] }
 0x171   : > { %v895_v19 = vmax.f32 %v846_v51, %v2653_v27  ;;  %940 = vst.msk [vmem:[#allocation2 + $0xc0] sm:$0xff] %vm915_vm5, %v890_v8  ;;  %941 = vst.msk [vmem:[#allocation2 + $0xc8] sm:$0xff] %vm915_vm5, %v891_v15  ;;  %v896_v40 = vmax.f32 %v847_v38, %v2654_v34  ;;  %v852_v41 = vld [vmem:[#allocation2 + $0x118] sm:$0xff]  ;;  %v2657_v46 = vmax.f32 %v1935_v29, 0.0  ;;  %v2658_v6 = vmax.f32 %v1943_v43, 0.0  ;;  %v853_v22 = vld [vmem:[#allocation2 + $0x120] sm:$0xff] }
 0x172   : > { %942 = vst.msk [vmem:[#allocation2 + $0xd0] sm:$0xff] %vm915_vm5, %v892_v35  ;;  %v897_v39 = vmax.f32 %v848_v33, %v2655_v45  ;;  %v898_v52 = vmax.f32 %v849_v49, %v2656_v54  ;;  %943 = vst.msk [vmem:[#allocation2 + $0xd8] sm:$0xff] %vm915_vm5, %v893_v4  ;;  %v2659_v13 = vmax.f32 %v1951_v58, 0.0  ;;  %v854_v57 = vld [vmem:[#allocation2 + $0x128] sm:$0xff]  ;;  %v855_v10 = vld [vmem:[#allocation2 + $0x130] sm:$0xff]  ;;  %v2660_v63 = vmax.f32 %v1959_v11, 0.0 }
 0x173   : > { %944 = vst.msk [vmem:[#allocation2 + $0xe0] sm:$0xff] %vm915_vm5, %v894_v24  ;;  %945 = vst.msk [vmem:[#allocation2 + $0xe8] sm:$0xff] %vm915_vm5, %v895_v19  ;;  %v899_v47 = vmax.f32 %v850_v61, %v2657_v46  ;;  %v900_v50 = vmax.f32 %v851_v5, %v2658_v6  ;;  %v2661_v29 = vmax.f32 %v1967_v26, 0.0  ;;  %v2662_v43 = vmax.f32 %v1975_v53, 0.0  ;;  %v856_v58 = vld [vmem:[#allocation2 + $0x138] sm:$0xff]  ;;  %v857_v9 = vld [vmem:[#allocation2 + $0x140] sm:$0xff] }
 0x174   : > { %v901_v56 = vmax.f32 %v852_v41, %v2659_v13  ;;  %946 = vst.msk [vmem:[#allocation2 + $0xf0] sm:$0xff] %vm915_vm5, %v896_v40  ;;  %947 = vst.msk [vmem:[#allocation2 + $0xf8] sm:$0xff] %vm915_vm5, %v897_v39  ;;  %v902_v23 = vmax.f32 %v853_v22, %v2660_v63  ;;  %v858_v62 = vld [vmem:[#allocation2 + $0x148] sm:$0xff]  ;;  %v2663_v17 = vmax.f32 %v1983_v20, 0.0  ;;  %v2664_v11 = vmax.f32 %v1991_v7, 0.0  ;;  %v859_v53 = vld [vmem:[#allocation2 + $0x150] sm:$0xff] }
 0x175   : > { %948 = vst.msk [vmem:[#allocation2 + $0x100] sm:$0xff] %vm915_vm5, %v898_v52  ;;  %v903_v2 = vmax.f32 %v854_v57, %v2661_v29  ;;  %v904_v1 = vmax.f32 %v855_v10, %v2662_v43  ;;  %949 = vst.msk [vmem:[#allocation2 + $0x108] sm:$0xff] %vm915_vm5, %v899_v47  ;;  %v2665_v26 = vmax.f32 %v1999_v55, 0.0  ;;  %v860_v0 = vld [vmem:[#allocation2 + $0x158] sm:$0xff]  ;;  %v861_v37 = vld [vmem:[#allocation2 + $0x160] sm:$0xff]  ;;  %v2666_v59 = vmax.f32 %v2007_v21, 0.0 }
 0x176   : > { %950 = vst.msk [vmem:[#allocation2 + $0x110] sm:$0xff] %vm915_vm5, %v900_v50  ;;  %951 = vst.msk [vmem:[#allocation2 + $0x118] sm:$0xff] %vm915_vm5, %v901_v56  ;;  %v905_v3 = vmax.f32 %v856_v58, %v2663_v17  ;;  %v906_v12 = vmax.f32 %v857_v9, %v2664_v11  ;;  %v2667_v20 = vmax.f32 %v2015_v60, 0.0  ;;  %v2668_v7 = vmax.f32 %v2023_v42, 0.0  ;;  %v862_v55 = vld [vmem:[#allocation2 + $0x168] sm:$0xff]  ;;  %v863_v8 = vld [vmem:[#allocation2 + $0x170] sm:$0xff] }
 0x177   : > { %v907_v18 = vmax.f32 %v858_v62, %v2665_v26  ;;  %952 = vst.msk [vmem:[#allocation2 + $0x120] sm:$0xff] %vm915_vm5, %v902_v23  ;;  %953 = vst.msk [vmem:[#allocation2 + $0x128] sm:$0xff] %vm915_vm5, %v903_v2  ;;  %v908_v25 = vmax.f32 %v859_v53, %v2666_v59  ;;  %v864_v28 = vld [vmem:[#allocation2 + $0x178] sm:$0xff]  ;;  %v2669_v15 = vmax.f32 %v2031_v14, 0.0  ;;  %v2670_v21 = vld [vmem:[#allocation3_spill] sm:$0xff] }
 0x178   : > { %954 = vst.msk [vmem:[#allocation2 + $0x130] sm:$0xff] %vm915_vm5, %v904_v1  ;;  %v909_v32 = vmax.f32 %v860_v0, %v2667_v20  ;;  %v910_v36 = vmax.f32 %v861_v37, %v2668_v7  ;;  %955 = vst.msk [vmem:[#allocation2 + $0x138] sm:$0xff] %vm915_vm5, %v905_v3  ;;  %v2671_v35 = vmax.f32 %v2670_v21, 0.0  ;;  %v2672_v60 = vld [vmem:[#allocation4_spill] sm:$0xff]  ;;  %v865_v42 = vld [vmem:[#allocation2 + $0x180] sm:$0xff] }
 0x179   : > { %956 = vst.msk [vmem:[#allocation2 + $0x140] sm:$0xff] %vm915_vm5, %v906_v12  ;;  %957 = vst.msk [vmem:[#allocation2 + $0x148] sm:$0xff] %vm915_vm5, %v907_v18  ;;  %v911_v30 = vmax.f32 %v862_v55, %v2669_v15  ;;  %v2673_v16 = vmax.f32 %v2672_v60, 0.0  ;;  %v2674_v31 = vld [vmem:[#allocation5_spill] sm:$0xff] }
 0x17a   : > { %v912_v44 = vmax.f32 %v863_v8, %v2671_v35  ;;  %958 = vst.msk [vmem:[#allocation2 + $0x150] sm:$0xff] %vm915_vm5, %v908_v25  ;;  %959 = vst.msk [vmem:[#allocation2 + $0x158] sm:$0xff] %vm915_vm5, %v909_v32  ;;  %v2675_v4 = vmax.f32 %v2674_v31, 0.0 }
 0x17b   : > { %v913_v51 = vmax.f32 %v864_v28, %v2673_v16  ;;  %960 = vst.msk [vmem:[#allocation2 + $0x160] sm:$0xff] %vm915_vm5, %v910_v36  ;;  %961 = vst.msk [vmem:[#allocation2 + $0x168] sm:$0xff] %vm915_vm5, %v911_v30 }
 0x17c   : > { %v914_v48 = vmax.f32 %v865_v42, %v2675_v4  ;;  %962 = vst.msk [vmem:[#allocation2 + $0x170] sm:$0xff] %vm915_vm5, %v912_v44 }
 0x17d   : > { %963 = vst.msk [vmem:[#allocation2 + $0x178] sm:$0xff] %vm915_vm5, %v913_v51 }
 0x17e   : > { %964 = vst.msk [vmem:[#allocation2 + $0x180] sm:$0xff] %vm915_vm5, %v914_v48 }
 0x17f PF: > { %p1393_p7 = scmp.ne.s32.totalorder %s1700_s12, 3 }
 0x180   : > { %vm1215_vm6 = vcmask (!%p1393_p7), 257024   ;;  %v978_v6 = vld [vmem:[#allocation2 + $0x48] sm:$0xff] (!%p1393_p7)  ;;  %v979_v50 = vld [vmem:[#allocation2 + $0x50] sm:$0xff] (!%p1393_p7)  ;;  %v981_v10 = vld [vmem:[#allocation2 + $0x60] sm:$0xff] (!%p1393_p7) }
 0x181   : > { %968 = sbr.rel (%p1393_p7) target bundleno = 413 (0x19d), region = 44  ;;  %v969_v14 = vld [vmem:[#allocation2] sm:$0xff] (!%p1393_p7)  ;;  %v970_v24 = vld [vmem:[#allocation2 + $0x8] sm:$0xff] (!%p1393_p7)  ;;  %v1456_v56 = vpack.c.bf16 (!%p1393_p7), %v978_v6, %v978_v6  ;;  %v1457_v22 = vpack.c.bf16 (!%p1393_p7), %v979_v50, %v979_v50  ;;  %v983_v23 = vld [vmem:[#allocation2 + $0x70] sm:$0xff] (!%p1393_p7)  ;;  %v1459_v29 = vpack.c.bf16 (!%p1393_p7), %v981_v10, %v981_v10 }
 0x182   : > { %v971_v27 = vld [vmem:[#allocation2 + $0x10] sm:$0xff] (!%p1393_p7)  ;;  %v1447_v19 = vpack.c.bf16 (!%p1393_p7), %v969_v14, %v969_v14  ;;  %v1448_v38 = vpack.c.bf16 (!%p1393_p7), %v970_v24, %v970_v24  ;;  %v972_v49 = vld [vmem:[#allocation2 + $0x18] sm:$0xff] (!%p1393_p7)  ;;  %v982_v63 = vld [vmem:[#allocation2 + $0x68] sm:$0xff] (!%p1393_p7)  ;;  %v1461_v43 = vpack.c.bf16 (!%p1393_p7), %v983_v23, %v983_v23 }
 0x183   : > { %v1449_v33 = vpack.c.bf16 (!%p1393_p7), %v971_v27, %v971_v27  ;;  %v1450_v45 = vpack.c.bf16 (!%p1393_p7), %v972_v49, %v972_v49  ;;  %v1460_v2 = vpack.c.bf16 (!%p1393_p7), %v982_v63, %v982_v63  ;;  %v984_v1 = vld [vmem:[#allocation2 + $0x78] sm:$0xff] (!%p1393_p7)  ;;  %v985_v58 = vld [vmem:[#allocation2 + $0x80] sm:$0xff] (!%p1393_p7)  ;;  %v986_v9 = vld [vmem:[#allocation2 + $0x88] sm:$0xff] (!%p1393_p7)  ;;  %1225 = vst.msk [vmem:[%s2576_s3 + $0x24] sm:$0xf] (!%p1393_p7), %vm1215_vm6, %v1456_v56 }
 0x184   : > { %v975_v52 = vld [vmem:[#allocation2 + $0x30] sm:$0xff] (!%p1393_p7)  ;;  %v976_v61 = vld [vmem:[#allocation2 + $0x38] sm:$0xff] (!%p1393_p7)  ;;  %1216 = vst.msk [vmem:[%s2576_s3] sm:$0xf] (!%p1393_p7), %vm1215_vm6, %v1447_v19  ;;  %1217 = vst.msk [vmem:[%s2576_s3 + $0x4] sm:$0xf] (!%p1393_p7), %vm1215_vm6, %v1448_v38  ;;  %v1462_v62 = vpack.c.bf16 (!%p1393_p7), %v984_v1, %v984_v1  ;;  %v1463_v17 = vpack.c.bf16 (!%p1393_p7), %v985_v58, %v985_v58  ;;  %v1464_v3 = vpack.c.bf16 (!%p1393_p7), %v986_v9, %v986_v9 }
 0x185   : > { %v974_v40 = vld [vmem:[#allocation2 + $0x28] sm:$0xff] (!%p1393_p7)  ;;  %v977_v5 = vld [vmem:[#allocation2 + $0x40] sm:$0xff] (!%p1393_p7)  ;;  %1218 = vst.msk [vmem:[%s2576_s3 + $0x8] sm:$0xf] (!%p1393_p7), %vm1215_vm6, %v1449_v33  ;;  %v1453_v41 = vpack.c.bf16 (!%p1393_p7), %v975_v52, %v975_v52  ;;  %v1454_v46 = vpack.c.bf16 (!%p1393_p7), %v976_v61, %v976_v61  ;;  %1219 = vst.msk [vmem:[%s2576_s3 + $0xc] sm:$0xf] (!%p1393_p7), %vm1215_vm6, %v1450_v45 }
 0x186   : > { %v973_v34 = vld [vmem:[#allocation2 + $0x20] sm:$0xff] (!%p1393_p7)  ;;  %v1452_v54 = vpack.c.bf16 (!%p1393_p7), %v974_v40, %v974_v40  ;;  %v1455_v47 = vpack.c.bf16 (!%p1393_p7), %v977_v5, %v977_v5  ;;  %v980_v13 = vld [vmem:[#allocation2 + $0x58] sm:$0xff] (!%p1393_p7)  ;;  %1226 = vst.msk [vmem:[%s2576_s3 + $0x28] sm:$0xf] (!%p1393_p7), %vm1215_vm6, %v1457_v22  ;;  %v987_v11 = vld [vmem:[#allocation2 + $0x90] sm:$0xff] (!%p1393_p7) }
 0x187   : > { %v1451_v39 = vpack.c.bf16 (!%p1393_p7), %v973_v34, %v973_v34  ;;  %v1458_v57 = vpack.c.bf16 (!%p1393_p7), %v980_v13, %v980_v13  ;;  %1222 = vst.msk [vmem:[%s2576_s3 + $0x18] sm:$0xf] (!%p1393_p7), %vm1215_vm6, %v1453_v41  ;;  %1223 = vst.msk [vmem:[%s2576_s3 + $0x1c] sm:$0xf] (!%p1393_p7), %vm1215_vm6, %v1454_v46  ;;  %v988_v12 = vld [vmem:[#allocation2 + $0x98] sm:$0xff] (!%p1393_p7)  ;;  %v989_v26 = vld [vmem:[#allocation2 + $0xa0] sm:$0xff] (!%p1393_p7)  ;;  %v1465_v18 = vpack.c.bf16 (!%p1393_p7), %v987_v11, %v987_v11 }
 0x188   : > { %1221 = vst.msk [vmem:[%s2576_s3 + $0x14] sm:$0xf] %vm1215_vm6, %v1452_v54  ;;  %1224 = vst.msk [vmem:[%s2576_s3 + $0x20] sm:$0xf] %vm1215_vm6, %v1455_v47  ;;  %v1466_v53 = vpack.c.bf16 %v988_v12, %v988_v12  ;;  %v1467_v0 = vpack.c.bf16 %v989_v26, %v989_v26  ;;  %v990_v37 = vld [vmem:[#allocation2 + $0xa8] sm:$0xff]  ;;  %v991_v59 = vld [vmem:[#allocation2 + $0xb0] sm:$0xff] }
 0x189   : > { %1220 = vst.msk [vmem:[%s2576_s3 + $0x10] sm:$0xf] %vm1215_vm6, %v1451_v39  ;;  %1227 = vst.msk [vmem:[%s2576_s3 + $0x2c] sm:$0xf] %vm1215_vm6, %v1458_v57  ;;  %v992_v25 = vld [vmem:[#allocation2 + $0xb8] sm:$0xff]  ;;  %v1468_v20 = vpack.c.bf16 %v990_v37, %v990_v37  ;;  %v1469_v32 = vpack.c.bf16 %v991_v59, %v991_v59  ;;  %v993_v36 = vld [vmem:[#allocation2 + $0xc0] sm:$0xff] }
 0x18a   : > { %1228 = vst.msk [vmem:[%s2576_s3 + $0x30] sm:$0xf] %vm1215_vm6, %v1459_v29  ;;  %1229 = vst.msk [vmem:[%s2576_s3 + $0x34] sm:$0xf] %vm1215_vm6, %v1460_v2  ;;  %v1470_v7 = vpack.c.bf16 %v992_v25, %v992_v25  ;;  %v994_v55 = vld [vmem:[#allocation2 + $0xc8] sm:$0xff]  ;;  %v995_v8 = vld [vmem:[#allocation2 + $0xd0] sm:$0xff]  ;;  %v1471_v28 = vpack.c.bf16 %v993_v36, %v993_v36 }
 0x18b   : > { %1230 = vst.msk [vmem:[%s2576_s3 + $0x38] sm:$0xf] %vm1215_vm6, %v1461_v43  ;;  %1231 = vst.msk [vmem:[%s2576_s3 + $0x3c] sm:$0xf] %vm1215_vm6, %v1462_v62  ;;  %v1472_v15 = vpack.c.bf16 %v994_v55, %v994_v55  ;;  %v1473_v30 = vpack.c.bf16 %v995_v8, %v995_v8  ;;  %v996_v21 = vld [vmem:[#allocation2 + $0xd8] sm:$0xff]  ;;  %v997_v35 = vld [vmem:[#allocation2 + $0xe0] sm:$0xff] }
 0x18c   : > { %1232 = vst.msk [vmem:[%s2576_s3 + $0x40] sm:$0xf] %vm1215_vm6, %v1463_v17  ;;  %1233 = vst.msk [vmem:[%s2576_s3 + $0x44] sm:$0xf] %vm1215_vm6, %v1464_v3  ;;  %v998_v44 = vld [vmem:[#allocation2 + $0xe8] sm:$0xff]  ;;  %v1474_v60 = vpack.c.bf16 %v996_v21, %v996_v21  ;;  %v1475_v16 = vpack.c.bf16 %v997_v35, %v997_v35  ;;  %v999_v42 = vld [vmem:[#allocation2 + $0xf0] sm:$0xff] }
 0x18d   : > { %1234 = vst.msk [vmem:[%s2576_s3 + $0x48] sm:$0xf] %vm1215_vm6, %v1465_v18  ;;  %1235 = vst.msk [vmem:[%s2576_s3 + $0x4c] sm:$0xf] %vm1215_vm6, %v1466_v53  ;;  %v1476_v51 = vpack.c.bf16 %v998_v44, %v998_v44  ;;  %v1000_v31 = vld [vmem:[#allocation2 + $0xf8] sm:$0xff]  ;;  %v1001_v4 = vld [vmem:[#allocation2 + $0x100] sm:$0xff]  ;;  %v1477_v48 = vpack.c.bf16 %v999_v42, %v999_v42 }
 0x18e   : > { %1236 = vst.msk [vmem:[%s2576_s3 + $0x50] sm:$0xf] %vm1215_vm6, %v1467_v0  ;;  %1237 = vst.msk [vmem:[%s2576_s3 + $0x54] sm:$0xf] %vm1215_vm6, %v1468_v20  ;;  %v1478_v14 = vpack.c.bf16 %v1000_v31, %v1000_v31  ;;  %v1479_v24 = vpack.c.bf16 %v1001_v4, %v1001_v4  ;;  %v1002_v27 = vld [vmem:[#allocation2 + $0x108] sm:$0xff]  ;;  %v1003_v19 = vld [vmem:[#allocation2 + $0x110] sm:$0xff] }
 0x18f   : > { %1238 = vst.msk [vmem:[%s2576_s3 + $0x58] sm:$0xf] %vm1215_vm6, %v1469_v32  ;;  %1239 = vst.msk [vmem:[%s2576_s3 + $0x5c] sm:$0xf] %vm1215_vm6, %v1470_v7  ;;  %v1004_v38 = vld [vmem:[#allocation2 + $0x118] sm:$0xff]  ;;  %v1480_v33 = vpack.c.bf16 %v1002_v27, %v1002_v27  ;;  %v1481_v49 = vpack.c.bf16 %v1003_v19, %v1003_v19  ;;  %v1005_v40 = vld [vmem:[#allocation2 + $0x120] sm:$0xff] }
 0x190   : > { %1240 = vst.msk [vmem:[%s2576_s3 + $0x60] sm:$0xf] %vm1215_vm6, %v1471_v28  ;;  %1241 = vst.msk [vmem:[%s2576_s3 + $0x64] sm:$0xf] %vm1215_vm6, %v1472_v15  ;;  %v1482_v34 = vpack.c.bf16 %v1004_v38, %v1004_v38  ;;  %v1006_v45 = vld [vmem:[#allocation2 + $0x128] sm:$0xff]  ;;  %v1007_v39 = vld [vmem:[#allocation2 + $0x130] sm:$0xff]  ;;  %v1483_v54 = vpack.c.bf16 %v1005_v40, %v1005_v40 }
 0x191   : > { %1242 = vst.msk [vmem:[%s2576_s3 + $0x68] sm:$0xf] %vm1215_vm6, %v1473_v30  ;;  %1243 = vst.msk [vmem:[%s2576_s3 + $0x6c] sm:$0xf] %vm1215_vm6, %v1474_v60  ;;  %v1484_v52 = vpack.c.bf16 %v1006_v45, %v1006_v45  ;;  %v1485_v61 = vpack.c.bf16 %v1007_v39, %v1007_v39  ;;  %v1008_v5 = vld [vmem:[#allocation2 + $0x138] sm:$0xff]  ;;  %v1009_v41 = vld [vmem:[#allocation2 + $0x140] sm:$0xff] }
 0x192   : > { %1244 = vst.msk [vmem:[%s2576_s3 + $0x70] sm:$0xf] %vm1215_vm6, %v1475_v16  ;;  %1245 = vst.msk [vmem:[%s2576_s3 + $0x74] sm:$0xf] %vm1215_vm6, %v1476_v51  ;;  %v1010_v46 = vld [vmem:[#allocation2 + $0x148] sm:$0xff]  ;;  %v1486_v47 = vpack.c.bf16 %v1008_v5, %v1008_v5  ;;  %v1487_v6 = vpack.c.bf16 %v1009_v41, %v1009_v41  ;;  %v1011_v13 = vld [vmem:[#allocation2 + $0x150] sm:$0xff] }
 0x193   : > { %1246 = vst.msk [vmem:[%s2576_s3 + $0x78] sm:$0xf] %vm1215_vm6, %v1477_v48  ;;  %1247 = vst.msk [vmem:[%s2576_s3 + $0x7c] sm:$0xf] %vm1215_vm6, %v1478_v14  ;;  %v1488_v50 = vpack.c.bf16 %v1010_v46, %v1010_v46  ;;  %v1012_v56 = vld [vmem:[#allocation2 + $0x158] sm:$0xff]  ;;  %v1013_v22 = vld [vmem:[#allocation2 + $0x160] sm:$0xff]  ;;  %v1489_v57 = vpack.c.bf16 %v1011_v13, %v1011_v13 }
 0x194   : > { %1248 = vst.msk [vmem:[%s2576_s3 + $0x80] sm:$0xf] %vm1215_vm6, %v1479_v24  ;;  %1249 = vst.msk [vmem:[%s2576_s3 + $0x84] sm:$0xf] %vm1215_vm6, %v1480_v33  ;;  %v1490_v10 = vpack.c.bf16 %v1012_v56, %v1012_v56  ;;  %v1491_v63 = vpack.c.bf16 %v1013_v22, %v1013_v22  ;;  %v1014_v23 = vld [vmem:[#allocation2 + $0x168] sm:$0xff]  ;;  %v1015_v29 = vld [vmem:[#allocation2 + $0x170] sm:$0xff] }
 0x195   : > { %1250 = vst.msk [vmem:[%s2576_s3 + $0x88] sm:$0xf] %vm1215_vm6, %v1481_v49  ;;  %1251 = vst.msk [vmem:[%s2576_s3 + $0x8c] sm:$0xf] %vm1215_vm6, %v1482_v34  ;;  %v1016_v2 = vld [vmem:[#allocation2 + $0x178] sm:$0xff]  ;;  %v1492_v43 = vpack.c.bf16 %v1014_v23, %v1014_v23  ;;  %v1493_v1 = vpack.c.bf16 %v1015_v29, %v1015_v29  ;;  %v1017_v9 = vld [vmem:[#allocation2 + $0x180] sm:$0xff] }
 0x196   : > { %1252 = vst.msk [vmem:[%s2576_s3 + $0x90] sm:$0xf] %vm1215_vm6, %v1483_v54  ;;  %1253 = vst.msk [vmem:[%s2576_s3 + $0x94] sm:$0xf] %vm1215_vm6, %v1484_v52  ;;  %v1494_v58 = vpack.c.bf16 %v1016_v2, %v1016_v2  ;;  %v1495_v62 = vpack.c.bf16 %v1017_v9, %v1017_v9 }
 0x197   : > { %1254 = vst.msk [vmem:[%s2576_s3 + $0x98] sm:$0xf] %vm1215_vm6, %v1485_v61  ;;  %1255 = vst.msk [vmem:[%s2576_s3 + $0x9c] sm:$0xf] %vm1215_vm6, %v1486_v47 }
 0x198   : > { %1256 = vst.msk [vmem:[%s2576_s3 + $0xa0] sm:$0xf] %vm1215_vm6, %v1487_v6  ;;  %1257 = vst.msk [vmem:[%s2576_s3 + $0xa4] sm:$0xf] %vm1215_vm6, %v1488_v50 }
 0x199   : > { %1258 = vst.msk [vmem:[%s2576_s3 + $0xa8] sm:$0xf] %vm1215_vm6, %v1489_v57  ;;  %1259 = vst.msk [vmem:[%s2576_s3 + $0xac] sm:$0xf] %vm1215_vm6, %v1490_v10 }
 0x19a   : > { %1260 = vst.msk [vmem:[%s2576_s3 + $0xb0] sm:$0xf] %vm1215_vm6, %v1491_v63  ;;  %1261 = vst.msk [vmem:[%s2576_s3 + $0xb4] sm:$0xf] %vm1215_vm6, %v1492_v43 }
 0x19b   : > { %1262 = vst.msk [vmem:[%s2576_s3 + $0xb8] sm:$0xf] %vm1215_vm6, %v1493_v1  ;;  %1263 = vst.msk [vmem:[%s2576_s3 + $0xbc] sm:$0xf] %vm1215_vm6, %v1494_v58 }
 0x19c   : > { %1264 = vst.msk [vmem:[%s2576_s3 + $0xc0] sm:$0xf] %vm1215_vm6, %v1495_v62 }
 0x19d PF: > { %s13_s14 = sadd.s32 1, %s1708_s14   ;;  %s2676_s12 = smov %s1704_s13 }
 0x19e   : > { %p10_p8 = scmp.ge.s32.totalorder %s13_s14, 6   ;;  %s2677_s13 = smov %s2679_s15 }
 0x1a0   :  { %12 = sbr.rel (!%p10_p8) target bundleno = 2 (0x2), region = 74 }

// kernel: forward.5
= control target key start
LH: loop header
LB: loop body
LE: loop exit
PB: predicated region body
PF: predicated region fallthrough
CT: control target
= control target key end

     0   :  { %s2051_s12 = smov 0   ;;  %s2053_s13 = smov 0   ;;  %s2511_s0 = inlined_call_operand.vmem [shape: bf16[4,104,800], index: 0, kind: input, shape index: {}]   ;;  %s2512_s1 = inlined_call_operand.vmem [shape: bf16[800,64], index: 1, kind: input, shape index: {}]   ;;  %s2513_s2 = inlined_call_operand.vmem [shape: f32[1,64], index: 2, kind: input, shape index: {}]   ;;  %s2514_s3 = inlined_call_operand.vmem [shape: bf16[104,64], index: 3, kind: output, shape index: {}]  }
   0x1   :  { %s2055_s14 = smov 0  }
   0x2 LB: > { %s22_s15 = sadd.s32 1, %s2023_s13  ;;  %p1504_p0 = scmp.ge.s32.totalorder %s2027_s14, 1  ;;  %s2027_s14 = sphi %s2055_s14, %s13_s14   ;;  %s2023_s13 = sphi %s2053_s13, %s2516_s13   ;;  %s2019_s12 = sphi %s2051_s12, %s2515_s12  }
   0x3   : > { %p23_p1 = scmp.ge.s32.totalorder %s22_s15, 4  ;;  %p157_p2 = scmp.lt.s32.totalorder %s2027_s14, 5 }
   0x5   : > { %s2518_s15 = smov (%p23_p1, %s22_s15), 0  ;;  %p158_p3 = pnand %p1504_p0, %p157_p2 }
   0x6   : > { %v1888_v0 = vld [vmem:[%s2512_s1 + $0x40] sm:$0xff] (!%p158_p3)   ;;  %v1892_v4 = vld [vmem:[%s2512_s1 + $0x48] sm:$0xff] (!%p158_p3)   ;;  %v1896_v8 = vld [vmem:[%s2512_s1 + $0x50] sm:$0xff] (!%p158_p3)   ;;  %p187_p4 = scmp.lt.s32.totalorder (!%p158_p3), %s2019_s12, 3  ;;  %v2029_v38 = vmov (!%p158_p3), 0.0   ;;  %vm2030_vm0 = vmmov (!%p158_p3), 0  }
   0x7   : > { %161 = sbr.rel (%p158_p3) target bundleno = 388 (0x184), region = 32  ;;  %v1889_v1 = vld [vmem:[%s2512_s1] sm:$0xff] (!%p158_p3)   ;;  %1646 = vmatprep.subr.bf16.mxu0 (!%p158_p3), %v1888_v0  ;;  %v1893_v5 = vld [vmem:[%s2512_s1 + $0x8] sm:$0xff] (!%p158_p3)   ;;  %v1897_v9 = vld [vmem:[%s2512_s1 + $0x10] sm:$0xff] (!%p158_p3)   ;;  %vm897_vm1 = vcmask (!%p158_p3), 261120   ;;  %p1613_p5 = scmp.ne.s32.totalorder (!%p158_p3), %s2019_s12, 0 }
   0x8   : > { %v1890_v2 = vld [vmem:[%s2512_s1 + $0xc0] sm:$0xff] (!%p158_p3)   ;;  %1647 = vmatpush3.bf16.msra.mxu0 (!%p158_p3), %v1889_v1  ;;  %v1894_v6 = vld [vmem:[%s2512_s1 + $0xc8] sm:$0xff] (!%p158_p3)   ;;  %v1898_v10 = vld [vmem:[%s2512_s1 + $0xd0] sm:$0xff] (!%p158_p3)  }
   0x9   : > { %v1891_v3 = vld [vmem:[%s2512_s1 + $0x80] sm:$0xff] (!%p158_p3)   ;;  %1704 = vmatprep.subr.bf16.mxu1 (!%p158_p3), %v1890_v2  ;;  %1648 = vmatprep.subr.bf16.mxu0 (!%p158_p3), %v1892_v4  ;;  %v1895_v7 = vld [vmem:[%s2512_s1 + $0x88] sm:$0xff] (!%p158_p3)   ;;  %v1899_v11 = vld [vmem:[%s2512_s1 + $0x90] sm:$0xff] (!%p158_p3)  }
   0xa   : > { %1705 = vmatpush3.bf16.msra.mxu1 (!%p158_p3), %v1891_v3  ;;  %v1900_v12 = vld [vmem:[%s2512_s1 + $0x58] sm:$0xff] (!%p158_p3)   ;;  %v1904_v16 = vld [vmem:[%s2512_s1 + $0x60] sm:$0xff] (!%p158_p3)   ;;  %v1908_v20 = vld [vmem:[%s2512_s1 + $0x68] sm:$0xff] (!%p158_p3)  }
   0xb   : > { %1706 = vmatprep.subr.bf16.mxu1 (!%p158_p3), %v1894_v6  ;;  %v1901_v13 = vld [vmem:[%s2512_s1 + $0x18] sm:$0xff] (!%p158_p3)   ;;  %v1905_v17 = vld [vmem:[%s2512_s1 + $0x20] sm:$0xff] (!%p158_p3)   ;;  %v1909_v21 = vld [vmem:[%s2512_s1 + $0x28] sm:$0xff] (!%p158_p3)  }
   0xc   : > { %1649 = vmatpush3.bf16.msra.mxu0 (!%p158_p3), %v1893_v5  ;;  %v1902_v14 = vld [vmem:[%s2512_s1 + $0xd8] sm:$0xff] (!%p158_p3)   ;;  %v1906_v18 = vld [vmem:[%s2512_s1 + $0xe0] sm:$0xff] (!%p158_p3)   ;;  %v1910_v22 = vld [vmem:[%s2512_s1 + $0xe8] sm:$0xff] (!%p158_p3)  }
   0xd   : > { %1650 = vmatprep.subr.bf16.mxu0 (!%p158_p3), %v1896_v8  ;;  %v1903_v15 = vld [vmem:[%s2512_s1 + $0x98] sm:$0xff] (!%p158_p3)   ;;  %v1907_v19 = vld [vmem:[%s2512_s1 + $0xa0] sm:$0xff] (!%p158_p3)   ;;  %v1911_v23 = vld [vmem:[%s2512_s1 + $0xa8] sm:$0xff] (!%p158_p3)  }
   0xe   : > { %1707 = vmatpush3.bf16.msra.mxu1 %v1895_v7  ;;  %s188_s8 = scalar_select %p187_p4, %s2019_s12, 3  ;;  %v1912_v24 = vld [vmem:[%s2512_s1 + $0x70] sm:$0xff]   ;;  %v1916_v28 = vld [vmem:[%s2512_s1 + $0x78] sm:$0xff]   ;;  %v1923_v34 = vld [vmem:[%s2512_s1 + $0x140] sm:$0xff]  }
   0xf   : > { %1708 = vmatprep.subr.bf16.mxu1 %v1898_v10  ;;  %v1913_v25 = vld [vmem:[%s2512_s1 + $0x30] sm:$0xff]   ;;  %v1917_v29 = vld [vmem:[%s2512_s1 + $0x38] sm:$0xff]   ;;  %v1927_v37 = vld [vmem:[%s2512_s1 + $0x100] sm:$0xff]   ;;  %vm1288_vm2 = vcmask (!%p1613_p5), 523264  }
  0x10   : > { %1651 = vmatpush3.bf16.msra.mxu0 %v1897_v9  ;;  %s1861_s21 = smul.u32 364, %s188_s8  ;;  %v1914_v26 = vld [vmem:[%s2512_s1 + $0xf0] sm:$0xff]   ;;  %v1918_v30 = vld [vmem:[%s2512_s1 + $0xf8] sm:$0xff]   ;;  %v1928_v39 = vld [vmem:[%s2512_s1 + $0x180] sm:$0xff]  }
  0x11   : > { %1652 = vmatprep.subr.bf16.mxu0 %v1900_v12  ;;  %v1915_v27 = vld [vmem:[%s2512_s1 + $0xb0] sm:$0xff]   ;;  %v1922_v33 = vld [vmem:[%s2512_s1 + $0xb8] sm:$0xff]   ;;  %v1931_v41 = vld [vmem:[%s2512_s1 + $0x148] sm:$0xff]  }
  0x12   : > { %1709 = vmatpush3.bf16.msra.mxu1 %v1899_v11  ;;  %s2163_s5 = scalar_lea.vmem %s2511_s0, %s1861_s21  ;;  %v1933_v43 = vld [vmem:[%s2512_s1 + $0x108] sm:$0xff]   ;;  %v1937_v46 = vld [vmem:[%s2512_s1 + $0x150] sm:$0xff]   ;;  %v1945_v51 = vld [vmem:[%s2512_s1 + $0x158] sm:$0xff]  }
  0x13   : > { %1710 = vmatprep.subr.bf16.mxu1 %v1902_v14  ;;  %v1919_v31 = vld [vmem:[%s2163_s5] ss:$28 sps:$4 sm:$0xff]   ;;  %v1924_v35 = vld [vmem:[%s2163_s5 + $0x8] ss:$28 sps:$4 sm:$0xff]   ;;  %v1932_v42 = vld [vmem:[%s2163_s5 + $0x38] ss:$28 sps:$4 sm:$0xff]  }
  0x14   : > { %1653 = vmatpush3.bf16.msra.mxu0 %v1901_v13  ;;  %v1921_v32 = vld [vmem:[%s2163_s5 + $0x4] ss:$28 sps:$4 sm:$0xff]   ;;  %v1926_v36 = vld [vmem:[%s2163_s5 + $0xc] ss:$28 sps:$4 sm:$0xff]   ;;  %v1929_v40 = vld [vmem:[%s2163_s5 + $0x3c] ss:$28 sps:$4 sm:$0xff]  }
  0x15   : > { %1654 = vmatprep.subr.bf16.mxu0 %v1904_v16  ;;  %951 = vmatprep.mubr.bf16.mxu0 %v1921_v32  ;;  %v1934_v44 = vld [vmem:[%s2163_s5 + $0x44] ss:$28 sps:$4 sm:$0xff]   ;;  %v1938_v47 = vld [vmem:[%s2163_s5 + $0x74] ss:$28 sps:$4 sm:$0xff]   ;;  %v1942_v50 = vld [vmem:[%s2163_s5 + $0x7c] ss:$28 sps:$4 sm:$0xff]  }
  0x16   : > { %1711 = vmatpush3.bf16.msra.mxu1 %v1903_v15  ;;  %1039 = vmatprep.mubr.bf16.mxu1 %v1926_v36  ;;  %v1936_v45 = vld [vmem:[%s2163_s5 + $0x40] ss:$28 sps:$4 sm:$0xff]   ;;  %v1940_v48 = vld [vmem:[%s2512_s1 + $0x110] sm:$0xff]   ;;  %v1947_v53 = vld [vmem:[%s2163_s5 + $0xac] ss:$28 sps:$4 sm:$0xff]  }
  0x17   : > { %1712 = vmatprep.subr.bf16.mxu1 %v1906_v18  ;;  %v1941_v49 = vld [vmem:[%s2163_s5 + $0x70] ss:$28 sps:$4 sm:$0xff]   ;;  %v1946_v52 = vld [vmem:[%s2512_s1 + $0x118] sm:$0xff]   ;;  %v1953_v56 = vld [vmem:[%s2512_s1 + $0x160] sm:$0xff]  }
  0x18   : > { %1655 = vmatpush3.bf16.msra.mxu0 %v1905_v17  ;;  %v1944_v54 = vld [vmem:[%s2163_s5 + $0x78] ss:$28 sps:$4 sm:$0xff]   ;;  %v1954_v57 = vld [vmem:[%s2512_s1 + $0x120] sm:$0xff]   ;;  %v1952_v59 = vld [vmem:[%s2163_s5 + $0xb0] ss:$28 sps:$4 sm:$0xff]  }
  0x19   : > { %1656 = vmatprep.subr.bf16.mxu0 %v1908_v20  ;;  %v1950_v55 = vld [vmem:[%s2163_s5 + $0xb4] ss:$28 sps:$4 sm:$0xff]   ;;  %v1949_v58 = vld [vmem:[%s2163_s5 + $0xa8] ss:$28 sps:$4 sm:$0xff]   ;;  %v1957_v1 = vld [vmem:[%s2163_s5 + $0xe0] ss:$28 sps:$4 sm:$0xff]  }
  0x1a   : > { %1713 = vmatpush3.bf16.msra.mxu1 %v1907_v19  ;;  %v1955_v60 = vld [vmem:[%s2163_s5 + $0xe4] ss:$28 sps:$4 sm:$0xff]   ;;  %v1958_v61 = vld [vmem:[%s2163_s5 + $0xec] ss:$28 sps:$4 sm:$0xff]   ;;  %v1970_v2 = vld [vmem:[%s2512_s1 + $0x170] sm:$0xff]  }
  0x1b   : > { %1714 = vmatprep.subr.bf16.mxu1 %v1910_v22  ;;  %v1961_v62 = vld [vmem:[%s2512_s1 + $0x188] sm:$0xff]   ;;  %v1971_v3 = vld [vmem:[%s2512_s1 + $0x130] sm:$0xff]   ;;  %v1964_v5 = vld [vmem:[%s2163_s5 + $0x11c] ss:$28 sps:$4 sm:$0xff]  }
  0x1c   : > { %1657 = vmatpush3.bf16.msra.mxu0 %v1909_v21  ;;  %v1962_v63 = vld [vmem:[%s2512_s1 + $0x168] sm:$0xff]   ;;  %v1975_v6 = vld [vmem:[%s2512_s1 + $0x178] sm:$0xff]   ;;  %v1967_v8 = vld [vmem:[%s2163_s5 + $0x124] ss:$28 sps:$4 sm:$0xff]  }
  0x1d   : > { %1658 = vmatprep.subr.bf16.mxu0 %v1912_v24  ;;  %v1963_v0 = vld [vmem:[%s2512_s1 + $0x128] sm:$0xff]   ;;  %v1977_v7 = vld [vmem:[%s2512_s1 + $0x138] sm:$0xff]   ;;  %v252_v9 = vld [vmem:[%s2163_s5 + $0x150] sm:$0xff] }
  0x1e   : > { %1715 = vmatpush3.bf16.msra.mxu1 %v1911_v23  ;;  %v1960_v4 = vld [vmem:[%s2163_s5 + $0xe8] ss:$28 sps:$4 sm:$0xff]   ;;  %v1966_v10 = vld [vmem:[%s2163_s5 + $0x118] ss:$28 sps:$4 sm:$0xff]   ;;  %v1550_v11 = vcombine.high %v252_v9, %v252_v9  ;;  %v1969_v13 = vld [vmem:[%s2163_s5 + $0x120] ss:$28 sps:$4 sm:$0xff]   ;;  %v1549_v15 = vcombine.low %v252_v9, %v252_v9 }
  0x1f   : > { %1716 = vmatprep.subr.bf16.mxu1 %v1914_v26  ;;  %v253_v12 = vld [vmem:[%s2163_s5 + $0x158] sm:$0xff]  ;;  %v1980_v16 = vld [vmem:[%s2163_s5 + $0x14] ss:$28 sps:$4 sm:$0xff]   ;;  %v1982_v19 = vld [vmem:[%s2163_s5 + $0x4c] ss:$28 sps:$4 sm:$0xff]  }
  0x20   : > { %1659 = vmatpush3.bf16.msra.mxu0 %v1913_v25  ;;  %v1552_v14 = vcombine.high %v253_v12, %v253_v12  ;;  %v1551_v17 = vcombine.low %v253_v12, %v253_v12  ;;  %v1978_v18 = vld [vmem:[%s2163_s5 + $0x10] ss:$28 sps:$4 sm:$0xff]   ;;  %v1981_v20 = vld [vmem:[%s2163_s5 + $0x18] ss:$28 sps:$4 sm:$0xff]   ;;  %v1984_v21 = vld [vmem:[%s2163_s5 + $0x48] ss:$28 sps:$4 sm:$0xff]  }
  0x21   : > { %1660 = vmatprep.subr.bf16.mxu0 %v1916_v28  ;;  %v1986_v22 = vld [vmem:[%s2163_s5 + $0x84] ss:$28 sps:$4 sm:$0xff]   ;;  %v1985_v23 = vld [vmem:[%s2163_s5 + $0x50] ss:$28 sps:$4 sm:$0xff]   ;;  %v1990_v25 = vld [vmem:[%s2163_s5 + $0xbc] ss:$28 sps:$4 sm:$0xff]  }
  0x22   : > { %1717 = vmatpush3.bf16.msra.mxu1 %v1915_v27  ;;  %v1988_v24 = vld [vmem:[%s2163_s5 + $0x80] ss:$28 sps:$4 sm:$0xff]   ;;  %v1989_v26 = vld [vmem:[%s2163_s5 + $0x88] ss:$28 sps:$4 sm:$0xff]   ;;  %v1992_v27 = vld [vmem:[%s2163_s5 + $0xb8] ss:$28 sps:$4 sm:$0xff]  }
  0x23   : > { %1718 = vmatprep.subr.bf16.mxu1 %v1918_v30  ;;  %v1994_v28 = vld [vmem:[%s2163_s5 + $0xf4] ss:$28 sps:$4 sm:$0xff]  }
  0x24   : > { %1661 = vmatpush3.bf16.msra.mxu0 %v1917_v29  ;;  %v1993_v29 = vld [vmem:[%s2163_s5 + $0xc0] ss:$28 sps:$4 sm:$0xff]   ;;  %v1996_v30 = vld [vmem:[%s2163_s5 + $0xf0] ss:$28 sps:$4 sm:$0xff]   ;;  %v1997_v32 = vld [vmem:[%s2163_s5 + $0xf8] ss:$28 sps:$4 sm:$0xff]  }
  0x25   : > { %1762 = vmatprep.subr.bf16.mxu0 %v1923_v34  ;;  %v2000_v34 = vld [vmem:[%s2163_s5 + $0x128] ss:$28 sps:$4 sm:$0xff]   ;;  %v2001_v36 = vld [vmem:[%s2163_s5 + $0x130] ss:$28 sps:$4 sm:$0xff]  }
  0x26   : > { %1719 = vmatpush3.bf16.msra.mxu1 %v1922_v33  ;;  %v254_v33 = vld [vmem:[%s2163_s5 + $0x160] sm:$0xff] }
  0x27   : > { %952 = vmatmul.mubr.bf16.vlgmr.msra.gmra.mrb[0].mxu0 %v1919_v31  ;;  %1829 = vmatprep.subr.bf16.mxu1 %v2029_v38  ;;  %v1998_v31 = vld [vmem:[%s2163_s5 + $0x12c] ss:$28 sps:$4 sm:$0xff]  }
  0x28   : > { %1763 = vmatpush3.bf16.msra.mxu0 %v1927_v37  ;;  %959 = vmatprep.mubr.bf16.mxu0 %v1929_v40  ;;  %v1553_v37 = vcombine.low %v254_v33, %v254_v33 }
  0x29   : > { %1040 = vmatmul.mubr.bf16.vlgmr.msra.gmra.mrb[0].mxu1 %v1924_v35  ;;  %1764 = vmatprep.subr.bf16.mxu0 %v1931_v41  ;;  %v1554_v35 = vcombine.high %v254_v33, %v254_v33  ;;  %v2300_v41 = vld [vmem:[%s2513_s2] ss:$0 sm:$0xff] }
  0x2a   : > { %1830 = vmatpush3.bf16.msra.mxu1 %v1928_v39  ;;  %1047 = vmatprep.mubr.bf16.mxu1 %v1934_v44  ;;  %v2004_v39 = vld [vmem:[%s2163_s5 + $0x168] ss:$0 sps:$4 sm:$0xff]  }
  0x2b   : > { %1831 = vmatprep.subr.bf16.mxu1 %v2029_v38 }
  0x2c   : > { %1765 = vmatpush3.bf16.msra.mxu0 %v1933_v43 }
  0x2d   : > { %1766 = vmatprep.subr.bf16.mxu0 %v1937_v46 }
  0x2e   : > { %1832 = vmatpush3.bf16.msra.mxu1 %v1961_v62 }
  0x2f   : > { %960 = vmatmul.mubr.bf16.gmra.mrb[4].mxu0 %v1932_v42 }
  0x30   : > { %967 = vmatprep.mubr.bf16.mxu0 %v1938_v47  ;;  %1767 = vmatpush3.bf16.msra.mxu0 %v1940_v48 }
  0x31   : > { %1048 = vmatmul.mubr.bf16.gmra.mrb[4].mxu1 %v1936_v45  ;;  %1768 = vmatprep.subr.bf16.mxu0 %v1945_v51 }
  0x32   : > { %1055 = vmatprep.mubr.bf16.mxu1 %v1942_v50 }
  0x34   : > { %1769 = vmatpush3.bf16.msra.mxu0 %v1946_v52 }
  0x35   : > { %1770 = vmatprep.subr.bf16.mxu0 %v1953_v56 }
  0x37   : > { %968 = vmatmul.mubr.bf16.gmra.mrb[8].mxu0 %v1941_v49 }
  0x38   : > { %975 = vmatprep.mubr.bf16.mxu0 %v1947_v53  ;;  %1771 = vmatpush3.bf16.msra.mxu0 %v1954_v57 }
  0x39   : > { %1056 = vmatmul.mubr.bf16.gmra.mrb[8].mxu1 %v1944_v54  ;;  %1772 = vmatprep.subr.bf16.mxu0 %v1962_v63 }
  0x3a   : > { %1063 = vmatprep.mubr.bf16.mxu1 %v1950_v55 }
  0x3c   : > { %1773 = vmatpush3.bf16.msra.mxu0 %v1963_v0 }
  0x3d   : > { %1774 = vmatprep.subr.bf16.mxu0 %v1970_v2 }
  0x3f   : > { %976 = vmatmul.mubr.bf16.gmra.mrb[12].mxu0 %v1949_v58 }
  0x40   : > { %983 = vmatprep.mubr.bf16.mxu0 %v1955_v60  ;;  %1775 = vmatpush3.bf16.msra.mxu0 %v1971_v3 }
  0x41   : > { %1064 = vmatmul.mubr.bf16.gmra.mrb[12].mxu1 %v1952_v59  ;;  %1776 = vmatprep.subr.bf16.mxu0 %v1975_v6 }
  0x42   : > { %1071 = vmatprep.mubr.bf16.mxu1 %v1958_v61 }
  0x44   : > { %1777 = vmatpush3.bf16.msra.mxu0 %v1977_v7 }
  0x47   : > { %984 = vmatmul.mubr.bf16.gmra.mrb[16].mxu0 %v1957_v1 }
  0x48   : > { %991 = vmatprep.mubr.bf16.mxu0 %v1964_v5 }
  0x49   : > { %1072 = vmatmul.mubr.bf16.gmra.mrb[16].mxu1 %v1960_v4 }
  0x4a   : > { %1079 = vmatprep.mubr.bf16.mxu1 %v1967_v8 }
  0x4f   : > { %992 = vmatmul.mubr.bf16.gmra.mrb[20].mxu0 %v1966_v10 }
  0x50   : > { %999 = vmatprep.mubr.bf16.mxu0 %v1550_v11 }
  0x51   : > { %1080 = vmatmul.mubr.bf16.gmra.mrb[20].mxu1 %v1969_v13 }
  0x52   : > { %1087 = vmatprep.mubr.bf16.mxu1 %v1552_v14 }
  0x57   : > { %1000 = vmatmul.mubr.bf16.gmra.mrb[24].mxu0 %v1549_v15 }
  0x58   : > { %1127 = vmatprep.mubr.bf16.mxu0 %v1980_v16 }
  0x59   : > { %1088 = vmatmul.mubr.bf16.gmra.mrb[24].mxu1 %v1551_v17 }
  0x5a   : > { %1833 = vmatprep.mubr.msk.bf16.mxu1 %vm2030_vm0, %v2029_v38 }
  0x5f   : > { %1128 = vmatmul.mubr.bf16.vlgmr.msra.gmra.mrb[28].mxu0 %v1978_v18 }
  0x60   : > { %1135 = vmatprep.mubr.bf16.mxu0 %v1982_v19 }
  0x61   : > { %1834 = vmatmul.mubr.msk.bf16.vlgmr.msra.gmra.mrb[28].mxu1 %vm897_vm1, %v1981_v20 }
  0x62   : > { %1837 = vmatprep.mubr.msk.bf16.mxu1 %vm2030_vm0, %v2029_v38 }
  0x67   : > { %1136 = vmatmul.mubr.bf16.gmra.mrb[32].mxu0 %v1984_v21 }
  0x68   : > { %1143 = vmatprep.mubr.bf16.mxu0 %v1986_v22 }
  0x69   : > { %1838 = vmatmul.mubr.msk.bf16.gmra.mrb[32].mxu1 %vm897_vm1, %v1985_v23 }
  0x6a   : > { %1841 = vmatprep.mubr.msk.bf16.mxu1 %vm2030_vm0, %v2029_v38 }
  0x6f   : > { %1144 = vmatmul.mubr.bf16.gmra.mrb[36].mxu0 %v1988_v24 }
  0x70   : > { %1151 = vmatprep.mubr.bf16.mxu0 %v1990_v25 }
  0x71   : > { %1842 = vmatmul.mubr.msk.bf16.gmra.mrb[36].mxu1 %vm897_vm1, %v1989_v26 }
  0x72   : > { %1845 = vmatprep.mubr.msk.bf16.mxu1 %vm2030_vm0, %v2029_v38 }
  0x77   : > { %1152 = vmatmul.mubr.bf16.gmra.mrb[40].mxu0 %v1992_v27 }
  0x78   : > { %1159 = vmatprep.mubr.bf16.mxu0 %v1994_v28 }
  0x79   : > { %1846 = vmatmul.mubr.msk.bf16.gmra.mrb[40].mxu1 %vm897_vm1, %v1993_v29 }
  0x7a   : > { %1849 = vmatprep.mubr.msk.bf16.mxu1 %vm2030_vm0, %v2029_v38 }
  0x7f   : > { %1160 = vmatmul.mubr.bf16.gmra.mrb[44].mxu0 %v1996_v30 }
  0x80   : > { %1167 = vmatprep.mubr.bf16.mxu0 %v1998_v31 }
  0x81   : > { %1850 = vmatmul.mubr.msk.bf16.gmra.mrb[44].mxu1 %vm897_vm1, %v1997_v32 }
  0x82   : > { %1853 = vmatprep.mubr.msk.bf16.mxu1 %vm2030_vm0, %v2029_v38 }
  0x87   : > { %1168 = vmatmul.mubr.bf16.gmra.mrb[48].mxu0 %v2000_v34 }
  0x88   : > { %1175 = vmatprep.mubr.bf16.mxu0 %v1554_v35 }
  0x89   : > { %1854 = vmatmul.mubr.msk.bf16.gmra.mrb[48].mxu1 %vm897_vm1, %v2001_v36 }
  0x8a   : > { %1857 = vmatprep.mubr.msk.bf16.mxu1 %vm2030_vm0, %v2029_v38 }
  0x8f   : > { %1176 = vmatmul.mubr.bf16.gmra.mrb[52].mxu0 %v1553_v37 }
  0x91   : > { %1858 = vmatmul.mubr.msk.bf16.gmra.mrb[52].mxu1 %vm897_vm1, %v2004_v39 }
  0xfa   : > { %v1662_v40 = vpop.f32.mrb[0].mxu0 }
  0xfb   : > { %v1663_v42 = vpop.f32.mrb[1].mxu0 }
  0xfc   : > { %v1664_v43 = vadd.f32 %v1663_v42, %v1662_v40  ;;  %v1665_v44 = vpop.f32.mrb[2].mxu0  ;;  %v1720_v45 = vpop.f32.mrb[0].mxu1 }
  0xfd   : > { %v1666_v46 = vpop.f32.mrb[3].mxu0  ;;  %v1721_v49 = vpop.f32.mrb[1].mxu1 }
  0xfe   : > { %v954_v47 = vadd.f32 %v1664_v43, %v2300_v41  ;;  %v1667_v48 = vadd.f32 %v1666_v46, %v1665_v44  ;;  %v1722_v38 = vadd.f32 %v1721_v49, %v1720_v45  ;;  %v1723_v50 = vpop.f32.mrb[2].mxu1 }
  0xff   : > { %v1724_v52 = vpop.f32.mrb[3].mxu1 }
 0x100   : > { %v957_v51 = vadd.f32 %v1667_v48, %v2300_v41  ;;  %v2304_v53 = vadd.f32 %v1722_v38, %v954_v47  ;;  %v1725_v54 = vadd.f32 %v1724_v52, %v1723_v50 }
 0x102   : > { %v1668_v55 = vpop.f32.mrb[4].mxu0  ;;  %v2306_v56 = vadd.f32 %v1725_v54, %v957_v51 }
 0x103   : > { %v1669_v57 = vpop.f32.mrb[5].mxu0 }
 0x104   : > { %v1670_v58 = vadd.f32 %v1669_v57, %v1668_v55  ;;  %v1671_v59 = vpop.f32.mrb[6].mxu0  ;;  %v1726_v60 = vpop.f32.mrb[4].mxu1 }
 0x105   : > { %v1672_v61 = vpop.f32.mrb[7].mxu0  ;;  %v1727_v0 = vpop.f32.mrb[5].mxu1 }
 0x106   : > { %v962_v62 = vadd.f32 %v1670_v58, %v2300_v41  ;;  %v1673_v63 = vadd.f32 %v1672_v61, %v1671_v59  ;;  %v1728_v1 = vadd.f32 %v1727_v0, %v1726_v60  ;;  %v1729_v2 = vpop.f32.mrb[6].mxu1 }
 0x107   : > { %v1730_v4 = vpop.f32.mrb[7].mxu1 }
 0x108   : > { %v965_v3 = vadd.f32 %v1673_v63, %v2300_v41  ;;  %v2310_v5 = vadd.f32 %v1728_v1, %v962_v62  ;;  %v1731_v6 = vadd.f32 %v1730_v4, %v1729_v2 }
 0x10a   : > { %v1674_v7 = vpop.f32.mrb[8].mxu0  ;;  %v2312_v8 = vadd.f32 %v1731_v6, %v965_v3 }
 0x10b   : > { %v1675_v9 = vpop.f32.mrb[9].mxu0 }
 0x10c   : > { %v1676_v10 = vadd.f32 %v1675_v9, %v1674_v7  ;;  %v1677_v11 = vpop.f32.mrb[10].mxu0  ;;  %v1732_v12 = vpop.f32.mrb[8].mxu1 }
 0x10d   : > { %v1678_v13 = vpop.f32.mrb[11].mxu0  ;;  %v1733_v16 = vpop.f32.mrb[9].mxu1 }
 0x10e   : > { %v970_v14 = vadd.f32 %v1676_v10, %v2300_v41  ;;  %v1679_v15 = vadd.f32 %v1678_v13, %v1677_v11  ;;  %v1734_v17 = vadd.f32 %v1733_v16, %v1732_v12  ;;  %v1735_v18 = vpop.f32.mrb[10].mxu1 }
 0x10f   : > { %v1736_v20 = vpop.f32.mrb[11].mxu1 }
 0x110   : > { %v973_v19 = vadd.f32 %v1679_v15, %v2300_v41  ;;  %v2316_v21 = vadd.f32 %v1734_v17, %v970_v14  ;;  %v1737_v22 = vadd.f32 %v1736_v20, %v1735_v18 }
 0x112   : > { %v1680_v23 = vpop.f32.mrb[12].mxu0  ;;  %v2318_v24 = vadd.f32 %v1737_v22, %v973_v19 }
 0x113   : > { %v1681_v25 = vpop.f32.mrb[13].mxu0 }
 0x114   : > { %v1682_v26 = vadd.f32 %v1681_v25, %v1680_v23  ;;  %v1683_v27 = vpop.f32.mrb[14].mxu0  ;;  %v1738_v28 = vpop.f32.mrb[12].mxu1 }
 0x115   : > { %v1684_v29 = vpop.f32.mrb[15].mxu0  ;;  %v1739_v32 = vpop.f32.mrb[13].mxu1 }
 0x116   : > { %v978_v30 = vadd.f32 %v1682_v26, %v2300_v41  ;;  %v1685_v31 = vadd.f32 %v1684_v29, %v1683_v27  ;;  %v1740_v33 = vadd.f32 %v1739_v32, %v1738_v28  ;;  %v1741_v34 = vpop.f32.mrb[14].mxu1 }
 0x117   : > { %v1742_v36 = vpop.f32.mrb[15].mxu1 }
 0x118   : > { %v981_v35 = vadd.f32 %v1685_v31, %v2300_v41  ;;  %v2322_v37 = vadd.f32 %v1740_v33, %v978_v30  ;;  %v1743_v39 = vadd.f32 %v1742_v36, %v1741_v34 }
 0x11a   : > { %v1686_v40 = vpop.f32.mrb[16].mxu0  ;;  %v2324_v42 = vadd.f32 %v1743_v39, %v981_v35 }
 0x11b   : > { %v1687_v43 = vpop.f32.mrb[17].mxu0 }
 0x11c   : > { %v1688_v44 = vadd.f32 %v1687_v43, %v1686_v40  ;;  %v1689_v45 = vpop.f32.mrb[18].mxu0  ;;  %v1744_v46 = vpop.f32.mrb[16].mxu1 }
 0x11d   : > { %v1690_v47 = vpop.f32.mrb[19].mxu0  ;;  %v1745_v38 = vpop.f32.mrb[17].mxu1 }
 0x11e   : > { %v986_v48 = vadd.f32 %v1688_v44, %v2300_v41  ;;  %v1691_v49 = vadd.f32 %v1690_v47, %v1689_v45  ;;  %v1746_v50 = vadd.f32 %v1745_v38, %v1744_v46  ;;  %v1747_v51 = vpop.f32.mrb[18].mxu1 }
 0x11f   : > { %v1748_v54 = vpop.f32.mrb[19].mxu1 }
 0x120   : > { %v989_v52 = vadd.f32 %v1691_v49, %v2300_v41  ;;  %v2328_v55 = vadd.f32 %v1746_v50, %v986_v48  ;;  %v1749_v57 = vadd.f32 %v1748_v54, %v1747_v51 }
 0x122   : > { %v1692_v58 = vpop.f32.mrb[20].mxu0  ;;  %v2330_v59 = vadd.f32 %v1749_v57, %v989_v52 }
 0x123   : > { %v1693_v60 = vpop.f32.mrb[21].mxu0 }
 0x124   : > { %v1694_v61 = vadd.f32 %v1693_v60, %v1692_v58  ;;  %v1695_v62 = vpop.f32.mrb[22].mxu0  ;;  %v1750_v63 = vpop.f32.mrb[20].mxu1 }
 0x125   : > { %v1696_v0 = vpop.f32.mrb[23].mxu0  ;;  %v1751_v3 = vpop.f32.mrb[21].mxu1 }
 0x126   : > { %v994_v1 = vadd.f32 %v1694_v61, %v2300_v41  ;;  %v1697_v2 = vadd.f32 %v1696_v0, %v1695_v62  ;;  %v1752_v4 = vadd.f32 %v1751_v3, %v1750_v63  ;;  %v1753_v6 = vpop.f32.mrb[22].mxu1 }
 0x127   : > { %v1754_v9 = vpop.f32.mrb[23].mxu1 }
 0x128   : > { %v997_v7 = vadd.f32 %v1697_v2, %v2300_v41  ;;  %v2334_v10 = vadd.f32 %v1752_v4, %v994_v1  ;;  %v1755_v11 = vadd.f32 %v1754_v9, %v1753_v6 }
 0x12a   : > { %v1698_v12 = vpop.f32.mrb[24].mxu0  ;;  %v2336_v13 = vadd.f32 %v1755_v11, %v997_v7 }
 0x12b   : > { %v1699_v14 = vpop.f32.mrb[25].mxu0 }
 0x12c   : > { %v1700_v15 = vadd.f32 %v1699_v14, %v1698_v12  ;;  %v1701_v16 = vpop.f32.mrb[26].mxu0  ;;  %v1756_v17 = vpop.f32.mrb[24].mxu1 }
 0x12d   : > { %v1702_v18 = vpop.f32.mrb[27].mxu0  ;;  %v1757_v20 = vpop.f32.mrb[25].mxu1 }
 0x12e   : > { %v1002_v19 = vadd.f32 %v1700_v15, %v2300_v41  ;;  %v1758_v22 = vadd.f32 %v1757_v20, %v1756_v17  ;;  %v1759_v23 = vpop.f32.mrb[26].mxu1 }
 0x12f   : > { %v1760_v25 = vpop.f32.mrb[27].mxu1 }
 0x130   : > { %v2339_v26 = vadd.f32 %v1758_v22, %v1002_v19 }
 0x132   : > { %v1778_v27 = vpop.f32.mrb[28].mxu0 }
 0x133   : > { %v1779_v28 = vpop.f32.mrb[29].mxu0 }
 0x134   : > { %v1780_v29 = vadd.f32 %v1779_v28, %v1778_v27  ;;  %v1781_v30 = vpop.f32.mrb[30].mxu0  ;;  %v1217_v32 = vpop.f32.mrb[28].mxu1 }
 0x135   : > { %v1782_v31 = vpop.f32.mrb[31].mxu0  ;;  %v1835_v35 = vpop.f32.mrb[29].mxu1 }
 0x136   : > { %v1783_v33 = vadd.f32 %v1782_v31, %v1781_v30  ;;  %v1130_v34 = vadd.f32 %v1780_v29, %v2304_v53  ;;  %v1220_v36 = vpop.f32.mrb[30].mxu1 }
 0x137   : > { %v1836_v40 = vpop.f32.mrb[31].mxu1 }
 0x138   : > { %v2342_v39 = vadd.f32 %v1217_v32, %v1130_v34  ;;  %v1133_v41 = vadd.f32 %v1783_v33, %v2306_v56 }
 0x13a   : > { %v1271_v43 = vmax.f32 %v2342_v39, 0.0  ;;  %v2346_v44 = vadd.f32 %v1220_v36, %v1133_v41  ;;  %v1784_v45 = vpop.f32.mrb[32].mxu0 }
 0x13b   : > { %v1785_v46 = vpop.f32.mrb[33].mxu0 }
 0x13c   : > { %v1272_v47 = vmax.f32 %v2346_v44, 0.0  ;;  %v1786_v48 = vadd.f32 %v1785_v46, %v1784_v45  ;;  %v1787_v49 = vpop.f32.mrb[34].mxu0  ;;  %v1225_v50 = vpop.f32.mrb[32].mxu1  ;;  %1289 = vst.msk [vmem:[#allocation2] sm:$0xff] (!%p1613_p5), %vm1288_vm2, %v1271_v43 }
 0x13d   : > { %v1788_v38 = vpop.f32.mrb[35].mxu0  ;;  %v1839_v52 = vpop.f32.mrb[33].mxu1 }
 0x13e   : > { %v1789_v53 = vadd.f32 %v1788_v38, %v1787_v49  ;;  %v1138_v51 = vadd.f32 %v1786_v48, %v2310_v5  ;;  %v1228_v54 = vpop.f32.mrb[34].mxu1  ;;  %1290 = vst.msk [vmem:[#allocation2 + $0x8] sm:$0xff] (!%p1613_p5), %vm1288_vm2, %v1272_v47 }
 0x13f   : > { %v1840_v58 = vpop.f32.mrb[35].mxu1 }
 0x140   : > { %v2350_v57 = vadd.f32 %v1225_v50, %v1138_v51  ;;  %v1141_v56 = vadd.f32 %v1789_v53, %v2312_v8 }
 0x142   : > { %v1273_v60 = vmax.f32 %v2350_v57, 0.0  ;;  %v2354_v61 = vadd.f32 %v1228_v54, %v1141_v56  ;;  %v1790_v62 = vpop.f32.mrb[36].mxu0 }
 0x143   : > { %v1791_v63 = vpop.f32.mrb[37].mxu0 }
 0x144   : > { %v1274_v0 = vmax.f32 %v2354_v61, 0.0  ;;  %v1792_v1 = vadd.f32 %v1791_v63, %v1790_v62  ;;  %v1793_v2 = vpop.f32.mrb[38].mxu0  ;;  %v1233_v4 = vpop.f32.mrb[36].mxu1  ;;  %1291 = vst.msk [vmem:[#allocation2 + $0x10] sm:$0xff] (!%p1613_p5), %vm1288_vm2, %v1273_v60 }
 0x145   : > { %v1794_v3 = vpop.f32.mrb[39].mxu0  ;;  %v1843_v7 = vpop.f32.mrb[37].mxu1 }
 0x146   : > { %v1795_v5 = vadd.f32 %v1794_v3, %v1793_v2  ;;  %v1146_v6 = vadd.f32 %v1792_v1, %v2316_v21  ;;  %v1236_v9 = vpop.f32.mrb[38].mxu1  ;;  %1292 = vst.msk [vmem:[#allocation2 + $0x18] sm:$0xff] (!%p1613_p5), %vm1288_vm2, %v1274_v0 }
 0x147   : > { %v1844_v12 = vpop.f32.mrb[39].mxu1 }
 0x148   : > { %v2358_v11 = vadd.f32 %v1233_v4, %v1146_v6  ;;  %v1149_v8 = vadd.f32 %v1795_v5, %v2318_v24 }
 0x14a   : > { %v1275_v14 = vmax.f32 %v2358_v11, 0.0  ;;  %v2362_v15 = vadd.f32 %v1236_v9, %v1149_v8  ;;  %v1796_v16 = vpop.f32.mrb[40].mxu0 }
 0x14b   : > { %v1797_v17 = vpop.f32.mrb[41].mxu0 }
 0x14c   : > { %v1276_v18 = vmax.f32 %v2362_v15, 0.0  ;;  %v1798_v19 = vadd.f32 %v1797_v17, %v1796_v16  ;;  %v1799_v20 = vpop.f32.mrb[42].mxu0  ;;  %v1241_v23 = vpop.f32.mrb[40].mxu1  ;;  %1293 = vst.msk [vmem:[#allocation2 + $0x20] sm:$0xff] (!%p1613_p5), %vm1288_vm2, %v1275_v14 }
 0x14d   : > { %v1800_v22 = vpop.f32.mrb[43].mxu0  ;;  %v1847_v27 = vpop.f32.mrb[41].mxu1 }
 0x14e   : > { %v1801_v21 = vadd.f32 %v1800_v22, %v1799_v20  ;;  %v1154_v25 = vadd.f32 %v1798_v19, %v2322_v37  ;;  %v1244_v28 = vpop.f32.mrb[42].mxu1  ;;  %1294 = vst.msk [vmem:[#allocation2 + $0x28] sm:$0xff] (!%p1613_p5), %vm1288_vm2, %v1276_v18 }
 0x14f   : > { %v1848_v30 = vpop.f32.mrb[43].mxu1 }
 0x150   : > { %v2366_v29 = vadd.f32 %v1241_v23, %v1154_v25  ;;  %v1157_v24 = vadd.f32 %v1801_v21, %v2324_v42 }
 0x152   : > { %v1277_v31 = vmax.f32 %v2366_v29, 0.0  ;;  %v2370_v32 = vadd.f32 %v1244_v28, %v1157_v24  ;;  %v1802_v33 = vpop.f32.mrb[44].mxu0 }
 0x153   : > { %v1803_v34 = vpop.f32.mrb[45].mxu0 }
 0x154   : > { %v1278_v35 = vmax.f32 %v2370_v32, 0.0  ;;  %v1804_v36 = vadd.f32 %v1803_v34, %v1802_v33  ;;  %v1805_v41 = vpop.f32.mrb[46].mxu0  ;;  %v1249_v45 = vpop.f32.mrb[44].mxu1  ;;  %1295 = vst.msk [vmem:[#allocation2 + $0x30] sm:$0xff] (!%p1613_p5), %vm1288_vm2, %v1277_v31 }
 0x155   : > { %v1806_v40 = vpop.f32.mrb[47].mxu0  ;;  %v1851_v48 = vpop.f32.mrb[45].mxu1 }
 0x156   : > { %v1807_v37 = vadd.f32 %v1806_v40, %v1805_v41  ;;  %v1162_v46 = vadd.f32 %v1804_v36, %v2328_v55  ;;  %v1252_v49 = vpop.f32.mrb[46].mxu1  ;;  %1296 = vst.msk [vmem:[#allocation2 + $0x38] sm:$0xff] (!%p1613_p5), %vm1288_vm2, %v1278_v35 }
 0x157   : > { %v1852_v50 = vpop.f32.mrb[47].mxu1 }
 0x158   : > { %v2374_v38 = vadd.f32 %v1249_v45, %v1162_v46  ;;  %v1165_v42 = vadd.f32 %v1807_v37, %v2330_v59 }
 0x15a   : > { %v1279_v53 = vmax.f32 %v2374_v38, 0.0  ;;  %v2378_v51 = vadd.f32 %v1252_v49, %v1165_v42  ;;  %v1808_v52 = vpop.f32.mrb[48].mxu0 }
 0x15b   : > { %v1809_v54 = vpop.f32.mrb[49].mxu0 }
 0x15c   : > { %v1280_v56 = vmax.f32 %v2378_v51, 0.0  ;;  %v1810_v58 = vadd.f32 %v1809_v54, %v1808_v52  ;;  %v1811_v62 = vpop.f32.mrb[50].mxu0  ;;  %v1257_v1 = vpop.f32.mrb[48].mxu1  ;;  %1297 = vst.msk [vmem:[#allocation2 + $0x40] sm:$0xff] (!%p1613_p5), %vm1288_vm2, %v1279_v53 }
 0x15d   : > { %v1812_v63 = vpop.f32.mrb[51].mxu0  ;;  %v1855_v3 = vpop.f32.mrb[49].mxu1 }
 0x15e   : > { %v1813_v55 = vadd.f32 %v1812_v63, %v1811_v62  ;;  %v1170_v2 = vadd.f32 %v1810_v58, %v2334_v10  ;;  %v1260_v4 = vpop.f32.mrb[50].mxu1  ;;  %1298 = vst.msk [vmem:[#allocation2 + $0x48] sm:$0xff] (!%p1613_p5), %vm1288_vm2, %v1280_v56 }
 0x15f   : > { %v1856_v6 = vpop.f32.mrb[51].mxu1 }
 0x160   : > { %v2382_v5 = vadd.f32 %v1257_v1, %v1170_v2  ;;  %v1173_v59 = vadd.f32 %v1813_v55, %v2336_v13 }
 0x162   : > { %v1281_v7 = vmax.f32 %v2382_v5, 0.0  ;;  %v2386_v9 = vadd.f32 %v1260_v4, %v1173_v59  ;;  %v1814_v8 = vpop.f32.mrb[52].mxu0 }
 0x163   : > { %v1815_v12 = vpop.f32.mrb[53].mxu0 }
 0x164   : > { %v1282_v16 = vmax.f32 %v2386_v9, 0.0  ;;  %v1816_v17 = vadd.f32 %v1815_v12, %v1814_v8  ;;  %v1817_v19 = vpop.f32.mrb[54].mxu0  ;;  %v1265_v22 = vpop.f32.mrb[52].mxu1  ;;  %1287 = sbr.rel (%p1613_p5) target bundleno = 365 (0x16d), region = 36  ;;  %1299 = vst.msk [vmem:[#allocation2 + $0x50] sm:$0xff] (!%p1613_p5), %vm1288_vm2, %v1281_v7 }
 0x165   : > { %v1818_v20 = vpop.f32.mrb[55].mxu0  ;;  %v1859_v23 = vpop.f32.mrb[53].mxu1 }
 0x166   : > { %v1178_v10 = vadd.f32 %v1816_v17, %v2339_v26  ;;  %v1268_v21 = vpop.f32.mrb[54].mxu1  ;;  %1300 = vst.msk [vmem:[#allocation2 + $0x58] sm:$0xff] (!%p1613_p5), %vm1288_vm2, %v1282_v16 }
 0x167   : > { %v1860_v27 = vpop.f32.mrb[55].mxu1 }
 0x168   : > { %v1266_v25 = vadd.f32 %v1265_v22, %v1178_v10 }
 0x16a   : > { %v1283_v13 = vmax.f32 %v1266_v25, 0.0 }
 0x16c   : > { %1301 = vst.msk [vmem:[#allocation2 + $0x60] sm:$0xff] %vm1288_vm2, %v1283_v13 }
 0x16d PF: > { %p1614_p6 = scmp.le.s32.totalorder %s2019_s12, 0 }
 0x16e   : > { %v1306_v26 = vld [vmem:[#allocation2] sm:$0xff] (!%p1614_p6)  ;;  %vm1332_vm3 = vcmask (!%p1614_p6), 523264   ;;  %v1307_v28 = vld [vmem:[#allocation2 + $0x8] sm:$0xff] (!%p1614_p6)  ;;  %v1308_v24 = vld [vmem:[#allocation2 + $0x10] sm:$0xff] (!%p1614_p6) }
 0x16f   : > { %1305 = sbr.rel (%p1614_p6) target bundleno = 376 (0x178), region = 40  ;;  %v1319_v30 = vmax.f32 (!%p1614_p6), %v1306_v26, %v1271_v43  ;;  %v1320_v33 = vmax.f32 (!%p1614_p6), %v1307_v28, %v1272_v47  ;;  %v1321_v34 = vmax.f32 (!%p1614_p6), %v1308_v24, %v1273_v60  ;;  %v1309_v36 = vld [vmem:[#allocation2 + $0x18] sm:$0xff] (!%p1614_p6)  ;;  %v1310_v41 = vld [vmem:[#allocation2 + $0x20] sm:$0xff] (!%p1614_p6)  ;;  %v1311_v40 = vld [vmem:[#allocation2 + $0x28] sm:$0xff] (!%p1614_p6) }
 0x170   : > { %v1322_v45 = vmax.f32 (!%p1614_p6), %v1309_v36, %v1274_v0  ;;  %v1323_v37 = vmax.f32 (!%p1614_p6), %v1310_v41, %v1275_v14  ;;  %v1324_v46 = vmax.f32 (!%p1614_p6), %v1311_v40, %v1276_v18  ;;  %v1312_v39 = vld [vmem:[#allocation2 + $0x30] sm:$0xff] (!%p1614_p6)  ;;  %v1313_v43 = vld [vmem:[#allocation2 + $0x38] sm:$0xff] (!%p1614_p6)  ;;  %v1314_v48 = vld [vmem:[#allocation2 + $0x40] sm:$0xff] (!%p1614_p6) }
 0x171   : > { %1333 = vst.msk [vmem:[#allocation2] sm:$0xff] (!%p1614_p6), %vm1332_vm3, %v1319_v30  ;;  %1334 = vst.msk [vmem:[#allocation2 + $0x8] sm:$0xff] (!%p1614_p6), %vm1332_vm3, %v1320_v33  ;;  %v1325_v44 = vmax.f32 (!%p1614_p6), %v1312_v39, %v1277_v31  ;;  %v1326_v47 = vmax.f32 (!%p1614_p6), %v1313_v43, %v1278_v35  ;;  %v1327_v57 = vmax.f32 (!%p1614_p6), %v1314_v48, %v1279_v53  ;;  %v1315_v60 = vld [vmem:[#allocation2 + $0x48] sm:$0xff] (!%p1614_p6)  ;;  %v1316_v61 = vld [vmem:[#allocation2 + $0x50] sm:$0xff] (!%p1614_p6) }
 0x172   : > { %1335 = vst.msk [vmem:[#allocation2 + $0x10] sm:$0xff] (!%p1614_p6), %vm1332_vm3, %v1321_v34  ;;  %v1317_v0 = vld [vmem:[#allocation2 + $0x58] sm:$0xff] (!%p1614_p6)  ;;  %1336 = vst.msk [vmem:[#allocation2 + $0x18] sm:$0xff] (!%p1614_p6), %vm1332_vm3, %v1322_v45  ;;  %v1328_v11 = vmax.f32 (!%p1614_p6), %v1315_v60, %v1280_v56  ;;  %v1329_v14 = vmax.f32 (!%p1614_p6), %v1316_v61, %v1281_v7 }
 0x173   : > { %1337 = vst.msk [vmem:[#allocation2 + $0x20] sm:$0xff] (!%p1614_p6), %vm1332_vm3, %v1323_v37  ;;  %1338 = vst.msk [vmem:[#allocation2 + $0x28] sm:$0xff] (!%p1614_p6), %vm1332_vm3, %v1324_v46  ;;  %v1330_v15 = vmax.f32 (!%p1614_p6), %v1317_v0, %v1282_v16  ;;  %v1318_v18 = vld [vmem:[#allocation2 + $0x60] sm:$0xff] (!%p1614_p6) }
 0x174   : > { %1339 = vst.msk [vmem:[#allocation2 + $0x30] sm:$0xff] (!%p1614_p6), %vm1332_vm3, %v1325_v44  ;;  %1340 = vst.msk [vmem:[#allocation2 + $0x38] sm:$0xff] (!%p1614_p6), %vm1332_vm3, %v1326_v47  ;;  %v1331_v29 = vmax.f32 (!%p1614_p6), %v1318_v18, %v1283_v13 }
 0x175   : > { %1341 = vst.msk [vmem:[#allocation2 + $0x40] sm:$0xff] (!%p1614_p6), %vm1332_vm3, %v1327_v57  ;;  %1342 = vst.msk [vmem:[#allocation2 + $0x48] sm:$0xff] (!%p1614_p6), %vm1332_vm3, %v1328_v11 }
 0x176   : > { %1343 = vst.msk [vmem:[#allocation2 + $0x50] sm:$0xff] %vm1332_vm3, %v1329_v14  ;;  %1344 = vst.msk [vmem:[#allocation2 + $0x58] sm:$0xff] %vm1332_vm3, %v1330_v15 }
 0x177   : > { %1345 = vst.msk [vmem:[#allocation2 + $0x60] sm:$0xff] %vm1332_vm3, %v1331_v29 }
 0x178 PF: > { %p1615_p7 = scmp.ne.s32.totalorder %s2019_s12, 3 }
 0x179   : > { %vm1416_vm4 = vcmask (!%p1615_p7), 519168  }
 0x17a   : > { %1349 = sbr.rel (%p1615_p7) target bundleno = 388 (0x184), region = 44  ;;  %v1350_v31 = vld [vmem:[#allocation2] sm:$0xff] (!%p1615_p7)  ;;  %v1351_v32 = vld [vmem:[#allocation2 + $0x8] sm:$0xff] (!%p1615_p7) }
 0x17b   : > { %v1352_v35 = vld [vmem:[#allocation2 + $0x10] sm:$0xff] (!%p1615_p7)  ;;  %v1633_v49 = vpack.c.bf16 (!%p1615_p7), %v1350_v31, %v1350_v31  ;;  %v1634_v38 = vpack.c.bf16 (!%p1615_p7), %v1351_v32, %v1351_v32  ;;  %v1353_v50 = vld [vmem:[#allocation2 + $0x18] sm:$0xff] (!%p1615_p7) }
 0x17c   : > { %v1635_v42 = vpack.c.bf16 (!%p1615_p7), %v1352_v35, %v1352_v35  ;;  %v1354_v53 = vld [vmem:[#allocation2 + $0x20] sm:$0xff] (!%p1615_p7)  ;;  %v1355_v51 = vld [vmem:[#allocation2 + $0x28] sm:$0xff] (!%p1615_p7)  ;;  %v1636_v52 = vpack.c.bf16 (!%p1615_p7), %v1353_v50, %v1353_v50 }
 0x17d   : > { %v1637_v54 = vpack.c.bf16 (!%p1615_p7), %v1354_v53, %v1354_v53  ;;  %v1638_v56 = vpack.c.bf16 (!%p1615_p7), %v1355_v51, %v1355_v51  ;;  %v1356_v58 = vld [vmem:[#allocation2 + $0x30] sm:$0xff] (!%p1615_p7)  ;;  %v1357_v62 = vld [vmem:[#allocation2 + $0x38] sm:$0xff] (!%p1615_p7)  ;;  %1417 = vst.msk [vmem:[%s2514_s3] sm:$0xf] (!%p1615_p7), %vm1416_vm4, %v1633_v49  ;;  %1418 = vst.msk [vmem:[%s2514_s3 + $0x4] sm:$0xf] (!%p1615_p7), %vm1416_vm4, %v1634_v38 }
 0x17e   : > { %v1358_v63 = vld [vmem:[#allocation2 + $0x40] sm:$0xff] (!%p1615_p7)  ;;  %1419 = vst.msk [vmem:[%s2514_s3 + $0x8] sm:$0xf] (!%p1615_p7), %vm1416_vm4, %v1635_v42  ;;  %v1639_v1 = vpack.c.bf16 (!%p1615_p7), %v1356_v58, %v1356_v58  ;;  %v1640_v55 = vpack.c.bf16 (!%p1615_p7), %v1357_v62, %v1357_v62  ;;  %v1359_v3 = vld [vmem:[#allocation2 + $0x48] sm:$0xff] (!%p1615_p7)  ;;  %1420 = vst.msk [vmem:[%s2514_s3 + $0xc] sm:$0xf] (!%p1615_p7), %vm1416_vm4, %v1636_v52 }
 0x17f   : > { %v1641_v2 = vpack.c.bf16 (!%p1615_p7), %v1358_v63, %v1358_v63  ;;  %v1360_v4 = vld [vmem:[#allocation2 + $0x50] sm:$0xff] (!%p1615_p7)  ;;  %v1361_v5 = vld [vmem:[#allocation2 + $0x58] sm:$0xff] (!%p1615_p7)  ;;  %1421 = vst.msk [vmem:[%s2514_s3 + $0x10] sm:$0xf] (!%p1615_p7), %vm1416_vm4, %v1637_v54  ;;  %1422 = vst.msk [vmem:[%s2514_s3 + $0x14] sm:$0xf] (!%p1615_p7), %vm1416_vm4, %v1638_v56  ;;  %v1642_v59 = vpack.c.bf16 (!%p1615_p7), %v1359_v3, %v1359_v3 }
 0x180   : > { %v1643_v6 = vpack.c.bf16 (!%p1615_p7), %v1360_v4, %v1360_v4  ;;  %v1644_v7 = vpack.c.bf16 (!%p1615_p7), %v1361_v5, %v1361_v5  ;;  %v1362_v9 = vld [vmem:[#allocation2 + $0x60] sm:$0xff] (!%p1615_p7)  ;;  %1423 = vst.msk [vmem:[%s2514_s3 + $0x18] sm:$0xf] (!%p1615_p7), %vm1416_vm4, %v1639_v1  ;;  %1424 = vst.msk [vmem:[%s2514_s3 + $0x1c] sm:$0xf] (!%p1615_p7), %vm1416_vm4, %v1640_v55 }
 0x181   : > { %1425 = vst.msk [vmem:[%s2514_s3 + $0x20] sm:$0xf] %vm1416_vm4, %v1641_v2  ;;  %v1645_v8 = vpack.c.bf16 %v1362_v9, %v1362_v9  ;;  %1426 = vst.msk [vmem:[%s2514_s3 + $0x24] sm:$0xf] %vm1416_vm4, %v1642_v59 }
 0x182   : > { %1427 = vst.msk [vmem:[%s2514_s3 + $0x28] sm:$0xf] %vm1416_vm4, %v1643_v6  ;;  %1428 = vst.msk [vmem:[%s2514_s3 + $0x2c] sm:$0xf] %vm1416_vm4, %v1644_v7 }
 0x183   : > { %1429 = vst.msk [vmem:[%s2514_s3 + $0x30] sm:$0xf] %vm1416_vm4, %v1645_v8 }
 0x184 PF: > { %s13_s14 = sadd.s32 1, %s2027_s14   ;;  %s2515_s12 = smov %s2023_s13 }
 0x185   : > { %p10_p8 = scmp.ge.s32.totalorder %s13_s14, 6   ;;  %s2516_s13 = smov %s2518_s15 }
 0x187   :  { %12 = sbr.rel (!%p10_p8) target bundleno = 2 (0x2), region = 74 }

// kernel: forward.7
= control target key start
LH: loop header
LB: loop body
LE: loop exit
PB: predicated region body
PF: predicated region fallthrough
CT: control target
= control target key end

     0   :  { %v157_v28 = vlaneseq  ;;  %v1037_v36 = vmov 1966171168   ;;  %s1285_s0 = inlined_call_operand.vmem [shape: bf16[2,1024], index: 0, kind: input, shape index: {}]   ;;  %s1286_s1 = inlined_call_operand.vmem [shape: bf16[1024,10], index: 1, kind: input, shape index: {}]   ;;  %s1287_s2 = inlined_call_operand.vmem [shape: f32[1,10], index: 2, kind: input, shape index: {}]   ;;  %s1288_s3 = inlined_call_operand.hbm [shape: f32[2,10], index: 3, kind: output, shape index: {}]  }
   0x1   :  { %v944_v0 = vld [vmem:[%s1286_s1 + $0x40] sm:$0xff]   ;;  %v948_v4 = vld [vmem:[%s1286_s1 + $0x48] sm:$0xff]   ;;  %v952_v8 = vld [vmem:[%s1286_s1 + $0x50] sm:$0xff]   ;;  %v155_v37 = vunpack.c.l.s4 %v1037_v36 }
   0x2   :  { %v945_v1 = vld [vmem:[%s1286_s1 + $0xc0] sm:$0xff]   ;;  %854 = vmatprep.subr.bf16.mxu0 %v944_v0  ;;  %v949_v5 = vld [vmem:[%s1286_s1 + $0xc8] sm:$0xff]   ;;  %v953_v9 = vld [vmem:[%s1286_s1 + $0xd0] sm:$0xff]   ;;  %v158_v33 = vshrl.u32 %v157_v28, 7 }
   0x3   :  { %v946_v2 = vld [vmem:[%s1286_s1] sm:$0xff]   ;;  %876 = vmatprep.subr.bf16.mxu1 %v945_v1  ;;  %v950_v6 = vld [vmem:[%s1286_s1 + $0x8] sm:$0xff]   ;;  %v954_v10 = vld [vmem:[%s1286_s1 + $0x10] sm:$0xff]   ;;  %v156_v40 = vunpack.c.0.s8 %v155_v37 }
   0x4   :  { %v947_v3 = vld [vmem:[%s1286_s1 + $0x80] sm:$0xff]   ;;  %855 = vmatpush3.bf16.msra.mxu0 %v946_v2  ;;  %v951_v7 = vld [vmem:[%s1286_s1 + $0x88] sm:$0xff]   ;;  %v955_v11 = vld [vmem:[%s1286_s1 + $0x90] sm:$0xff]  }
   0x5   :  { %877 = vmatpush3.bf16.msra.mxu1 %v947_v3  ;;  %856 = vmatprep.subr.bf16.mxu0 %v948_v4  ;;  %v956_v12 = vld [vmem:[%s1286_s1 + $0x58] sm:$0xff]   ;;  %v960_v16 = vld [vmem:[%s1286_s1 + $0x60] sm:$0xff]   ;;  %v964_v20 = vld [vmem:[%s1286_s1 + $0x68] sm:$0xff]   ;;  %v1164_v41 = vsub.s32 %v156_v40, %v158_v33 }
   0x6   :  { %878 = vmatprep.subr.bf16.mxu1 %v949_v5  ;;  %v957_v13 = vld [vmem:[%s1286_s1 + $0xd8] sm:$0xff]   ;;  %v961_v17 = vld [vmem:[%s1286_s1 + $0xe0] sm:$0xff]   ;;  %v965_v21 = vld [vmem:[%s1286_s1 + $0xe8] sm:$0xff]  }
   0x7   :  { %v958_v14 = vld [vmem:[%s1286_s1 + $0x18] sm:$0xff]   ;;  %v962_v18 = vld [vmem:[%s1286_s1 + $0x20] sm:$0xff]   ;;  %v966_v22 = vld [vmem:[%s1286_s1 + $0x28] sm:$0xff]  }
   0x8   :  { %857 = vmatpush3.bf16.msra.mxu0 %v950_v6  ;;  %v959_v15 = vld [vmem:[%s1286_s1 + $0x98] sm:$0xff]   ;;  %v963_v19 = vld [vmem:[%s1286_s1 + $0xa0] sm:$0xff]   ;;  %v967_v23 = vld [vmem:[%s1286_s1 + $0xa8] sm:$0xff]  }
   0x9   :  { %879 = vmatpush3.bf16.msra.mxu1 %v951_v7  ;;  %858 = vmatprep.subr.bf16.mxu0 %v952_v8  ;;  %v968_v24 = vld [vmem:[%s1286_s1 + $0x70] sm:$0xff]   ;;  %v972_v29 = vld [vmem:[%s1286_s1 + $0x78] sm:$0xff]   ;;  %v16_v34 = vld [vmem:[%s1285_s0] sm:$0xff] }
   0xa   :  { %880 = vmatprep.subr.bf16.mxu1 %v953_v9  ;;  %v969_v25 = vld [vmem:[%s1286_s1 + $0xf0] sm:$0xff]   ;;  %v973_v30 = vld [vmem:[%s1286_s1 + $0xf8] sm:$0xff]   ;;  %v977_v35 = vld [vmem:[%s1286_s1 + $0x140] sm:$0xff]   ;;  %v153_v39 = vcombine.high %v16_v34, %v16_v34  ;;  %v160_v42 = vrot.slane %v16_v34, %v1164_v41 }
   0xb   :  { %v970_v26 = vld [vmem:[%s1286_s1 + $0x30] sm:$0xff]   ;;  %v974_v31 = vld [vmem:[%s1286_s1 + $0x38] sm:$0xff]   ;;  %v978_v38 = vld [vmem:[%s1286_s1 + $0x1c0] sm:$0xff]  }
   0xc   :  { %859 = vmatpush3.bf16.msra.mxu0 %v954_v10  ;;  %v971_v27 = vld [vmem:[%s1286_s1 + $0xb0] sm:$0xff]   ;;  %v975_v32 = vld [vmem:[%s1286_s1 + $0xb8] sm:$0xff]   ;;  %v1168_v43 = vrot.slane %v153_v39, %v1164_v41  ;;  %v168_v44 = vcombine.high %v160_v42, %v160_v42  ;;  %v176_v45 = vrot.slane %v160_v42, %v1164_v41  ;;  %v979_v48 = vld [vmem:[%s1286_s1 + $0x100] sm:$0xff]  }
   0xd   :  { %881 = vmatpush3.bf16.msra.mxu1 %v955_v11  ;;  %860 = vmatprep.subr.bf16.mxu0 %v956_v12  ;;  %v981_v51 = vld [vmem:[%s1286_s1 + $0x148] sm:$0xff]   ;;  %v980_v53 = vld [vmem:[%s1286_s1 + $0x180] sm:$0xff]   ;;  %v985_v57 = vld [vmem:[%s1286_s1 + $0x150] sm:$0xff]  }
   0xe   :  { %882 = vmatprep.subr.bf16.mxu1 %v957_v13  ;;  %v169_v46 = vcombine.high %v1168_v43, %v1168_v43  ;;  %v190_v47 = vrot.slane %v168_v44, %v1164_v41  ;;  %v198_v50 = vcombine.high %v176_v45, %v176_v45  ;;  %v982_v54 = vld [vmem:[%s1286_s1 + $0x1c8] sm:$0xff]   ;;  %v986_v59 = vld [vmem:[%s1286_s1 + $0x1d0] sm:$0xff]   ;;  %v989_v61 = vld [vmem:[%s1286_s1 + $0x158] sm:$0xff]  }
   0xf   :  { %v983_v56 = vld [vmem:[%s1286_s1 + $0x108] sm:$0xff]   ;;  %v987_v60 = vld [vmem:[%s1286_s1 + $0x110] sm:$0xff]   ;;  %v990_v63 = vld [vmem:[%s1286_s1 + $0x1d8] sm:$0xff]  }
  0x10   :  { %861 = vmatpush3.bf16.msra.mxu0 %v958_v14  ;;  %v197_v49 = vrot.slane %v169_v46, %v1164_v41  ;;  %626 = vmatprep.mubr.bf16.mxu0 %v190_v47  ;;  %v200_v52 = vcombine.high %v190_v47, %v190_v47  ;;  %v984_v58 = vld [vmem:[%s1286_s1 + $0x188] sm:$0xff]   ;;  %v988_v62 = vld [vmem:[%s1286_s1 + $0x190] sm:$0xff]   ;;  %v991_v0 = vld [vmem:[%s1286_s1 + $0x118] sm:$0xff]  }
  0x11   :  { %883 = vmatpush3.bf16.msra.mxu1 %v959_v15  ;;  %862 = vmatprep.subr.bf16.mxu0 %v960_v16  ;;  %v993_v1 = vld [vmem:[%s1286_s1 + $0x160] sm:$0xff]   ;;  %v992_v2 = vld [vmem:[%s1286_s1 + $0x198] sm:$0xff]   ;;  %v997_v5 = vld [vmem:[%s1286_s1 + $0x168] sm:$0xff]  }
  0x12   :  { %884 = vmatprep.subr.bf16.mxu1 %v961_v17  ;;  %v201_v55 = vcombine.high %v197_v49, %v197_v49  ;;  %666 = vmatprep.mubr.bf16.mxu1 %v200_v52  ;;  %v994_v3 = vld [vmem:[%s1286_s1 + $0x1e0] sm:$0xff]   ;;  %v998_v7 = vld [vmem:[%s1286_s1 + $0x1e8] sm:$0xff]   ;;  %v1001_v9 = vld [vmem:[%s1286_s1 + $0x170] sm:$0xff]  }
  0x13   :  { %v995_v4 = vld [vmem:[%s1286_s1 + $0x120] sm:$0xff]   ;;  %v999_v8 = vld [vmem:[%s1286_s1 + $0x128] sm:$0xff]  }
  0x14   :  { %863 = vmatpush3.bf16.msra.mxu0 %v962_v18  ;;  %v996_v6 = vld [vmem:[%s1286_s1 + $0x1a0] sm:$0xff]  }
  0x15   :  { %885 = vmatpush3.bf16.msra.mxu1 %v963_v19  ;;  %864 = vmatprep.subr.bf16.mxu0 %v964_v20 }
  0x16   :  { %886 = vmatprep.subr.bf16.mxu1 %v965_v21 }
  0x18   :  { %865 = vmatpush3.bf16.msra.mxu0 %v966_v22 }
  0x19   :  { %887 = vmatpush3.bf16.msra.mxu1 %v967_v23  ;;  %866 = vmatprep.subr.bf16.mxu0 %v968_v24 }
  0x1a   :  { %888 = vmatprep.subr.bf16.mxu1 %v969_v25 }
  0x1c   :  { %867 = vmatpush3.bf16.msra.mxu0 %v970_v26 }
  0x1d   :  { %889 = vmatpush3.bf16.msra.mxu1 %v971_v27  ;;  %868 = vmatprep.subr.bf16.mxu0 %v972_v29 }
  0x1e   :  { %890 = vmatprep.subr.bf16.mxu1 %v973_v30 }
  0x20   :  { %869 = vmatpush3.bf16.msra.mxu0 %v974_v31 }
  0x21   :  { %891 = vmatpush3.bf16.msra.mxu1 %v975_v32  ;;  %898 = vmatprep.subr.bf16.mxu0 %v977_v35 }
  0x22   :  { %920 = vmatprep.subr.bf16.mxu1 %v978_v38 }
  0x23   :  { %627 = vmatmul.mubr.bf16.vlgmr.msra.gmra.mrb[0].mxu0 %v176_v45 }
  0x24   :  { %899 = vmatpush3.bf16.msra.mxu0 %v979_v48  ;;  %667 = vmatmul.mubr.bf16.vlgmr.msra.gmra.mrb[0].mxu1 %v198_v50 }
  0x25   :  { %900 = vmatprep.subr.bf16.mxu0 %v981_v51  ;;  %921 = vmatpush3.bf16.msra.mxu1 %v980_v53 }
  0x26   :  { %706 = vmatprep.mubr.bf16.mxu0 %v197_v49  ;;  %922 = vmatprep.subr.bf16.mxu1 %v982_v54 }
  0x27   :  { %746 = vmatprep.mubr.bf16.mxu1 %v201_v55 }
  0x28   :  { %901 = vmatpush3.bf16.msra.mxu0 %v983_v56 }
  0x29   :  { %902 = vmatprep.subr.bf16.mxu0 %v985_v57  ;;  %923 = vmatpush3.bf16.msra.mxu1 %v984_v58 }
  0x2a   :  { %924 = vmatprep.subr.bf16.mxu1 %v986_v59 }
  0x2c   :  { %903 = vmatpush3.bf16.msra.mxu0 %v987_v60 }
  0x2d   :  { %904 = vmatprep.subr.bf16.mxu0 %v989_v61  ;;  %925 = vmatpush3.bf16.msra.mxu1 %v988_v62 }
  0x2e   :  { %926 = vmatprep.subr.bf16.mxu1 %v990_v63 }
  0x30   :  { %905 = vmatpush3.bf16.msra.mxu0 %v991_v0 }
  0x31   :  { %906 = vmatprep.subr.bf16.mxu0 %v993_v1  ;;  %927 = vmatpush3.bf16.msra.mxu1 %v992_v2 }
  0x32   :  { %928 = vmatprep.subr.bf16.mxu1 %v994_v3 }
  0x34   :  { %907 = vmatpush3.bf16.msra.mxu0 %v995_v4 }
  0x35   :  { %908 = vmatprep.subr.bf16.mxu0 %v997_v5 }
  0x36   :  { %8 = vsyncpa [#allocation3], 0  ;;  %929 = vmatpush3.bf16.msra.mxu1 %v996_v6  ;;  %v1000_v10 = vld [vmem:[%s1286_s1 + $0x1a8] sm:$0xff]   ;;  %v1002_v11 = vld [vmem:[%s1286_s1 + $0x1f0] sm:$0xff]   ;;  %v183_v17 = vrot.slane %v1168_v43, %v1164_v41  ;;  %vm754_vm0 = vcmask 74752  }
  0x37   :  { %930 = vmatprep.subr.bf16.mxu1 %v998_v7  ;;  %v1003_v12 = vld [vmem:[%s1286_s1 + $0x130] sm:$0xff]   ;;  %v1005_v13 = vld [vmem:[%s1286_s1 + $0x178] sm:$0xff]   ;;  %v789_v21 = vld [vmem:[%s1287_s2] ss:$0 sm:$0xff] }
  0x38   :  { %909 = vmatpush3.bf16.msra.mxu0 %v999_v8  ;;  %v1004_v14 = vld [vmem:[%s1286_s1 + $0x1b0] sm:$0xff]   ;;  %v1006_v15 = vld [vmem:[%s1286_s1 + $0x1f8] sm:$0xff]   ;;  %v199_v19 = vcombine.high %v183_v17, %v183_v17 }
  0x39   :  { %910 = vmatprep.subr.bf16.mxu0 %v1001_v9  ;;  %v1007_v16 = vld [vmem:[%s1286_s1 + $0x138] sm:$0xff]  }
  0x3a   :  { %931 = vmatpush3.bf16.msra.mxu1 %v1000_v10  ;;  %v1008_v18 = vld [vmem:[%s1286_s1 + $0x1b8] sm:$0xff]   ;;  %s1038_s1 = smov [#allocation2]  }
  0x3b   :  { %932 = vmatprep.subr.bf16.mxu1 %v1002_v11  ;;  %s781_s2 = sshll.u32 %s1038_s1, 4  ;;  %s782_s2 = int_to_ptr.vmem [resolvable:$true] %s781_s2 }
  0x3c   :  { %911 = vmatpush3.bf16.msra.mxu0 %v1003_v12  ;;  %s1013_s6 = scalar_lea.vmem %s782_s2, 32  ;;  %p1018_p1 = scmp.lt.s32.totalorder %s782_s2, %s782_s2 }
  0x3d   :  { %912 = vmatprep.subr.bf16.mxu0 %v1005_v13  ;;  %p1014_p0 = scmp.ne.s32.totalorder %s782_s2, %s1013_s6  ;;  %p1019_p2 = scmp.lt.s32.totalorder %s1013_s6, %s1013_s6 }
  0x3e   :  { %933 = vmatpush3.bf16.msra.mxu1 %v1004_v14 }
  0x3f   :  { %934 = vmatprep.subr.bf16.mxu1 %v1006_v15  ;;  %p1020_p3 = por %p1019_p2, %p1018_p1 }
  0x40   :  { %913 = vmatpush3.bf16.msra.mxu0 %v1007_v16 }
  0x41   :  { %p1021_p4 = pnand %p1020_p3, %p1014_p0 }
  0x42   :  { %935 = vmatpush3.bf16.msra.mxu1 %v1008_v18 }
  0x43   :  { %707 = vmatmul.mubr.bf16.vlgmr.msra.gmra.mrb[4].mxu0 %v183_v17 }
  0x45   :  { %747 = vmatmul.mubr.bf16.vlgmr.msra.gmra.mrb[4].mxu1 %v199_v19 }
  0xf6   :  { %v870_v20 = vpop.f32.mrb[0].mxu0 }
  0xf7   :  { %v871_v22 = vpop.f32.mrb[1].mxu0  ;;  %v892_v23 = vpop.f32.mrb[0].mxu1 }
  0xf8   :  { %v872_v24 = vadd.f32 %v871_v22, %v870_v20  ;;  %v873_v25 = vpop.f32.mrb[2].mxu0  ;;  %v893_v26 = vpop.f32.mrb[1].mxu1 }
  0xf9   :  { %v874_v27 = vpop.f32.mrb[3].mxu0  ;;  %v894_v29 = vadd.f32 %v893_v26, %v892_v23  ;;  %v895_v30 = vpop.f32.mrb[2].mxu1 }
  0xfa   :  { %v629_v28 = vadd.f32 %v872_v24, %v789_v21  ;;  %v896_v31 = vpop.f32.mrb[3].mxu1 }
  0xfc   :  { %v669_v32 = vadd.f32 %v894_v29, %v629_v28 }
 0x116   :  { %v914_v33 = vpop.f32.mrb[4].mxu0 }
 0x117   :  { %v915_v34 = vpop.f32.mrb[5].mxu0 }
 0x118   :  { %v936_v35 = vpop.f32.mrb[4].mxu1  ;;  %v916_v36 = vadd.f32 %v915_v34, %v914_v33  ;;  %v917_v37 = vpop.f32.mrb[6].mxu0 }
 0x119   :  { %v937_v38 = vpop.f32.mrb[5].mxu1  ;;  %v918_v39 = vpop.f32.mrb[7].mxu0 }
 0x11a   :  { %v709_v40 = vadd.f32 %v916_v36, %v669_v32  ;;  %v938_v41 = vadd.f32 %v937_v38, %v936_v35  ;;  %v939_v42 = vpop.f32.mrb[6].mxu1 }
 0x11b   :  { %v940_v43 = vpop.f32.mrb[7].mxu1 }
 0x11c   :  { %v749_v44 = vadd.f32 %v938_v41, %v709_v40 }
 0x11e   :  { %v755_v45 = vsel %vm754_vm0, %v749_v44, -inf }
 0x11f   :  { %v756_v46 = vrot.slane %v755_v45, 4 }
 0x121   :  { %v757_v47 = vmax.f32 %v755_v45, %v756_v46 }
 0x123   :  { %v758_v48 = vrot.slane %v757_v47, 2 }
 0x125   :  { %v759_v49 = vmax.f32 %v757_v47, %v758_v48 }
 0x127   :  { %v760_v50 = vrot.slane %v759_v49, 1 }
 0x129   :  { %v761_v51 = vmax.f32 %v759_v49, %v760_v50 }
 0x12b   :  { %v762_v52 = vsub.f32 %v749_v44, %v761_v51 }
 0x12d   :  { %v763_v53 = vmul.f32 1.442695, %v762_v52 }
 0x12f   :  { %1009 = vpow2.f32 %v763_v53 }
 0x139   :  { %v1010_v54 = vpop.eup %1009 }
 0x13a   :  { %v765_v55 = vsel %vm754_vm0, %v1010_v54, 0.0 }
 0x13b   :  { %v766_v56 = vrot.slane %v765_v55, 4 }
 0x13d   :  { %v767_v57 = vadd.f32 %v766_v56, %v765_v55 }
 0x13f   :  { %v768_v58 = vrot.slane %v767_v57, 2 }
 0x141   :  { %v769_v59 = vadd.f32 %v768_v58, %v767_v57 }
 0x143   :  { %v770_v60 = vrot.slane %v769_v59, 1 }
 0x145   :  { %v771_v61 = vadd.f32 %v770_v60, %v769_v59 }
 0x147   :  { %1011 = vrcp.f32 %v771_v61 }
 0x151   :  { %v1012_v62 = vpop.eup %1011 }
 0x152   :  { %v773_v63 = vmul.f32 %v1012_v62, %v1010_v54 }
 0x154   :  { %774 = vst.msk [vmem:[#allocation2] sm:$0x3] %vm754_vm0, %v773_v63 }
 0x155   :  { %1024 = shalt.err (!%p1021_p4)
}
 0x156   :  { %s1025_s9 = scalar_lea.hbm %s1288_s3, 32 }
 0x157   :  { %p1026_p5 = scmp.ne.s32.totalorder %s1288_s3, %s1025_s9  ;;  %p1029_p6 = scmp.lt.u32.totalorder %s1025_s9, %s1288_s3 }
 0x159   :  { %p1031_p7 = pnand %p1029_p6, %p1026_p5 }
 0x15b   :  { %1034 = shalt.err (!%p1031_p7)
}
 0x15c   :  { %784 = dma.vmem_to_hbm [thread:$0]  %s782_s2, 32, %s1288_s3, [#allocation3]  }
 0x15d   :  { %1035 = dma.done.wait [#allocation3], 32  }
 0x15e   :  { %1036 = vsyncadd [#allocation3], 4294967264 }
 0x15f   :  { %788 = vsyncpa [#allocation3], 1 }

// kernel: forward.6
= control target key start
LH: loop header
LB: loop body
LE: loop exit
PB: predicated region body
PF: predicated region fallthrough
CT: control target
= control target key end

     0   :  { %s10134_s12 = smov 0   ;;  %s10136_s13 = smov 0   ;;  %s12720_s0 = inlined_call_operand.vmem [shape: bf16[2,3136], index: 0, kind: input, shape index: {}]   ;;  %s12721_s1 = inlined_call_operand.vmem [shape: bf16[3136,1024], index: 1, kind: input, shape index: {}]   ;;  %s12722_s2 = inlined_call_operand.vmem [shape: f32[1,1024], index: 2, kind: input, shape index: {}]   ;;  %s12723_s3 = inlined_call_operand.vmem [shape: bf16[2,1024], index: 3, kind: output, shape index: {}]  }
   0x1   :  { %s10138_s14 = smov 0   ;;  %s10140_s15 = smov 0  }
   0x2   :  { %s10142_s16 = smov 0  }
   0x3 LB: > { %s22_s17 = sadd.s32 1, %s10106_s15  ;;  %p65_p1 = scmp.ne.s32.totalorder %s10098_s13, %s10094_s12  ;;  %s10110_s16 = sphi %s10142_s16, %s13_s16   ;;  %s10106_s15 = sphi %s10140_s15, %s12727_s15   ;;  %s10102_s14 = sphi %s10138_s14, %s12726_s14   ;;  %s10098_s13 = sphi %s10136_s13, %s12725_s13   ;;  %s10094_s12 = sphi %s10134_s12, %s12724_s12  }
   0x4   : > { %p23_p0 = scmp.ge.s32.totalorder %s22_s17, 2  ;;  %p66_p2 = scmp.eq.s32.totalorder %s10110_s16, 0 }
   0x5   : > { %s58_s19 = sadd.s32 1, %s10098_s13  ;;  %p7948_p5 = scmp.ge.s32.totalorder %s10110_s16, 2 }
   0x6   : > { %s12729_s17 = smov (%p23_p0, %s22_s17), 0  ;;  %p67_p3 = por %p66_p2, %p65_p1 }
   0x7   : > { %s55_s18 = ssub.s32 %s10106_s15, %s12729_s17  ;;  %152 = sbr.rel (%p7948_p5) target bundleno = 410 (0x19a), region = 20 }
   0x8   : > { %p56_p4 = scmp.eq.s32.totalorder %s55_s18, 0 }
   0xa   : > { %s10169_s20 = scalar_select %p56_p4, %s10098_s13, %s58_s19  }
   0xe   : > { %155 = sbr.rel (!%p67_p3) target bundleno = 410 (0x19a), region = 24  ;;  %s157_s21 = sand.u32 (%p67_p3), 1, %s10098_s13  }
   0xf   : > { %s8746_s22 = sshll.u32 (%p67_p3), %s10106_s15, 4  ;;  %s8847_s23 = smul.u32 (%p67_p3), 6272, %s157_s21 }
  0x10   : > { %s10177_s26 = scalar_lea.vmem (%p67_p3), %s12721_s1, %s8746_s22 }
  0x11   : > { %v175_v0 = vld [vmem:[%s10177_s26] sm:$0xff] (%p67_p3)  ;;  %v177_v1 = vld [vmem:[%s10177_s26 + $0x8] sm:$0xff] (%p67_p3)  ;;  %s10185_s27 = scalar_lea.vmem (%p67_p3), [#allocation2], %s8847_s23 }
  0x12   : > { %v179_v2 = vld [vmem:[%s10177_s26 + $0x20] sm:$0xff] (%p67_p3)  ;;  %v181_v3 = vld [vmem:[%s10177_s26 + $0x28] sm:$0xff] (%p67_p3)  ;;  %176 = vst [vmem:[%s10185_s27] sm:$0xff] (%p67_p3), %v175_v0  ;;  %178 = vst [vmem:[%s10185_s27 + $0x8] sm:$0xff] (%p67_p3), %v177_v1 }
  0x13   : > { %v183_v4 = vld [vmem:[%s10177_s26 + $0x40] sm:$0xff] (%p67_p3)  ;;  %v185_v5 = vld [vmem:[%s10177_s26 + $0x48] sm:$0xff] (%p67_p3)  ;;  %180 = vst [vmem:[%s10185_s27 + $0x10] sm:$0xff] (%p67_p3), %v179_v2  ;;  %182 = vst [vmem:[%s10185_s27 + $0x18] sm:$0xff] (%p67_p3), %v181_v3 }
  0x14   : > { %184 = vst [vmem:[%s10185_s27 + $0x20] sm:$0xff] (%p67_p3), %v183_v4  ;;  %186 = vst [vmem:[%s10185_s27 + $0x28] sm:$0xff] (%p67_p3), %v185_v5  ;;  %v187_v6 = vld [vmem:[%s10177_s26 + $0x60] sm:$0xff] (%p67_p3)  ;;  %v189_v7 = vld [vmem:[%s10177_s26 + $0x68] sm:$0xff] (%p67_p3) }
  0x15   : > { %v191_v8 = vld [vmem:[%s10177_s26 + $0x80] sm:$0xff]  ;;  %188 = vst [vmem:[%s10185_s27 + $0x30] sm:$0xff] %v187_v6  ;;  %190 = vst [vmem:[%s10185_s27 + $0x38] sm:$0xff] %v189_v7  ;;  %v193_v9 = vld [vmem:[%s10177_s26 + $0x88] sm:$0xff] }
  0x16   : > { %192 = vst [vmem:[%s10185_s27 + $0x40] sm:$0xff] %v191_v8  ;;  %v195_v10 = vld [vmem:[%s10177_s26 + $0xa0] sm:$0xff]  ;;  %v197_v11 = vld [vmem:[%s10177_s26 + $0xa8] sm:$0xff]  ;;  %194 = vst [vmem:[%s10185_s27 + $0x48] sm:$0xff] %v193_v9 }
  0x17   : > { %196 = vst [vmem:[%s10185_s27 + $0x50] sm:$0xff] %v195_v10  ;;  %198 = vst [vmem:[%s10185_s27 + $0x58] sm:$0xff] %v197_v11  ;;  %v199_v12 = vld [vmem:[%s10177_s26 + $0xc0] sm:$0xff]  ;;  %v201_v13 = vld [vmem:[%s10177_s26 + $0xc8] sm:$0xff] }
  0x18   : > { %v203_v14 = vld [vmem:[%s10177_s26 + $0xe0] sm:$0xff]  ;;  %200 = vst [vmem:[%s10185_s27 + $0x60] sm:$0xff] %v199_v12  ;;  %202 = vst [vmem:[%s10185_s27 + $0x68] sm:$0xff] %v201_v13  ;;  %v205_v15 = vld [vmem:[%s10177_s26 + $0xe8] sm:$0xff] }
  0x19   : > { %204 = vst [vmem:[%s10185_s27 + $0x70] sm:$0xff] %v203_v14  ;;  %v207_v16 = vld [vmem:[%s10177_s26 + $0x100] sm:$0xff]  ;;  %v209_v17 = vld [vmem:[%s10177_s26 + $0x108] sm:$0xff]  ;;  %206 = vst [vmem:[%s10185_s27 + $0x78] sm:$0xff] %v205_v15 }
  0x1a   : > { %208 = vst [vmem:[%s10185_s27 + $0x80] sm:$0xff] %v207_v16  ;;  %210 = vst [vmem:[%s10185_s27 + $0x88] sm:$0xff] %v209_v17  ;;  %v211_v18 = vld [vmem:[%s10177_s26 + $0x120] sm:$0xff]  ;;  %v213_v19 = vld [vmem:[%s10177_s26 + $0x128] sm:$0xff] }
  0x1b   : > { %v215_v20 = vld [vmem:[%s10177_s26 + $0x140] sm:$0xff]  ;;  %212 = vst [vmem:[%s10185_s27 + $0x90] sm:$0xff] %v211_v18  ;;  %214 = vst [vmem:[%s10185_s27 + $0x98] sm:$0xff] %v213_v19  ;;  %v217_v21 = vld [vmem:[%s10177_s26 + $0x148] sm:$0xff] }
  0x1c   : > { %216 = vst [vmem:[%s10185_s27 + $0xa0] sm:$0xff] %v215_v20  ;;  %v219_v22 = vld [vmem:[%s10177_s26 + $0x160] sm:$0xff]  ;;  %v221_v23 = vld [vmem:[%s10177_s26 + $0x168] sm:$0xff]  ;;  %218 = vst [vmem:[%s10185_s27 + $0xa8] sm:$0xff] %v217_v21 }
  0x1d   : > { %220 = vst [vmem:[%s10185_s27 + $0xb0] sm:$0xff] %v219_v22  ;;  %222 = vst [vmem:[%s10185_s27 + $0xb8] sm:$0xff] %v221_v23  ;;  %v223_v24 = vld [vmem:[%s10177_s26 + $0x180] sm:$0xff]  ;;  %v225_v25 = vld [vmem:[%s10177_s26 + $0x188] sm:$0xff] }
  0x1e   : > { %v227_v26 = vld [vmem:[%s10177_s26 + $0x1a0] sm:$0xff]  ;;  %224 = vst [vmem:[%s10185_s27 + $0xc0] sm:$0xff] %v223_v24  ;;  %226 = vst [vmem:[%s10185_s27 + $0xc8] sm:$0xff] %v225_v25  ;;  %v229_v27 = vld [vmem:[%s10177_s26 + $0x1a8] sm:$0xff] }
  0x1f   : > { %228 = vst [vmem:[%s10185_s27 + $0xd0] sm:$0xff] %v227_v26  ;;  %v231_v28 = vld [vmem:[%s10177_s26 + $0x1c0] sm:$0xff]  ;;  %v233_v29 = vld [vmem:[%s10177_s26 + $0x1c8] sm:$0xff]  ;;  %230 = vst [vmem:[%s10185_s27 + $0xd8] sm:$0xff] %v229_v27 }
  0x20   : > { %232 = vst [vmem:[%s10185_s27 + $0xe0] sm:$0xff] %v231_v28  ;;  %234 = vst [vmem:[%s10185_s27 + $0xe8] sm:$0xff] %v233_v29  ;;  %v235_v30 = vld [vmem:[%s10177_s26 + $0x1e0] sm:$0xff]  ;;  %v237_v31 = vld [vmem:[%s10177_s26 + $0x1e8] sm:$0xff] }
  0x21   : > { %v239_v32 = vld [vmem:[%s10177_s26 + $0x200] sm:$0xff]  ;;  %236 = vst [vmem:[%s10185_s27 + $0xf0] sm:$0xff] %v235_v30  ;;  %238 = vst [vmem:[%s10185_s27 + $0xf8] sm:$0xff] %v237_v31  ;;  %v241_v33 = vld [vmem:[%s10177_s26 + $0x208] sm:$0xff] }
  0x22   : > { %240 = vst [vmem:[%s10185_s27 + $0x100] sm:$0xff] %v239_v32  ;;  %v243_v34 = vld [vmem:[%s10177_s26 + $0x220] sm:$0xff]  ;;  %v245_v35 = vld [vmem:[%s10177_s26 + $0x228] sm:$0xff]  ;;  %242 = vst [vmem:[%s10185_s27 + $0x108] sm:$0xff] %v241_v33 }
  0x23   : > { %244 = vst [vmem:[%s10185_s27 + $0x110] sm:$0xff] %v243_v34  ;;  %246 = vst [vmem:[%s10185_s27 + $0x118] sm:$0xff] %v245_v35  ;;  %v247_v36 = vld [vmem:[%s10177_s26 + $0x240] sm:$0xff]  ;;  %v249_v37 = vld [vmem:[%s10177_s26 + $0x248] sm:$0xff] }
  0x24   : > { %v251_v38 = vld [vmem:[%s10177_s26 + $0x260] sm:$0xff]  ;;  %248 = vst [vmem:[%s10185_s27 + $0x120] sm:$0xff] %v247_v36  ;;  %250 = vst [vmem:[%s10185_s27 + $0x128] sm:$0xff] %v249_v37  ;;  %v253_v39 = vld [vmem:[%s10177_s26 + $0x268] sm:$0xff] }
  0x25   : > { %252 = vst [vmem:[%s10185_s27 + $0x130] sm:$0xff] %v251_v38  ;;  %v255_v40 = vld [vmem:[%s10177_s26 + $0x280] sm:$0xff]  ;;  %v257_v41 = vld [vmem:[%s10177_s26 + $0x288] sm:$0xff]  ;;  %254 = vst [vmem:[%s10185_s27 + $0x138] sm:$0xff] %v253_v39 }
  0x26   : > { %256 = vst [vmem:[%s10185_s27 + $0x140] sm:$0xff] %v255_v40  ;;  %258 = vst [vmem:[%s10185_s27 + $0x148] sm:$0xff] %v257_v41  ;;  %v259_v42 = vld [vmem:[%s10177_s26 + $0x2a0] sm:$0xff]  ;;  %v261_v43 = vld [vmem:[%s10177_s26 + $0x2a8] sm:$0xff] }
  0x27   : > { %v263_v44 = vld [vmem:[%s10177_s26 + $0x2c0] sm:$0xff]  ;;  %260 = vst [vmem:[%s10185_s27 + $0x150] sm:$0xff] %v259_v42  ;;  %262 = vst [vmem:[%s10185_s27 + $0x158] sm:$0xff] %v261_v43  ;;  %v265_v45 = vld [vmem:[%s10177_s26 + $0x2c8] sm:$0xff] }
  0x28   : > { %264 = vst [vmem:[%s10185_s27 + $0x160] sm:$0xff] %v263_v44  ;;  %v267_v46 = vld [vmem:[%s10177_s26 + $0x2e0] sm:$0xff]  ;;  %v269_v47 = vld [vmem:[%s10177_s26 + $0x2e8] sm:$0xff]  ;;  %266 = vst [vmem:[%s10185_s27 + $0x168] sm:$0xff] %v265_v45 }
  0x29   : > { %268 = vst [vmem:[%s10185_s27 + $0x170] sm:$0xff] %v267_v46  ;;  %270 = vst [vmem:[%s10185_s27 + $0x178] sm:$0xff] %v269_v47  ;;  %v271_v48 = vld [vmem:[%s10177_s26 + $0x300] sm:$0xff]  ;;  %v273_v49 = vld [vmem:[%s10177_s26 + $0x308] sm:$0xff] }
  0x2a   : > { %v275_v50 = vld [vmem:[%s10177_s26 + $0x320] sm:$0xff]  ;;  %272 = vst [vmem:[%s10185_s27 + $0x180] sm:$0xff] %v271_v48  ;;  %274 = vst [vmem:[%s10185_s27 + $0x188] sm:$0xff] %v273_v49  ;;  %v277_v51 = vld [vmem:[%s10177_s26 + $0x328] sm:$0xff] }
  0x2b   : > { %276 = vst [vmem:[%s10185_s27 + $0x190] sm:$0xff] %v275_v50  ;;  %v279_v52 = vld [vmem:[%s10177_s26 + $0x340] sm:$0xff]  ;;  %v281_v53 = vld [vmem:[%s10177_s26 + $0x348] sm:$0xff]  ;;  %278 = vst [vmem:[%s10185_s27 + $0x198] sm:$0xff] %v277_v51 }
  0x2c   : > { %280 = vst [vmem:[%s10185_s27 + $0x1a0] sm:$0xff] %v279_v52  ;;  %282 = vst [vmem:[%s10185_s27 + $0x1a8] sm:$0xff] %v281_v53  ;;  %v283_v54 = vld [vmem:[%s10177_s26 + $0x360] sm:$0xff]  ;;  %v285_v55 = vld [vmem:[%s10177_s26 + $0x368] sm:$0xff] }
  0x2d   : > { %v287_v56 = vld [vmem:[%s10177_s26 + $0x380] sm:$0xff]  ;;  %284 = vst [vmem:[%s10185_s27 + $0x1b0] sm:$0xff] %v283_v54  ;;  %286 = vst [vmem:[%s10185_s27 + $0x1b8] sm:$0xff] %v285_v55  ;;  %v289_v57 = vld [vmem:[%s10177_s26 + $0x388] sm:$0xff] }
  0x2e   : > { %288 = vst [vmem:[%s10185_s27 + $0x1c0] sm:$0xff] %v287_v56  ;;  %v291_v58 = vld [vmem:[%s10177_s26 + $0x3a0] sm:$0xff]  ;;  %v293_v59 = vld [vmem:[%s10177_s26 + $0x3a8] sm:$0xff]  ;;  %290 = vst [vmem:[%s10185_s27 + $0x1c8] sm:$0xff] %v289_v57 }
  0x2f   : > { %292 = vst [vmem:[%s10185_s27 + $0x1d0] sm:$0xff] %v291_v58  ;;  %294 = vst [vmem:[%s10185_s27 + $0x1d8] sm:$0xff] %v293_v59  ;;  %v295_v60 = vld [vmem:[%s10177_s26 + $0x3c0] sm:$0xff]  ;;  %v297_v61 = vld [vmem:[%s10177_s26 + $0x3c8] sm:$0xff] }
  0x30   : > { %v299_v62 = vld [vmem:[%s10177_s26 + $0x3e0] sm:$0xff]  ;;  %296 = vst [vmem:[%s10185_s27 + $0x1e0] sm:$0xff] %v295_v60  ;;  %298 = vst [vmem:[%s10185_s27 + $0x1e8] sm:$0xff] %v297_v61  ;;  %v301_v63 = vld [vmem:[%s10177_s26 + $0x3e8] sm:$0xff] }
  0x31   : > { %300 = vst [vmem:[%s10185_s27 + $0x1f0] sm:$0xff] %v299_v62  ;;  %v303_v0 = vld [vmem:[%s10177_s26 + $0x400] sm:$0xff]  ;;  %v305_v1 = vld [vmem:[%s10177_s26 + $0x408] sm:$0xff]  ;;  %302 = vst [vmem:[%s10185_s27 + $0x1f8] sm:$0xff] %v301_v63 }
  0x32   : > { %304 = vst [vmem:[%s10185_s27 + $0x200] sm:$0xff] %v303_v0  ;;  %306 = vst [vmem:[%s10185_s27 + $0x208] sm:$0xff] %v305_v1  ;;  %v307_v2 = vld [vmem:[%s10177_s26 + $0x420] sm:$0xff]  ;;  %v309_v3 = vld [vmem:[%s10177_s26 + $0x428] sm:$0xff] }
  0x33   : > { %v311_v4 = vld [vmem:[%s10177_s26 + $0x440] sm:$0xff]  ;;  %308 = vst [vmem:[%s10185_s27 + $0x210] sm:$0xff] %v307_v2  ;;  %310 = vst [vmem:[%s10185_s27 + $0x218] sm:$0xff] %v309_v3  ;;  %v313_v5 = vld [vmem:[%s10177_s26 + $0x448] sm:$0xff] }
  0x34   : > { %312 = vst [vmem:[%s10185_s27 + $0x220] sm:$0xff] %v311_v4  ;;  %v315_v6 = vld [vmem:[%s10177_s26 + $0x460] sm:$0xff]  ;;  %v317_v7 = vld [vmem:[%s10177_s26 + $0x468] sm:$0xff]  ;;  %314 = vst [vmem:[%s10185_s27 + $0x228] sm:$0xff] %v313_v5 }
  0x35   : > { %316 = vst [vmem:[%s10185_s27 + $0x230] sm:$0xff] %v315_v6  ;;  %318 = vst [vmem:[%s10185_s27 + $0x238] sm:$0xff] %v317_v7  ;;  %v319_v8 = vld [vmem:[%s10177_s26 + $0x480] sm:$0xff]  ;;  %v321_v9 = vld [vmem:[%s10177_s26 + $0x488] sm:$0xff] }
  0x36   : > { %v323_v10 = vld [vmem:[%s10177_s26 + $0x4a0] sm:$0xff]  ;;  %320 = vst [vmem:[%s10185_s27 + $0x240] sm:$0xff] %v319_v8  ;;  %322 = vst [vmem:[%s10185_s27 + $0x248] sm:$0xff] %v321_v9  ;;  %v325_v11 = vld [vmem:[%s10177_s26 + $0x4a8] sm:$0xff] }
  0x37   : > { %324 = vst [vmem:[%s10185_s27 + $0x250] sm:$0xff] %v323_v10  ;;  %v327_v12 = vld [vmem:[%s10177_s26 + $0x4c0] sm:$0xff]  ;;  %v329_v13 = vld [vmem:[%s10177_s26 + $0x4c8] sm:$0xff]  ;;  %326 = vst [vmem:[%s10185_s27 + $0x258] sm:$0xff] %v325_v11 }
  0x38   : > { %328 = vst [vmem:[%s10185_s27 + $0x260] sm:$0xff] %v327_v12  ;;  %330 = vst [vmem:[%s10185_s27 + $0x268] sm:$0xff] %v329_v13  ;;  %v331_v14 = vld [vmem:[%s10177_s26 + $0x4e0] sm:$0xff]  ;;  %v333_v15 = vld [vmem:[%s10177_s26 + $0x4e8] sm:$0xff] }
  0x39   : > { %v335_v16 = vld [vmem:[%s10177_s26 + $0x500] sm:$0xff]  ;;  %332 = vst [vmem:[%s10185_s27 + $0x270] sm:$0xff] %v331_v14  ;;  %334 = vst [vmem:[%s10185_s27 + $0x278] sm:$0xff] %v333_v15  ;;  %v337_v17 = vld [vmem:[%s10177_s26 + $0x508] sm:$0xff] }
  0x3a   : > { %336 = vst [vmem:[%s10185_s27 + $0x280] sm:$0xff] %v335_v16  ;;  %v339_v18 = vld [vmem:[%s10177_s26 + $0x520] sm:$0xff]  ;;  %v341_v19 = vld [vmem:[%s10177_s26 + $0x528] sm:$0xff]  ;;  %338 = vst [vmem:[%s10185_s27 + $0x288] sm:$0xff] %v337_v17 }
  0x3b   : > { %340 = vst [vmem:[%s10185_s27 + $0x290] sm:$0xff] %v339_v18  ;;  %342 = vst [vmem:[%s10185_s27 + $0x298] sm:$0xff] %v341_v19  ;;  %v343_v20 = vld [vmem:[%s10177_s26 + $0x540] sm:$0xff]  ;;  %v345_v21 = vld [vmem:[%s10177_s26 + $0x548] sm:$0xff] }
  0x3c   : > { %v347_v22 = vld [vmem:[%s10177_s26 + $0x560] sm:$0xff]  ;;  %344 = vst [vmem:[%s10185_s27 + $0x2a0] sm:$0xff] %v343_v20  ;;  %346 = vst [vmem:[%s10185_s27 + $0x2a8] sm:$0xff] %v345_v21  ;;  %v349_v23 = vld [vmem:[%s10177_s26 + $0x568] sm:$0xff] }
  0x3d   : > { %348 = vst [vmem:[%s10185_s27 + $0x2b0] sm:$0xff] %v347_v22  ;;  %v351_v24 = vld [vmem:[%s10177_s26 + $0x580] sm:$0xff]  ;;  %v353_v25 = vld [vmem:[%s10177_s26 + $0x588] sm:$0xff]  ;;  %350 = vst [vmem:[%s10185_s27 + $0x2b8] sm:$0xff] %v349_v23 }
  0x3e   : > { %352 = vst [vmem:[%s10185_s27 + $0x2c0] sm:$0xff] %v351_v24  ;;  %354 = vst [vmem:[%s10185_s27 + $0x2c8] sm:$0xff] %v353_v25  ;;  %v355_v26 = vld [vmem:[%s10177_s26 + $0x5a0] sm:$0xff]  ;;  %v357_v27 = vld [vmem:[%s10177_s26 + $0x5a8] sm:$0xff] }
  0x3f   : > { %v359_v28 = vld [vmem:[%s10177_s26 + $0x5c0] sm:$0xff]  ;;  %356 = vst [vmem:[%s10185_s27 + $0x2d0] sm:$0xff] %v355_v26  ;;  %358 = vst [vmem:[%s10185_s27 + $0x2d8] sm:$0xff] %v357_v27  ;;  %v361_v29 = vld [vmem:[%s10177_s26 + $0x5c8] sm:$0xff] }
  0x40   : > { %360 = vst [vmem:[%s10185_s27 + $0x2e0] sm:$0xff] %v359_v28  ;;  %v363_v30 = vld [vmem:[%s10177_s26 + $0x5e0] sm:$0xff]  ;;  %v365_v31 = vld [vmem:[%s10177_s26 + $0x5e8] sm:$0xff]  ;;  %362 = vst [vmem:[%s10185_s27 + $0x2e8] sm:$0xff] %v361_v29 }
  0x41   : > { %364 = vst [vmem:[%s10185_s27 + $0x2f0] sm:$0xff] %v363_v30  ;;  %366 = vst [vmem:[%s10185_s27 + $0x2f8] sm:$0xff] %v365_v31  ;;  %v367_v32 = vld [vmem:[%s10177_s26 + $0x600] sm:$0xff]  ;;  %v369_v33 = vld [vmem:[%s10177_s26 + $0x608] sm:$0xff] }
  0x42   : > { %v371_v34 = vld [vmem:[%s10177_s26 + $0x620] sm:$0xff]  ;;  %368 = vst [vmem:[%s10185_s27 + $0x300] sm:$0xff] %v367_v32  ;;  %370 = vst [vmem:[%s10185_s27 + $0x308] sm:$0xff] %v369_v33  ;;  %v373_v35 = vld [vmem:[%s10177_s26 + $0x628] sm:$0xff] }
  0x43   : > { %372 = vst [vmem:[%s10185_s27 + $0x310] sm:$0xff] %v371_v34  ;;  %v375_v36 = vld [vmem:[%s10177_s26 + $0x640] sm:$0xff]  ;;  %v377_v37 = vld [vmem:[%s10177_s26 + $0x648] sm:$0xff]  ;;  %374 = vst [vmem:[%s10185_s27 + $0x318] sm:$0xff] %v373_v35 }
  0x44   : > { %376 = vst [vmem:[%s10185_s27 + $0x320] sm:$0xff] %v375_v36  ;;  %378 = vst [vmem:[%s10185_s27 + $0x328] sm:$0xff] %v377_v37  ;;  %v379_v38 = vld [vmem:[%s10177_s26 + $0x660] sm:$0xff]  ;;  %v381_v39 = vld [vmem:[%s10177_s26 + $0x668] sm:$0xff] }
  0x45   : > { %v383_v40 = vld [vmem:[%s10177_s26 + $0x680] sm:$0xff]  ;;  %380 = vst [vmem:[%s10185_s27 + $0x330] sm:$0xff] %v379_v38  ;;  %382 = vst [vmem:[%s10185_s27 + $0x338] sm:$0xff] %v381_v39  ;;  %v385_v41 = vld [vmem:[%s10177_s26 + $0x688] sm:$0xff] }
  0x46   : > { %384 = vst [vmem:[%s10185_s27 + $0x340] sm:$0xff] %v383_v40  ;;  %v387_v42 = vld [vmem:[%s10177_s26 + $0x6a0] sm:$0xff]  ;;  %v389_v43 = vld [vmem:[%s10177_s26 + $0x6a8] sm:$0xff]  ;;  %386 = vst [vmem:[%s10185_s27 + $0x348] sm:$0xff] %v385_v41 }
  0x47   : > { %388 = vst [vmem:[%s10185_s27 + $0x350] sm:$0xff] %v387_v42  ;;  %390 = vst [vmem:[%s10185_s27 + $0x358] sm:$0xff] %v389_v43  ;;  %v391_v44 = vld [vmem:[%s10177_s26 + $0x6c0] sm:$0xff]  ;;  %v393_v45 = vld [vmem:[%s10177_s26 + $0x6c8] sm:$0xff] }
  0x48   : > { %v395_v46 = vld [vmem:[%s10177_s26 + $0x6e0] sm:$0xff]  ;;  %392 = vst [vmem:[%s10185_s27 + $0x360] sm:$0xff] %v391_v44  ;;  %394 = vst [vmem:[%s10185_s27 + $0x368] sm:$0xff] %v393_v45  ;;  %v397_v47 = vld [vmem:[%s10177_s26 + $0x6e8] sm:$0xff] }
  0x49   : > { %396 = vst [vmem:[%s10185_s27 + $0x370] sm:$0xff] %v395_v46  ;;  %v399_v48 = vld [vmem:[%s10177_s26 + $0x700] sm:$0xff]  ;;  %v401_v49 = vld [vmem:[%s10177_s26 + $0x708] sm:$0xff]  ;;  %398 = vst [vmem:[%s10185_s27 + $0x378] sm:$0xff] %v397_v47 }
  0x4a   : > { %400 = vst [vmem:[%s10185_s27 + $0x380] sm:$0xff] %v399_v48  ;;  %402 = vst [vmem:[%s10185_s27 + $0x388] sm:$0xff] %v401_v49  ;;  %v403_v50 = vld [vmem:[%s10177_s26 + $0x720] sm:$0xff]  ;;  %v405_v51 = vld [vmem:[%s10177_s26 + $0x728] sm:$0xff] }
  0x4b   : > { %v407_v52 = vld [vmem:[%s10177_s26 + $0x740] sm:$0xff]  ;;  %404 = vst [vmem:[%s10185_s27 + $0x390] sm:$0xff] %v403_v50  ;;  %406 = vst [vmem:[%s10185_s27 + $0x398] sm:$0xff] %v405_v51  ;;  %v409_v53 = vld [vmem:[%s10177_s26 + $0x748] sm:$0xff] }
  0x4c   : > { %408 = vst [vmem:[%s10185_s27 + $0x3a0] sm:$0xff] %v407_v52  ;;  %v411_v54 = vld [vmem:[%s10177_s26 + $0x760] sm:$0xff]  ;;  %v413_v55 = vld [vmem:[%s10177_s26 + $0x768] sm:$0xff]  ;;  %410 = vst [vmem:[%s10185_s27 + $0x3a8] sm:$0xff] %v409_v53 }
  0x4d   : > { %412 = vst [vmem:[%s10185_s27 + $0x3b0] sm:$0xff] %v411_v54  ;;  %414 = vst [vmem:[%s10185_s27 + $0x3b8] sm:$0xff] %v413_v55  ;;  %v415_v56 = vld [vmem:[%s10177_s26 + $0x780] sm:$0xff]  ;;  %v417_v57 = vld [vmem:[%s10177_s26 + $0x788] sm:$0xff] }
  0x4e   : > { %v419_v58 = vld [vmem:[%s10177_s26 + $0x7a0] sm:$0xff]  ;;  %416 = vst [vmem:[%s10185_s27 + $0x3c0] sm:$0xff] %v415_v56  ;;  %418 = vst [vmem:[%s10185_s27 + $0x3c8] sm:$0xff] %v417_v57  ;;  %v421_v59 = vld [vmem:[%s10177_s26 + $0x7a8] sm:$0xff] }
  0x4f   : > { %420 = vst [vmem:[%s10185_s27 + $0x3d0] sm:$0xff] %v419_v58  ;;  %v423_v60 = vld [vmem:[%s10177_s26 + $0x7c0] sm:$0xff]  ;;  %v425_v61 = vld [vmem:[%s10177_s26 + $0x7c8] sm:$0xff]  ;;  %422 = vst [vmem:[%s10185_s27 + $0x3d8] sm:$0xff] %v421_v59 }
  0x50   : > { %424 = vst [vmem:[%s10185_s27 + $0x3e0] sm:$0xff] %v423_v60  ;;  %426 = vst [vmem:[%s10185_s27 + $0x3e8] sm:$0xff] %v425_v61  ;;  %v427_v62 = vld [vmem:[%s10177_s26 + $0x7e0] sm:$0xff]  ;;  %v429_v63 = vld [vmem:[%s10177_s26 + $0x7e8] sm:$0xff] }
  0x51   : > { %v431_v0 = vld [vmem:[%s10177_s26 + $0x800] sm:$0xff]  ;;  %428 = vst [vmem:[%s10185_s27 + $0x3f0] sm:$0xff] %v427_v62  ;;  %430 = vst [vmem:[%s10185_s27 + $0x3f8] sm:$0xff] %v429_v63  ;;  %v433_v1 = vld [vmem:[%s10177_s26 + $0x808] sm:$0xff] }
  0x52   : > { %432 = vst [vmem:[%s10185_s27 + $0x400] sm:$0xff] %v431_v0  ;;  %v435_v2 = vld [vmem:[%s10177_s26 + $0x820] sm:$0xff]  ;;  %v437_v3 = vld [vmem:[%s10177_s26 + $0x828] sm:$0xff]  ;;  %434 = vst [vmem:[%s10185_s27 + $0x408] sm:$0xff] %v433_v1 }
  0x53   : > { %436 = vst [vmem:[%s10185_s27 + $0x410] sm:$0xff] %v435_v2  ;;  %438 = vst [vmem:[%s10185_s27 + $0x418] sm:$0xff] %v437_v3  ;;  %v439_v4 = vld [vmem:[%s10177_s26 + $0x840] sm:$0xff]  ;;  %v441_v5 = vld [vmem:[%s10177_s26 + $0x848] sm:$0xff] }
  0x54   : > { %v443_v6 = vld [vmem:[%s10177_s26 + $0x860] sm:$0xff]  ;;  %440 = vst [vmem:[%s10185_s27 + $0x420] sm:$0xff] %v439_v4  ;;  %442 = vst [vmem:[%s10185_s27 + $0x428] sm:$0xff] %v441_v5  ;;  %v445_v7 = vld [vmem:[%s10177_s26 + $0x868] sm:$0xff] }
  0x55   : > { %444 = vst [vmem:[%s10185_s27 + $0x430] sm:$0xff] %v443_v6  ;;  %v447_v8 = vld [vmem:[%s10177_s26 + $0x880] sm:$0xff]  ;;  %v449_v9 = vld [vmem:[%s10177_s26 + $0x888] sm:$0xff]  ;;  %446 = vst [vmem:[%s10185_s27 + $0x438] sm:$0xff] %v445_v7 }
  0x56   : > { %448 = vst [vmem:[%s10185_s27 + $0x440] sm:$0xff] %v447_v8  ;;  %450 = vst [vmem:[%s10185_s27 + $0x448] sm:$0xff] %v449_v9  ;;  %v451_v10 = vld [vmem:[%s10177_s26 + $0x8a0] sm:$0xff]  ;;  %v453_v11 = vld [vmem:[%s10177_s26 + $0x8a8] sm:$0xff] }
  0x57   : > { %v455_v12 = vld [vmem:[%s10177_s26 + $0x8c0] sm:$0xff]  ;;  %452 = vst [vmem:[%s10185_s27 + $0x450] sm:$0xff] %v451_v10  ;;  %454 = vst [vmem:[%s10185_s27 + $0x458] sm:$0xff] %v453_v11  ;;  %v457_v13 = vld [vmem:[%s10177_s26 + $0x8c8] sm:$0xff] }
  0x58   : > { %456 = vst [vmem:[%s10185_s27 + $0x460] sm:$0xff] %v455_v12  ;;  %v459_v14 = vld [vmem:[%s10177_s26 + $0x8e0] sm:$0xff]  ;;  %v461_v15 = vld [vmem:[%s10177_s26 + $0x8e8] sm:$0xff]  ;;  %458 = vst [vmem:[%s10185_s27 + $0x468] sm:$0xff] %v457_v13 }
  0x59   : > { %460 = vst [vmem:[%s10185_s27 + $0x470] sm:$0xff] %v459_v14  ;;  %462 = vst [vmem:[%s10185_s27 + $0x478] sm:$0xff] %v461_v15  ;;  %v463_v16 = vld [vmem:[%s10177_s26 + $0x900] sm:$0xff]  ;;  %v465_v17 = vld [vmem:[%s10177_s26 + $0x908] sm:$0xff] }
  0x5a   : > { %v467_v18 = vld [vmem:[%s10177_s26 + $0x920] sm:$0xff]  ;;  %464 = vst [vmem:[%s10185_s27 + $0x480] sm:$0xff] %v463_v16  ;;  %466 = vst [vmem:[%s10185_s27 + $0x488] sm:$0xff] %v465_v17  ;;  %v469_v19 = vld [vmem:[%s10177_s26 + $0x928] sm:$0xff] }
  0x5b   : > { %468 = vst [vmem:[%s10185_s27 + $0x490] sm:$0xff] %v467_v18  ;;  %v471_v20 = vld [vmem:[%s10177_s26 + $0x940] sm:$0xff]  ;;  %v473_v21 = vld [vmem:[%s10177_s26 + $0x948] sm:$0xff]  ;;  %470 = vst [vmem:[%s10185_s27 + $0x498] sm:$0xff] %v469_v19 }
  0x5c   : > { %472 = vst [vmem:[%s10185_s27 + $0x4a0] sm:$0xff] %v471_v20  ;;  %474 = vst [vmem:[%s10185_s27 + $0x4a8] sm:$0xff] %v473_v21  ;;  %v475_v22 = vld [vmem:[%s10177_s26 + $0x960] sm:$0xff]  ;;  %v477_v23 = vld [vmem:[%s10177_s26 + $0x968] sm:$0xff] }
  0x5d   : > { %v479_v24 = vld [vmem:[%s10177_s26 + $0x980] sm:$0xff]  ;;  %476 = vst [vmem:[%s10185_s27 + $0x4b0] sm:$0xff] %v475_v22  ;;  %478 = vst [vmem:[%s10185_s27 + $0x4b8] sm:$0xff] %v477_v23  ;;  %v481_v25 = vld [vmem:[%s10177_s26 + $0x988] sm:$0xff] }
  0x5e   : > { %480 = vst [vmem:[%s10185_s27 + $0x4c0] sm:$0xff] %v479_v24  ;;  %v483_v26 = vld [vmem:[%s10177_s26 + $0x9a0] sm:$0xff]  ;;  %v485_v27 = vld [vmem:[%s10177_s26 + $0x9a8] sm:$0xff]  ;;  %482 = vst [vmem:[%s10185_s27 + $0x4c8] sm:$0xff] %v481_v25 }
  0x5f   : > { %484 = vst [vmem:[%s10185_s27 + $0x4d0] sm:$0xff] %v483_v26  ;;  %486 = vst [vmem:[%s10185_s27 + $0x4d8] sm:$0xff] %v485_v27  ;;  %v487_v28 = vld [vmem:[%s10177_s26 + $0x9c0] sm:$0xff]  ;;  %v489_v29 = vld [vmem:[%s10177_s26 + $0x9c8] sm:$0xff] }
  0x60   : > { %v491_v30 = vld [vmem:[%s10177_s26 + $0x9e0] sm:$0xff]  ;;  %488 = vst [vmem:[%s10185_s27 + $0x4e0] sm:$0xff] %v487_v28  ;;  %490 = vst [vmem:[%s10185_s27 + $0x4e8] sm:$0xff] %v489_v29  ;;  %v493_v31 = vld [vmem:[%s10177_s26 + $0x9e8] sm:$0xff] }
  0x61   : > { %492 = vst [vmem:[%s10185_s27 + $0x4f0] sm:$0xff] %v491_v30  ;;  %v495_v32 = vld [vmem:[%s10177_s26 + $0xa00] sm:$0xff]  ;;  %v497_v33 = vld [vmem:[%s10177_s26 + $0xa08] sm:$0xff]  ;;  %494 = vst [vmem:[%s10185_s27 + $0x4f8] sm:$0xff] %v493_v31 }
  0x62   : > { %496 = vst [vmem:[%s10185_s27 + $0x500] sm:$0xff] %v495_v32  ;;  %498 = vst [vmem:[%s10185_s27 + $0x508] sm:$0xff] %v497_v33  ;;  %v499_v34 = vld [vmem:[%s10177_s26 + $0xa20] sm:$0xff]  ;;  %v501_v35 = vld [vmem:[%s10177_s26 + $0xa28] sm:$0xff] }
  0x63   : > { %v503_v36 = vld [vmem:[%s10177_s26 + $0xa40] sm:$0xff]  ;;  %500 = vst [vmem:[%s10185_s27 + $0x510] sm:$0xff] %v499_v34  ;;  %502 = vst [vmem:[%s10185_s27 + $0x518] sm:$0xff] %v501_v35  ;;  %v505_v37 = vld [vmem:[%s10177_s26 + $0xa48] sm:$0xff] }
  0x64   : > { %504 = vst [vmem:[%s10185_s27 + $0x520] sm:$0xff] %v503_v36  ;;  %v507_v38 = vld [vmem:[%s10177_s26 + $0xa60] sm:$0xff]  ;;  %v509_v39 = vld [vmem:[%s10177_s26 + $0xa68] sm:$0xff]  ;;  %506 = vst [vmem:[%s10185_s27 + $0x528] sm:$0xff] %v505_v37 }
  0x65   : > { %508 = vst [vmem:[%s10185_s27 + $0x530] sm:$0xff] %v507_v38  ;;  %510 = vst [vmem:[%s10185_s27 + $0x538] sm:$0xff] %v509_v39  ;;  %v511_v40 = vld [vmem:[%s10177_s26 + $0xa80] sm:$0xff]  ;;  %v513_v41 = vld [vmem:[%s10177_s26 + $0xa88] sm:$0xff] }
  0x66   : > { %v515_v42 = vld [vmem:[%s10177_s26 + $0xaa0] sm:$0xff]  ;;  %512 = vst [vmem:[%s10185_s27 + $0x540] sm:$0xff] %v511_v40  ;;  %514 = vst [vmem:[%s10185_s27 + $0x548] sm:$0xff] %v513_v41  ;;  %v517_v43 = vld [vmem:[%s10177_s26 + $0xaa8] sm:$0xff] }
  0x67   : > { %516 = vst [vmem:[%s10185_s27 + $0x550] sm:$0xff] %v515_v42  ;;  %v519_v44 = vld [vmem:[%s10177_s26 + $0xac0] sm:$0xff]  ;;  %v521_v45 = vld [vmem:[%s10177_s26 + $0xac8] sm:$0xff]  ;;  %518 = vst [vmem:[%s10185_s27 + $0x558] sm:$0xff] %v517_v43 }
  0x68   : > { %520 = vst [vmem:[%s10185_s27 + $0x560] sm:$0xff] %v519_v44  ;;  %522 = vst [vmem:[%s10185_s27 + $0x568] sm:$0xff] %v521_v45  ;;  %v523_v46 = vld [vmem:[%s10177_s26 + $0xae0] sm:$0xff]  ;;  %v525_v47 = vld [vmem:[%s10177_s26 + $0xae8] sm:$0xff] }
  0x69   : > { %v527_v48 = vld [vmem:[%s10177_s26 + $0xb00] sm:$0xff]  ;;  %524 = vst [vmem:[%s10185_s27 + $0x570] sm:$0xff] %v523_v46  ;;  %526 = vst [vmem:[%s10185_s27 + $0x578] sm:$0xff] %v525_v47  ;;  %v529_v49 = vld [vmem:[%s10177_s26 + $0xb08] sm:$0xff] }
  0x6a   : > { %528 = vst [vmem:[%s10185_s27 + $0x580] sm:$0xff] %v527_v48  ;;  %v531_v50 = vld [vmem:[%s10177_s26 + $0xb20] sm:$0xff]  ;;  %v533_v51 = vld [vmem:[%s10177_s26 + $0xb28] sm:$0xff]  ;;  %530 = vst [vmem:[%s10185_s27 + $0x588] sm:$0xff] %v529_v49 }
  0x6b   : > { %532 = vst [vmem:[%s10185_s27 + $0x590] sm:$0xff] %v531_v50  ;;  %534 = vst [vmem:[%s10185_s27 + $0x598] sm:$0xff] %v533_v51  ;;  %v535_v52 = vld [vmem:[%s10177_s26 + $0xb40] sm:$0xff]  ;;  %v537_v53 = vld [vmem:[%s10177_s26 + $0xb48] sm:$0xff] }
  0x6c   : > { %v539_v54 = vld [vmem:[%s10177_s26 + $0xb60] sm:$0xff]  ;;  %536 = vst [vmem:[%s10185_s27 + $0x5a0] sm:$0xff] %v535_v52  ;;  %538 = vst [vmem:[%s10185_s27 + $0x5a8] sm:$0xff] %v537_v53  ;;  %v541_v55 = vld [vmem:[%s10177_s26 + $0xb68] sm:$0xff] }
  0x6d   : > { %540 = vst [vmem:[%s10185_s27 + $0x5b0] sm:$0xff] %v539_v54  ;;  %v543_v56 = vld [vmem:[%s10177_s26 + $0xb80] sm:$0xff]  ;;  %v545_v57 = vld [vmem:[%s10177_s26 + $0xb88] sm:$0xff]  ;;  %542 = vst [vmem:[%s10185_s27 + $0x5b8] sm:$0xff] %v541_v55 }
  0x6e   : > { %544 = vst [vmem:[%s10185_s27 + $0x5c0] sm:$0xff] %v543_v56  ;;  %546 = vst [vmem:[%s10185_s27 + $0x5c8] sm:$0xff] %v545_v57  ;;  %v547_v58 = vld [vmem:[%s10177_s26 + $0xba0] sm:$0xff]  ;;  %v549_v59 = vld [vmem:[%s10177_s26 + $0xba8] sm:$0xff] }
  0x6f   : > { %v551_v60 = vld [vmem:[%s10177_s26 + $0xbc0] sm:$0xff]  ;;  %548 = vst [vmem:[%s10185_s27 + $0x5d0] sm:$0xff] %v547_v58  ;;  %550 = vst [vmem:[%s10185_s27 + $0x5d8] sm:$0xff] %v549_v59  ;;  %v553_v61 = vld [vmem:[%s10177_s26 + $0xbc8] sm:$0xff] }
  0x70   : > { %552 = vst [vmem:[%s10185_s27 + $0x5e0] sm:$0xff] %v551_v60  ;;  %v555_v62 = vld [vmem:[%s10177_s26 + $0xbe0] sm:$0xff]  ;;  %v557_v63 = vld [vmem:[%s10177_s26 + $0xbe8] sm:$0xff]  ;;  %554 = vst [vmem:[%s10185_s27 + $0x5e8] sm:$0xff] %v553_v61 }
  0x71   : > { %556 = vst [vmem:[%s10185_s27 + $0x5f0] sm:$0xff] %v555_v62  ;;  %558 = vst [vmem:[%s10185_s27 + $0x5f8] sm:$0xff] %v557_v63  ;;  %v559_v0 = vld [vmem:[%s10177_s26 + $0xc00] sm:$0xff]  ;;  %v561_v1 = vld [vmem:[%s10177_s26 + $0xc08] sm:$0xff] }
  0x72   : > { %v563_v2 = vld [vmem:[%s10177_s26 + $0xc20] sm:$0xff]  ;;  %560 = vst [vmem:[%s10185_s27 + $0x600] sm:$0xff] %v559_v0  ;;  %562 = vst [vmem:[%s10185_s27 + $0x608] sm:$0xff] %v561_v1  ;;  %v565_v3 = vld [vmem:[%s10177_s26 + $0xc28] sm:$0xff] }
  0x73   : > { %564 = vst [vmem:[%s10185_s27 + $0x610] sm:$0xff] %v563_v2  ;;  %v567_v4 = vld [vmem:[%s10177_s26 + $0xc40] sm:$0xff]  ;;  %v569_v5 = vld [vmem:[%s10177_s26 + $0xc48] sm:$0xff]  ;;  %566 = vst [vmem:[%s10185_s27 + $0x618] sm:$0xff] %v565_v3 }
  0x74   : > { %568 = vst [vmem:[%s10185_s27 + $0x620] sm:$0xff] %v567_v4  ;;  %570 = vst [vmem:[%s10185_s27 + $0x628] sm:$0xff] %v569_v5  ;;  %v571_v6 = vld [vmem:[%s10177_s26 + $0xc60] sm:$0xff]  ;;  %v573_v7 = vld [vmem:[%s10177_s26 + $0xc68] sm:$0xff] }
  0x75   : > { %v575_v8 = vld [vmem:[%s10177_s26 + $0xc80] sm:$0xff]  ;;  %572 = vst [vmem:[%s10185_s27 + $0x630] sm:$0xff] %v571_v6  ;;  %574 = vst [vmem:[%s10185_s27 + $0x638] sm:$0xff] %v573_v7  ;;  %v577_v9 = vld [vmem:[%s10177_s26 + $0xc88] sm:$0xff] }
  0x76   : > { %576 = vst [vmem:[%s10185_s27 + $0x640] sm:$0xff] %v575_v8  ;;  %v579_v10 = vld [vmem:[%s10177_s26 + $0xca0] sm:$0xff]  ;;  %v581_v11 = vld [vmem:[%s10177_s26 + $0xca8] sm:$0xff]  ;;  %578 = vst [vmem:[%s10185_s27 + $0x648] sm:$0xff] %v577_v9 }
  0x77   : > { %580 = vst [vmem:[%s10185_s27 + $0x650] sm:$0xff] %v579_v10  ;;  %582 = vst [vmem:[%s10185_s27 + $0x658] sm:$0xff] %v581_v11  ;;  %v583_v12 = vld [vmem:[%s10177_s26 + $0xcc0] sm:$0xff]  ;;  %v585_v13 = vld [vmem:[%s10177_s26 + $0xcc8] sm:$0xff] }
  0x78   : > { %v587_v14 = vld [vmem:[%s10177_s26 + $0xce0] sm:$0xff]  ;;  %584 = vst [vmem:[%s10185_s27 + $0x660] sm:$0xff] %v583_v12  ;;  %586 = vst [vmem:[%s10185_s27 + $0x668] sm:$0xff] %v585_v13  ;;  %v589_v15 = vld [vmem:[%s10177_s26 + $0xce8] sm:$0xff] }
  0x79   : > { %588 = vst [vmem:[%s10185_s27 + $0x670] sm:$0xff] %v587_v14  ;;  %v591_v16 = vld [vmem:[%s10177_s26 + $0xd00] sm:$0xff]  ;;  %v593_v17 = vld [vmem:[%s10177_s26 + $0xd08] sm:$0xff]  ;;  %590 = vst [vmem:[%s10185_s27 + $0x678] sm:$0xff] %v589_v15 }
  0x7a   : > { %592 = vst [vmem:[%s10185_s27 + $0x680] sm:$0xff] %v591_v16  ;;  %594 = vst [vmem:[%s10185_s27 + $0x688] sm:$0xff] %v593_v17  ;;  %v595_v18 = vld [vmem:[%s10177_s26 + $0xd20] sm:$0xff]  ;;  %v597_v19 = vld [vmem:[%s10177_s26 + $0xd28] sm:$0xff] }
  0x7b   : > { %v599_v20 = vld [vmem:[%s10177_s26 + $0xd40] sm:$0xff]  ;;  %596 = vst [vmem:[%s10185_s27 + $0x690] sm:$0xff] %v595_v18  ;;  %598 = vst [vmem:[%s10185_s27 + $0x698] sm:$0xff] %v597_v19  ;;  %v601_v21 = vld [vmem:[%s10177_s26 + $0xd48] sm:$0xff] }
  0x7c   : > { %600 = vst [vmem:[%s10185_s27 + $0x6a0] sm:$0xff] %v599_v20  ;;  %v603_v22 = vld [vmem:[%s10177_s26 + $0xd60] sm:$0xff]  ;;  %v605_v23 = vld [vmem:[%s10177_s26 + $0xd68] sm:$0xff]  ;;  %602 = vst [vmem:[%s10185_s27 + $0x6a8] sm:$0xff] %v601_v21 }
  0x7d   : > { %604 = vst [vmem:[%s10185_s27 + $0x6b0] sm:$0xff] %v603_v22  ;;  %606 = vst [vmem:[%s10185_s27 + $0x6b8] sm:$0xff] %v605_v23  ;;  %v607_v24 = vld [vmem:[%s10177_s26 + $0xd80] sm:$0xff]  ;;  %v609_v25 = vld [vmem:[%s10177_s26 + $0xd88] sm:$0xff] }
  0x7e   : > { %v611_v26 = vld [vmem:[%s10177_s26 + $0xda0] sm:$0xff]  ;;  %608 = vst [vmem:[%s10185_s27 + $0x6c0] sm:$0xff] %v607_v24  ;;  %610 = vst [vmem:[%s10185_s27 + $0x6c8] sm:$0xff] %v609_v25  ;;  %v613_v27 = vld [vmem:[%s10177_s26 + $0xda8] sm:$0xff] }
  0x7f   : > { %612 = vst [vmem:[%s10185_s27 + $0x6d0] sm:$0xff] %v611_v26  ;;  %v615_v28 = vld [vmem:[%s10177_s26 + $0xdc0] sm:$0xff]  ;;  %v617_v29 = vld [vmem:[%s10177_s26 + $0xdc8] sm:$0xff]  ;;  %614 = vst [vmem:[%s10185_s27 + $0x6d8] sm:$0xff] %v613_v27 }
  0x80   : > { %616 = vst [vmem:[%s10185_s27 + $0x6e0] sm:$0xff] %v615_v28  ;;  %618 = vst [vmem:[%s10185_s27 + $0x6e8] sm:$0xff] %v617_v29  ;;  %v619_v30 = vld [vmem:[%s10177_s26 + $0xde0] sm:$0xff]  ;;  %v621_v31 = vld [vmem:[%s10177_s26 + $0xde8] sm:$0xff] }
  0x81   : > { %v623_v32 = vld [vmem:[%s10177_s26 + $0xe00] sm:$0xff]  ;;  %620 = vst [vmem:[%s10185_s27 + $0x6f0] sm:$0xff] %v619_v30  ;;  %622 = vst [vmem:[%s10185_s27 + $0x6f8] sm:$0xff] %v621_v31  ;;  %v625_v33 = vld [vmem:[%s10177_s26 + $0xe08] sm:$0xff] }
  0x82   : > { %624 = vst [vmem:[%s10185_s27 + $0x700] sm:$0xff] %v623_v32  ;;  %v627_v34 = vld [vmem:[%s10177_s26 + $0xe20] sm:$0xff]  ;;  %v629_v35 = vld [vmem:[%s10177_s26 + $0xe28] sm:$0xff]  ;;  %626 = vst [vmem:[%s10185_s27 + $0x708] sm:$0xff] %v625_v33 }
  0x83   : > { %628 = vst [vmem:[%s10185_s27 + $0x710] sm:$0xff] %v627_v34  ;;  %630 = vst [vmem:[%s10185_s27 + $0x718] sm:$0xff] %v629_v35  ;;  %v631_v36 = vld [vmem:[%s10177_s26 + $0xe40] sm:$0xff]  ;;  %v633_v37 = vld [vmem:[%s10177_s26 + $0xe48] sm:$0xff] }
  0x84   : > { %v635_v38 = vld [vmem:[%s10177_s26 + $0xe60] sm:$0xff]  ;;  %632 = vst [vmem:[%s10185_s27 + $0x720] sm:$0xff] %v631_v36  ;;  %634 = vst [vmem:[%s10185_s27 + $0x728] sm:$0xff] %v633_v37  ;;  %v637_v39 = vld [vmem:[%s10177_s26 + $0xe68] sm:$0xff] }
  0x85   : > { %636 = vst [vmem:[%s10185_s27 + $0x730] sm:$0xff] %v635_v38  ;;  %v639_v40 = vld [vmem:[%s10177_s26 + $0xe80] sm:$0xff]  ;;  %v641_v41 = vld [vmem:[%s10177_s26 + $0xe88] sm:$0xff]  ;;  %638 = vst [vmem:[%s10185_s27 + $0x738] sm:$0xff] %v637_v39 }
  0x86   : > { %640 = vst [vmem:[%s10185_s27 + $0x740] sm:$0xff] %v639_v40  ;;  %642 = vst [vmem:[%s10185_s27 + $0x748] sm:$0xff] %v641_v41  ;;  %v643_v42 = vld [vmem:[%s10177_s26 + $0xea0] sm:$0xff]  ;;  %v645_v43 = vld [vmem:[%s10177_s26 + $0xea8] sm:$0xff] }
  0x87   : > { %v647_v44 = vld [vmem:[%s10177_s26 + $0xec0] sm:$0xff]  ;;  %644 = vst [vmem:[%s10185_s27 + $0x750] sm:$0xff] %v643_v42  ;;  %646 = vst [vmem:[%s10185_s27 + $0x758] sm:$0xff] %v645_v43  ;;  %v649_v45 = vld [vmem:[%s10177_s26 + $0xec8] sm:$0xff] }
  0x88   : > { %648 = vst [vmem:[%s10185_s27 + $0x760] sm:$0xff] %v647_v44  ;;  %v651_v46 = vld [vmem:[%s10177_s26 + $0xee0] sm:$0xff]  ;;  %v653_v47 = vld [vmem:[%s10177_s26 + $0xee8] sm:$0xff]  ;;  %650 = vst [vmem:[%s10185_s27 + $0x768] sm:$0xff] %v649_v45 }
  0x89   : > { %652 = vst [vmem:[%s10185_s27 + $0x770] sm:$0xff] %v651_v46  ;;  %654 = vst [vmem:[%s10185_s27 + $0x778] sm:$0xff] %v653_v47  ;;  %v655_v48 = vld [vmem:[%s10177_s26 + $0xf00] sm:$0xff]  ;;  %v657_v49 = vld [vmem:[%s10177_s26 + $0xf08] sm:$0xff] }
  0x8a   : > { %v659_v50 = vld [vmem:[%s10177_s26 + $0xf20] sm:$0xff]  ;;  %656 = vst [vmem:[%s10185_s27 + $0x780] sm:$0xff] %v655_v48  ;;  %658 = vst [vmem:[%s10185_s27 + $0x788] sm:$0xff] %v657_v49  ;;  %v661_v51 = vld [vmem:[%s10177_s26 + $0xf28] sm:$0xff] }
  0x8b   : > { %660 = vst [vmem:[%s10185_s27 + $0x790] sm:$0xff] %v659_v50  ;;  %v663_v52 = vld [vmem:[%s10177_s26 + $0xf40] sm:$0xff]  ;;  %v665_v53 = vld [vmem:[%s10177_s26 + $0xf48] sm:$0xff]  ;;  %662 = vst [vmem:[%s10185_s27 + $0x798] sm:$0xff] %v661_v51 }
  0x8c   : > { %664 = vst [vmem:[%s10185_s27 + $0x7a0] sm:$0xff] %v663_v52  ;;  %666 = vst [vmem:[%s10185_s27 + $0x7a8] sm:$0xff] %v665_v53  ;;  %v667_v54 = vld [vmem:[%s10177_s26 + $0xf60] sm:$0xff]  ;;  %v669_v55 = vld [vmem:[%s10177_s26 + $0xf68] sm:$0xff] }
  0x8d   : > { %v671_v56 = vld [vmem:[%s10177_s26 + $0xf80] sm:$0xff]  ;;  %668 = vst [vmem:[%s10185_s27 + $0x7b0] sm:$0xff] %v667_v54  ;;  %670 = vst [vmem:[%s10185_s27 + $0x7b8] sm:$0xff] %v669_v55  ;;  %v673_v57 = vld [vmem:[%s10177_s26 + $0xf88] sm:$0xff] }
  0x8e   : > { %672 = vst [vmem:[%s10185_s27 + $0x7c0] sm:$0xff] %v671_v56  ;;  %v675_v58 = vld [vmem:[%s10177_s26 + $0xfa0] sm:$0xff]  ;;  %v677_v59 = vld [vmem:[%s10177_s26 + $0xfa8] sm:$0xff]  ;;  %674 = vst [vmem:[%s10185_s27 + $0x7c8] sm:$0xff] %v673_v57 }
  0x8f   : > { %676 = vst [vmem:[%s10185_s27 + $0x7d0] sm:$0xff] %v675_v58  ;;  %678 = vst [vmem:[%s10185_s27 + $0x7d8] sm:$0xff] %v677_v59  ;;  %v679_v60 = vld [vmem:[%s10177_s26 + $0xfc0] sm:$0xff]  ;;  %v681_v61 = vld [vmem:[%s10177_s26 + $0xfc8] sm:$0xff] }
  0x90   : > { %v683_v62 = vld [vmem:[%s10177_s26 + $0xfe0] sm:$0xff]  ;;  %680 = vst [vmem:[%s10185_s27 + $0x7e0] sm:$0xff] %v679_v60  ;;  %682 = vst [vmem:[%s10185_s27 + $0x7e8] sm:$0xff] %v681_v61  ;;  %v685_v63 = vld [vmem:[%s10177_s26 + $0xfe8] sm:$0xff] }
  0x91   : > { %684 = vst [vmem:[%s10185_s27 + $0x7f0] sm:$0xff] %v683_v62  ;;  %v687_v0 = vld [vmem:[%s10177_s26 + $0x1000] sm:$0xff]  ;;  %v689_v1 = vld [vmem:[%s10177_s26 + $0x1008] sm:$0xff]  ;;  %686 = vst [vmem:[%s10185_s27 + $0x7f8] sm:$0xff] %v685_v63 }
  0x92   : > { %688 = vst [vmem:[%s10185_s27 + $0x800] sm:$0xff] %v687_v0  ;;  %690 = vst [vmem:[%s10185_s27 + $0x808] sm:$0xff] %v689_v1  ;;  %v691_v2 = vld [vmem:[%s10177_s26 + $0x1020] sm:$0xff]  ;;  %v693_v3 = vld [vmem:[%s10177_s26 + $0x1028] sm:$0xff] }
  0x93   : > { %v695_v4 = vld [vmem:[%s10177_s26 + $0x1040] sm:$0xff]  ;;  %692 = vst [vmem:[%s10185_s27 + $0x810] sm:$0xff] %v691_v2  ;;  %694 = vst [vmem:[%s10185_s27 + $0x818] sm:$0xff] %v693_v3  ;;  %v697_v5 = vld [vmem:[%s10177_s26 + $0x1048] sm:$0xff] }
  0x94   : > { %696 = vst [vmem:[%s10185_s27 + $0x820] sm:$0xff] %v695_v4  ;;  %v699_v6 = vld [vmem:[%s10177_s26 + $0x1060] sm:$0xff]  ;;  %v701_v7 = vld [vmem:[%s10177_s26 + $0x1068] sm:$0xff]  ;;  %698 = vst [vmem:[%s10185_s27 + $0x828] sm:$0xff] %v697_v5 }
  0x95   : > { %700 = vst [vmem:[%s10185_s27 + $0x830] sm:$0xff] %v699_v6  ;;  %702 = vst [vmem:[%s10185_s27 + $0x838] sm:$0xff] %v701_v7  ;;  %v703_v8 = vld [vmem:[%s10177_s26 + $0x1080] sm:$0xff]  ;;  %v705_v9 = vld [vmem:[%s10177_s26 + $0x1088] sm:$0xff] }
  0x96   : > { %v707_v10 = vld [vmem:[%s10177_s26 + $0x10a0] sm:$0xff]  ;;  %704 = vst [vmem:[%s10185_s27 + $0x840] sm:$0xff] %v703_v8  ;;  %706 = vst [vmem:[%s10185_s27 + $0x848] sm:$0xff] %v705_v9  ;;  %v709_v11 = vld [vmem:[%s10177_s26 + $0x10a8] sm:$0xff] }
  0x97   : > { %708 = vst [vmem:[%s10185_s27 + $0x850] sm:$0xff] %v707_v10  ;;  %v711_v12 = vld [vmem:[%s10177_s26 + $0x10c0] sm:$0xff]  ;;  %v713_v13 = vld [vmem:[%s10177_s26 + $0x10c8] sm:$0xff]  ;;  %710 = vst [vmem:[%s10185_s27 + $0x858] sm:$0xff] %v709_v11 }
  0x98   : > { %712 = vst [vmem:[%s10185_s27 + $0x860] sm:$0xff] %v711_v12  ;;  %714 = vst [vmem:[%s10185_s27 + $0x868] sm:$0xff] %v713_v13  ;;  %v715_v14 = vld [vmem:[%s10177_s26 + $0x10e0] sm:$0xff]  ;;  %v717_v15 = vld [vmem:[%s10177_s26 + $0x10e8] sm:$0xff] }
  0x99   : > { %v719_v16 = vld [vmem:[%s10177_s26 + $0x1100] sm:$0xff]  ;;  %716 = vst [vmem:[%s10185_s27 + $0x870] sm:$0xff] %v715_v14  ;;  %718 = vst [vmem:[%s10185_s27 + $0x878] sm:$0xff] %v717_v15  ;;  %v721_v17 = vld [vmem:[%s10177_s26 + $0x1108] sm:$0xff] }
  0x9a   : > { %720 = vst [vmem:[%s10185_s27 + $0x880] sm:$0xff] %v719_v16  ;;  %v723_v18 = vld [vmem:[%s10177_s26 + $0x1120] sm:$0xff]  ;;  %v725_v19 = vld [vmem:[%s10177_s26 + $0x1128] sm:$0xff]  ;;  %722 = vst [vmem:[%s10185_s27 + $0x888] sm:$0xff] %v721_v17 }
  0x9b   : > { %724 = vst [vmem:[%s10185_s27 + $0x890] sm:$0xff] %v723_v18  ;;  %726 = vst [vmem:[%s10185_s27 + $0x898] sm:$0xff] %v725_v19  ;;  %v727_v20 = vld [vmem:[%s10177_s26 + $0x1140] sm:$0xff]  ;;  %v729_v21 = vld [vmem:[%s10177_s26 + $0x1148] sm:$0xff] }
  0x9c   : > { %v731_v22 = vld [vmem:[%s10177_s26 + $0x1160] sm:$0xff]  ;;  %728 = vst [vmem:[%s10185_s27 + $0x8a0] sm:$0xff] %v727_v20  ;;  %730 = vst [vmem:[%s10185_s27 + $0x8a8] sm:$0xff] %v729_v21  ;;  %v733_v23 = vld [vmem:[%s10177_s26 + $0x1168] sm:$0xff] }
  0x9d   : > { %732 = vst [vmem:[%s10185_s27 + $0x8b0] sm:$0xff] %v731_v22  ;;  %v735_v24 = vld [vmem:[%s10177_s26 + $0x1180] sm:$0xff]  ;;  %v737_v25 = vld [vmem:[%s10177_s26 + $0x1188] sm:$0xff]  ;;  %734 = vst [vmem:[%s10185_s27 + $0x8b8] sm:$0xff] %v733_v23 }
  0x9e   : > { %736 = vst [vmem:[%s10185_s27 + $0x8c0] sm:$0xff] %v735_v24  ;;  %738 = vst [vmem:[%s10185_s27 + $0x8c8] sm:$0xff] %v737_v25  ;;  %v739_v26 = vld [vmem:[%s10177_s26 + $0x11a0] sm:$0xff]  ;;  %v741_v27 = vld [vmem:[%s10177_s26 + $0x11a8] sm:$0xff] }
  0x9f   : > { %v743_v28 = vld [vmem:[%s10177_s26 + $0x11c0] sm:$0xff]  ;;  %740 = vst [vmem:[%s10185_s27 + $0x8d0] sm:$0xff] %v739_v26  ;;  %742 = vst [vmem:[%s10185_s27 + $0x8d8] sm:$0xff] %v741_v27  ;;  %v745_v29 = vld [vmem:[%s10177_s26 + $0x11c8] sm:$0xff] }
  0xa0   : > { %744 = vst [vmem:[%s10185_s27 + $0x8e0] sm:$0xff] %v743_v28  ;;  %v747_v30 = vld [vmem:[%s10177_s26 + $0x11e0] sm:$0xff]  ;;  %v749_v31 = vld [vmem:[%s10177_s26 + $0x11e8] sm:$0xff]  ;;  %746 = vst [vmem:[%s10185_s27 + $0x8e8] sm:$0xff] %v745_v29 }
  0xa1   : > { %748 = vst [vmem:[%s10185_s27 + $0x8f0] sm:$0xff] %v747_v30  ;;  %750 = vst [vmem:[%s10185_s27 + $0x8f8] sm:$0xff] %v749_v31  ;;  %v751_v32 = vld [vmem:[%s10177_s26 + $0x1200] sm:$0xff]  ;;  %v753_v33 = vld [vmem:[%s10177_s26 + $0x1208] sm:$0xff] }
  0xa2   : > { %v755_v34 = vld [vmem:[%s10177_s26 + $0x1220] sm:$0xff]  ;;  %752 = vst [vmem:[%s10185_s27 + $0x900] sm:$0xff] %v751_v32  ;;  %754 = vst [vmem:[%s10185_s27 + $0x908] sm:$0xff] %v753_v33  ;;  %v757_v35 = vld [vmem:[%s10177_s26 + $0x1228] sm:$0xff] }
  0xa3   : > { %756 = vst [vmem:[%s10185_s27 + $0x910] sm:$0xff] %v755_v34  ;;  %v759_v36 = vld [vmem:[%s10177_s26 + $0x1240] sm:$0xff]  ;;  %v761_v37 = vld [vmem:[%s10177_s26 + $0x1248] sm:$0xff]  ;;  %758 = vst [vmem:[%s10185_s27 + $0x918] sm:$0xff] %v757_v35 }
  0xa4   : > { %760 = vst [vmem:[%s10185_s27 + $0x920] sm:$0xff] %v759_v36  ;;  %762 = vst [vmem:[%s10185_s27 + $0x928] sm:$0xff] %v761_v37  ;;  %v763_v38 = vld [vmem:[%s10177_s26 + $0x1260] sm:$0xff]  ;;  %v765_v39 = vld [vmem:[%s10177_s26 + $0x1268] sm:$0xff] }
  0xa5   : > { %v767_v40 = vld [vmem:[%s10177_s26 + $0x1280] sm:$0xff]  ;;  %764 = vst [vmem:[%s10185_s27 + $0x930] sm:$0xff] %v763_v38  ;;  %766 = vst [vmem:[%s10185_s27 + $0x938] sm:$0xff] %v765_v39  ;;  %v769_v41 = vld [vmem:[%s10177_s26 + $0x1288] sm:$0xff] }
  0xa6   : > { %768 = vst [vmem:[%s10185_s27 + $0x940] sm:$0xff] %v767_v40  ;;  %v771_v42 = vld [vmem:[%s10177_s26 + $0x12a0] sm:$0xff]  ;;  %v773_v43 = vld [vmem:[%s10177_s26 + $0x12a8] sm:$0xff]  ;;  %770 = vst [vmem:[%s10185_s27 + $0x948] sm:$0xff] %v769_v41 }
  0xa7   : > { %772 = vst [vmem:[%s10185_s27 + $0x950] sm:$0xff] %v771_v42  ;;  %774 = vst [vmem:[%s10185_s27 + $0x958] sm:$0xff] %v773_v43  ;;  %v775_v44 = vld [vmem:[%s10177_s26 + $0x12c0] sm:$0xff]  ;;  %v777_v45 = vld [vmem:[%s10177_s26 + $0x12c8] sm:$0xff] }
  0xa8   : > { %v779_v46 = vld [vmem:[%s10177_s26 + $0x12e0] sm:$0xff]  ;;  %776 = vst [vmem:[%s10185_s27 + $0x960] sm:$0xff] %v775_v44  ;;  %778 = vst [vmem:[%s10185_s27 + $0x968] sm:$0xff] %v777_v45  ;;  %v781_v47 = vld [vmem:[%s10177_s26 + $0x12e8] sm:$0xff] }
  0xa9   : > { %780 = vst [vmem:[%s10185_s27 + $0x970] sm:$0xff] %v779_v46  ;;  %v783_v48 = vld [vmem:[%s10177_s26 + $0x1300] sm:$0xff]  ;;  %v785_v49 = vld [vmem:[%s10177_s26 + $0x1308] sm:$0xff]  ;;  %782 = vst [vmem:[%s10185_s27 + $0x978] sm:$0xff] %v781_v47 }
  0xaa   : > { %784 = vst [vmem:[%s10185_s27 + $0x980] sm:$0xff] %v783_v48  ;;  %786 = vst [vmem:[%s10185_s27 + $0x988] sm:$0xff] %v785_v49  ;;  %v787_v50 = vld [vmem:[%s10177_s26 + $0x1320] sm:$0xff]  ;;  %v789_v51 = vld [vmem:[%s10177_s26 + $0x1328] sm:$0xff] }
  0xab   : > { %v791_v52 = vld [vmem:[%s10177_s26 + $0x1340] sm:$0xff]  ;;  %788 = vst [vmem:[%s10185_s27 + $0x990] sm:$0xff] %v787_v50  ;;  %790 = vst [vmem:[%s10185_s27 + $0x998] sm:$0xff] %v789_v51  ;;  %v793_v53 = vld [vmem:[%s10177_s26 + $0x1348] sm:$0xff] }
  0xac   : > { %792 = vst [vmem:[%s10185_s27 + $0x9a0] sm:$0xff] %v791_v52  ;;  %v795_v54 = vld [vmem:[%s10177_s26 + $0x1360] sm:$0xff]  ;;  %v797_v55 = vld [vmem:[%s10177_s26 + $0x1368] sm:$0xff]  ;;  %794 = vst [vmem:[%s10185_s27 + $0x9a8] sm:$0xff] %v793_v53 }
  0xad   : > { %796 = vst [vmem:[%s10185_s27 + $0x9b0] sm:$0xff] %v795_v54  ;;  %798 = vst [vmem:[%s10185_s27 + $0x9b8] sm:$0xff] %v797_v55  ;;  %v799_v56 = vld [vmem:[%s10177_s26 + $0x1380] sm:$0xff]  ;;  %v801_v57 = vld [vmem:[%s10177_s26 + $0x1388] sm:$0xff] }
  0xae   : > { %v803_v58 = vld [vmem:[%s10177_s26 + $0x13a0] sm:$0xff]  ;;  %800 = vst [vmem:[%s10185_s27 + $0x9c0] sm:$0xff] %v799_v56  ;;  %802 = vst [vmem:[%s10185_s27 + $0x9c8] sm:$0xff] %v801_v57  ;;  %v805_v59 = vld [vmem:[%s10177_s26 + $0x13a8] sm:$0xff] }
  0xaf   : > { %804 = vst [vmem:[%s10185_s27 + $0x9d0] sm:$0xff] %v803_v58  ;;  %v807_v60 = vld [vmem:[%s10177_s26 + $0x13c0] sm:$0xff]  ;;  %v809_v61 = vld [vmem:[%s10177_s26 + $0x13c8] sm:$0xff]  ;;  %806 = vst [vmem:[%s10185_s27 + $0x9d8] sm:$0xff] %v805_v59 }
  0xb0   : > { %808 = vst [vmem:[%s10185_s27 + $0x9e0] sm:$0xff] %v807_v60  ;;  %810 = vst [vmem:[%s10185_s27 + $0x9e8] sm:$0xff] %v809_v61  ;;  %v811_v62 = vld [vmem:[%s10177_s26 + $0x13e0] sm:$0xff]  ;;  %v813_v63 = vld [vmem:[%s10177_s26 + $0x13e8] sm:$0xff] }
  0xb1   : > { %v815_v0 = vld [vmem:[%s10177_s26 + $0x1400] sm:$0xff]  ;;  %812 = vst [vmem:[%s10185_s27 + $0x9f0] sm:$0xff] %v811_v62  ;;  %814 = vst [vmem:[%s10185_s27 + $0x9f8] sm:$0xff] %v813_v63  ;;  %v817_v1 = vld [vmem:[%s10177_s26 + $0x1408] sm:$0xff] }
  0xb2   : > { %816 = vst [vmem:[%s10185_s27 + $0xa00] sm:$0xff] %v815_v0  ;;  %v819_v2 = vld [vmem:[%s10177_s26 + $0x1420] sm:$0xff]  ;;  %v821_v3 = vld [vmem:[%s10177_s26 + $0x1428] sm:$0xff]  ;;  %818 = vst [vmem:[%s10185_s27 + $0xa08] sm:$0xff] %v817_v1 }
  0xb3   : > { %820 = vst [vmem:[%s10185_s27 + $0xa10] sm:$0xff] %v819_v2  ;;  %822 = vst [vmem:[%s10185_s27 + $0xa18] sm:$0xff] %v821_v3  ;;  %v823_v4 = vld [vmem:[%s10177_s26 + $0x1440] sm:$0xff]  ;;  %v825_v5 = vld [vmem:[%s10177_s26 + $0x1448] sm:$0xff] }
  0xb4   : > { %v827_v6 = vld [vmem:[%s10177_s26 + $0x1460] sm:$0xff]  ;;  %824 = vst [vmem:[%s10185_s27 + $0xa20] sm:$0xff] %v823_v4  ;;  %826 = vst [vmem:[%s10185_s27 + $0xa28] sm:$0xff] %v825_v5  ;;  %v829_v7 = vld [vmem:[%s10177_s26 + $0x1468] sm:$0xff] }
  0xb5   : > { %828 = vst [vmem:[%s10185_s27 + $0xa30] sm:$0xff] %v827_v6  ;;  %v831_v8 = vld [vmem:[%s10177_s26 + $0x1480] sm:$0xff]  ;;  %v833_v9 = vld [vmem:[%s10177_s26 + $0x1488] sm:$0xff]  ;;  %830 = vst [vmem:[%s10185_s27 + $0xa38] sm:$0xff] %v829_v7 }
  0xb6   : > { %832 = vst [vmem:[%s10185_s27 + $0xa40] sm:$0xff] %v831_v8  ;;  %834 = vst [vmem:[%s10185_s27 + $0xa48] sm:$0xff] %v833_v9  ;;  %v835_v10 = vld [vmem:[%s10177_s26 + $0x14a0] sm:$0xff]  ;;  %v837_v11 = vld [vmem:[%s10177_s26 + $0x14a8] sm:$0xff] }
  0xb7   : > { %v839_v12 = vld [vmem:[%s10177_s26 + $0x14c0] sm:$0xff]  ;;  %836 = vst [vmem:[%s10185_s27 + $0xa50] sm:$0xff] %v835_v10  ;;  %838 = vst [vmem:[%s10185_s27 + $0xa58] sm:$0xff] %v837_v11  ;;  %v841_v13 = vld [vmem:[%s10177_s26 + $0x14c8] sm:$0xff] }
  0xb8   : > { %840 = vst [vmem:[%s10185_s27 + $0xa60] sm:$0xff] %v839_v12  ;;  %v843_v14 = vld [vmem:[%s10177_s26 + $0x14e0] sm:$0xff]  ;;  %v845_v15 = vld [vmem:[%s10177_s26 + $0x14e8] sm:$0xff]  ;;  %842 = vst [vmem:[%s10185_s27 + $0xa68] sm:$0xff] %v841_v13 }
  0xb9   : > { %844 = vst [vmem:[%s10185_s27 + $0xa70] sm:$0xff] %v843_v14  ;;  %846 = vst [vmem:[%s10185_s27 + $0xa78] sm:$0xff] %v845_v15  ;;  %v847_v16 = vld [vmem:[%s10177_s26 + $0x1500] sm:$0xff]  ;;  %v849_v17 = vld [vmem:[%s10177_s26 + $0x1508] sm:$0xff] }
  0xba   : > { %v851_v18 = vld [vmem:[%s10177_s26 + $0x1520] sm:$0xff]  ;;  %848 = vst [vmem:[%s10185_s27 + $0xa80] sm:$0xff] %v847_v16  ;;  %850 = vst [vmem:[%s10185_s27 + $0xa88] sm:$0xff] %v849_v17  ;;  %v853_v19 = vld [vmem:[%s10177_s26 + $0x1528] sm:$0xff] }
  0xbb   : > { %852 = vst [vmem:[%s10185_s27 + $0xa90] sm:$0xff] %v851_v18  ;;  %v855_v20 = vld [vmem:[%s10177_s26 + $0x1540] sm:$0xff]  ;;  %v857_v21 = vld [vmem:[%s10177_s26 + $0x1548] sm:$0xff]  ;;  %854 = vst [vmem:[%s10185_s27 + $0xa98] sm:$0xff] %v853_v19 }
  0xbc   : > { %856 = vst [vmem:[%s10185_s27 + $0xaa0] sm:$0xff] %v855_v20  ;;  %858 = vst [vmem:[%s10185_s27 + $0xaa8] sm:$0xff] %v857_v21  ;;  %v859_v22 = vld [vmem:[%s10177_s26 + $0x1560] sm:$0xff]  ;;  %v861_v23 = vld [vmem:[%s10177_s26 + $0x1568] sm:$0xff] }
  0xbd   : > { %v863_v24 = vld [vmem:[%s10177_s26 + $0x1580] sm:$0xff]  ;;  %860 = vst [vmem:[%s10185_s27 + $0xab0] sm:$0xff] %v859_v22  ;;  %862 = vst [vmem:[%s10185_s27 + $0xab8] sm:$0xff] %v861_v23  ;;  %v865_v25 = vld [vmem:[%s10177_s26 + $0x1588] sm:$0xff] }
  0xbe   : > { %864 = vst [vmem:[%s10185_s27 + $0xac0] sm:$0xff] %v863_v24  ;;  %v867_v26 = vld [vmem:[%s10177_s26 + $0x15a0] sm:$0xff]  ;;  %v869_v27 = vld [vmem:[%s10177_s26 + $0x15a8] sm:$0xff]  ;;  %866 = vst [vmem:[%s10185_s27 + $0xac8] sm:$0xff] %v865_v25 }
  0xbf   : > { %868 = vst [vmem:[%s10185_s27 + $0xad0] sm:$0xff] %v867_v26  ;;  %870 = vst [vmem:[%s10185_s27 + $0xad8] sm:$0xff] %v869_v27  ;;  %v871_v28 = vld [vmem:[%s10177_s26 + $0x15c0] sm:$0xff]  ;;  %v873_v29 = vld [vmem:[%s10177_s26 + $0x15c8] sm:$0xff] }
  0xc0   : > { %v875_v30 = vld [vmem:[%s10177_s26 + $0x15e0] sm:$0xff]  ;;  %872 = vst [vmem:[%s10185_s27 + $0xae0] sm:$0xff] %v871_v28  ;;  %874 = vst [vmem:[%s10185_s27 + $0xae8] sm:$0xff] %v873_v29  ;;  %v877_v31 = vld [vmem:[%s10177_s26 + $0x15e8] sm:$0xff] }
  0xc1   : > { %876 = vst [vmem:[%s10185_s27 + $0xaf0] sm:$0xff] %v875_v30  ;;  %v879_v32 = vld [vmem:[%s10177_s26 + $0x1600] sm:$0xff]  ;;  %v881_v33 = vld [vmem:[%s10177_s26 + $0x1608] sm:$0xff]  ;;  %878 = vst [vmem:[%s10185_s27 + $0xaf8] sm:$0xff] %v877_v31 }
  0xc2   : > { %880 = vst [vmem:[%s10185_s27 + $0xb00] sm:$0xff] %v879_v32  ;;  %882 = vst [vmem:[%s10185_s27 + $0xb08] sm:$0xff] %v881_v33  ;;  %v883_v34 = vld [vmem:[%s10177_s26 + $0x1620] sm:$0xff]  ;;  %v885_v35 = vld [vmem:[%s10177_s26 + $0x1628] sm:$0xff] }
  0xc3   : > { %v887_v36 = vld [vmem:[%s10177_s26 + $0x1640] sm:$0xff]  ;;  %884 = vst [vmem:[%s10185_s27 + $0xb10] sm:$0xff] %v883_v34  ;;  %886 = vst [vmem:[%s10185_s27 + $0xb18] sm:$0xff] %v885_v35  ;;  %v889_v37 = vld [vmem:[%s10177_s26 + $0x1648] sm:$0xff] }
  0xc4   : > { %888 = vst [vmem:[%s10185_s27 + $0xb20] sm:$0xff] %v887_v36  ;;  %v891_v38 = vld [vmem:[%s10177_s26 + $0x1660] sm:$0xff]  ;;  %v893_v39 = vld [vmem:[%s10177_s26 + $0x1668] sm:$0xff]  ;;  %890 = vst [vmem:[%s10185_s27 + $0xb28] sm:$0xff] %v889_v37 }
  0xc5   : > { %892 = vst [vmem:[%s10185_s27 + $0xb30] sm:$0xff] %v891_v38  ;;  %894 = vst [vmem:[%s10185_s27 + $0xb38] sm:$0xff] %v893_v39  ;;  %v895_v40 = vld [vmem:[%s10177_s26 + $0x1680] sm:$0xff]  ;;  %v897_v41 = vld [vmem:[%s10177_s26 + $0x1688] sm:$0xff] }
  0xc6   : > { %v899_v42 = vld [vmem:[%s10177_s26 + $0x16a0] sm:$0xff]  ;;  %896 = vst [vmem:[%s10185_s27 + $0xb40] sm:$0xff] %v895_v40  ;;  %898 = vst [vmem:[%s10185_s27 + $0xb48] sm:$0xff] %v897_v41  ;;  %v901_v43 = vld [vmem:[%s10177_s26 + $0x16a8] sm:$0xff] }
  0xc7   : > { %900 = vst [vmem:[%s10185_s27 + $0xb50] sm:$0xff] %v899_v42  ;;  %v903_v44 = vld [vmem:[%s10177_s26 + $0x16c0] sm:$0xff]  ;;  %v905_v45 = vld [vmem:[%s10177_s26 + $0x16c8] sm:$0xff]  ;;  %902 = vst [vmem:[%s10185_s27 + $0xb58] sm:$0xff] %v901_v43 }
  0xc8   : > { %904 = vst [vmem:[%s10185_s27 + $0xb60] sm:$0xff] %v903_v44  ;;  %906 = vst [vmem:[%s10185_s27 + $0xb68] sm:$0xff] %v905_v45  ;;  %v907_v46 = vld [vmem:[%s10177_s26 + $0x16e0] sm:$0xff]  ;;  %v909_v47 = vld [vmem:[%s10177_s26 + $0x16e8] sm:$0xff] }
  0xc9   : > { %v911_v48 = vld [vmem:[%s10177_s26 + $0x1700] sm:$0xff]  ;;  %908 = vst [vmem:[%s10185_s27 + $0xb70] sm:$0xff] %v907_v46  ;;  %910 = vst [vmem:[%s10185_s27 + $0xb78] sm:$0xff] %v909_v47  ;;  %v913_v49 = vld [vmem:[%s10177_s26 + $0x1708] sm:$0xff] }
  0xca   : > { %912 = vst [vmem:[%s10185_s27 + $0xb80] sm:$0xff] %v911_v48  ;;  %v915_v50 = vld [vmem:[%s10177_s26 + $0x1720] sm:$0xff]  ;;  %v917_v51 = vld [vmem:[%s10177_s26 + $0x1728] sm:$0xff]  ;;  %914 = vst [vmem:[%s10185_s27 + $0xb88] sm:$0xff] %v913_v49 }
  0xcb   : > { %916 = vst [vmem:[%s10185_s27 + $0xb90] sm:$0xff] %v915_v50  ;;  %918 = vst [vmem:[%s10185_s27 + $0xb98] sm:$0xff] %v917_v51  ;;  %v919_v52 = vld [vmem:[%s10177_s26 + $0x1740] sm:$0xff]  ;;  %v921_v53 = vld [vmem:[%s10177_s26 + $0x1748] sm:$0xff] }
  0xcc   : > { %v923_v54 = vld [vmem:[%s10177_s26 + $0x1760] sm:$0xff]  ;;  %920 = vst [vmem:[%s10185_s27 + $0xba0] sm:$0xff] %v919_v52  ;;  %922 = vst [vmem:[%s10185_s27 + $0xba8] sm:$0xff] %v921_v53  ;;  %v925_v55 = vld [vmem:[%s10177_s26 + $0x1768] sm:$0xff] }
  0xcd   : > { %924 = vst [vmem:[%s10185_s27 + $0xbb0] sm:$0xff] %v923_v54  ;;  %v927_v56 = vld [vmem:[%s10177_s26 + $0x1780] sm:$0xff]  ;;  %v929_v57 = vld [vmem:[%s10177_s26 + $0x1788] sm:$0xff]  ;;  %926 = vst [vmem:[%s10185_s27 + $0xbb8] sm:$0xff] %v925_v55 }
  0xce   : > { %928 = vst [vmem:[%s10185_s27 + $0xbc0] sm:$0xff] %v927_v56  ;;  %930 = vst [vmem:[%s10185_s27 + $0xbc8] sm:$0xff] %v929_v57  ;;  %v931_v58 = vld [vmem:[%s10177_s26 + $0x17a0] sm:$0xff]  ;;  %v933_v59 = vld [vmem:[%s10177_s26 + $0x17a8] sm:$0xff] }
  0xcf   : > { %v935_v60 = vld [vmem:[%s10177_s26 + $0x17c0] sm:$0xff]  ;;  %932 = vst [vmem:[%s10185_s27 + $0xbd0] sm:$0xff] %v931_v58  ;;  %934 = vst [vmem:[%s10185_s27 + $0xbd8] sm:$0xff] %v933_v59  ;;  %v937_v61 = vld [vmem:[%s10177_s26 + $0x17c8] sm:$0xff] }
  0xd0   : > { %936 = vst [vmem:[%s10185_s27 + $0xbe0] sm:$0xff] %v935_v60  ;;  %v939_v62 = vld [vmem:[%s10177_s26 + $0x17e0] sm:$0xff]  ;;  %v941_v63 = vld [vmem:[%s10177_s26 + $0x17e8] sm:$0xff]  ;;  %938 = vst [vmem:[%s10185_s27 + $0xbe8] sm:$0xff] %v937_v61 }
  0xd1   : > { %940 = vst [vmem:[%s10185_s27 + $0xbf0] sm:$0xff] %v939_v62  ;;  %942 = vst [vmem:[%s10185_s27 + $0xbf8] sm:$0xff] %v941_v63  ;;  %v943_v0 = vld [vmem:[%s10177_s26 + $0x1800] sm:$0xff]  ;;  %v945_v1 = vld [vmem:[%s10177_s26 + $0x1808] sm:$0xff] }
  0xd2   : > { %v947_v2 = vld [vmem:[%s10177_s26 + $0x1820] sm:$0xff]  ;;  %944 = vst [vmem:[%s10185_s27 + $0xc00] sm:$0xff] %v943_v0  ;;  %946 = vst [vmem:[%s10185_s27 + $0xc08] sm:$0xff] %v945_v1  ;;  %v949_v3 = vld [vmem:[%s10177_s26 + $0x1828] sm:$0xff] }
  0xd3   : > { %948 = vst [vmem:[%s10185_s27 + $0xc10] sm:$0xff] %v947_v2  ;;  %v951_v4 = vld [vmem:[%s10177_s26 + $0x1840] sm:$0xff]  ;;  %v953_v5 = vld [vmem:[%s10177_s26 + $0x1848] sm:$0xff]  ;;  %950 = vst [vmem:[%s10185_s27 + $0xc18] sm:$0xff] %v949_v3 }
  0xd4   : > { %952 = vst [vmem:[%s10185_s27 + $0xc20] sm:$0xff] %v951_v4  ;;  %954 = vst [vmem:[%s10185_s27 + $0xc28] sm:$0xff] %v953_v5  ;;  %v955_v6 = vld [vmem:[%s10177_s26 + $0x1860] sm:$0xff]  ;;  %v957_v7 = vld [vmem:[%s10177_s26 + $0x1868] sm:$0xff] }
  0xd5   : > { %v959_v8 = vld [vmem:[%s10177_s26 + $0x1880] sm:$0xff]  ;;  %956 = vst [vmem:[%s10185_s27 + $0xc30] sm:$0xff] %v955_v6  ;;  %958 = vst [vmem:[%s10185_s27 + $0xc38] sm:$0xff] %v957_v7  ;;  %v961_v9 = vld [vmem:[%s10177_s26 + $0x1888] sm:$0xff] }
  0xd6   : > { %960 = vst [vmem:[%s10185_s27 + $0xc40] sm:$0xff] %v959_v8  ;;  %v963_v10 = vld [vmem:[%s10177_s26 + $0x18a0] sm:$0xff]  ;;  %v965_v11 = vld [vmem:[%s10177_s26 + $0x18a8] sm:$0xff]  ;;  %962 = vst [vmem:[%s10185_s27 + $0xc48] sm:$0xff] %v961_v9 }
  0xd7   : > { %964 = vst [vmem:[%s10185_s27 + $0xc50] sm:$0xff] %v963_v10  ;;  %966 = vst [vmem:[%s10185_s27 + $0xc58] sm:$0xff] %v965_v11  ;;  %v967_v12 = vld [vmem:[%s10177_s26 + $0x18c0] sm:$0xff]  ;;  %v969_v13 = vld [vmem:[%s10177_s26 + $0x18c8] sm:$0xff] }
  0xd8   : > { %v971_v14 = vld [vmem:[%s10177_s26 + $0x18e0] sm:$0xff]  ;;  %968 = vst [vmem:[%s10185_s27 + $0xc60] sm:$0xff] %v967_v12  ;;  %970 = vst [vmem:[%s10185_s27 + $0xc68] sm:$0xff] %v969_v13  ;;  %v973_v15 = vld [vmem:[%s10177_s26 + $0x18e8] sm:$0xff] }
  0xd9   : > { %972 = vst [vmem:[%s10185_s27 + $0xc70] sm:$0xff] %v971_v14  ;;  %v975_v16 = vld [vmem:[%s10177_s26 + $0x1900] sm:$0xff]  ;;  %v977_v17 = vld [vmem:[%s10177_s26 + $0x1908] sm:$0xff]  ;;  %974 = vst [vmem:[%s10185_s27 + $0xc78] sm:$0xff] %v973_v15 }
  0xda   : > { %976 = vst [vmem:[%s10185_s27 + $0xc80] sm:$0xff] %v975_v16  ;;  %978 = vst [vmem:[%s10185_s27 + $0xc88] sm:$0xff] %v977_v17  ;;  %v979_v18 = vld [vmem:[%s10177_s26 + $0x1920] sm:$0xff]  ;;  %v981_v19 = vld [vmem:[%s10177_s26 + $0x1928] sm:$0xff] }
  0xdb   : > { %v983_v20 = vld [vmem:[%s10177_s26 + $0x1940] sm:$0xff]  ;;  %980 = vst [vmem:[%s10185_s27 + $0xc90] sm:$0xff] %v979_v18  ;;  %982 = vst [vmem:[%s10185_s27 + $0xc98] sm:$0xff] %v981_v19  ;;  %v985_v21 = vld [vmem:[%s10177_s26 + $0x1948] sm:$0xff] }
  0xdc   : > { %984 = vst [vmem:[%s10185_s27 + $0xca0] sm:$0xff] %v983_v20  ;;  %v987_v22 = vld [vmem:[%s10177_s26 + $0x1960] sm:$0xff]  ;;  %v989_v23 = vld [vmem:[%s10177_s26 + $0x1968] sm:$0xff]  ;;  %986 = vst [vmem:[%s10185_s27 + $0xca8] sm:$0xff] %v985_v21 }
  0xdd   : > { %988 = vst [vmem:[%s10185_s27 + $0xcb0] sm:$0xff] %v987_v22  ;;  %990 = vst [vmem:[%s10185_s27 + $0xcb8] sm:$0xff] %v989_v23  ;;  %v991_v24 = vld [vmem:[%s10177_s26 + $0x1980] sm:$0xff]  ;;  %v993_v25 = vld [vmem:[%s10177_s26 + $0x1988] sm:$0xff] }
  0xde   : > { %v995_v26 = vld [vmem:[%s10177_s26 + $0x19a0] sm:$0xff]  ;;  %992 = vst [vmem:[%s10185_s27 + $0xcc0] sm:$0xff] %v991_v24  ;;  %994 = vst [vmem:[%s10185_s27 + $0xcc8] sm:$0xff] %v993_v25  ;;  %v997_v27 = vld [vmem:[%s10177_s26 + $0x19a8] sm:$0xff] }
  0xdf   : > { %996 = vst [vmem:[%s10185_s27 + $0xcd0] sm:$0xff] %v995_v26  ;;  %v999_v28 = vld [vmem:[%s10177_s26 + $0x19c0] sm:$0xff]  ;;  %v1001_v29 = vld [vmem:[%s10177_s26 + $0x19c8] sm:$0xff]  ;;  %998 = vst [vmem:[%s10185_s27 + $0xcd8] sm:$0xff] %v997_v27 }
  0xe0   : > { %1000 = vst [vmem:[%s10185_s27 + $0xce0] sm:$0xff] %v999_v28  ;;  %1002 = vst [vmem:[%s10185_s27 + $0xce8] sm:$0xff] %v1001_v29  ;;  %v1003_v30 = vld [vmem:[%s10177_s26 + $0x19e0] sm:$0xff]  ;;  %v1005_v31 = vld [vmem:[%s10177_s26 + $0x19e8] sm:$0xff] }
  0xe1   : > { %v1007_v32 = vld [vmem:[%s10177_s26 + $0x1a00] sm:$0xff]  ;;  %1004 = vst [vmem:[%s10185_s27 + $0xcf0] sm:$0xff] %v1003_v30  ;;  %1006 = vst [vmem:[%s10185_s27 + $0xcf8] sm:$0xff] %v1005_v31  ;;  %v1009_v33 = vld [vmem:[%s10177_s26 + $0x1a08] sm:$0xff] }
  0xe2   : > { %1008 = vst [vmem:[%s10185_s27 + $0xd00] sm:$0xff] %v1007_v32  ;;  %v1011_v34 = vld [vmem:[%s10177_s26 + $0x1a20] sm:$0xff]  ;;  %v1013_v35 = vld [vmem:[%s10177_s26 + $0x1a28] sm:$0xff]  ;;  %1010 = vst [vmem:[%s10185_s27 + $0xd08] sm:$0xff] %v1009_v33 }
  0xe3   : > { %1012 = vst [vmem:[%s10185_s27 + $0xd10] sm:$0xff] %v1011_v34  ;;  %1014 = vst [vmem:[%s10185_s27 + $0xd18] sm:$0xff] %v1013_v35  ;;  %v1015_v36 = vld [vmem:[%s10177_s26 + $0x1a40] sm:$0xff]  ;;  %v1017_v37 = vld [vmem:[%s10177_s26 + $0x1a48] sm:$0xff] }
  0xe4   : > { %v1019_v38 = vld [vmem:[%s10177_s26 + $0x1a60] sm:$0xff]  ;;  %1016 = vst [vmem:[%s10185_s27 + $0xd20] sm:$0xff] %v1015_v36  ;;  %1018 = vst [vmem:[%s10185_s27 + $0xd28] sm:$0xff] %v1017_v37  ;;  %v1021_v39 = vld [vmem:[%s10177_s26 + $0x1a68] sm:$0xff] }
  0xe5   : > { %1020 = vst [vmem:[%s10185_s27 + $0xd30] sm:$0xff] %v1019_v38  ;;  %v1023_v40 = vld [vmem:[%s10177_s26 + $0x1a80] sm:$0xff]  ;;  %v1025_v41 = vld [vmem:[%s10177_s26 + $0x1a88] sm:$0xff]  ;;  %1022 = vst [vmem:[%s10185_s27 + $0xd38] sm:$0xff] %v1021_v39 }
  0xe6   : > { %1024 = vst [vmem:[%s10185_s27 + $0xd40] sm:$0xff] %v1023_v40  ;;  %1026 = vst [vmem:[%s10185_s27 + $0xd48] sm:$0xff] %v1025_v41  ;;  %v1027_v42 = vld [vmem:[%s10177_s26 + $0x1aa0] sm:$0xff]  ;;  %v1029_v43 = vld [vmem:[%s10177_s26 + $0x1aa8] sm:$0xff] }
  0xe7   : > { %v1031_v44 = vld [vmem:[%s10177_s26 + $0x1ac0] sm:$0xff]  ;;  %1028 = vst [vmem:[%s10185_s27 + $0xd50] sm:$0xff] %v1027_v42  ;;  %1030 = vst [vmem:[%s10185_s27 + $0xd58] sm:$0xff] %v1029_v43  ;;  %v1033_v45 = vld [vmem:[%s10177_s26 + $0x1ac8] sm:$0xff] }
  0xe8   : > { %1032 = vst [vmem:[%s10185_s27 + $0xd60] sm:$0xff] %v1031_v44  ;;  %v1035_v46 = vld [vmem:[%s10177_s26 + $0x1ae0] sm:$0xff]  ;;  %v1037_v47 = vld [vmem:[%s10177_s26 + $0x1ae8] sm:$0xff]  ;;  %1034 = vst [vmem:[%s10185_s27 + $0xd68] sm:$0xff] %v1033_v45 }
  0xe9   : > { %1036 = vst [vmem:[%s10185_s27 + $0xd70] sm:$0xff] %v1035_v46  ;;  %1038 = vst [vmem:[%s10185_s27 + $0xd78] sm:$0xff] %v1037_v47  ;;  %v1039_v48 = vld [vmem:[%s10177_s26 + $0x1b00] sm:$0xff]  ;;  %v1041_v49 = vld [vmem:[%s10177_s26 + $0x1b08] sm:$0xff] }
  0xea   : > { %v1043_v50 = vld [vmem:[%s10177_s26 + $0x1b20] sm:$0xff]  ;;  %1040 = vst [vmem:[%s10185_s27 + $0xd80] sm:$0xff] %v1039_v48  ;;  %1042 = vst [vmem:[%s10185_s27 + $0xd88] sm:$0xff] %v1041_v49  ;;  %v1045_v51 = vld [vmem:[%s10177_s26 + $0x1b28] sm:$0xff] }
  0xeb   : > { %1044 = vst [vmem:[%s10185_s27 + $0xd90] sm:$0xff] %v1043_v50  ;;  %v1047_v52 = vld [vmem:[%s10177_s26 + $0x1b40] sm:$0xff]  ;;  %v1049_v53 = vld [vmem:[%s10177_s26 + $0x1b48] sm:$0xff]  ;;  %1046 = vst [vmem:[%s10185_s27 + $0xd98] sm:$0xff] %v1045_v51 }
  0xec   : > { %1048 = vst [vmem:[%s10185_s27 + $0xda0] sm:$0xff] %v1047_v52  ;;  %1050 = vst [vmem:[%s10185_s27 + $0xda8] sm:$0xff] %v1049_v53  ;;  %v1051_v54 = vld [vmem:[%s10177_s26 + $0x1b60] sm:$0xff]  ;;  %v1053_v55 = vld [vmem:[%s10177_s26 + $0x1b68] sm:$0xff] }
  0xed   : > { %v1055_v56 = vld [vmem:[%s10177_s26 + $0x1b80] sm:$0xff]  ;;  %1052 = vst [vmem:[%s10185_s27 + $0xdb0] sm:$0xff] %v1051_v54  ;;  %1054 = vst [vmem:[%s10185_s27 + $0xdb8] sm:$0xff] %v1053_v55  ;;  %v1057_v57 = vld [vmem:[%s10177_s26 + $0x1b88] sm:$0xff] }
  0xee   : > { %1056 = vst [vmem:[%s10185_s27 + $0xdc0] sm:$0xff] %v1055_v56  ;;  %v1059_v58 = vld [vmem:[%s10177_s26 + $0x1ba0] sm:$0xff]  ;;  %v1061_v59 = vld [vmem:[%s10177_s26 + $0x1ba8] sm:$0xff]  ;;  %1058 = vst [vmem:[%s10185_s27 + $0xdc8] sm:$0xff] %v1057_v57 }
  0xef   : > { %1060 = vst [vmem:[%s10185_s27 + $0xdd0] sm:$0xff] %v1059_v58  ;;  %1062 = vst [vmem:[%s10185_s27 + $0xdd8] sm:$0xff] %v1061_v59  ;;  %v1063_v60 = vld [vmem:[%s10177_s26 + $0x1bc0] sm:$0xff]  ;;  %v1065_v61 = vld [vmem:[%s10177_s26 + $0x1bc8] sm:$0xff] }
  0xf0   : > { %v1067_v62 = vld [vmem:[%s10177_s26 + $0x1be0] sm:$0xff]  ;;  %1064 = vst [vmem:[%s10185_s27 + $0xde0] sm:$0xff] %v1063_v60  ;;  %1066 = vst [vmem:[%s10185_s27 + $0xde8] sm:$0xff] %v1065_v61  ;;  %v1069_v63 = vld [vmem:[%s10177_s26 + $0x1be8] sm:$0xff] }
  0xf1   : > { %1068 = vst [vmem:[%s10185_s27 + $0xdf0] sm:$0xff] %v1067_v62  ;;  %v1071_v0 = vld [vmem:[%s10177_s26 + $0x1c00] sm:$0xff]  ;;  %v1073_v1 = vld [vmem:[%s10177_s26 + $0x1c08] sm:$0xff]  ;;  %1070 = vst [vmem:[%s10185_s27 + $0xdf8] sm:$0xff] %v1069_v63 }
  0xf2   : > { %1072 = vst [vmem:[%s10185_s27 + $0xe00] sm:$0xff] %v1071_v0  ;;  %1074 = vst [vmem:[%s10185_s27 + $0xe08] sm:$0xff] %v1073_v1  ;;  %v1075_v2 = vld [vmem:[%s10177_s26 + $0x1c20] sm:$0xff]  ;;  %v1077_v3 = vld [vmem:[%s10177_s26 + $0x1c28] sm:$0xff] }
  0xf3   : > { %v1079_v4 = vld [vmem:[%s10177_s26 + $0x1c40] sm:$0xff]  ;;  %1076 = vst [vmem:[%s10185_s27 + $0xe10] sm:$0xff] %v1075_v2  ;;  %1078 = vst [vmem:[%s10185_s27 + $0xe18] sm:$0xff] %v1077_v3  ;;  %v1081_v5 = vld [vmem:[%s10177_s26 + $0x1c48] sm:$0xff] }
  0xf4   : > { %1080 = vst [vmem:[%s10185_s27 + $0xe20] sm:$0xff] %v1079_v4  ;;  %v1083_v6 = vld [vmem:[%s10177_s26 + $0x1c60] sm:$0xff]  ;;  %v1085_v7 = vld [vmem:[%s10177_s26 + $0x1c68] sm:$0xff]  ;;  %1082 = vst [vmem:[%s10185_s27 + $0xe28] sm:$0xff] %v1081_v5 }
  0xf5   : > { %1084 = vst [vmem:[%s10185_s27 + $0xe30] sm:$0xff] %v1083_v6  ;;  %1086 = vst [vmem:[%s10185_s27 + $0xe38] sm:$0xff] %v1085_v7  ;;  %v1087_v8 = vld [vmem:[%s10177_s26 + $0x1c80] sm:$0xff]  ;;  %v1089_v9 = vld [vmem:[%s10177_s26 + $0x1c88] sm:$0xff] }
  0xf6   : > { %v1091_v10 = vld [vmem:[%s10177_s26 + $0x1ca0] sm:$0xff]  ;;  %1088 = vst [vmem:[%s10185_s27 + $0xe40] sm:$0xff] %v1087_v8  ;;  %1090 = vst [vmem:[%s10185_s27 + $0xe48] sm:$0xff] %v1089_v9  ;;  %v1093_v11 = vld [vmem:[%s10177_s26 + $0x1ca8] sm:$0xff] }
  0xf7   : > { %1092 = vst [vmem:[%s10185_s27 + $0xe50] sm:$0xff] %v1091_v10  ;;  %v1095_v12 = vld [vmem:[%s10177_s26 + $0x1cc0] sm:$0xff]  ;;  %v1097_v13 = vld [vmem:[%s10177_s26 + $0x1cc8] sm:$0xff]  ;;  %1094 = vst [vmem:[%s10185_s27 + $0xe58] sm:$0xff] %v1093_v11 }
  0xf8   : > { %1096 = vst [vmem:[%s10185_s27 + $0xe60] sm:$0xff] %v1095_v12  ;;  %1098 = vst [vmem:[%s10185_s27 + $0xe68] sm:$0xff] %v1097_v13  ;;  %v1099_v14 = vld [vmem:[%s10177_s26 + $0x1ce0] sm:$0xff]  ;;  %v1101_v15 = vld [vmem:[%s10177_s26 + $0x1ce8] sm:$0xff] }
  0xf9   : > { %v1103_v16 = vld [vmem:[%s10177_s26 + $0x1d00] sm:$0xff]  ;;  %1100 = vst [vmem:[%s10185_s27 + $0xe70] sm:$0xff] %v1099_v14  ;;  %1102 = vst [vmem:[%s10185_s27 + $0xe78] sm:$0xff] %v1101_v15  ;;  %v1105_v17 = vld [vmem:[%s10177_s26 + $0x1d08] sm:$0xff] }
  0xfa   : > { %1104 = vst [vmem:[%s10185_s27 + $0xe80] sm:$0xff] %v1103_v16  ;;  %v1107_v18 = vld [vmem:[%s10177_s26 + $0x1d20] sm:$0xff]  ;;  %v1109_v19 = vld [vmem:[%s10177_s26 + $0x1d28] sm:$0xff]  ;;  %1106 = vst [vmem:[%s10185_s27 + $0xe88] sm:$0xff] %v1105_v17 }
  0xfb   : > { %1108 = vst [vmem:[%s10185_s27 + $0xe90] sm:$0xff] %v1107_v18  ;;  %1110 = vst [vmem:[%s10185_s27 + $0xe98] sm:$0xff] %v1109_v19  ;;  %v1111_v20 = vld [vmem:[%s10177_s26 + $0x1d40] sm:$0xff]  ;;  %v1113_v21 = vld [vmem:[%s10177_s26 + $0x1d48] sm:$0xff] }
  0xfc   : > { %v1115_v22 = vld [vmem:[%s10177_s26 + $0x1d60] sm:$0xff]  ;;  %1112 = vst [vmem:[%s10185_s27 + $0xea0] sm:$0xff] %v1111_v20  ;;  %1114 = vst [vmem:[%s10185_s27 + $0xea8] sm:$0xff] %v1113_v21  ;;  %v1117_v23 = vld [vmem:[%s10177_s26 + $0x1d68] sm:$0xff] }
  0xfd   : > { %1116 = vst [vmem:[%s10185_s27 + $0xeb0] sm:$0xff] %v1115_v22  ;;  %v1119_v24 = vld [vmem:[%s10177_s26 + $0x1d80] sm:$0xff]  ;;  %v1121_v25 = vld [vmem:[%s10177_s26 + $0x1d88] sm:$0xff]  ;;  %1118 = vst [vmem:[%s10185_s27 + $0xeb8] sm:$0xff] %v1117_v23 }
  0xfe   : > { %1120 = vst [vmem:[%s10185_s27 + $0xec0] sm:$0xff] %v1119_v24  ;;  %1122 = vst [vmem:[%s10185_s27 + $0xec8] sm:$0xff] %v1121_v25  ;;  %v1123_v26 = vld [vmem:[%s10177_s26 + $0x1da0] sm:$0xff]  ;;  %v1125_v27 = vld [vmem:[%s10177_s26 + $0x1da8] sm:$0xff] }
  0xff   : > { %v1127_v28 = vld [vmem:[%s10177_s26 + $0x1dc0] sm:$0xff]  ;;  %1124 = vst [vmem:[%s10185_s27 + $0xed0] sm:$0xff] %v1123_v26  ;;  %1126 = vst [vmem:[%s10185_s27 + $0xed8] sm:$0xff] %v1125_v27  ;;  %v1129_v29 = vld [vmem:[%s10177_s26 + $0x1dc8] sm:$0xff] }
 0x100   : > { %1128 = vst [vmem:[%s10185_s27 + $0xee0] sm:$0xff] %v1127_v28  ;;  %v1131_v30 = vld [vmem:[%s10177_s26 + $0x1de0] sm:$0xff]  ;;  %v1133_v31 = vld [vmem:[%s10177_s26 + $0x1de8] sm:$0xff]  ;;  %1130 = vst [vmem:[%s10185_s27 + $0xee8] sm:$0xff] %v1129_v29 }
 0x101   : > { %1132 = vst [vmem:[%s10185_s27 + $0xef0] sm:$0xff] %v1131_v30  ;;  %1134 = vst [vmem:[%s10185_s27 + $0xef8] sm:$0xff] %v1133_v31  ;;  %v1135_v32 = vld [vmem:[%s10177_s26 + $0x1e00] sm:$0xff]  ;;  %v1137_v33 = vld [vmem:[%s10177_s26 + $0x1e08] sm:$0xff] }
 0x102   : > { %v1139_v34 = vld [vmem:[%s10177_s26 + $0x1e20] sm:$0xff]  ;;  %1136 = vst [vmem:[%s10185_s27 + $0xf00] sm:$0xff] %v1135_v32  ;;  %1138 = vst [vmem:[%s10185_s27 + $0xf08] sm:$0xff] %v1137_v33  ;;  %v1141_v35 = vld [vmem:[%s10177_s26 + $0x1e28] sm:$0xff] }
 0x103   : > { %1140 = vst [vmem:[%s10185_s27 + $0xf10] sm:$0xff] %v1139_v34  ;;  %v1143_v36 = vld [vmem:[%s10177_s26 + $0x1e40] sm:$0xff]  ;;  %v1145_v37 = vld [vmem:[%s10177_s26 + $0x1e48] sm:$0xff]  ;;  %1142 = vst [vmem:[%s10185_s27 + $0xf18] sm:$0xff] %v1141_v35 }
 0x104   : > { %1144 = vst [vmem:[%s10185_s27 + $0xf20] sm:$0xff] %v1143_v36  ;;  %1146 = vst [vmem:[%s10185_s27 + $0xf28] sm:$0xff] %v1145_v37  ;;  %v1147_v38 = vld [vmem:[%s10177_s26 + $0x1e60] sm:$0xff]  ;;  %v1149_v39 = vld [vmem:[%s10177_s26 + $0x1e68] sm:$0xff] }
 0x105   : > { %v1151_v40 = vld [vmem:[%s10177_s26 + $0x1e80] sm:$0xff]  ;;  %1148 = vst [vmem:[%s10185_s27 + $0xf30] sm:$0xff] %v1147_v38  ;;  %1150 = vst [vmem:[%s10185_s27 + $0xf38] sm:$0xff] %v1149_v39  ;;  %v1153_v41 = vld [vmem:[%s10177_s26 + $0x1e88] sm:$0xff] }
 0x106   : > { %1152 = vst [vmem:[%s10185_s27 + $0xf40] sm:$0xff] %v1151_v40  ;;  %v1155_v42 = vld [vmem:[%s10177_s26 + $0x1ea0] sm:$0xff]  ;;  %v1157_v43 = vld [vmem:[%s10177_s26 + $0x1ea8] sm:$0xff]  ;;  %1154 = vst [vmem:[%s10185_s27 + $0xf48] sm:$0xff] %v1153_v41 }
 0x107   : > { %1156 = vst [vmem:[%s10185_s27 + $0xf50] sm:$0xff] %v1155_v42  ;;  %1158 = vst [vmem:[%s10185_s27 + $0xf58] sm:$0xff] %v1157_v43  ;;  %v1159_v44 = vld [vmem:[%s10177_s26 + $0x1ec0] sm:$0xff]  ;;  %v1161_v45 = vld [vmem:[%s10177_s26 + $0x1ec8] sm:$0xff] }
 0x108   : > { %v1163_v46 = vld [vmem:[%s10177_s26 + $0x1ee0] sm:$0xff]  ;;  %1160 = vst [vmem:[%s10185_s27 + $0xf60] sm:$0xff] %v1159_v44  ;;  %1162 = vst [vmem:[%s10185_s27 + $0xf68] sm:$0xff] %v1161_v45  ;;  %v1165_v47 = vld [vmem:[%s10177_s26 + $0x1ee8] sm:$0xff] }
 0x109   : > { %1164 = vst [vmem:[%s10185_s27 + $0xf70] sm:$0xff] %v1163_v46  ;;  %v1167_v48 = vld [vmem:[%s10177_s26 + $0x1f00] sm:$0xff]  ;;  %v1169_v49 = vld [vmem:[%s10177_s26 + $0x1f08] sm:$0xff]  ;;  %1166 = vst [vmem:[%s10185_s27 + $0xf78] sm:$0xff] %v1165_v47 }
 0x10a   : > { %1168 = vst [vmem:[%s10185_s27 + $0xf80] sm:$0xff] %v1167_v48  ;;  %1170 = vst [vmem:[%s10185_s27 + $0xf88] sm:$0xff] %v1169_v49  ;;  %v1171_v50 = vld [vmem:[%s10177_s26 + $0x1f20] sm:$0xff]  ;;  %v1173_v51 = vld [vmem:[%s10177_s26 + $0x1f28] sm:$0xff] }
 0x10b   : > { %v1175_v52 = vld [vmem:[%s10177_s26 + $0x1f40] sm:$0xff]  ;;  %1172 = vst [vmem:[%s10185_s27 + $0xf90] sm:$0xff] %v1171_v50  ;;  %1174 = vst [vmem:[%s10185_s27 + $0xf98] sm:$0xff] %v1173_v51  ;;  %v1177_v53 = vld [vmem:[%s10177_s26 + $0x1f48] sm:$0xff] }
 0x10c   : > { %1176 = vst [vmem:[%s10185_s27 + $0xfa0] sm:$0xff] %v1175_v52  ;;  %v1179_v54 = vld [vmem:[%s10177_s26 + $0x1f60] sm:$0xff]  ;;  %v1181_v55 = vld [vmem:[%s10177_s26 + $0x1f68] sm:$0xff]  ;;  %1178 = vst [vmem:[%s10185_s27 + $0xfa8] sm:$0xff] %v1177_v53 }
 0x10d   : > { %1180 = vst [vmem:[%s10185_s27 + $0xfb0] sm:$0xff] %v1179_v54  ;;  %1182 = vst [vmem:[%s10185_s27 + $0xfb8] sm:$0xff] %v1181_v55  ;;  %v1183_v56 = vld [vmem:[%s10177_s26 + $0x1f80] sm:$0xff]  ;;  %v1185_v57 = vld [vmem:[%s10177_s26 + $0x1f88] sm:$0xff] }
 0x10e   : > { %v1187_v58 = vld [vmem:[%s10177_s26 + $0x1fa0] sm:$0xff]  ;;  %1184 = vst [vmem:[%s10185_s27 + $0xfc0] sm:$0xff] %v1183_v56  ;;  %1186 = vst [vmem:[%s10185_s27 + $0xfc8] sm:$0xff] %v1185_v57  ;;  %v1189_v59 = vld [vmem:[%s10177_s26 + $0x1fa8] sm:$0xff] }
 0x10f   : > { %1188 = vst [vmem:[%s10185_s27 + $0xfd0] sm:$0xff] %v1187_v58  ;;  %v1191_v60 = vld [vmem:[%s10177_s26 + $0x1fc0] sm:$0xff]  ;;  %v1193_v61 = vld [vmem:[%s10177_s26 + $0x1fc8] sm:$0xff]  ;;  %1190 = vst [vmem:[%s10185_s27 + $0xfd8] sm:$0xff] %v1189_v59 }
 0x110   : > { %1192 = vst [vmem:[%s10185_s27 + $0xfe0] sm:$0xff] %v1191_v60  ;;  %1194 = vst [vmem:[%s10185_s27 + $0xfe8] sm:$0xff] %v1193_v61  ;;  %v1195_v62 = vld [vmem:[%s10177_s26 + $0x1fe0] sm:$0xff]  ;;  %v1197_v63 = vld [vmem:[%s10177_s26 + $0x1fe8] sm:$0xff] }
 0x111   : > { %v1199_v0 = vld [vmem:[%s10177_s26 + $0x2000] sm:$0xff]  ;;  %1196 = vst [vmem:[%s10185_s27 + $0xff0] sm:$0xff] %v1195_v62  ;;  %1198 = vst [vmem:[%s10185_s27 + $0xff8] sm:$0xff] %v1197_v63  ;;  %v1201_v1 = vld [vmem:[%s10177_s26 + $0x2008] sm:$0xff] }
 0x112   : > { %1200 = vst [vmem:[%s10185_s27 + $0x1000] sm:$0xff] %v1199_v0  ;;  %v1203_v2 = vld [vmem:[%s10177_s26 + $0x2020] sm:$0xff]  ;;  %v1205_v3 = vld [vmem:[%s10177_s26 + $0x2028] sm:$0xff]  ;;  %1202 = vst [vmem:[%s10185_s27 + $0x1008] sm:$0xff] %v1201_v1 }
 0x113   : > { %1204 = vst [vmem:[%s10185_s27 + $0x1010] sm:$0xff] %v1203_v2  ;;  %1206 = vst [vmem:[%s10185_s27 + $0x1018] sm:$0xff] %v1205_v3  ;;  %v1207_v4 = vld [vmem:[%s10177_s26 + $0x2040] sm:$0xff]  ;;  %v1209_v5 = vld [vmem:[%s10177_s26 + $0x2048] sm:$0xff] }
 0x114   : > { %v1211_v6 = vld [vmem:[%s10177_s26 + $0x2060] sm:$0xff]  ;;  %1208 = vst [vmem:[%s10185_s27 + $0x1020] sm:$0xff] %v1207_v4  ;;  %1210 = vst [vmem:[%s10185_s27 + $0x1028] sm:$0xff] %v1209_v5  ;;  %v1213_v7 = vld [vmem:[%s10177_s26 + $0x2068] sm:$0xff] }
 0x115   : > { %1212 = vst [vmem:[%s10185_s27 + $0x1030] sm:$0xff] %v1211_v6  ;;  %v1215_v8 = vld [vmem:[%s10177_s26 + $0x2080] sm:$0xff]  ;;  %v1217_v9 = vld [vmem:[%s10177_s26 + $0x2088] sm:$0xff]  ;;  %1214 = vst [vmem:[%s10185_s27 + $0x1038] sm:$0xff] %v1213_v7 }
 0x116   : > { %1216 = vst [vmem:[%s10185_s27 + $0x1040] sm:$0xff] %v1215_v8  ;;  %1218 = vst [vmem:[%s10185_s27 + $0x1048] sm:$0xff] %v1217_v9  ;;  %v1219_v10 = vld [vmem:[%s10177_s26 + $0x20a0] sm:$0xff]  ;;  %v1221_v11 = vld [vmem:[%s10177_s26 + $0x20a8] sm:$0xff] }
 0x117   : > { %v1223_v12 = vld [vmem:[%s10177_s26 + $0x20c0] sm:$0xff]  ;;  %1220 = vst [vmem:[%s10185_s27 + $0x1050] sm:$0xff] %v1219_v10  ;;  %1222 = vst [vmem:[%s10185_s27 + $0x1058] sm:$0xff] %v1221_v11  ;;  %v1225_v13 = vld [vmem:[%s10177_s26 + $0x20c8] sm:$0xff] }
 0x118   : > { %1224 = vst [vmem:[%s10185_s27 + $0x1060] sm:$0xff] %v1223_v12  ;;  %v1227_v14 = vld [vmem:[%s10177_s26 + $0x20e0] sm:$0xff]  ;;  %v1229_v15 = vld [vmem:[%s10177_s26 + $0x20e8] sm:$0xff]  ;;  %1226 = vst [vmem:[%s10185_s27 + $0x1068] sm:$0xff] %v1225_v13 }
 0x119   : > { %1228 = vst [vmem:[%s10185_s27 + $0x1070] sm:$0xff] %v1227_v14  ;;  %1230 = vst [vmem:[%s10185_s27 + $0x1078] sm:$0xff] %v1229_v15  ;;  %v1231_v16 = vld [vmem:[%s10177_s26 + $0x2100] sm:$0xff]  ;;  %v1233_v17 = vld [vmem:[%s10177_s26 + $0x2108] sm:$0xff] }
 0x11a   : > { %v1235_v18 = vld [vmem:[%s10177_s26 + $0x2120] sm:$0xff]  ;;  %1232 = vst [vmem:[%s10185_s27 + $0x1080] sm:$0xff] %v1231_v16  ;;  %1234 = vst [vmem:[%s10185_s27 + $0x1088] sm:$0xff] %v1233_v17  ;;  %v1237_v19 = vld [vmem:[%s10177_s26 + $0x2128] sm:$0xff] }
 0x11b   : > { %1236 = vst [vmem:[%s10185_s27 + $0x1090] sm:$0xff] %v1235_v18  ;;  %v1239_v20 = vld [vmem:[%s10177_s26 + $0x2140] sm:$0xff]  ;;  %v1241_v21 = vld [vmem:[%s10177_s26 + $0x2148] sm:$0xff]  ;;  %1238 = vst [vmem:[%s10185_s27 + $0x1098] sm:$0xff] %v1237_v19 }
 0x11c   : > { %1240 = vst [vmem:[%s10185_s27 + $0x10a0] sm:$0xff] %v1239_v20  ;;  %1242 = vst [vmem:[%s10185_s27 + $0x10a8] sm:$0xff] %v1241_v21  ;;  %v1243_v22 = vld [vmem:[%s10177_s26 + $0x2160] sm:$0xff]  ;;  %v1245_v23 = vld [vmem:[%s10177_s26 + $0x2168] sm:$0xff] }
 0x11d   : > { %v1247_v24 = vld [vmem:[%s10177_s26 + $0x2180] sm:$0xff]  ;;  %1244 = vst [vmem:[%s10185_s27 + $0x10b0] sm:$0xff] %v1243_v22  ;;  %1246 = vst [vmem:[%s10185_s27 + $0x10b8] sm:$0xff] %v1245_v23  ;;  %v1249_v25 = vld [vmem:[%s10177_s26 + $0x2188] sm:$0xff] }
 0x11e   : > { %1248 = vst [vmem:[%s10185_s27 + $0x10c0] sm:$0xff] %v1247_v24  ;;  %v1251_v26 = vld [vmem:[%s10177_s26 + $0x21a0] sm:$0xff]  ;;  %v1253_v27 = vld [vmem:[%s10177_s26 + $0x21a8] sm:$0xff]  ;;  %1250 = vst [vmem:[%s10185_s27 + $0x10c8] sm:$0xff] %v1249_v25 }
 0x11f   : > { %1252 = vst [vmem:[%s10185_s27 + $0x10d0] sm:$0xff] %v1251_v26  ;;  %1254 = vst [vmem:[%s10185_s27 + $0x10d8] sm:$0xff] %v1253_v27  ;;  %v1255_v28 = vld [vmem:[%s10177_s26 + $0x21c0] sm:$0xff]  ;;  %v1257_v29 = vld [vmem:[%s10177_s26 + $0x21c8] sm:$0xff] }
 0x120   : > { %v1259_v30 = vld [vmem:[%s10177_s26 + $0x21e0] sm:$0xff]  ;;  %1256 = vst [vmem:[%s10185_s27 + $0x10e0] sm:$0xff] %v1255_v28  ;;  %1258 = vst [vmem:[%s10185_s27 + $0x10e8] sm:$0xff] %v1257_v29  ;;  %v1261_v31 = vld [vmem:[%s10177_s26 + $0x21e8] sm:$0xff] }
 0x121   : > { %1260 = vst [vmem:[%s10185_s27 + $0x10f0] sm:$0xff] %v1259_v30  ;;  %v1263_v32 = vld [vmem:[%s10177_s26 + $0x2200] sm:$0xff]  ;;  %v1265_v33 = vld [vmem:[%s10177_s26 + $0x2208] sm:$0xff]  ;;  %1262 = vst [vmem:[%s10185_s27 + $0x10f8] sm:$0xff] %v1261_v31 }
 0x122   : > { %1264 = vst [vmem:[%s10185_s27 + $0x1100] sm:$0xff] %v1263_v32  ;;  %1266 = vst [vmem:[%s10185_s27 + $0x1108] sm:$0xff] %v1265_v33  ;;  %v1267_v34 = vld [vmem:[%s10177_s26 + $0x2220] sm:$0xff]  ;;  %v1269_v35 = vld [vmem:[%s10177_s26 + $0x2228] sm:$0xff] }
 0x123   : > { %v1271_v36 = vld [vmem:[%s10177_s26 + $0x2240] sm:$0xff]  ;;  %1268 = vst [vmem:[%s10185_s27 + $0x1110] sm:$0xff] %v1267_v34  ;;  %1270 = vst [vmem:[%s10185_s27 + $0x1118] sm:$0xff] %v1269_v35  ;;  %v1273_v37 = vld [vmem:[%s10177_s26 + $0x2248] sm:$0xff] }
 0x124   : > { %1272 = vst [vmem:[%s10185_s27 + $0x1120] sm:$0xff] %v1271_v36  ;;  %v1275_v38 = vld [vmem:[%s10177_s26 + $0x2260] sm:$0xff]  ;;  %v1277_v39 = vld [vmem:[%s10177_s26 + $0x2268] sm:$0xff]  ;;  %1274 = vst [vmem:[%s10185_s27 + $0x1128] sm:$0xff] %v1273_v37 }
 0x125   : > { %1276 = vst [vmem:[%s10185_s27 + $0x1130] sm:$0xff] %v1275_v38  ;;  %1278 = vst [vmem:[%s10185_s27 + $0x1138] sm:$0xff] %v1277_v39  ;;  %v1279_v40 = vld [vmem:[%s10177_s26 + $0x2280] sm:$0xff]  ;;  %v1281_v41 = vld [vmem:[%s10177_s26 + $0x2288] sm:$0xff] }
 0x126   : > { %v1283_v42 = vld [vmem:[%s10177_s26 + $0x22a0] sm:$0xff]  ;;  %1280 = vst [vmem:[%s10185_s27 + $0x1140] sm:$0xff] %v1279_v40  ;;  %1282 = vst [vmem:[%s10185_s27 + $0x1148] sm:$0xff] %v1281_v41  ;;  %v1285_v43 = vld [vmem:[%s10177_s26 + $0x22a8] sm:$0xff] }
 0x127   : > { %1284 = vst [vmem:[%s10185_s27 + $0x1150] sm:$0xff] %v1283_v42  ;;  %v1287_v44 = vld [vmem:[%s10177_s26 + $0x22c0] sm:$0xff]  ;;  %v1289_v45 = vld [vmem:[%s10177_s26 + $0x22c8] sm:$0xff]  ;;  %1286 = vst [vmem:[%s10185_s27 + $0x1158] sm:$0xff] %v1285_v43 }
 0x128   : > { %1288 = vst [vmem:[%s10185_s27 + $0x1160] sm:$0xff] %v1287_v44  ;;  %1290 = vst [vmem:[%s10185_s27 + $0x1168] sm:$0xff] %v1289_v45  ;;  %v1291_v46 = vld [vmem:[%s10177_s26 + $0x22e0] sm:$0xff]  ;;  %v1293_v47 = vld [vmem:[%s10177_s26 + $0x22e8] sm:$0xff] }
 0x129   : > { %v1295_v48 = vld [vmem:[%s10177_s26 + $0x2300] sm:$0xff]  ;;  %1292 = vst [vmem:[%s10185_s27 + $0x1170] sm:$0xff] %v1291_v46  ;;  %1294 = vst [vmem:[%s10185_s27 + $0x1178] sm:$0xff] %v1293_v47  ;;  %v1297_v49 = vld [vmem:[%s10177_s26 + $0x2308] sm:$0xff] }
 0x12a   : > { %1296 = vst [vmem:[%s10185_s27 + $0x1180] sm:$0xff] %v1295_v48  ;;  %v1299_v50 = vld [vmem:[%s10177_s26 + $0x2320] sm:$0xff]  ;;  %v1301_v51 = vld [vmem:[%s10177_s26 + $0x2328] sm:$0xff]  ;;  %1298 = vst [vmem:[%s10185_s27 + $0x1188] sm:$0xff] %v1297_v49 }
 0x12b   : > { %1300 = vst [vmem:[%s10185_s27 + $0x1190] sm:$0xff] %v1299_v50  ;;  %1302 = vst [vmem:[%s10185_s27 + $0x1198] sm:$0xff] %v1301_v51  ;;  %v1303_v52 = vld [vmem:[%s10177_s26 + $0x2340] sm:$0xff]  ;;  %v1305_v53 = vld [vmem:[%s10177_s26 + $0x2348] sm:$0xff] }
 0x12c   : > { %v1307_v54 = vld [vmem:[%s10177_s26 + $0x2360] sm:$0xff]  ;;  %1304 = vst [vmem:[%s10185_s27 + $0x11a0] sm:$0xff] %v1303_v52  ;;  %1306 = vst [vmem:[%s10185_s27 + $0x11a8] sm:$0xff] %v1305_v53  ;;  %v1309_v55 = vld [vmem:[%s10177_s26 + $0x2368] sm:$0xff] }
 0x12d   : > { %1308 = vst [vmem:[%s10185_s27 + $0x11b0] sm:$0xff] %v1307_v54  ;;  %v1311_v56 = vld [vmem:[%s10177_s26 + $0x2380] sm:$0xff]  ;;  %v1313_v57 = vld [vmem:[%s10177_s26 + $0x2388] sm:$0xff]  ;;  %1310 = vst [vmem:[%s10185_s27 + $0x11b8] sm:$0xff] %v1309_v55 }
 0x12e   : > { %1312 = vst [vmem:[%s10185_s27 + $0x11c0] sm:$0xff] %v1311_v56  ;;  %1314 = vst [vmem:[%s10185_s27 + $0x11c8] sm:$0xff] %v1313_v57  ;;  %v1315_v58 = vld [vmem:[%s10177_s26 + $0x23a0] sm:$0xff]  ;;  %v1317_v59 = vld [vmem:[%s10177_s26 + $0x23a8] sm:$0xff] }
 0x12f   : > { %v1319_v60 = vld [vmem:[%s10177_s26 + $0x23c0] sm:$0xff]  ;;  %1316 = vst [vmem:[%s10185_s27 + $0x11d0] sm:$0xff] %v1315_v58  ;;  %1318 = vst [vmem:[%s10185_s27 + $0x11d8] sm:$0xff] %v1317_v59  ;;  %v1321_v61 = vld [vmem:[%s10177_s26 + $0x23c8] sm:$0xff] }
 0x130   : > { %1320 = vst [vmem:[%s10185_s27 + $0x11e0] sm:$0xff] %v1319_v60  ;;  %v1323_v62 = vld [vmem:[%s10177_s26 + $0x23e0] sm:$0xff]  ;;  %v1325_v63 = vld [vmem:[%s10177_s26 + $0x23e8] sm:$0xff]  ;;  %1322 = vst [vmem:[%s10185_s27 + $0x11e8] sm:$0xff] %v1321_v61 }
 0x131   : > { %1324 = vst [vmem:[%s10185_s27 + $0x11f0] sm:$0xff] %v1323_v62  ;;  %1326 = vst [vmem:[%s10185_s27 + $0x11f8] sm:$0xff] %v1325_v63  ;;  %v1327_v0 = vld [vmem:[%s10177_s26 + $0x2400] sm:$0xff]  ;;  %v1329_v1 = vld [vmem:[%s10177_s26 + $0x2408] sm:$0xff] }
 0x132   : > { %v1331_v2 = vld [vmem:[%s10177_s26 + $0x2420] sm:$0xff]  ;;  %1328 = vst [vmem:[%s10185_s27 + $0x1200] sm:$0xff] %v1327_v0  ;;  %1330 = vst [vmem:[%s10185_s27 + $0x1208] sm:$0xff] %v1329_v1  ;;  %v1333_v3 = vld [vmem:[%s10177_s26 + $0x2428] sm:$0xff] }
 0x133   : > { %1332 = vst [vmem:[%s10185_s27 + $0x1210] sm:$0xff] %v1331_v2  ;;  %v1335_v4 = vld [vmem:[%s10177_s26 + $0x2440] sm:$0xff]  ;;  %v1337_v5 = vld [vmem:[%s10177_s26 + $0x2448] sm:$0xff]  ;;  %1334 = vst [vmem:[%s10185_s27 + $0x1218] sm:$0xff] %v1333_v3 }
 0x134   : > { %1336 = vst [vmem:[%s10185_s27 + $0x1220] sm:$0xff] %v1335_v4  ;;  %1338 = vst [vmem:[%s10185_s27 + $0x1228] sm:$0xff] %v1337_v5  ;;  %v1339_v6 = vld [vmem:[%s10177_s26 + $0x2460] sm:$0xff]  ;;  %v1341_v7 = vld [vmem:[%s10177_s26 + $0x2468] sm:$0xff] }
 0x135   : > { %v1343_v8 = vld [vmem:[%s10177_s26 + $0x2480] sm:$0xff]  ;;  %1340 = vst [vmem:[%s10185_s27 + $0x1230] sm:$0xff] %v1339_v6  ;;  %1342 = vst [vmem:[%s10185_s27 + $0x1238] sm:$0xff] %v1341_v7  ;;  %v1345_v9 = vld [vmem:[%s10177_s26 + $0x2488] sm:$0xff] }
 0x136   : > { %1344 = vst [vmem:[%s10185_s27 + $0x1240] sm:$0xff] %v1343_v8  ;;  %v1347_v10 = vld [vmem:[%s10177_s26 + $0x24a0] sm:$0xff]  ;;  %v1349_v11 = vld [vmem:[%s10177_s26 + $0x24a8] sm:$0xff]  ;;  %1346 = vst [vmem:[%s10185_s27 + $0x1248] sm:$0xff] %v1345_v9 }
 0x137   : > { %1348 = vst [vmem:[%s10185_s27 + $0x1250] sm:$0xff] %v1347_v10  ;;  %1350 = vst [vmem:[%s10185_s27 + $0x1258] sm:$0xff] %v1349_v11  ;;  %v1351_v12 = vld [vmem:[%s10177_s26 + $0x24c0] sm:$0xff]  ;;  %v1353_v13 = vld [vmem:[%s10177_s26 + $0x24c8] sm:$0xff] }
 0x138   : > { %v1355_v14 = vld [vmem:[%s10177_s26 + $0x24e0] sm:$0xff]  ;;  %1352 = vst [vmem:[%s10185_s27 + $0x1260] sm:$0xff] %v1351_v12  ;;  %1354 = vst [vmem:[%s10185_s27 + $0x1268] sm:$0xff] %v1353_v13  ;;  %v1357_v15 = vld [vmem:[%s10177_s26 + $0x24e8] sm:$0xff] }
 0x139   : > { %1356 = vst [vmem:[%s10185_s27 + $0x1270] sm:$0xff] %v1355_v14  ;;  %v1359_v16 = vld [vmem:[%s10177_s26 + $0x2500] sm:$0xff]  ;;  %v1361_v17 = vld [vmem:[%s10177_s26 + $0x2508] sm:$0xff]  ;;  %1358 = vst [vmem:[%s10185_s27 + $0x1278] sm:$0xff] %v1357_v15 }
 0x13a   : > { %1360 = vst [vmem:[%s10185_s27 + $0x1280] sm:$0xff] %v1359_v16  ;;  %1362 = vst [vmem:[%s10185_s27 + $0x1288] sm:$0xff] %v1361_v17  ;;  %v1363_v18 = vld [vmem:[%s10177_s26 + $0x2520] sm:$0xff]  ;;  %v1365_v19 = vld [vmem:[%s10177_s26 + $0x2528] sm:$0xff] }
 0x13b   : > { %v1367_v20 = vld [vmem:[%s10177_s26 + $0x2540] sm:$0xff]  ;;  %1364 = vst [vmem:[%s10185_s27 + $0x1290] sm:$0xff] %v1363_v18  ;;  %1366 = vst [vmem:[%s10185_s27 + $0x1298] sm:$0xff] %v1365_v19  ;;  %v1369_v21 = vld [vmem:[%s10177_s26 + $0x2548] sm:$0xff] }
 0x13c   : > { %1368 = vst [vmem:[%s10185_s27 + $0x12a0] sm:$0xff] %v1367_v20  ;;  %v1371_v22 = vld [vmem:[%s10177_s26 + $0x2560] sm:$0xff]  ;;  %v1373_v23 = vld [vmem:[%s10177_s26 + $0x2568] sm:$0xff]  ;;  %1370 = vst [vmem:[%s10185_s27 + $0x12a8] sm:$0xff] %v1369_v21 }
 0x13d   : > { %1372 = vst [vmem:[%s10185_s27 + $0x12b0] sm:$0xff] %v1371_v22  ;;  %1374 = vst [vmem:[%s10185_s27 + $0x12b8] sm:$0xff] %v1373_v23  ;;  %v1375_v24 = vld [vmem:[%s10177_s26 + $0x2580] sm:$0xff]  ;;  %v1377_v25 = vld [vmem:[%s10177_s26 + $0x2588] sm:$0xff] }
 0x13e   : > { %v1379_v26 = vld [vmem:[%s10177_s26 + $0x25a0] sm:$0xff]  ;;  %1376 = vst [vmem:[%s10185_s27 + $0x12c0] sm:$0xff] %v1375_v24  ;;  %1378 = vst [vmem:[%s10185_s27 + $0x12c8] sm:$0xff] %v1377_v25  ;;  %v1381_v27 = vld [vmem:[%s10177_s26 + $0x25a8] sm:$0xff] }
 0x13f   : > { %1380 = vst [vmem:[%s10185_s27 + $0x12d0] sm:$0xff] %v1379_v26  ;;  %v1383_v28 = vld [vmem:[%s10177_s26 + $0x25c0] sm:$0xff]  ;;  %v1385_v29 = vld [vmem:[%s10177_s26 + $0x25c8] sm:$0xff]  ;;  %1382 = vst [vmem:[%s10185_s27 + $0x12d8] sm:$0xff] %v1381_v27 }
 0x140   : > { %1384 = vst [vmem:[%s10185_s27 + $0x12e0] sm:$0xff] %v1383_v28  ;;  %1386 = vst [vmem:[%s10185_s27 + $0x12e8] sm:$0xff] %v1385_v29  ;;  %v1387_v30 = vld [vmem:[%s10177_s26 + $0x25e0] sm:$0xff]  ;;  %v1389_v31 = vld [vmem:[%s10177_s26 + $0x25e8] sm:$0xff] }
 0x141   : > { %v1391_v32 = vld [vmem:[%s10177_s26 + $0x2600] sm:$0xff]  ;;  %1388 = vst [vmem:[%s10185_s27 + $0x12f0] sm:$0xff] %v1387_v30  ;;  %1390 = vst [vmem:[%s10185_s27 + $0x12f8] sm:$0xff] %v1389_v31  ;;  %v1393_v33 = vld [vmem:[%s10177_s26 + $0x2608] sm:$0xff] }
 0x142   : > { %1392 = vst [vmem:[%s10185_s27 + $0x1300] sm:$0xff] %v1391_v32  ;;  %v1395_v34 = vld [vmem:[%s10177_s26 + $0x2620] sm:$0xff]  ;;  %v1397_v35 = vld [vmem:[%s10177_s26 + $0x2628] sm:$0xff]  ;;  %1394 = vst [vmem:[%s10185_s27 + $0x1308] sm:$0xff] %v1393_v33 }
 0x143   : > { %1396 = vst [vmem:[%s10185_s27 + $0x1310] sm:$0xff] %v1395_v34  ;;  %1398 = vst [vmem:[%s10185_s27 + $0x1318] sm:$0xff] %v1397_v35  ;;  %v1399_v36 = vld [vmem:[%s10177_s26 + $0x2640] sm:$0xff]  ;;  %v1401_v37 = vld [vmem:[%s10177_s26 + $0x2648] sm:$0xff] }
 0x144   : > { %v1403_v38 = vld [vmem:[%s10177_s26 + $0x2660] sm:$0xff]  ;;  %1400 = vst [vmem:[%s10185_s27 + $0x1320] sm:$0xff] %v1399_v36  ;;  %1402 = vst [vmem:[%s10185_s27 + $0x1328] sm:$0xff] %v1401_v37  ;;  %v1405_v39 = vld [vmem:[%s10177_s26 + $0x2668] sm:$0xff] }
 0x145   : > { %1404 = vst [vmem:[%s10185_s27 + $0x1330] sm:$0xff] %v1403_v38  ;;  %v1407_v40 = vld [vmem:[%s10177_s26 + $0x2680] sm:$0xff]  ;;  %v1409_v41 = vld [vmem:[%s10177_s26 + $0x2688] sm:$0xff]  ;;  %1406 = vst [vmem:[%s10185_s27 + $0x1338] sm:$0xff] %v1405_v39 }
 0x146   : > { %1408 = vst [vmem:[%s10185_s27 + $0x1340] sm:$0xff] %v1407_v40  ;;  %1410 = vst [vmem:[%s10185_s27 + $0x1348] sm:$0xff] %v1409_v41  ;;  %v1411_v42 = vld [vmem:[%s10177_s26 + $0x26a0] sm:$0xff]  ;;  %v1413_v43 = vld [vmem:[%s10177_s26 + $0x26a8] sm:$0xff] }
 0x147   : > { %v1415_v44 = vld [vmem:[%s10177_s26 + $0x26c0] sm:$0xff]  ;;  %1412 = vst [vmem:[%s10185_s27 + $0x1350] sm:$0xff] %v1411_v42  ;;  %1414 = vst [vmem:[%s10185_s27 + $0x1358] sm:$0xff] %v1413_v43  ;;  %v1417_v45 = vld [vmem:[%s10177_s26 + $0x26c8] sm:$0xff] }
 0x148   : > { %1416 = vst [vmem:[%s10185_s27 + $0x1360] sm:$0xff] %v1415_v44  ;;  %v1419_v46 = vld [vmem:[%s10177_s26 + $0x26e0] sm:$0xff]  ;;  %v1421_v47 = vld [vmem:[%s10177_s26 + $0x26e8] sm:$0xff]  ;;  %1418 = vst [vmem:[%s10185_s27 + $0x1368] sm:$0xff] %v1417_v45 }
 0x149   : > { %1420 = vst [vmem:[%s10185_s27 + $0x1370] sm:$0xff] %v1419_v46  ;;  %1422 = vst [vmem:[%s10185_s27 + $0x1378] sm:$0xff] %v1421_v47  ;;  %v1423_v48 = vld [vmem:[%s10177_s26 + $0x2700] sm:$0xff]  ;;  %v1425_v49 = vld [vmem:[%s10177_s26 + $0x2708] sm:$0xff] }
 0x14a   : > { %v1427_v50 = vld [vmem:[%s10177_s26 + $0x2720] sm:$0xff]  ;;  %1424 = vst [vmem:[%s10185_s27 + $0x1380] sm:$0xff] %v1423_v48  ;;  %1426 = vst [vmem:[%s10185_s27 + $0x1388] sm:$0xff] %v1425_v49  ;;  %v1429_v51 = vld [vmem:[%s10177_s26 + $0x2728] sm:$0xff] }
 0x14b   : > { %1428 = vst [vmem:[%s10185_s27 + $0x1390] sm:$0xff] %v1427_v50  ;;  %v1431_v52 = vld [vmem:[%s10177_s26 + $0x2740] sm:$0xff]  ;;  %v1433_v53 = vld [vmem:[%s10177_s26 + $0x2748] sm:$0xff]  ;;  %1430 = vst [vmem:[%s10185_s27 + $0x1398] sm:$0xff] %v1429_v51 }
 0x14c   : > { %1432 = vst [vmem:[%s10185_s27 + $0x13a0] sm:$0xff] %v1431_v52  ;;  %1434 = vst [vmem:[%s10185_s27 + $0x13a8] sm:$0xff] %v1433_v53  ;;  %v1435_v54 = vld [vmem:[%s10177_s26 + $0x2760] sm:$0xff]  ;;  %v1437_v55 = vld [vmem:[%s10177_s26 + $0x2768] sm:$0xff] }
 0x14d   : > { %v1439_v56 = vld [vmem:[%s10177_s26 + $0x2780] sm:$0xff]  ;;  %1436 = vst [vmem:[%s10185_s27 + $0x13b0] sm:$0xff] %v1435_v54  ;;  %1438 = vst [vmem:[%s10185_s27 + $0x13b8] sm:$0xff] %v1437_v55  ;;  %v1441_v57 = vld [vmem:[%s10177_s26 + $0x2788] sm:$0xff] }
 0x14e   : > { %1440 = vst [vmem:[%s10185_s27 + $0x13c0] sm:$0xff] %v1439_v56  ;;  %v1443_v58 = vld [vmem:[%s10177_s26 + $0x27a0] sm:$0xff]  ;;  %v1445_v59 = vld [vmem:[%s10177_s26 + $0x27a8] sm:$0xff]  ;;  %1442 = vst [vmem:[%s10185_s27 + $0x13c8] sm:$0xff] %v1441_v57 }
 0x14f   : > { %1444 = vst [vmem:[%s10185_s27 + $0x13d0] sm:$0xff] %v1443_v58  ;;  %1446 = vst [vmem:[%s10185_s27 + $0x13d8] sm:$0xff] %v1445_v59  ;;  %v1447_v60 = vld [vmem:[%s10177_s26 + $0x27c0] sm:$0xff]  ;;  %v1449_v61 = vld [vmem:[%s10177_s26 + $0x27c8] sm:$0xff] }
 0x150   : > { %v1451_v62 = vld [vmem:[%s10177_s26 + $0x27e0] sm:$0xff]  ;;  %1448 = vst [vmem:[%s10185_s27 + $0x13e0] sm:$0xff] %v1447_v60  ;;  %1450 = vst [vmem:[%s10185_s27 + $0x13e8] sm:$0xff] %v1449_v61  ;;  %v1453_v63 = vld [vmem:[%s10177_s26 + $0x27e8] sm:$0xff] }
 0x151   : > { %1452 = vst [vmem:[%s10185_s27 + $0x13f0] sm:$0xff] %v1451_v62  ;;  %v1455_v0 = vld [vmem:[%s10177_s26 + $0x2800] sm:$0xff]  ;;  %v1457_v1 = vld [vmem:[%s10177_s26 + $0x2808] sm:$0xff]  ;;  %1454 = vst [vmem:[%s10185_s27 + $0x13f8] sm:$0xff] %v1453_v63 }
 0x152   : > { %1456 = vst [vmem:[%s10185_s27 + $0x1400] sm:$0xff] %v1455_v0  ;;  %1458 = vst [vmem:[%s10185_s27 + $0x1408] sm:$0xff] %v1457_v1  ;;  %v1459_v2 = vld [vmem:[%s10177_s26 + $0x2820] sm:$0xff]  ;;  %v1461_v3 = vld [vmem:[%s10177_s26 + $0x2828] sm:$0xff] }
 0x153   : > { %v1463_v4 = vld [vmem:[%s10177_s26 + $0x2840] sm:$0xff]  ;;  %1460 = vst [vmem:[%s10185_s27 + $0x1410] sm:$0xff] %v1459_v2  ;;  %1462 = vst [vmem:[%s10185_s27 + $0x1418] sm:$0xff] %v1461_v3  ;;  %v1465_v5 = vld [vmem:[%s10177_s26 + $0x2848] sm:$0xff] }
 0x154   : > { %1464 = vst [vmem:[%s10185_s27 + $0x1420] sm:$0xff] %v1463_v4  ;;  %v1467_v6 = vld [vmem:[%s10177_s26 + $0x2860] sm:$0xff]  ;;  %v1469_v7 = vld [vmem:[%s10177_s26 + $0x2868] sm:$0xff]  ;;  %1466 = vst [vmem:[%s10185_s27 + $0x1428] sm:$0xff] %v1465_v5 }
 0x155   : > { %1468 = vst [vmem:[%s10185_s27 + $0x1430] sm:$0xff] %v1467_v6  ;;  %1470 = vst [vmem:[%s10185_s27 + $0x1438] sm:$0xff] %v1469_v7  ;;  %v1471_v8 = vld [vmem:[%s10177_s26 + $0x2880] sm:$0xff]  ;;  %v1473_v9 = vld [vmem:[%s10177_s26 + $0x2888] sm:$0xff] }
 0x156   : > { %v1475_v10 = vld [vmem:[%s10177_s26 + $0x28a0] sm:$0xff]  ;;  %1472 = vst [vmem:[%s10185_s27 + $0x1440] sm:$0xff] %v1471_v8  ;;  %1474 = vst [vmem:[%s10185_s27 + $0x1448] sm:$0xff] %v1473_v9  ;;  %v1477_v11 = vld [vmem:[%s10177_s26 + $0x28a8] sm:$0xff] }
 0x157   : > { %1476 = vst [vmem:[%s10185_s27 + $0x1450] sm:$0xff] %v1475_v10  ;;  %v1479_v12 = vld [vmem:[%s10177_s26 + $0x28c0] sm:$0xff]  ;;  %v1481_v13 = vld [vmem:[%s10177_s26 + $0x28c8] sm:$0xff]  ;;  %1478 = vst [vmem:[%s10185_s27 + $0x1458] sm:$0xff] %v1477_v11 }
 0x158   : > { %1480 = vst [vmem:[%s10185_s27 + $0x1460] sm:$0xff] %v1479_v12  ;;  %1482 = vst [vmem:[%s10185_s27 + $0x1468] sm:$0xff] %v1481_v13  ;;  %v1483_v14 = vld [vmem:[%s10177_s26 + $0x28e0] sm:$0xff]  ;;  %v1485_v15 = vld [vmem:[%s10177_s26 + $0x28e8] sm:$0xff] }
 0x159   : > { %v1487_v16 = vld [vmem:[%s10177_s26 + $0x2900] sm:$0xff]  ;;  %1484 = vst [vmem:[%s10185_s27 + $0x1470] sm:$0xff] %v1483_v14  ;;  %1486 = vst [vmem:[%s10185_s27 + $0x1478] sm:$0xff] %v1485_v15  ;;  %v1489_v17 = vld [vmem:[%s10177_s26 + $0x2908] sm:$0xff] }
 0x15a   : > { %1488 = vst [vmem:[%s10185_s27 + $0x1480] sm:$0xff] %v1487_v16  ;;  %v1491_v18 = vld [vmem:[%s10177_s26 + $0x2920] sm:$0xff]  ;;  %v1493_v19 = vld [vmem:[%s10177_s26 + $0x2928] sm:$0xff]  ;;  %1490 = vst [vmem:[%s10185_s27 + $0x1488] sm:$0xff] %v1489_v17 }
 0x15b   : > { %1492 = vst [vmem:[%s10185_s27 + $0x1490] sm:$0xff] %v1491_v18  ;;  %1494 = vst [vmem:[%s10185_s27 + $0x1498] sm:$0xff] %v1493_v19  ;;  %v1495_v20 = vld [vmem:[%s10177_s26 + $0x2940] sm:$0xff]  ;;  %v1497_v21 = vld [vmem:[%s10177_s26 + $0x2948] sm:$0xff] }
 0x15c   : > { %v1499_v22 = vld [vmem:[%s10177_s26 + $0x2960] sm:$0xff]  ;;  %1496 = vst [vmem:[%s10185_s27 + $0x14a0] sm:$0xff] %v1495_v20  ;;  %1498 = vst [vmem:[%s10185_s27 + $0x14a8] sm:$0xff] %v1497_v21  ;;  %v1501_v23 = vld [vmem:[%s10177_s26 + $0x2968] sm:$0xff] }
 0x15d   : > { %1500 = vst [vmem:[%s10185_s27 + $0x14b0] sm:$0xff] %v1499_v22  ;;  %v1503_v24 = vld [vmem:[%s10177_s26 + $0x2980] sm:$0xff]  ;;  %v1505_v25 = vld [vmem:[%s10177_s26 + $0x2988] sm:$0xff]  ;;  %1502 = vst [vmem:[%s10185_s27 + $0x14b8] sm:$0xff] %v1501_v23 }
 0x15e   : > { %1504 = vst [vmem:[%s10185_s27 + $0x14c0] sm:$0xff] %v1503_v24  ;;  %1506 = vst [vmem:[%s10185_s27 + $0x14c8] sm:$0xff] %v1505_v25  ;;  %v1507_v26 = vld [vmem:[%s10177_s26 + $0x29a0] sm:$0xff]  ;;  %v1509_v27 = vld [vmem:[%s10177_s26 + $0x29a8] sm:$0xff] }
 0x15f   : > { %v1511_v28 = vld [vmem:[%s10177_s26 + $0x29c0] sm:$0xff]  ;;  %1508 = vst [vmem:[%s10185_s27 + $0x14d0] sm:$0xff] %v1507_v26  ;;  %1510 = vst [vmem:[%s10185_s27 + $0x14d8] sm:$0xff] %v1509_v27  ;;  %v1513_v29 = vld [vmem:[%s10177_s26 + $0x29c8] sm:$0xff] }
 0x160   : > { %1512 = vst [vmem:[%s10185_s27 + $0x14e0] sm:$0xff] %v1511_v28  ;;  %v1515_v30 = vld [vmem:[%s10177_s26 + $0x29e0] sm:$0xff]  ;;  %v1517_v31 = vld [vmem:[%s10177_s26 + $0x29e8] sm:$0xff]  ;;  %1514 = vst [vmem:[%s10185_s27 + $0x14e8] sm:$0xff] %v1513_v29 }
 0x161   : > { %1516 = vst [vmem:[%s10185_s27 + $0x14f0] sm:$0xff] %v1515_v30  ;;  %1518 = vst [vmem:[%s10185_s27 + $0x14f8] sm:$0xff] %v1517_v31  ;;  %v1519_v32 = vld [vmem:[%s10177_s26 + $0x2a00] sm:$0xff]  ;;  %v1521_v33 = vld [vmem:[%s10177_s26 + $0x2a08] sm:$0xff] }
 0x162   : > { %v1523_v34 = vld [vmem:[%s10177_s26 + $0x2a20] sm:$0xff]  ;;  %1520 = vst [vmem:[%s10185_s27 + $0x1500] sm:$0xff] %v1519_v32  ;;  %1522 = vst [vmem:[%s10185_s27 + $0x1508] sm:$0xff] %v1521_v33  ;;  %v1525_v35 = vld [vmem:[%s10177_s26 + $0x2a28] sm:$0xff] }
 0x163   : > { %1524 = vst [vmem:[%s10185_s27 + $0x1510] sm:$0xff] %v1523_v34  ;;  %v1527_v36 = vld [vmem:[%s10177_s26 + $0x2a40] sm:$0xff]  ;;  %v1529_v37 = vld [vmem:[%s10177_s26 + $0x2a48] sm:$0xff]  ;;  %1526 = vst [vmem:[%s10185_s27 + $0x1518] sm:$0xff] %v1525_v35 }
 0x164   : > { %1528 = vst [vmem:[%s10185_s27 + $0x1520] sm:$0xff] %v1527_v36  ;;  %1530 = vst [vmem:[%s10185_s27 + $0x1528] sm:$0xff] %v1529_v37  ;;  %v1531_v38 = vld [vmem:[%s10177_s26 + $0x2a60] sm:$0xff]  ;;  %v1533_v39 = vld [vmem:[%s10177_s26 + $0x2a68] sm:$0xff] }
 0x165   : > { %v1535_v40 = vld [vmem:[%s10177_s26 + $0x2a80] sm:$0xff]  ;;  %1532 = vst [vmem:[%s10185_s27 + $0x1530] sm:$0xff] %v1531_v38  ;;  %1534 = vst [vmem:[%s10185_s27 + $0x1538] sm:$0xff] %v1533_v39  ;;  %v1537_v41 = vld [vmem:[%s10177_s26 + $0x2a88] sm:$0xff] }
 0x166   : > { %1536 = vst [vmem:[%s10185_s27 + $0x1540] sm:$0xff] %v1535_v40  ;;  %v1539_v42 = vld [vmem:[%s10177_s26 + $0x2aa0] sm:$0xff]  ;;  %v1541_v43 = vld [vmem:[%s10177_s26 + $0x2aa8] sm:$0xff]  ;;  %1538 = vst [vmem:[%s10185_s27 + $0x1548] sm:$0xff] %v1537_v41 }
 0x167   : > { %1540 = vst [vmem:[%s10185_s27 + $0x1550] sm:$0xff] %v1539_v42  ;;  %1542 = vst [vmem:[%s10185_s27 + $0x1558] sm:$0xff] %v1541_v43  ;;  %v1543_v44 = vld [vmem:[%s10177_s26 + $0x2ac0] sm:$0xff]  ;;  %v1545_v45 = vld [vmem:[%s10177_s26 + $0x2ac8] sm:$0xff] }
 0x168   : > { %v1547_v46 = vld [vmem:[%s10177_s26 + $0x2ae0] sm:$0xff]  ;;  %1544 = vst [vmem:[%s10185_s27 + $0x1560] sm:$0xff] %v1543_v44  ;;  %1546 = vst [vmem:[%s10185_s27 + $0x1568] sm:$0xff] %v1545_v45  ;;  %v1549_v47 = vld [vmem:[%s10177_s26 + $0x2ae8] sm:$0xff] }
 0x169   : > { %1548 = vst [vmem:[%s10185_s27 + $0x1570] sm:$0xff] %v1547_v46  ;;  %v1551_v48 = vld [vmem:[%s10177_s26 + $0x2b00] sm:$0xff]  ;;  %v1553_v49 = vld [vmem:[%s10177_s26 + $0x2b08] sm:$0xff]  ;;  %1550 = vst [vmem:[%s10185_s27 + $0x1578] sm:$0xff] %v1549_v47 }
 0x16a   : > { %1552 = vst [vmem:[%s10185_s27 + $0x1580] sm:$0xff] %v1551_v48  ;;  %1554 = vst [vmem:[%s10185_s27 + $0x1588] sm:$0xff] %v1553_v49  ;;  %v1555_v50 = vld [vmem:[%s10177_s26 + $0x2b20] sm:$0xff]  ;;  %v1557_v51 = vld [vmem:[%s10177_s26 + $0x2b28] sm:$0xff] }
 0x16b   : > { %v1559_v52 = vld [vmem:[%s10177_s26 + $0x2b40] sm:$0xff]  ;;  %1556 = vst [vmem:[%s10185_s27 + $0x1590] sm:$0xff] %v1555_v50  ;;  %1558 = vst [vmem:[%s10185_s27 + $0x1598] sm:$0xff] %v1557_v51  ;;  %v1561_v53 = vld [vmem:[%s10177_s26 + $0x2b48] sm:$0xff] }
 0x16c   : > { %1560 = vst [vmem:[%s10185_s27 + $0x15a0] sm:$0xff] %v1559_v52  ;;  %v1563_v54 = vld [vmem:[%s10177_s26 + $0x2b60] sm:$0xff]  ;;  %v1565_v55 = vld [vmem:[%s10177_s26 + $0x2b68] sm:$0xff]  ;;  %1562 = vst [vmem:[%s10185_s27 + $0x15a8] sm:$0xff] %v1561_v53 }
 0x16d   : > { %1564 = vst [vmem:[%s10185_s27 + $0x15b0] sm:$0xff] %v1563_v54  ;;  %1566 = vst [vmem:[%s10185_s27 + $0x15b8] sm:$0xff] %v1565_v55  ;;  %v1567_v56 = vld [vmem:[%s10177_s26 + $0x2b80] sm:$0xff]  ;;  %v1569_v57 = vld [vmem:[%s10177_s26 + $0x2b88] sm:$0xff] }
 0x16e   : > { %v1571_v58 = vld [vmem:[%s10177_s26 + $0x2ba0] sm:$0xff]  ;;  %1568 = vst [vmem:[%s10185_s27 + $0x15c0] sm:$0xff] %v1567_v56  ;;  %1570 = vst [vmem:[%s10185_s27 + $0x15c8] sm:$0xff] %v1569_v57  ;;  %v1573_v59 = vld [vmem:[%s10177_s26 + $0x2ba8] sm:$0xff] }
 0x16f   : > { %1572 = vst [vmem:[%s10185_s27 + $0x15d0] sm:$0xff] %v1571_v58  ;;  %v1575_v60 = vld [vmem:[%s10177_s26 + $0x2bc0] sm:$0xff]  ;;  %v1577_v61 = vld [vmem:[%s10177_s26 + $0x2bc8] sm:$0xff]  ;;  %1574 = vst [vmem:[%s10185_s27 + $0x15d8] sm:$0xff] %v1573_v59 }
 0x170   : > { %1576 = vst [vmem:[%s10185_s27 + $0x15e0] sm:$0xff] %v1575_v60  ;;  %1578 = vst [vmem:[%s10185_s27 + $0x15e8] sm:$0xff] %v1577_v61  ;;  %v1579_v62 = vld [vmem:[%s10177_s26 + $0x2be0] sm:$0xff]  ;;  %v1581_v63 = vld [vmem:[%s10177_s26 + $0x2be8] sm:$0xff] }
 0x171   : > { %v1583_v0 = vld [vmem:[%s10177_s26 + $0x2c00] sm:$0xff]  ;;  %1580 = vst [vmem:[%s10185_s27 + $0x15f0] sm:$0xff] %v1579_v62  ;;  %1582 = vst [vmem:[%s10185_s27 + $0x15f8] sm:$0xff] %v1581_v63  ;;  %v1585_v1 = vld [vmem:[%s10177_s26 + $0x2c08] sm:$0xff] }
 0x172   : > { %1584 = vst [vmem:[%s10185_s27 + $0x1600] sm:$0xff] %v1583_v0  ;;  %v1587_v2 = vld [vmem:[%s10177_s26 + $0x2c20] sm:$0xff]  ;;  %v1589_v3 = vld [vmem:[%s10177_s26 + $0x2c28] sm:$0xff]  ;;  %1586 = vst [vmem:[%s10185_s27 + $0x1608] sm:$0xff] %v1585_v1 }
 0x173   : > { %1588 = vst [vmem:[%s10185_s27 + $0x1610] sm:$0xff] %v1587_v2  ;;  %1590 = vst [vmem:[%s10185_s27 + $0x1618] sm:$0xff] %v1589_v3  ;;  %v1591_v4 = vld [vmem:[%s10177_s26 + $0x2c40] sm:$0xff]  ;;  %v1593_v5 = vld [vmem:[%s10177_s26 + $0x2c48] sm:$0xff] }
 0x174   : > { %v1595_v6 = vld [vmem:[%s10177_s26 + $0x2c60] sm:$0xff]  ;;  %1592 = vst [vmem:[%s10185_s27 + $0x1620] sm:$0xff] %v1591_v4  ;;  %1594 = vst [vmem:[%s10185_s27 + $0x1628] sm:$0xff] %v1593_v5  ;;  %v1597_v7 = vld [vmem:[%s10177_s26 + $0x2c68] sm:$0xff] }
 0x175   : > { %1596 = vst [vmem:[%s10185_s27 + $0x1630] sm:$0xff] %v1595_v6  ;;  %v1599_v8 = vld [vmem:[%s10177_s26 + $0x2c80] sm:$0xff]  ;;  %v1601_v9 = vld [vmem:[%s10177_s26 + $0x2c88] sm:$0xff]  ;;  %1598 = vst [vmem:[%s10185_s27 + $0x1638] sm:$0xff] %v1597_v7 }
 0x176   : > { %1600 = vst [vmem:[%s10185_s27 + $0x1640] sm:$0xff] %v1599_v8  ;;  %1602 = vst [vmem:[%s10185_s27 + $0x1648] sm:$0xff] %v1601_v9  ;;  %v1603_v10 = vld [vmem:[%s10177_s26 + $0x2ca0] sm:$0xff]  ;;  %v1605_v11 = vld [vmem:[%s10177_s26 + $0x2ca8] sm:$0xff] }
 0x177   : > { %v1607_v12 = vld [vmem:[%s10177_s26 + $0x2cc0] sm:$0xff]  ;;  %1604 = vst [vmem:[%s10185_s27 + $0x1650] sm:$0xff] %v1603_v10  ;;  %1606 = vst [vmem:[%s10185_s27 + $0x1658] sm:$0xff] %v1605_v11  ;;  %v1609_v13 = vld [vmem:[%s10177_s26 + $0x2cc8] sm:$0xff] }
 0x178   : > { %1608 = vst [vmem:[%s10185_s27 + $0x1660] sm:$0xff] %v1607_v12  ;;  %v1611_v14 = vld [vmem:[%s10177_s26 + $0x2ce0] sm:$0xff]  ;;  %v1613_v15 = vld [vmem:[%s10177_s26 + $0x2ce8] sm:$0xff]  ;;  %1610 = vst [vmem:[%s10185_s27 + $0x1668] sm:$0xff] %v1609_v13 }
 0x179   : > { %1612 = vst [vmem:[%s10185_s27 + $0x1670] sm:$0xff] %v1611_v14  ;;  %1614 = vst [vmem:[%s10185_s27 + $0x1678] sm:$0xff] %v1613_v15  ;;  %v1615_v16 = vld [vmem:[%s10177_s26 + $0x2d00] sm:$0xff]  ;;  %v1617_v17 = vld [vmem:[%s10177_s26 + $0x2d08] sm:$0xff] }
 0x17a   : > { %v1619_v18 = vld [vmem:[%s10177_s26 + $0x2d20] sm:$0xff]  ;;  %1616 = vst [vmem:[%s10185_s27 + $0x1680] sm:$0xff] %v1615_v16  ;;  %1618 = vst [vmem:[%s10185_s27 + $0x1688] sm:$0xff] %v1617_v17  ;;  %v1621_v19 = vld [vmem:[%s10177_s26 + $0x2d28] sm:$0xff] }
 0x17b   : > { %1620 = vst [vmem:[%s10185_s27 + $0x1690] sm:$0xff] %v1619_v18  ;;  %v1623_v20 = vld [vmem:[%s10177_s26 + $0x2d40] sm:$0xff]  ;;  %v1625_v21 = vld [vmem:[%s10177_s26 + $0x2d48] sm:$0xff]  ;;  %1622 = vst [vmem:[%s10185_s27 + $0x1698] sm:$0xff] %v1621_v19 }
 0x17c   : > { %1624 = vst [vmem:[%s10185_s27 + $0x16a0] sm:$0xff] %v1623_v20  ;;  %1626 = vst [vmem:[%s10185_s27 + $0x16a8] sm:$0xff] %v1625_v21  ;;  %v1627_v22 = vld [vmem:[%s10177_s26 + $0x2d60] sm:$0xff]  ;;  %v1629_v23 = vld [vmem:[%s10177_s26 + $0x2d68] sm:$0xff] }
 0x17d   : > { %v1631_v24 = vld [vmem:[%s10177_s26 + $0x2d80] sm:$0xff]  ;;  %1628 = vst [vmem:[%s10185_s27 + $0x16b0] sm:$0xff] %v1627_v22  ;;  %1630 = vst [vmem:[%s10185_s27 + $0x16b8] sm:$0xff] %v1629_v23  ;;  %v1633_v25 = vld [vmem:[%s10177_s26 + $0x2d88] sm:$0xff] }
 0x17e   : > { %1632 = vst [vmem:[%s10185_s27 + $0x16c0] sm:$0xff] %v1631_v24  ;;  %v1635_v26 = vld [vmem:[%s10177_s26 + $0x2da0] sm:$0xff]  ;;  %v1637_v27 = vld [vmem:[%s10177_s26 + $0x2da8] sm:$0xff]  ;;  %1634 = vst [vmem:[%s10185_s27 + $0x16c8] sm:$0xff] %v1633_v25 }
 0x17f   : > { %1636 = vst [vmem:[%s10185_s27 + $0x16d0] sm:$0xff] %v1635_v26  ;;  %1638 = vst [vmem:[%s10185_s27 + $0x16d8] sm:$0xff] %v1637_v27  ;;  %v1639_v28 = vld [vmem:[%s10177_s26 + $0x2dc0] sm:$0xff]  ;;  %v1641_v29 = vld [vmem:[%s10177_s26 + $0x2dc8] sm:$0xff] }
 0x180   : > { %v1643_v30 = vld [vmem:[%s10177_s26 + $0x2de0] sm:$0xff]  ;;  %1640 = vst [vmem:[%s10185_s27 + $0x16e0] sm:$0xff] %v1639_v28  ;;  %1642 = vst [vmem:[%s10185_s27 + $0x16e8] sm:$0xff] %v1641_v29  ;;  %v1645_v31 = vld [vmem:[%s10177_s26 + $0x2de8] sm:$0xff] }
 0x181   : > { %1644 = vst [vmem:[%s10185_s27 + $0x16f0] sm:$0xff] %v1643_v30  ;;  %v1647_v32 = vld [vmem:[%s10177_s26 + $0x2e00] sm:$0xff]  ;;  %v1649_v33 = vld [vmem:[%s10177_s26 + $0x2e08] sm:$0xff]  ;;  %1646 = vst [vmem:[%s10185_s27 + $0x16f8] sm:$0xff] %v1645_v31 }
 0x182   : > { %1648 = vst [vmem:[%s10185_s27 + $0x1700] sm:$0xff] %v1647_v32  ;;  %1650 = vst [vmem:[%s10185_s27 + $0x1708] sm:$0xff] %v1649_v33  ;;  %v1651_v34 = vld [vmem:[%s10177_s26 + $0x2e20] sm:$0xff]  ;;  %v1653_v35 = vld [vmem:[%s10177_s26 + $0x2e28] sm:$0xff] }
 0x183   : > { %v1655_v36 = vld [vmem:[%s10177_s26 + $0x2e40] sm:$0xff]  ;;  %1652 = vst [vmem:[%s10185_s27 + $0x1710] sm:$0xff] %v1651_v34  ;;  %1654 = vst [vmem:[%s10185_s27 + $0x1718] sm:$0xff] %v1653_v35  ;;  %v1657_v37 = vld [vmem:[%s10177_s26 + $0x2e48] sm:$0xff] }
 0x184   : > { %1656 = vst [vmem:[%s10185_s27 + $0x1720] sm:$0xff] %v1655_v36  ;;  %v1659_v38 = vld [vmem:[%s10177_s26 + $0x2e60] sm:$0xff]  ;;  %v1661_v39 = vld [vmem:[%s10177_s26 + $0x2e68] sm:$0xff]  ;;  %1658 = vst [vmem:[%s10185_s27 + $0x1728] sm:$0xff] %v1657_v37 }
 0x185   : > { %1660 = vst [vmem:[%s10185_s27 + $0x1730] sm:$0xff] %v1659_v38  ;;  %1662 = vst [vmem:[%s10185_s27 + $0x1738] sm:$0xff] %v1661_v39  ;;  %v1663_v40 = vld [vmem:[%s10177_s26 + $0x2e80] sm:$0xff]  ;;  %v1665_v41 = vld [vmem:[%s10177_s26 + $0x2e88] sm:$0xff] }
 0x186   : > { %v1667_v42 = vld [vmem:[%s10177_s26 + $0x2ea0] sm:$0xff]  ;;  %1664 = vst [vmem:[%s10185_s27 + $0x1740] sm:$0xff] %v1663_v40  ;;  %1666 = vst [vmem:[%s10185_s27 + $0x1748] sm:$0xff] %v1665_v41  ;;  %v1669_v43 = vld [vmem:[%s10177_s26 + $0x2ea8] sm:$0xff] }
 0x187   : > { %1668 = vst [vmem:[%s10185_s27 + $0x1750] sm:$0xff] %v1667_v42  ;;  %v1671_v44 = vld [vmem:[%s10177_s26 + $0x2ec0] sm:$0xff]  ;;  %v1673_v45 = vld [vmem:[%s10177_s26 + $0x2ec8] sm:$0xff]  ;;  %1670 = vst [vmem:[%s10185_s27 + $0x1758] sm:$0xff] %v1669_v43 }
 0x188   : > { %1672 = vst [vmem:[%s10185_s27 + $0x1760] sm:$0xff] %v1671_v44  ;;  %1674 = vst [vmem:[%s10185_s27 + $0x1768] sm:$0xff] %v1673_v45  ;;  %v1675_v46 = vld [vmem:[%s10177_s26 + $0x2ee0] sm:$0xff]  ;;  %v1677_v47 = vld [vmem:[%s10177_s26 + $0x2ee8] sm:$0xff] }
 0x189   : > { %v1679_v48 = vld [vmem:[%s10177_s26 + $0x2f00] sm:$0xff]  ;;  %1676 = vst [vmem:[%s10185_s27 + $0x1770] sm:$0xff] %v1675_v46  ;;  %1678 = vst [vmem:[%s10185_s27 + $0x1778] sm:$0xff] %v1677_v47  ;;  %v1681_v49 = vld [vmem:[%s10177_s26 + $0x2f08] sm:$0xff] }
 0x18a   : > { %1680 = vst [vmem:[%s10185_s27 + $0x1780] sm:$0xff] %v1679_v48  ;;  %v1683_v50 = vld [vmem:[%s10177_s26 + $0x2f20] sm:$0xff]  ;;  %v1685_v51 = vld [vmem:[%s10177_s26 + $0x2f28] sm:$0xff]  ;;  %1682 = vst [vmem:[%s10185_s27 + $0x1788] sm:$0xff] %v1681_v49 }
 0x18b   : > { %1684 = vst [vmem:[%s10185_s27 + $0x1790] sm:$0xff] %v1683_v50  ;;  %1686 = vst [vmem:[%s10185_s27 + $0x1798] sm:$0xff] %v1685_v51  ;;  %v1687_v52 = vld [vmem:[%s10177_s26 + $0x2f40] sm:$0xff]  ;;  %v1689_v53 = vld [vmem:[%s10177_s26 + $0x2f48] sm:$0xff] }
 0x18c   : > { %v1691_v54 = vld [vmem:[%s10177_s26 + $0x2f60] sm:$0xff]  ;;  %1688 = vst [vmem:[%s10185_s27 + $0x17a0] sm:$0xff] %v1687_v52  ;;  %1690 = vst [vmem:[%s10185_s27 + $0x17a8] sm:$0xff] %v1689_v53  ;;  %v1693_v55 = vld [vmem:[%s10177_s26 + $0x2f68] sm:$0xff] }
 0x18d   : > { %1692 = vst [vmem:[%s10185_s27 + $0x17b0] sm:$0xff] %v1691_v54  ;;  %v1695_v56 = vld [vmem:[%s10177_s26 + $0x2f80] sm:$0xff]  ;;  %v1697_v57 = vld [vmem:[%s10177_s26 + $0x2f88] sm:$0xff]  ;;  %1694 = vst [vmem:[%s10185_s27 + $0x17b8] sm:$0xff] %v1693_v55 }
 0x18e   : > { %1696 = vst [vmem:[%s10185_s27 + $0x17c0] sm:$0xff] %v1695_v56  ;;  %1698 = vst [vmem:[%s10185_s27 + $0x17c8] sm:$0xff] %v1697_v57  ;;  %v1699_v58 = vld [vmem:[%s10177_s26 + $0x2fa0] sm:$0xff]  ;;  %v1701_v59 = vld [vmem:[%s10177_s26 + $0x2fa8] sm:$0xff] }
 0x18f   : > { %v1703_v60 = vld [vmem:[%s10177_s26 + $0x2fc0] sm:$0xff]  ;;  %1700 = vst [vmem:[%s10185_s27 + $0x17d0] sm:$0xff] %v1699_v58  ;;  %1702 = vst [vmem:[%s10185_s27 + $0x17d8] sm:$0xff] %v1701_v59  ;;  %v1705_v61 = vld [vmem:[%s10177_s26 + $0x2fc8] sm:$0xff] }
 0x190   : > { %1704 = vst [vmem:[%s10185_s27 + $0x17e0] sm:$0xff] %v1703_v60  ;;  %v1707_v62 = vld [vmem:[%s10177_s26 + $0x2fe0] sm:$0xff]  ;;  %v1709_v63 = vld [vmem:[%s10177_s26 + $0x2fe8] sm:$0xff]  ;;  %1706 = vst [vmem:[%s10185_s27 + $0x17e8] sm:$0xff] %v1705_v61 }
 0x191   : > { %1708 = vst [vmem:[%s10185_s27 + $0x17f0] sm:$0xff] %v1707_v62  ;;  %1710 = vst [vmem:[%s10185_s27 + $0x17f8] sm:$0xff] %v1709_v63  ;;  %v1711_v0 = vld [vmem:[%s10177_s26 + $0x3000] sm:$0xff]  ;;  %v1713_v1 = vld [vmem:[%s10177_s26 + $0x3008] sm:$0xff] }
 0x192   : > { %v1715_v2 = vld [vmem:[%s10177_s26 + $0x3020] sm:$0xff]  ;;  %1712 = vst [vmem:[%s10185_s27 + $0x1800] sm:$0xff] %v1711_v0  ;;  %1714 = vst [vmem:[%s10185_s27 + $0x1808] sm:$0xff] %v1713_v1  ;;  %v1717_v3 = vld [vmem:[%s10177_s26 + $0x3028] sm:$0xff] }
 0x193   : > { %1716 = vst [vmem:[%s10185_s27 + $0x1810] sm:$0xff] %v1715_v2  ;;  %v1719_v4 = vld [vmem:[%s10177_s26 + $0x3040] sm:$0xff]  ;;  %v1721_v5 = vld [vmem:[%s10177_s26 + $0x3048] sm:$0xff]  ;;  %1718 = vst [vmem:[%s10185_s27 + $0x1818] sm:$0xff] %v1717_v3 }
 0x194   : > { %1720 = vst [vmem:[%s10185_s27 + $0x1820] sm:$0xff] %v1719_v4  ;;  %1722 = vst [vmem:[%s10185_s27 + $0x1828] sm:$0xff] %v1721_v5  ;;  %v1723_v6 = vld [vmem:[%s10177_s26 + $0x3060] sm:$0xff]  ;;  %v1725_v7 = vld [vmem:[%s10177_s26 + $0x3068] sm:$0xff] }
 0x195   : > { %v1727_v8 = vld [vmem:[%s10177_s26 + $0x3080] sm:$0xff]  ;;  %1724 = vst [vmem:[%s10185_s27 + $0x1830] sm:$0xff] %v1723_v6  ;;  %1726 = vst [vmem:[%s10185_s27 + $0x1838] sm:$0xff] %v1725_v7  ;;  %v1729_v9 = vld [vmem:[%s10177_s26 + $0x3088] sm:$0xff] }
 0x196   : > { %1728 = vst [vmem:[%s10185_s27 + $0x1840] sm:$0xff] %v1727_v8  ;;  %v1731_v10 = vld [vmem:[%s10177_s26 + $0x30a0] sm:$0xff]  ;;  %v1733_v11 = vld [vmem:[%s10177_s26 + $0x30a8] sm:$0xff]  ;;  %1730 = vst [vmem:[%s10185_s27 + $0x1848] sm:$0xff] %v1729_v9 }
 0x197   : > { %1732 = vst [vmem:[%s10185_s27 + $0x1850] sm:$0xff] %v1731_v10  ;;  %1734 = vst [vmem:[%s10185_s27 + $0x1858] sm:$0xff] %v1733_v11  ;;  %v1735_v12 = vld [vmem:[%s10177_s26 + $0x30c0] sm:$0xff]  ;;  %v1737_v13 = vld [vmem:[%s10177_s26 + $0x30c8] sm:$0xff] }
 0x198   : > { %v1739_v14 = vld [vmem:[%s10177_s26 + $0x30e0] sm:$0xff]  ;;  %1736 = vst [vmem:[%s10185_s27 + $0x1860] sm:$0xff] %v1735_v12  ;;  %1738 = vst [vmem:[%s10185_s27 + $0x1868] sm:$0xff] %v1737_v13  ;;  %v1741_v15 = vld [vmem:[%s10177_s26 + $0x30e8] sm:$0xff] }
 0x199   : > { %1740 = vst [vmem:[%s10185_s27 + $0x1870] sm:$0xff] %v1739_v14  ;;  %1742 = vst [vmem:[%s10185_s27 + $0x1878] sm:$0xff] %v1741_v15 }
 0x19a PF: > { %p7951_p6 = scmp.ge.s32.totalorder %s10110_s16, 1  ;;  %p1755_p7 = scmp.lt.s32.totalorder %s10110_s16, 3 }
 0x19c   : > { %p1756_p8 = pnand %p7951_p6, %p1755_p7 }
 0x19d   : > { %s1762_s28 = sand.u32 (!%p1756_p8), 1, %s10094_s12   ;;  %v2606_v16 = vlaneseq (!%p1756_p8)  ;;  %v10112_v17 = vmov (!%p1756_p8), 1966171168   ;;  %v11757_v20 = vld [vmem:[%s12720_s0] sm:$0xff] (!%p1756_p8)  ;;  %vm6735_vm0 = vcmask (!%p1756_p8), 523264   ;;  %s7952_s19 = sshll.u32 (!%p1756_p8), %s10102_s14, 2 }
 0x19e   : > { %1759 = sbr.rel (%p1756_p8) target bundleno = 1425 (0x591), region = 51  ;;  %v2632_v18 = vunpack.c.l.s4 (!%p1756_p8), %v10112_v17  ;;  %p1802_p9 = scmp.lt.s32.totalorder (!%p1756_p8), %s7952_s19, 7 }
 0x19f   : > { %s8848_s29 = smul.u32 (!%p1756_p8), 6272, %s1762_s28  ;;  %v11752_v19 = vshrl.u32 (!%p1756_p8), %v2606_v16, 7 }
 0x1a0   : > { %v2633_v21 = vunpack.c.0.s8 (!%p1756_p8), %v2632_v18 }
 0x1a1   : > { %s11759_s5 = scalar_lea.vmem (!%p1756_p8), [#allocation2], %s8848_s29 }
 0x1a2   : > { %v8891_v22 = vld [vmem:[%s11759_s5 + $0x4] ss:$16 sps:$4 sm:$0xff] (!%p1756_p8)   ;;  %v8893_v23 = vld [vmem:[%s11759_s5 + $0xc] ss:$16 sps:$4 sm:$0xff] (!%p1756_p8)   ;;  %v11764_v24 = vsub.s32 (!%p1756_p8), %v2633_v21, %v11752_v19  ;;  %v8895_v25 = vld [vmem:[%s11759_s5] ss:$16 sps:$4 sm:$0xff] (!%p1756_p8)  }
 0x1a3   : > { %6739 = vmatprep.subr.bf16.mxu0 (!%p1756_p8), %v8891_v22  ;;  %v8896_v26 = vld [vmem:[%s11759_s5 + $0x8] ss:$16 sps:$4 sm:$0xff] (!%p1756_p8)   ;;  %7272 = vmatprep.subr.bf16.mxu1 (!%p1756_p8), %v8893_v23  ;;  %v8897_v27 = vld [vmem:[%s11759_s5 + $0x24] ss:$16 sps:$4 sm:$0xff] (!%p1756_p8)   ;;  %v8899_v29 = vld [vmem:[%s11759_s5 + $0x2c] ss:$16 sps:$4 sm:$0xff] (!%p1756_p8)  }
 0x1a4   : > { %v11771_v28 = vrot.slane (!%p1756_p8), %v11757_v20, %v11764_v24  ;;  %6740 = vmatpush1.bf16.msra.mxu0 (!%p1756_p8), %v8895_v25  ;;  %7273 = vmatpush1.bf16.msra.mxu1 (!%p1756_p8), %v8896_v26  ;;  %v8901_v30 = vld [vmem:[%s11759_s5 + $0x20] ss:$16 sps:$4 sm:$0xff] (!%p1756_p8)   ;;  %v8902_v31 = vld [vmem:[%s11759_s5 + $0x28] ss:$16 sps:$4 sm:$0xff] (!%p1756_p8)   ;;  %v8903_v33 = vld [vmem:[%s11759_s5 + $0x44] ss:$16 sps:$4 sm:$0xff] (!%p1756_p8)  }
 0x1a5   : > { %6741 = vmatprep.subr.bf16.mxu0 %v8897_v27  ;;  %7274 = vmatprep.subr.bf16.mxu1 %v8899_v29  ;;  %v8905_v34 = vld [vmem:[%s11759_s5 + $0x4c] ss:$16 sps:$4 sm:$0xff]   ;;  %v8907_v35 = vld [vmem:[%s11759_s5 + $0x40] ss:$16 sps:$4 sm:$0xff]   ;;  %v8908_v36 = vld [vmem:[%s11759_s5 + $0x48] ss:$16 sps:$4 sm:$0xff]  }
 0x1a6   : > { %v2645_v32 = vcombine.high %v11771_v28, %v11771_v28  ;;  %v8909_v38 = vld [vmem:[%s11759_s5 + $0x64] ss:$16 sps:$4 sm:$0xff]   ;;  %v8911_v39 = vld [vmem:[%s11759_s5 + $0x6c] ss:$16 sps:$4 sm:$0xff]   ;;  %v8913_v40 = vld [vmem:[%s11759_s5 + $0x60] ss:$16 sps:$4 sm:$0xff]  }
 0x1a7   : > { %v8914_v41 = vld [vmem:[%s11759_s5 + $0x68] ss:$16 sps:$4 sm:$0xff]   ;;  %v8915_v42 = vld [vmem:[%s11759_s5 + $0x84] ss:$16 sps:$4 sm:$0xff]   ;;  %v8917_v43 = vld [vmem:[%s11759_s5 + $0x8c] ss:$16 sps:$4 sm:$0xff]  }
 0x1a8   : > { %v11783_v37 = vrot.slane %v2645_v32, %v11764_v24  ;;  %6742 = vmatpush1.bf16.msra.mxu0 %v8901_v30  ;;  %7275 = vmatpush1.bf16.msra.mxu1 %v8902_v31  ;;  %v8919_v44 = vld [vmem:[%s11759_s5 + $0x80] ss:$16 sps:$4 sm:$0xff]   ;;  %v8920_v45 = vld [vmem:[%s11759_s5 + $0x88] ss:$16 sps:$4 sm:$0xff]   ;;  %v8921_v46 = vld [vmem:[%s11759_s5 + $0xa4] ss:$16 sps:$4 sm:$0xff]  }
 0x1a9   : > { %6743 = vmatprep.subr.bf16.mxu0 %v8903_v33  ;;  %7276 = vmatprep.subr.bf16.mxu1 %v8905_v34  ;;  %v8923_v47 = vld [vmem:[%s11759_s5 + $0xac] ss:$16 sps:$4 sm:$0xff]   ;;  %v8925_v48 = vld [vmem:[%s11759_s5 + $0xa0] ss:$16 sps:$4 sm:$0xff]   ;;  %v8926_v49 = vld [vmem:[%s11759_s5 + $0xa8] ss:$16 sps:$4 sm:$0xff]   ;;  %v11845_v34 = vrot.slane %v11771_v28, %v11764_v24 }
 0x1aa   : > { %6771 = vmatprep.mubr.bf16.mxu0 %v11783_v37  ;;  %7304 = vmatprep.mubr.bf16.mxu1 %v11783_v37  ;;  %v8927_v50 = vld [vmem:[%s11759_s5 + $0xc4] ss:$16 sps:$4 sm:$0xff]   ;;  %v8929_v51 = vld [vmem:[%s11759_s5 + $0xcc] ss:$16 sps:$4 sm:$0xff]   ;;  %v8931_v52 = vld [vmem:[%s11759_s5 + $0xc0] ss:$16 sps:$4 sm:$0xff]  }
 0x1ab   : > { %v8932_v53 = vld [vmem:[%s11759_s5 + $0xc8] ss:$16 sps:$4 sm:$0xff]   ;;  %v8933_v54 = vld [vmem:[%s11759_s5 + $0xe4] ss:$16 sps:$4 sm:$0xff]   ;;  %v8935_v55 = vld [vmem:[%s11759_s5 + $0xec] ss:$16 sps:$4 sm:$0xff]  }
 0x1ac   : > { %6744 = vmatpush1.bf16.msra.mxu0 %v8907_v35  ;;  %7277 = vmatpush1.bf16.msra.mxu1 %v8908_v36  ;;  %v8937_v56 = vld [vmem:[%s11759_s5 + $0xe0] ss:$16 sps:$4 sm:$0xff]   ;;  %v8938_v57 = vld [vmem:[%s11759_s5 + $0xe8] ss:$16 sps:$4 sm:$0xff]   ;;  %v8939_v58 = vld [vmem:[%s11759_s5 + $0x104] ss:$16 sps:$4 sm:$0xff]  }
 0x1ad   : > { %6745 = vmatprep.subr.bf16.mxu0 %v8909_v38  ;;  %7278 = vmatprep.subr.bf16.mxu1 %v8911_v39  ;;  %v8941_v59 = vld [vmem:[%s11759_s5 + $0x10c] ss:$16 sps:$4 sm:$0xff]   ;;  %v8943_v60 = vld [vmem:[%s11759_s5 + $0x100] ss:$16 sps:$4 sm:$0xff]   ;;  %v8944_v61 = vld [vmem:[%s11759_s5 + $0x108] ss:$16 sps:$4 sm:$0xff]   ;;  %v2677_v38 = vcombine.high %v11783_v37, %v11783_v37 }
 0x1ae   : > { %v8945_v62 = vld [vmem:[%s11759_s5 + $0x124] ss:$16 sps:$4 sm:$0xff]   ;;  %v8947_v63 = vld [vmem:[%s11759_s5 + $0x12c] ss:$16 sps:$4 sm:$0xff]   ;;  %v8949_v0 = vld [vmem:[%s11759_s5 + $0x120] ss:$16 sps:$4 sm:$0xff]  }
 0x1af   : > { %v8950_v1 = vld [vmem:[%s11759_s5 + $0x128] ss:$16 sps:$4 sm:$0xff]   ;;  %v8951_v2 = vld [vmem:[%s11759_s5 + $0x144] ss:$16 sps:$4 sm:$0xff]   ;;  %v8953_v3 = vld [vmem:[%s11759_s5 + $0x14c] ss:$16 sps:$4 sm:$0xff]  }
 0x1b0   : > { %6746 = vmatpush1.bf16.msra.mxu0 %v8913_v40  ;;  %7279 = vmatpush1.bf16.msra.mxu1 %v8914_v41  ;;  %v8955_v4 = vld [vmem:[%s11759_s5 + $0x140] ss:$16 sps:$4 sm:$0xff]   ;;  %v8956_v5 = vld [vmem:[%s11759_s5 + $0x148] ss:$16 sps:$4 sm:$0xff]   ;;  %v8957_v6 = vld [vmem:[%s11759_s5 + $0x164] ss:$16 sps:$4 sm:$0xff]  }
 0x1b1   : > { %6747 = vmatprep.subr.bf16.mxu0 %v8915_v42  ;;  %7280 = vmatprep.subr.bf16.mxu1 %v8917_v43  ;;  %v8959_v7 = vld [vmem:[%s11759_s5 + $0x16c] ss:$16 sps:$4 sm:$0xff]   ;;  %v8961_v8 = vld [vmem:[%s11759_s5 + $0x160] ss:$16 sps:$4 sm:$0xff]   ;;  %v8962_v9 = vld [vmem:[%s11759_s5 + $0x168] ss:$16 sps:$4 sm:$0xff]  }
 0x1b2   : > { %v8963_v10 = vld [vmem:[%s11759_s5 + $0x184] ss:$16 sps:$4 sm:$0xff]   ;;  %v8965_v11 = vld [vmem:[%s11759_s5 + $0x18c] ss:$16 sps:$4 sm:$0xff]   ;;  %v8967_v12 = vld [vmem:[%s11759_s5 + $0x180] ss:$16 sps:$4 sm:$0xff]  }
 0x1b3   : > { %v8968_v13 = vld [vmem:[%s11759_s5 + $0x188] ss:$16 sps:$4 sm:$0xff]   ;;  %v8969_v14 = vld [vmem:[%s11759_s5 + $0x1a4] ss:$16 sps:$4 sm:$0xff]   ;;  %v8971_v15 = vld [vmem:[%s11759_s5 + $0x1ac] ss:$16 sps:$4 sm:$0xff]  }
 0x1b4   : > { %6748 = vmatpush1.bf16.msra.mxu0 %v8919_v44  ;;  %7281 = vmatpush1.bf16.msra.mxu1 %v8920_v45  ;;  %v8973_v16 = vld [vmem:[%s11759_s5 + $0x1a0] ss:$16 sps:$4 sm:$0xff]   ;;  %v8974_v17 = vld [vmem:[%s11759_s5 + $0x1a8] ss:$16 sps:$4 sm:$0xff]   ;;  %v8975_v18 = vld [vmem:[%s11759_s5 + $0x1c4] ss:$16 sps:$4 sm:$0xff]  }
 0x1b5   : > { %6749 = vmatprep.subr.bf16.mxu0 %v8921_v46  ;;  %7282 = vmatprep.subr.bf16.mxu1 %v8923_v47  ;;  %v8977_v21 = vld [vmem:[%s11759_s5 + $0x1cc] ss:$16 sps:$4 sm:$0xff]   ;;  %v8979_v22 = vld [vmem:[%s11759_s5 + $0x1c0] ss:$16 sps:$4 sm:$0xff]   ;;  %v8980_v23 = vld [vmem:[%s11759_s5 + $0x1c8] ss:$16 sps:$4 sm:$0xff]  }
 0x1b6   : > { %v8981_v25 = vld [vmem:[%s11759_s5 + $0x1e4] ss:$16 sps:$4 sm:$0xff]   ;;  %v8983_v26 = vld [vmem:[%s11759_s5 + $0x1ec] ss:$16 sps:$4 sm:$0xff]   ;;  %v8985_v27 = vld [vmem:[%s11759_s5 + $0x1e0] ss:$16 sps:$4 sm:$0xff]  }
 0x1b7   : > { %v8986_v29 = vld [vmem:[%s11759_s5 + $0x1e8] ss:$16 sps:$4 sm:$0xff]   ;;  %v8989_v30 = vld [vmem:[%s11759_s5 + $0x204] ss:$16 sps:$4 sm:$0xff]   ;;  %v8992_v31 = vld [vmem:[%s11759_s5 + $0x20c] ss:$16 sps:$4 sm:$0xff]  }
 0x1b8   : > { %6750 = vmatpush1.bf16.msra.mxu0 %v8925_v48  ;;  %7283 = vmatpush1.bf16.msra.mxu1 %v8926_v49  ;;  %v8987_v32 = vld [vmem:[%s11759_s5 + $0x200] ss:$16 sps:$4 sm:$0xff]   ;;  %v8990_v33 = vld [vmem:[%s11759_s5 + $0x208] ss:$16 sps:$4 sm:$0xff]   ;;  %v8995_v35 = vld [vmem:[%s11759_s5 + $0x224] ss:$16 sps:$4 sm:$0xff]  }
 0x1b9   : > { %6751 = vmatprep.subr.bf16.mxu0 %v8927_v50  ;;  %7284 = vmatprep.subr.bf16.mxu1 %v8929_v51  ;;  %v8998_v36 = vld [vmem:[%s11759_s5 + $0x22c] ss:$16 sps:$4 sm:$0xff]   ;;  %v8993_v39 = vld [vmem:[%s11759_s5 + $0x220] ss:$16 sps:$4 sm:$0xff]   ;;  %v8996_v28 = vld [vmem:[%s11759_s5 + $0x228] ss:$16 sps:$4 sm:$0xff]  }
 0x1ba   : > { %v9001_v40 = vld [vmem:[%s11759_s5 + $0x244] ss:$16 sps:$4 sm:$0xff]   ;;  %v9004_v41 = vld [vmem:[%s11759_s5 + $0x24c] ss:$16 sps:$4 sm:$0xff]   ;;  %v8999_v37 = vld [vmem:[%s11759_s5 + $0x240] ss:$16 sps:$4 sm:$0xff]  }
 0x1bb   : > { %v9002_v42 = vld [vmem:[%s11759_s5 + $0x248] ss:$16 sps:$4 sm:$0xff]   ;;  %v9007_v43 = vld [vmem:[%s11759_s5 + $0x264] ss:$16 sps:$4 sm:$0xff]   ;;  %v9010_v44 = vld [vmem:[%s11759_s5 + $0x26c] ss:$16 sps:$4 sm:$0xff]  }
 0x1bc   : > { %6752 = vmatpush1.bf16.msra.mxu0 %v8931_v52  ;;  %7285 = vmatpush1.bf16.msra.mxu1 %v8932_v53  ;;  %v9005_v45 = vld [vmem:[%s11759_s5 + $0x260] ss:$16 sps:$4 sm:$0xff]   ;;  %v9008_v46 = vld [vmem:[%s11759_s5 + $0x268] ss:$16 sps:$4 sm:$0xff]   ;;  %v9013_v47 = vld [vmem:[%s11759_s5 + $0x284] ss:$16 sps:$4 sm:$0xff]  }
 0x1bd   : > { %6753 = vmatprep.subr.bf16.mxu0 %v8933_v54  ;;  %7286 = vmatprep.subr.bf16.mxu1 %v8935_v55  ;;  %v9016_v48 = vld [vmem:[%s11759_s5 + $0x28c] ss:$16 sps:$4 sm:$0xff]   ;;  %v9011_v49 = vld [vmem:[%s11759_s5 + $0x280] ss:$16 sps:$4 sm:$0xff]   ;;  %v9014_v50 = vld [vmem:[%s11759_s5 + $0x288] ss:$16 sps:$4 sm:$0xff]  }
 0x1be   : > { %v9019_v51 = vld [vmem:[%s11759_s5 + $0x2a4] ss:$16 sps:$4 sm:$0xff]   ;;  %v9022_v52 = vld [vmem:[%s11759_s5 + $0x2ac] ss:$16 sps:$4 sm:$0xff]   ;;  %v9017_v53 = vld [vmem:[%s11759_s5 + $0x2a0] ss:$16 sps:$4 sm:$0xff]  }
 0x1bf   : > { %v9020_v54 = vld [vmem:[%s11759_s5 + $0x2a8] ss:$16 sps:$4 sm:$0xff]   ;;  %v9025_v55 = vld [vmem:[%s11759_s5 + $0x2c4] ss:$16 sps:$4 sm:$0xff]   ;;  %s12731_s19 = smov (!%p1802_p9, %s7952_s19), 7 }
 0x1c0   : > { %6754 = vmatpush1.bf16.msra.mxu0 %v8937_v56  ;;  %7287 = vmatpush1.bf16.msra.mxu1 %v8938_v57  ;;  %v9028_v56 = vld [vmem:[%s11759_s5 + $0x2cc] ss:$16 sps:$4 sm:$0xff]   ;;  %v9023_v57 = vld [vmem:[%s11759_s5 + $0x2c0] ss:$16 sps:$4 sm:$0xff]   ;;  %s1804_s23 = scalar_lea.vmem %s12722_s2, %s12731_s19  ;;  %s1813_s25 = scalar_lea.vmem %s12723_s3, %s12731_s19 }
 0x1c1   : > { %6755 = vmatprep.subr.bf16.mxu0 %v8939_v58  ;;  %7288 = vmatprep.subr.bf16.mxu1 %v8941_v59  ;;  %v9026_v58 = vld [vmem:[%s11759_s5 + $0x2c8] ss:$16 sps:$4 sm:$0xff]   ;;  %v9031_v59 = vld [vmem:[%s11759_s5 + $0x2e4] ss:$16 sps:$4 sm:$0xff]  }
 0x1c4   : > { %6756 = vmatpush1.bf16.msra.mxu0 %v8943_v60  ;;  %7289 = vmatpush1.bf16.msra.mxu1 %v8944_v61  ;;  %v9034_v60 = vld [vmem:[%s11759_s5 + $0x2ec] ss:$16 sps:$4 sm:$0xff]   ;;  %v9029_v61 = vld [vmem:[%s11759_s5 + $0x2e0] ss:$16 sps:$4 sm:$0xff]  }
 0x1c5   : > { %6757 = vmatprep.subr.bf16.mxu0 %v8945_v62  ;;  %7290 = vmatprep.subr.bf16.mxu1 %v8947_v63  ;;  %v9032_v62 = vld [vmem:[%s11759_s5 + $0x2e8] ss:$16 sps:$4 sm:$0xff]   ;;  %v9037_v63 = vld [vmem:[%s11759_s5 + $0x304] ss:$16 sps:$4 sm:$0xff]  }
 0x1c8   : > { %6758 = vmatpush1.bf16.msra.mxu0 %v8949_v0  ;;  %7291 = vmatpush1.bf16.msra.mxu1 %v8950_v1  ;;  %v9040_v0 = vld [vmem:[%s11759_s5 + $0x30c] ss:$16 sps:$4 sm:$0xff]   ;;  %v9035_v1 = vld [vmem:[%s11759_s5 + $0x300] ss:$16 sps:$4 sm:$0xff]  }
 0x1c9   : > { %6759 = vmatprep.subr.bf16.mxu0 %v8951_v2  ;;  %7292 = vmatprep.subr.bf16.mxu1 %v8953_v3  ;;  %v9038_v2 = vld [vmem:[%s11759_s5 + $0x308] ss:$16 sps:$4 sm:$0xff]   ;;  %v9043_v3 = vld [vmem:[%s11759_s5 + $0x324] ss:$16 sps:$4 sm:$0xff]  }
 0x1cc   : > { %6760 = vmatpush1.bf16.msra.mxu0 %v8955_v4  ;;  %7293 = vmatpush1.bf16.msra.mxu1 %v8956_v5  ;;  %v9046_v4 = vld [vmem:[%s11759_s5 + $0x32c] ss:$16 sps:$4 sm:$0xff]   ;;  %v9041_v5 = vld [vmem:[%s11759_s5 + $0x320] ss:$16 sps:$4 sm:$0xff]  }
 0x1cd   : > { %6761 = vmatprep.subr.bf16.mxu0 %v8957_v6  ;;  %7294 = vmatprep.subr.bf16.mxu1 %v8959_v7  ;;  %v9044_v6 = vld [vmem:[%s11759_s5 + $0x328] ss:$16 sps:$4 sm:$0xff]   ;;  %v9049_v7 = vld [vmem:[%s11759_s5 + $0x344] ss:$16 sps:$4 sm:$0xff]  }
 0x1d0   : > { %6762 = vmatpush1.bf16.msra.mxu0 %v8961_v8  ;;  %7295 = vmatpush1.bf16.msra.mxu1 %v8962_v9  ;;  %v9052_v8 = vld [vmem:[%s11759_s5 + $0x34c] ss:$16 sps:$4 sm:$0xff]   ;;  %v9047_v9 = vld [vmem:[%s11759_s5 + $0x340] ss:$16 sps:$4 sm:$0xff]  }
 0x1d1   : > { %6763 = vmatprep.subr.bf16.mxu0 %v8963_v10  ;;  %7296 = vmatprep.subr.bf16.mxu1 %v8965_v11  ;;  %v9050_v10 = vld [vmem:[%s11759_s5 + $0x348] ss:$16 sps:$4 sm:$0xff]   ;;  %v9055_v11 = vld [vmem:[%s11759_s5 + $0x364] ss:$16 sps:$4 sm:$0xff]  }
 0x1d4   : > { %6764 = vmatpush1.bf16.msra.mxu0 %v8967_v12  ;;  %7297 = vmatpush1.bf16.msra.mxu1 %v8968_v13  ;;  %v9058_v12 = vld [vmem:[%s11759_s5 + $0x36c] ss:$16 sps:$4 sm:$0xff]   ;;  %v9053_v13 = vld [vmem:[%s11759_s5 + $0x360] ss:$16 sps:$4 sm:$0xff]  }
 0x1d5   : > { %6765 = vmatprep.subr.bf16.mxu0 %v8969_v14  ;;  %7298 = vmatprep.subr.bf16.mxu1 %v8971_v15  ;;  %v9056_v14 = vld [vmem:[%s11759_s5 + $0x368] ss:$16 sps:$4 sm:$0xff]   ;;  %v9061_v15 = vld [vmem:[%s11759_s5 + $0x384] ss:$16 sps:$4 sm:$0xff]  }
 0x1d8   : > { %6766 = vmatpush1.bf16.msra.mxu0 %v8973_v16  ;;  %7299 = vmatpush1.bf16.msra.mxu1 %v8974_v17  ;;  %v9064_v16 = vld [vmem:[%s11759_s5 + $0x38c] ss:$16 sps:$4 sm:$0xff]   ;;  %v9059_v17 = vld [vmem:[%s11759_s5 + $0x380] ss:$16 sps:$4 sm:$0xff]  }
 0x1d9   : > { %6767 = vmatprep.subr.bf16.mxu0 %v8975_v18  ;;  %7300 = vmatprep.subr.bf16.mxu1 %v8977_v21  ;;  %v9062_v18 = vld [vmem:[%s11759_s5 + $0x388] ss:$16 sps:$4 sm:$0xff]   ;;  %v9067_v21 = vld [vmem:[%s11759_s5 + $0x3a4] ss:$16 sps:$4 sm:$0xff]  }
 0x1dc   : > { %6768 = vmatpush1.bf16.msra.mxu0 %v8979_v22  ;;  %7301 = vmatpush1.bf16.msra.mxu1 %v8980_v23  ;;  %v9070_v22 = vld [vmem:[%s11759_s5 + $0x3ac] ss:$16 sps:$4 sm:$0xff]   ;;  %v9065_v23 = vld [vmem:[%s11759_s5 + $0x3a0] ss:$16 sps:$4 sm:$0xff]  }
 0x1dd   : > { %6769 = vmatprep.subr.bf16.mxu0 %v8981_v25  ;;  %7302 = vmatprep.subr.bf16.mxu1 %v8983_v26  ;;  %v9068_v25 = vld [vmem:[%s11759_s5 + $0x3a8] ss:$16 sps:$4 sm:$0xff]   ;;  %v9073_v26 = vld [vmem:[%s11759_s5 + $0x3c4] ss:$16 sps:$4 sm:$0xff]  }
 0x1e0   : > { %6770 = vmatpush1.bf16.msra.mxu0 %v8985_v27  ;;  %7303 = vmatpush1.bf16.msra.mxu1 %v8986_v29  ;;  %v9076_v27 = vld [vmem:[%s11759_s5 + $0x3cc] ss:$16 sps:$4 sm:$0xff]   ;;  %v2630_v29 = vcombine.high %v11757_v20, %v11757_v20  ;;  %v9085_v20 = vld [vmem:[%s11759_s5 + $0x404] ss:$16 sps:$4 sm:$0xff]  }
 0x1e1   : > { %6780 = vmatprep.subr.bf16.mxu0 %v8989_v30  ;;  %7313 = vmatprep.subr.bf16.mxu1 %v8992_v31  ;;  %v9071_v30 = vld [vmem:[%s11759_s5 + $0x3c0] ss:$16 sps:$4 sm:$0xff]   ;;  %v9074_v31 = vld [vmem:[%s11759_s5 + $0x3c8] ss:$16 sps:$4 sm:$0xff]  }
 0x1e3   : > { %6772 = vmatmul.mubr.bf16.vlgmr.msra.gmra.mrb[0].mxu0 %v11845_v34  ;;  %7305 = vmatmul.mubr.bf16.vlgmr.msra.gmra.mrb[0].mxu1 %v11845_v34 }
 0x1e4   : > { %6781 = vmatpush1.bf16.msra.mxu0 %v8987_v32  ;;  %7314 = vmatpush1.bf16.msra.mxu1 %v8990_v33  ;;  %v9079_v32 = vld [vmem:[%s11759_s5 + $0x3e4] ss:$16 sps:$4 sm:$0xff]   ;;  %v9082_v33 = vld [vmem:[%s11759_s5 + $0x3ec] ss:$16 sps:$4 sm:$0xff]  }
 0x1e5   : > { %6782 = vmatprep.subr.bf16.mxu0 %v8995_v35  ;;  %7315 = vmatprep.subr.bf16.mxu1 %v8998_v36  ;;  %v11912_v35 = vrot.slane %v2630_v29, %v11764_v24  ;;  %v9077_v36 = vld [vmem:[%s11759_s5 + $0x3e0] ss:$16 sps:$4 sm:$0xff]   ;;  %v9158_v29 = vld [vmem:[%s11759_s5 + $0x588] ss:$16 sps:$4 sm:$0xff]  }
 0x1e6   : > { %6812 = vmatprep.mubr.bf16.mxu0 %v2677_v38  ;;  %7345 = vmatprep.mubr.bf16.mxu1 %v2677_v38  ;;  %v9080_v38 = vld [vmem:[%s11759_s5 + $0x3e8] ss:$16 sps:$4 sm:$0xff]  }
 0x1e8   : > { %6783 = vmatpush1.bf16.msra.mxu0 %v8993_v39  ;;  %7316 = vmatpush1.bf16.msra.mxu1 %v8996_v28  ;;  %v9088_v39 = vld [vmem:[%s11759_s5 + $0x40c] ss:$16 sps:$4 sm:$0xff]   ;;  %v2646_v28 = vcombine.high %v11912_v35, %v11912_v35 }
 0x1e9   : > { %6784 = vmatprep.subr.bf16.mxu0 %v9001_v40  ;;  %7317 = vmatprep.subr.bf16.mxu1 %v9004_v41  ;;  %v9083_v40 = vld [vmem:[%s11759_s5 + $0x400] ss:$16 sps:$4 sm:$0xff]   ;;  %v9086_v41 = vld [vmem:[%s11759_s5 + $0x408] ss:$16 sps:$4 sm:$0xff]  }
 0x1ec   : > { %6785 = vmatpush1.bf16.msra.mxu0 %v8999_v37  ;;  %7318 = vmatpush1.bf16.msra.mxu1 %v9002_v42  ;;  %v2675_v37 = vcombine.high %v11845_v34, %v11845_v34  ;;  %v9091_v42 = vld [vmem:[%s11759_s5 + $0x424] ss:$16 sps:$4 sm:$0xff]  }
 0x1ed   : > { %6786 = vmatprep.subr.bf16.mxu0 %v9007_v43  ;;  %7319 = vmatprep.subr.bf16.mxu1 %v9010_v44  ;;  %v9094_v43 = vld [vmem:[%s11759_s5 + $0x42c] ss:$16 sps:$4 sm:$0xff]   ;;  %v11927_v44 = vrot.slane %v2646_v28, %v11764_v24  ;;  %v9097_v34 = vld [vmem:[%s11759_s5 + $0x444] ss:$16 sps:$4 sm:$0xff]  }
 0x1ee   : > { %v9175_v28 = vld [vmem:[%s11759_s5 + $0x5e4] ss:$16 sps:$4 sm:$0xff]  }
 0x1f0   : > { %6787 = vmatpush1.bf16.msra.mxu0 %v9005_v45  ;;  %7320 = vmatpush1.bf16.msra.mxu1 %v9008_v46  ;;  %v9089_v45 = vld [vmem:[%s11759_s5 + $0x420] ss:$16 sps:$4 sm:$0xff]   ;;  %v9092_v46 = vld [vmem:[%s11759_s5 + $0x428] ss:$16 sps:$4 sm:$0xff]  }
 0x1f1   : > { %6788 = vmatprep.subr.bf16.mxu0 %v9013_v47  ;;  %7321 = vmatprep.subr.bf16.mxu1 %v9016_v48  ;;  %v9100_v47 = vld [vmem:[%s11759_s5 + $0x44c] ss:$16 sps:$4 sm:$0xff]   ;;  %v9095_v48 = vld [vmem:[%s11759_s5 + $0x440] ss:$16 sps:$4 sm:$0xff]  }
 0x1f4   : > { %6789 = vmatpush1.bf16.msra.mxu0 %v9011_v49  ;;  %7322 = vmatpush1.bf16.msra.mxu1 %v9014_v50  ;;  %v9098_v49 = vld [vmem:[%s11759_s5 + $0x448] ss:$16 sps:$4 sm:$0xff]   ;;  %v9103_v50 = vld [vmem:[%s11759_s5 + $0x464] ss:$16 sps:$4 sm:$0xff]  }
 0x1f5   : > { %6790 = vmatprep.subr.bf16.mxu0 %v9019_v51  ;;  %7323 = vmatprep.subr.bf16.mxu1 %v9022_v52  ;;  %v9106_v51 = vld [vmem:[%s11759_s5 + $0x46c] ss:$16 sps:$4 sm:$0xff]   ;;  %v9101_v52 = vld [vmem:[%s11759_s5 + $0x460] ss:$16 sps:$4 sm:$0xff]  }
 0x1f8   : > { %6791 = vmatpush1.bf16.msra.mxu0 %v9017_v53  ;;  %7324 = vmatpush1.bf16.msra.mxu1 %v9020_v54  ;;  %v9104_v53 = vld [vmem:[%s11759_s5 + $0x468] ss:$16 sps:$4 sm:$0xff]   ;;  %v9109_v54 = vld [vmem:[%s11759_s5 + $0x484] ss:$16 sps:$4 sm:$0xff]  }
 0x1f9   : > { %6792 = vmatprep.subr.bf16.mxu0 %v9025_v55  ;;  %7325 = vmatprep.subr.bf16.mxu1 %v9028_v56  ;;  %v9112_v55 = vld [vmem:[%s11759_s5 + $0x48c] ss:$16 sps:$4 sm:$0xff]   ;;  %v9107_v56 = vld [vmem:[%s11759_s5 + $0x480] ss:$16 sps:$4 sm:$0xff]  }
 0x1fc   : > { %6793 = vmatpush1.bf16.msra.mxu0 %v9023_v57  ;;  %7326 = vmatpush1.bf16.msra.mxu1 %v9026_v58  ;;  %v9110_v57 = vld [vmem:[%s11759_s5 + $0x488] ss:$16 sps:$4 sm:$0xff]   ;;  %v9115_v58 = vld [vmem:[%s11759_s5 + $0x4a4] ss:$16 sps:$4 sm:$0xff]  }
 0x1fd   : > { %6794 = vmatprep.subr.bf16.mxu0 %v9031_v59  ;;  %7327 = vmatprep.subr.bf16.mxu1 %v9034_v60  ;;  %v9118_v59 = vld [vmem:[%s11759_s5 + $0x4ac] ss:$16 sps:$4 sm:$0xff]   ;;  %v9113_v60 = vld [vmem:[%s11759_s5 + $0x4a0] ss:$16 sps:$4 sm:$0xff]  }
 0x200   : > { %6795 = vmatpush1.bf16.msra.mxu0 %v9029_v61  ;;  %7328 = vmatpush1.bf16.msra.mxu1 %v9032_v62  ;;  %v9116_v61 = vld [vmem:[%s11759_s5 + $0x4a8] ss:$16 sps:$4 sm:$0xff]   ;;  %v9121_v62 = vld [vmem:[%s11759_s5 + $0x4c4] ss:$16 sps:$4 sm:$0xff]  }
 0x201   : > { %6796 = vmatprep.subr.bf16.mxu0 %v9037_v63  ;;  %7329 = vmatprep.subr.bf16.mxu1 %v9040_v0  ;;  %v9124_v63 = vld [vmem:[%s11759_s5 + $0x4cc] ss:$16 sps:$4 sm:$0xff]   ;;  %v9119_v0 = vld [vmem:[%s11759_s5 + $0x4c0] ss:$16 sps:$4 sm:$0xff]  }
 0x204   : > { %6797 = vmatpush1.bf16.msra.mxu0 %v9035_v1  ;;  %7330 = vmatpush1.bf16.msra.mxu1 %v9038_v2  ;;  %v9122_v1 = vld [vmem:[%s11759_s5 + $0x4c8] ss:$16 sps:$4 sm:$0xff]   ;;  %v9127_v2 = vld [vmem:[%s11759_s5 + $0x4e4] ss:$16 sps:$4 sm:$0xff]  }
 0x205   : > { %6798 = vmatprep.subr.bf16.mxu0 %v9043_v3  ;;  %7331 = vmatprep.subr.bf16.mxu1 %v9046_v4  ;;  %v9130_v3 = vld [vmem:[%s11759_s5 + $0x4ec] ss:$16 sps:$4 sm:$0xff]   ;;  %v9125_v4 = vld [vmem:[%s11759_s5 + $0x4e0] ss:$16 sps:$4 sm:$0xff]  }
 0x208   : > { %6799 = vmatpush1.bf16.msra.mxu0 %v9041_v5  ;;  %7332 = vmatpush1.bf16.msra.mxu1 %v9044_v6  ;;  %v9128_v5 = vld [vmem:[%s11759_s5 + $0x4e8] ss:$16 sps:$4 sm:$0xff]   ;;  %v9133_v6 = vld [vmem:[%s11759_s5 + $0x504] ss:$16 sps:$4 sm:$0xff]  }
 0x209   : > { %6800 = vmatprep.subr.bf16.mxu0 %v9049_v7  ;;  %7333 = vmatprep.subr.bf16.mxu1 %v9052_v8  ;;  %v9136_v7 = vld [vmem:[%s11759_s5 + $0x50c] ss:$16 sps:$4 sm:$0xff]   ;;  %v9131_v8 = vld [vmem:[%s11759_s5 + $0x500] ss:$16 sps:$4 sm:$0xff]  }
 0x20c   : > { %6801 = vmatpush1.bf16.msra.mxu0 %v9047_v9  ;;  %7334 = vmatpush1.bf16.msra.mxu1 %v9050_v10  ;;  %v9134_v9 = vld [vmem:[%s11759_s5 + $0x508] ss:$16 sps:$4 sm:$0xff]   ;;  %v9139_v10 = vld [vmem:[%s11759_s5 + $0x524] ss:$16 sps:$4 sm:$0xff]  }
 0x20d   : > { %6802 = vmatprep.subr.bf16.mxu0 %v9055_v11  ;;  %7335 = vmatprep.subr.bf16.mxu1 %v9058_v12  ;;  %v9142_v11 = vld [vmem:[%s11759_s5 + $0x52c] ss:$16 sps:$4 sm:$0xff]   ;;  %v9137_v12 = vld [vmem:[%s11759_s5 + $0x520] ss:$16 sps:$4 sm:$0xff]  }
 0x210   : > { %6803 = vmatpush1.bf16.msra.mxu0 %v9053_v13  ;;  %7336 = vmatpush1.bf16.msra.mxu1 %v9056_v14  ;;  %v9140_v13 = vld [vmem:[%s11759_s5 + $0x528] ss:$16 sps:$4 sm:$0xff]   ;;  %v9145_v14 = vld [vmem:[%s11759_s5 + $0x544] ss:$16 sps:$4 sm:$0xff]  }
 0x211   : > { %6804 = vmatprep.subr.bf16.mxu0 %v9061_v15  ;;  %7337 = vmatprep.subr.bf16.mxu1 %v9064_v16  ;;  %v9148_v15 = vld [vmem:[%s11759_s5 + $0x54c] ss:$16 sps:$4 sm:$0xff]   ;;  %v9143_v16 = vld [vmem:[%s11759_s5 + $0x540] ss:$16 sps:$4 sm:$0xff]  }
 0x214   : > { %6805 = vmatpush1.bf16.msra.mxu0 %v9059_v17  ;;  %7338 = vmatpush1.bf16.msra.mxu1 %v9062_v18  ;;  %v9146_v17 = vld [vmem:[%s11759_s5 + $0x548] ss:$16 sps:$4 sm:$0xff]   ;;  %v9151_v18 = vld [vmem:[%s11759_s5 + $0x564] ss:$16 sps:$4 sm:$0xff]  }
 0x215   : > { %6806 = vmatprep.subr.bf16.mxu0 %v9067_v21  ;;  %7339 = vmatprep.subr.bf16.mxu1 %v9070_v22  ;;  %v9154_v21 = vld [vmem:[%s11759_s5 + $0x56c] ss:$16 sps:$4 sm:$0xff]   ;;  %v9149_v22 = vld [vmem:[%s11759_s5 + $0x560] ss:$16 sps:$4 sm:$0xff]  }
 0x218   : > { %6807 = vmatpush1.bf16.msra.mxu0 %v9065_v23  ;;  %7340 = vmatpush1.bf16.msra.mxu1 %v9068_v25  ;;  %v9152_v23 = vld [vmem:[%s11759_s5 + $0x568] ss:$16 sps:$4 sm:$0xff]   ;;  %v9157_v25 = vld [vmem:[%s11759_s5 + $0x584] ss:$16 sps:$4 sm:$0xff]  }
 0x219   : > { %6808 = vmatprep.subr.bf16.mxu0 %v9073_v26  ;;  %7341 = vmatprep.subr.bf16.mxu1 %v9076_v27  ;;  %v9160_v26 = vld [vmem:[%s11759_s5 + $0x58c] ss:$16 sps:$4 sm:$0xff]   ;;  %v9155_v27 = vld [vmem:[%s11759_s5 + $0x580] ss:$16 sps:$4 sm:$0xff]  }
 0x21c   : > { %6809 = vmatpush1.bf16.msra.mxu0 %v9071_v30  ;;  %7342 = vmatpush1.bf16.msra.mxu1 %v9074_v31  ;;  %v9163_v30 = vld [vmem:[%s11759_s5 + $0x5a4] ss:$16 sps:$4 sm:$0xff]   ;;  %v9166_v31 = vld [vmem:[%s11759_s5 + $0x5ac] ss:$16 sps:$4 sm:$0xff]  }
 0x21d   : > { %6810 = vmatprep.subr.bf16.mxu0 %v9079_v32  ;;  %7343 = vmatprep.subr.bf16.mxu1 %v9082_v33  ;;  %v9161_v32 = vld [vmem:[%s11759_s5 + $0x5a0] ss:$16 sps:$4 sm:$0xff]   ;;  %v9164_v33 = vld [vmem:[%s11759_s5 + $0x5a8] ss:$16 sps:$4 sm:$0xff]  }
 0x220   : > { %6811 = vmatpush1.bf16.msra.mxu0 %v9077_v36  ;;  %7344 = vmatpush1.bf16.msra.mxu1 %v9080_v38  ;;  %v9169_v36 = vld [vmem:[%s11759_s5 + $0x5c4] ss:$16 sps:$4 sm:$0xff]   ;;  %v9172_v38 = vld [vmem:[%s11759_s5 + $0x5cc] ss:$16 sps:$4 sm:$0xff]  }
 0x221   : > { %6821 = vmatprep.subr.bf16.mxu0 %v9085_v20  ;;  %7354 = vmatprep.subr.bf16.mxu1 %v9088_v39  ;;  %v9167_v20 = vld [vmem:[%s11759_s5 + $0x5c0] ss:$16 sps:$4 sm:$0xff]   ;;  %v9170_v39 = vld [vmem:[%s11759_s5 + $0x5c8] ss:$16 sps:$4 sm:$0xff]  }
 0x223   : > { %6813 = vmatmul.mubr.bf16.vlgmr.msra.gmra.mrb[0].mxu0 %v2675_v37  ;;  %7346 = vmatmul.mubr.bf16.vlgmr.msra.gmra.mrb[0].mxu1 %v2675_v37  ;;  %v9176_v37 = vld [vmem:[%s11759_s5 + $0x5e8] ss:$16 sps:$4 sm:$0xff]  }
 0x224   : > { %6822 = vmatpush1.bf16.msra.mxu0 %v9083_v40  ;;  %7355 = vmatpush1.bf16.msra.mxu1 %v9086_v41  ;;  %v9178_v40 = vld [vmem:[%s11759_s5 + $0x5ec] ss:$16 sps:$4 sm:$0xff]   ;;  %v9173_v41 = vld [vmem:[%s11759_s5 + $0x5e0] ss:$16 sps:$4 sm:$0xff]  }
 0x225   : > { %6823 = vmatprep.subr.bf16.mxu0 %v9091_v42  ;;  %7356 = vmatprep.subr.bf16.mxu1 %v9094_v43  ;;  %v9182_v42 = vld [vmem:[%s11759_s5 + $0x604] ss:$16 sps:$4 sm:$0xff]   ;;  %v9185_v43 = vld [vmem:[%s11759_s5 + $0x60c] ss:$16 sps:$4 sm:$0xff]  }
 0x226   : > { %6853 = vmatprep.mubr.bf16.mxu0 %v11927_v44  ;;  %7386 = vmatprep.mubr.bf16.mxu1 %v11927_v44 }
 0x228   : > { %6824 = vmatpush1.bf16.msra.mxu0 %v9089_v45  ;;  %7357 = vmatpush1.bf16.msra.mxu1 %v9092_v46  ;;  %v9180_v45 = vld [vmem:[%s11759_s5 + $0x600] ss:$16 sps:$4 sm:$0xff]   ;;  %v9183_v46 = vld [vmem:[%s11759_s5 + $0x608] ss:$16 sps:$4 sm:$0xff]  }
 0x229   : > { %6825 = vmatprep.subr.bf16.mxu0 %v9097_v34  ;;  %7358 = vmatprep.subr.bf16.mxu1 %v9100_v47  ;;  %v11995_v34 = vrot.slane %v11912_v35, %v11764_v24  ;;  %v9188_v47 = vld [vmem:[%s11759_s5 + $0x624] ss:$16 sps:$4 sm:$0xff]   ;;  %v9189_v35 = vld [vmem:[%s11759_s5 + $0x628] ss:$16 sps:$4 sm:$0xff]  }
 0x22c   : > { %6826 = vmatpush1.bf16.msra.mxu0 %v9095_v48  ;;  %7359 = vmatpush1.bf16.msra.mxu1 %v9098_v49  ;;  %v9191_v48 = vld [vmem:[%s11759_s5 + $0x62c] ss:$16 sps:$4 sm:$0xff]   ;;  %v2678_v49 = vcombine.high %v11927_v44, %v11927_v44  ;;  %v9192_v44 = vld [vmem:[%s11759_s5 + $0x640] ss:$16 sps:$4 sm:$0xff]  }
 0x22d   : > { %6827 = vmatprep.subr.bf16.mxu0 %v9103_v50  ;;  %7360 = vmatprep.subr.bf16.mxu1 %v9106_v51  ;;  %v9186_v50 = vld [vmem:[%s11759_s5 + $0x620] ss:$16 sps:$4 sm:$0xff]   ;;  %v9194_v51 = vld [vmem:[%s11759_s5 + $0x644] ss:$16 sps:$4 sm:$0xff]  }
 0x230   : > { %6828 = vmatpush1.bf16.msra.mxu0 %v9101_v52  ;;  %7361 = vmatpush1.bf16.msra.mxu1 %v9104_v53  ;;  %v9197_v52 = vld [vmem:[%s11759_s5 + $0x64c] ss:$16 sps:$4 sm:$0xff]   ;;  %v9195_v53 = vld [vmem:[%s11759_s5 + $0x648] ss:$16 sps:$4 sm:$0xff]  }
 0x231   : > { %6829 = vmatprep.subr.bf16.mxu0 %v9109_v54  ;;  %7362 = vmatprep.subr.bf16.mxu1 %v9112_v55  ;;  %v9200_v54 = vld [vmem:[%s11759_s5 + $0x664] ss:$16 sps:$4 sm:$0xff]   ;;  %v9203_v55 = vld [vmem:[%s11759_s5 + $0x66c] ss:$16 sps:$4 sm:$0xff]  }
 0x234   : > { %6830 = vmatpush1.bf16.msra.mxu0 %v9107_v56  ;;  %7363 = vmatpush1.bf16.msra.mxu1 %v9110_v57  ;;  %v9198_v56 = vld [vmem:[%s11759_s5 + $0x660] ss:$16 sps:$4 sm:$0xff]   ;;  %v9201_v57 = vld [vmem:[%s11759_s5 + $0x668] ss:$16 sps:$4 sm:$0xff]  }
 0x235   : > { %6831 = vmatprep.subr.bf16.mxu0 %v9115_v58  ;;  %7364 = vmatprep.subr.bf16.mxu1 %v9118_v59  ;;  %v9206_v58 = vld [vmem:[%s11759_s5 + $0x684] ss:$16 sps:$4 sm:$0xff]   ;;  %v9209_v59 = vld [vmem:[%s11759_s5 + $0x68c] ss:$16 sps:$4 sm:$0xff]  }
 0x238   : > { %6832 = vmatpush1.bf16.msra.mxu0 %v9113_v60  ;;  %7365 = vmatpush1.bf16.msra.mxu1 %v9116_v61  ;;  %v9204_v60 = vld [vmem:[%s11759_s5 + $0x680] ss:$16 sps:$4 sm:$0xff]   ;;  %v9207_v61 = vld [vmem:[%s11759_s5 + $0x688] ss:$16 sps:$4 sm:$0xff]  }
 0x239   : > { %6833 = vmatprep.subr.bf16.mxu0 %v9121_v62  ;;  %7366 = vmatprep.subr.bf16.mxu1 %v9124_v63  ;;  %v9212_v62 = vld [vmem:[%s11759_s5 + $0x6a4] ss:$16 sps:$4 sm:$0xff]   ;;  %v9215_v63 = vld [vmem:[%s11759_s5 + $0x6ac] ss:$16 sps:$4 sm:$0xff]  }
 0x23c   : > { %6834 = vmatpush1.bf16.msra.mxu0 %v9119_v0  ;;  %7367 = vmatpush1.bf16.msra.mxu1 %v9122_v1  ;;  %v9210_v0 = vld [vmem:[%s11759_s5 + $0x6a0] ss:$16 sps:$4 sm:$0xff]   ;;  %v9213_v1 = vld [vmem:[%s11759_s5 + $0x6a8] ss:$16 sps:$4 sm:$0xff]  }
 0x23d   : > { %6835 = vmatprep.subr.bf16.mxu0 %v9127_v2  ;;  %7368 = vmatprep.subr.bf16.mxu1 %v9130_v3  ;;  %v9218_v2 = vld [vmem:[%s11759_s5 + $0x6c4] ss:$16 sps:$4 sm:$0xff]   ;;  %v9221_v3 = vld [vmem:[%s11759_s5 + $0x6cc] ss:$16 sps:$4 sm:$0xff]  }
 0x240   : > { %6836 = vmatpush1.bf16.msra.mxu0 %v9125_v4  ;;  %7369 = vmatpush1.bf16.msra.mxu1 %v9128_v5  ;;  %v9216_v4 = vld [vmem:[%s11759_s5 + $0x6c0] ss:$16 sps:$4 sm:$0xff]   ;;  %v9219_v5 = vld [vmem:[%s11759_s5 + $0x6c8] ss:$16 sps:$4 sm:$0xff]  }
 0x241   : > { %6837 = vmatprep.subr.bf16.mxu0 %v9133_v6  ;;  %7370 = vmatprep.subr.bf16.mxu1 %v9136_v7  ;;  %v9224_v6 = vld [vmem:[%s11759_s5 + $0x6e4] ss:$16 sps:$4 sm:$0xff]   ;;  %v9227_v7 = vld [vmem:[%s11759_s5 + $0x6ec] ss:$16 sps:$4 sm:$0xff]  }
 0x244   : > { %6838 = vmatpush1.bf16.msra.mxu0 %v9131_v8  ;;  %7371 = vmatpush1.bf16.msra.mxu1 %v9134_v9  ;;  %v9222_v8 = vld [vmem:[%s11759_s5 + $0x6e0] ss:$16 sps:$4 sm:$0xff]   ;;  %v9225_v9 = vld [vmem:[%s11759_s5 + $0x6e8] ss:$16 sps:$4 sm:$0xff]  }
 0x245   : > { %6839 = vmatprep.subr.bf16.mxu0 %v9139_v10  ;;  %7372 = vmatprep.subr.bf16.mxu1 %v9142_v11  ;;  %v9230_v10 = vld [vmem:[%s11759_s5 + $0x704] ss:$16 sps:$4 sm:$0xff]   ;;  %v9233_v11 = vld [vmem:[%s11759_s5 + $0x70c] ss:$16 sps:$4 sm:$0xff]  }
 0x248   : > { %6840 = vmatpush1.bf16.msra.mxu0 %v9137_v12  ;;  %7373 = vmatpush1.bf16.msra.mxu1 %v9140_v13  ;;  %v9228_v12 = vld [vmem:[%s11759_s5 + $0x700] ss:$16 sps:$4 sm:$0xff]   ;;  %v9231_v13 = vld [vmem:[%s11759_s5 + $0x708] ss:$16 sps:$4 sm:$0xff]  }
 0x249   : > { %6841 = vmatprep.subr.bf16.mxu0 %v9145_v14  ;;  %7374 = vmatprep.subr.bf16.mxu1 %v9148_v15  ;;  %v9236_v14 = vld [vmem:[%s11759_s5 + $0x724] ss:$16 sps:$4 sm:$0xff]   ;;  %v9239_v15 = vld [vmem:[%s11759_s5 + $0x72c] ss:$16 sps:$4 sm:$0xff]  }
 0x24c   : > { %6842 = vmatpush1.bf16.msra.mxu0 %v9143_v16  ;;  %7375 = vmatpush1.bf16.msra.mxu1 %v9146_v17  ;;  %v9234_v16 = vld [vmem:[%s11759_s5 + $0x720] ss:$16 sps:$4 sm:$0xff]   ;;  %v9237_v17 = vld [vmem:[%s11759_s5 + $0x728] ss:$16 sps:$4 sm:$0xff]  }
 0x24d   : > { %6843 = vmatprep.subr.bf16.mxu0 %v9151_v18  ;;  %7376 = vmatprep.subr.bf16.mxu1 %v9154_v21  ;;  %v9242_v18 = vld [vmem:[%s11759_s5 + $0x744] ss:$16 sps:$4 sm:$0xff]   ;;  %v9245_v21 = vld [vmem:[%s11759_s5 + $0x74c] ss:$16 sps:$4 sm:$0xff]  }
 0x250   : > { %6844 = vmatpush1.bf16.msra.mxu0 %v9149_v22  ;;  %7377 = vmatpush1.bf16.msra.mxu1 %v9152_v23  ;;  %v9240_v22 = vld [vmem:[%s11759_s5 + $0x740] ss:$16 sps:$4 sm:$0xff]   ;;  %v9243_v23 = vld [vmem:[%s11759_s5 + $0x748] ss:$16 sps:$4 sm:$0xff]  }
 0x251   : > { %6845 = vmatprep.subr.bf16.mxu0 %v9157_v25  ;;  %7378 = vmatprep.subr.bf16.mxu1 %v9160_v26  ;;  %v9248_v25 = vld [vmem:[%s11759_s5 + $0x764] ss:$16 sps:$4 sm:$0xff]   ;;  %v9251_v26 = vld [vmem:[%s11759_s5 + $0x76c] ss:$16 sps:$4 sm:$0xff]  }
 0x254   : > { %6846 = vmatpush1.bf16.msra.mxu0 %v9155_v27  ;;  %7379 = vmatpush1.bf16.msra.mxu1 %v9158_v29  ;;  %v9246_v27 = vld [vmem:[%s11759_s5 + $0x760] ss:$16 sps:$4 sm:$0xff]   ;;  %v9249_v29 = vld [vmem:[%s11759_s5 + $0x768] ss:$16 sps:$4 sm:$0xff]  }
 0x255   : > { %6847 = vmatprep.subr.bf16.mxu0 %v9163_v30  ;;  %7380 = vmatprep.subr.bf16.mxu1 %v9166_v31  ;;  %v9254_v30 = vld [vmem:[%s11759_s5 + $0x784] ss:$16 sps:$4 sm:$0xff]   ;;  %v9257_v31 = vld [vmem:[%s11759_s5 + $0x78c] ss:$16 sps:$4 sm:$0xff]  }
 0x258   : > { %6848 = vmatpush1.bf16.msra.mxu0 %v9161_v32  ;;  %7381 = vmatpush1.bf16.msra.mxu1 %v9164_v33  ;;  %v9252_v32 = vld [vmem:[%s11759_s5 + $0x780] ss:$16 sps:$4 sm:$0xff]   ;;  %v9255_v33 = vld [vmem:[%s11759_s5 + $0x788] ss:$16 sps:$4 sm:$0xff]  }
 0x259   : > { %6849 = vmatprep.subr.bf16.mxu0 %v9169_v36  ;;  %7382 = vmatprep.subr.bf16.mxu1 %v9172_v38  ;;  %v9260_v36 = vld [vmem:[%s11759_s5 + $0x7a4] ss:$16 sps:$4 sm:$0xff]   ;;  %v9263_v38 = vld [vmem:[%s11759_s5 + $0x7ac] ss:$16 sps:$4 sm:$0xff]  }
 0x25c   : > { %6850 = vmatpush1.bf16.msra.mxu0 %v9167_v20  ;;  %7383 = vmatpush1.bf16.msra.mxu1 %v9170_v39  ;;  %v9258_v20 = vld [vmem:[%s11759_s5 + $0x7a0] ss:$16 sps:$4 sm:$0xff]   ;;  %v9261_v39 = vld [vmem:[%s11759_s5 + $0x7a8] ss:$16 sps:$4 sm:$0xff]  }
 0x25d   : > { %6851 = vmatprep.subr.bf16.mxu0 %v9175_v28  ;;  %7384 = vmatprep.subr.bf16.mxu1 %v9178_v40  ;;  %v9266_v28 = vld [vmem:[%s11759_s5 + $0x7c4] ss:$16 sps:$4 sm:$0xff]   ;;  %v9269_v40 = vld [vmem:[%s11759_s5 + $0x7cc] ss:$16 sps:$4 sm:$0xff]  }
 0x260   : > { %6852 = vmatpush1.bf16.msra.mxu0 %v9173_v41  ;;  %7385 = vmatpush1.bf16.msra.mxu1 %v9176_v37  ;;  %v9264_v41 = vld [vmem:[%s11759_s5 + $0x7c0] ss:$16 sps:$4 sm:$0xff]   ;;  %v12059_v37 = vld.sshfl [vmem:[%s12720_s0 + $0x8] sm:$0xff pattern:$0x75316420] }
 0x261   : > { %6862 = vmatprep.subr.bf16.mxu0 %v9182_v42  ;;  %7395 = vmatprep.subr.bf16.mxu1 %v9185_v43  ;;  %v9267_v42 = vld [vmem:[%s11759_s5 + $0x7c8] ss:$16 sps:$4 sm:$0xff]   ;;  %v9272_v43 = vld [vmem:[%s11759_s5 + $0x7e4] ss:$16 sps:$4 sm:$0xff]  }
 0x263   : > { %6854 = vmatmul.mubr.bf16.vlgmr.msra.gmra.mrb[0].mxu0 %v11995_v34  ;;  %7387 = vmatmul.mubr.bf16.vlgmr.msra.gmra.mrb[0].mxu1 %v11995_v34 }
 0x264   : > { %6863 = vmatpush1.bf16.msra.mxu0 %v9180_v45  ;;  %7396 = vmatpush1.bf16.msra.mxu1 %v9183_v46  ;;  %v9275_v45 = vld [vmem:[%s11759_s5 + $0x7ec] ss:$16 sps:$4 sm:$0xff]   ;;  %v9270_v46 = vld [vmem:[%s11759_s5 + $0x7e0] ss:$16 sps:$4 sm:$0xff]  }
 0x265   : > { %6864 = vmatprep.subr.bf16.mxu0 %v9188_v47  ;;  %7397 = vmatprep.subr.bf16.mxu1 %v9191_v48  ;;  %v9273_v47 = vld [vmem:[%s11759_s5 + $0x7e8] ss:$16 sps:$4 sm:$0xff]   ;;  %v9278_v48 = vld [vmem:[%s11759_s5 + $0x804] ss:$16 sps:$4 sm:$0xff]  }
 0x266   : > { %6894 = vmatprep.mubr.bf16.mxu0 %v2678_v49  ;;  %7427 = vmatprep.mubr.bf16.mxu1 %v2678_v49  ;;  %v9281_v49 = vld [vmem:[%s11759_s5 + $0x80c] ss:$16 sps:$4 sm:$0xff]  }
 0x268   : > { %6865 = vmatpush1.bf16.msra.mxu0 %v9186_v50  ;;  %7398 = vmatpush1.bf16.msra.mxu1 %v9189_v35  ;;  %v2694_v50 = vcombine.high %v12059_v37, %v12059_v37  ;;  %v9276_v35 = vld [vmem:[%s11759_s5 + $0x800] ss:$16 sps:$4 sm:$0xff]  }
 0x269   : > { %6866 = vmatprep.subr.bf16.mxu0 %v9194_v51  ;;  %7399 = vmatprep.subr.bf16.mxu1 %v9197_v52  ;;  %v2676_v51 = vcombine.high %v11995_v34, %v11995_v34  ;;  %v9279_v52 = vld [vmem:[%s11759_s5 + $0x808] ss:$16 sps:$4 sm:$0xff]   ;;  %v9282_v34 = vld [vmem:[%s11759_s5 + $0x820] ss:$16 sps:$4 sm:$0xff]  }
 0x26c   : > { %6867 = vmatpush1.bf16.msra.mxu0 %v9192_v44  ;;  %7400 = vmatpush1.bf16.msra.mxu1 %v9195_v53  ;;  %v9284_v44 = vld [vmem:[%s11759_s5 + $0x824] ss:$16 sps:$4 sm:$0xff]   ;;  %v9287_v53 = vld [vmem:[%s11759_s5 + $0x82c] ss:$16 sps:$4 sm:$0xff]  }
 0x26d   : > { %6868 = vmatprep.subr.bf16.mxu0 %v9200_v54  ;;  %7401 = vmatprep.subr.bf16.mxu1 %v9203_v55  ;;  %v12077_v54 = vrot.slane %v2694_v50, %v11764_v24  ;;  %v9285_v55 = vld [vmem:[%s11759_s5 + $0x828] ss:$16 sps:$4 sm:$0xff]   ;;  %v9368_v50 = vld [vmem:[%s11759_s5 + $0x9e4] ss:$16 sps:$4 sm:$0xff]  }
 0x270   : > { %6869 = vmatpush1.bf16.msra.mxu0 %v9198_v56  ;;  %7402 = vmatpush1.bf16.msra.mxu1 %v9201_v57  ;;  %v9290_v56 = vld [vmem:[%s11759_s5 + $0x844] ss:$16 sps:$4 sm:$0xff]   ;;  %v9293_v57 = vld [vmem:[%s11759_s5 + $0x84c] ss:$16 sps:$4 sm:$0xff]  }
 0x271   : > { %6870 = vmatprep.subr.bf16.mxu0 %v9206_v58  ;;  %7403 = vmatprep.subr.bf16.mxu1 %v9209_v59  ;;  %v9288_v58 = vld [vmem:[%s11759_s5 + $0x840] ss:$16 sps:$4 sm:$0xff]   ;;  %v9291_v59 = vld [vmem:[%s11759_s5 + $0x848] ss:$16 sps:$4 sm:$0xff]  }
 0x274   : > { %6871 = vmatpush1.bf16.msra.mxu0 %v9204_v60  ;;  %7404 = vmatpush1.bf16.msra.mxu1 %v9207_v61  ;;  %v9296_v60 = vld [vmem:[%s11759_s5 + $0x864] ss:$16 sps:$4 sm:$0xff]   ;;  %v9299_v61 = vld [vmem:[%s11759_s5 + $0x86c] ss:$16 sps:$4 sm:$0xff]  }
 0x275   : > { %6872 = vmatprep.subr.bf16.mxu0 %v9212_v62  ;;  %7405 = vmatprep.subr.bf16.mxu1 %v9215_v63  ;;  %v9294_v62 = vld [vmem:[%s11759_s5 + $0x860] ss:$16 sps:$4 sm:$0xff]   ;;  %v9297_v63 = vld [vmem:[%s11759_s5 + $0x868] ss:$16 sps:$4 sm:$0xff]  }
 0x278   : > { %6873 = vmatpush1.bf16.msra.mxu0 %v9210_v0  ;;  %7406 = vmatpush1.bf16.msra.mxu1 %v9213_v1  ;;  %v9302_v0 = vld [vmem:[%s11759_s5 + $0x884] ss:$16 sps:$4 sm:$0xff]   ;;  %v9305_v1 = vld [vmem:[%s11759_s5 + $0x88c] ss:$16 sps:$4 sm:$0xff]  }
 0x279   : > { %6874 = vmatprep.subr.bf16.mxu0 %v9218_v2  ;;  %7407 = vmatprep.subr.bf16.mxu1 %v9221_v3  ;;  %v9300_v2 = vld [vmem:[%s11759_s5 + $0x880] ss:$16 sps:$4 sm:$0xff]   ;;  %v9303_v3 = vld [vmem:[%s11759_s5 + $0x888] ss:$16 sps:$4 sm:$0xff]  }
 0x27c   : > { %6875 = vmatpush1.bf16.msra.mxu0 %v9216_v4  ;;  %7408 = vmatpush1.bf16.msra.mxu1 %v9219_v5  ;;  %v9308_v4 = vld [vmem:[%s11759_s5 + $0x8a4] ss:$16 sps:$4 sm:$0xff]   ;;  %v9311_v5 = vld [vmem:[%s11759_s5 + $0x8ac] ss:$16 sps:$4 sm:$0xff]  }
 0x27d   : > { %6876 = vmatprep.subr.bf16.mxu0 %v9224_v6  ;;  %7409 = vmatprep.subr.bf16.mxu1 %v9227_v7  ;;  %v9306_v6 = vld [vmem:[%s11759_s5 + $0x8a0] ss:$16 sps:$4 sm:$0xff]   ;;  %v9309_v7 = vld [vmem:[%s11759_s5 + $0x8a8] ss:$16 sps:$4 sm:$0xff]  }
 0x280   : > { %6877 = vmatpush1.bf16.msra.mxu0 %v9222_v8  ;;  %7410 = vmatpush1.bf16.msra.mxu1 %v9225_v9  ;;  %v9314_v8 = vld [vmem:[%s11759_s5 + $0x8c4] ss:$16 sps:$4 sm:$0xff]   ;;  %v9317_v9 = vld [vmem:[%s11759_s5 + $0x8cc] ss:$16 sps:$4 sm:$0xff]  }
 0x281   : > { %6878 = vmatprep.subr.bf16.mxu0 %v9230_v10  ;;  %7411 = vmatprep.subr.bf16.mxu1 %v9233_v11  ;;  %v9312_v10 = vld [vmem:[%s11759_s5 + $0x8c0] ss:$16 sps:$4 sm:$0xff]   ;;  %v9315_v11 = vld [vmem:[%s11759_s5 + $0x8c8] ss:$16 sps:$4 sm:$0xff]  }
 0x284   : > { %6879 = vmatpush1.bf16.msra.mxu0 %v9228_v12  ;;  %7412 = vmatpush1.bf16.msra.mxu1 %v9231_v13  ;;  %v9320_v12 = vld [vmem:[%s11759_s5 + $0x8e4] ss:$16 sps:$4 sm:$0xff]   ;;  %v9323_v13 = vld [vmem:[%s11759_s5 + $0x8ec] ss:$16 sps:$4 sm:$0xff]  }
 0x285   : > { %6880 = vmatprep.subr.bf16.mxu0 %v9236_v14  ;;  %7413 = vmatprep.subr.bf16.mxu1 %v9239_v15  ;;  %v9318_v14 = vld [vmem:[%s11759_s5 + $0x8e0] ss:$16 sps:$4 sm:$0xff]   ;;  %v9321_v15 = vld [vmem:[%s11759_s5 + $0x8e8] ss:$16 sps:$4 sm:$0xff]  }
 0x288   : > { %6881 = vmatpush1.bf16.msra.mxu0 %v9234_v16  ;;  %7414 = vmatpush1.bf16.msra.mxu1 %v9237_v17  ;;  %v9326_v16 = vld [vmem:[%s11759_s5 + $0x904] ss:$16 sps:$4 sm:$0xff]   ;;  %v9329_v17 = vld [vmem:[%s11759_s5 + $0x90c] ss:$16 sps:$4 sm:$0xff]  }
 0x289   : > { %6882 = vmatprep.subr.bf16.mxu0 %v9242_v18  ;;  %7415 = vmatprep.subr.bf16.mxu1 %v9245_v21  ;;  %v9324_v18 = vld [vmem:[%s11759_s5 + $0x900] ss:$16 sps:$4 sm:$0xff]   ;;  %v9327_v21 = vld [vmem:[%s11759_s5 + $0x908] ss:$16 sps:$4 sm:$0xff]  }
 0x28c   : > { %6883 = vmatpush1.bf16.msra.mxu0 %v9240_v22  ;;  %7416 = vmatpush1.bf16.msra.mxu1 %v9243_v23  ;;  %v9332_v22 = vld [vmem:[%s11759_s5 + $0x924] ss:$16 sps:$4 sm:$0xff]   ;;  %v9335_v23 = vld [vmem:[%s11759_s5 + $0x92c] ss:$16 sps:$4 sm:$0xff]  }
 0x28d   : > { %6884 = vmatprep.subr.bf16.mxu0 %v9248_v25  ;;  %7417 = vmatprep.subr.bf16.mxu1 %v9251_v26  ;;  %v9330_v25 = vld [vmem:[%s11759_s5 + $0x920] ss:$16 sps:$4 sm:$0xff]   ;;  %v9333_v26 = vld [vmem:[%s11759_s5 + $0x928] ss:$16 sps:$4 sm:$0xff]  }
 0x290   : > { %6885 = vmatpush1.bf16.msra.mxu0 %v9246_v27  ;;  %7418 = vmatpush1.bf16.msra.mxu1 %v9249_v29  ;;  %v9338_v27 = vld [vmem:[%s11759_s5 + $0x944] ss:$16 sps:$4 sm:$0xff]   ;;  %v9341_v29 = vld [vmem:[%s11759_s5 + $0x94c] ss:$16 sps:$4 sm:$0xff]  }
 0x291   : > { %6886 = vmatprep.subr.bf16.mxu0 %v9254_v30  ;;  %7419 = vmatprep.subr.bf16.mxu1 %v9257_v31  ;;  %v9336_v30 = vld [vmem:[%s11759_s5 + $0x940] ss:$16 sps:$4 sm:$0xff]   ;;  %v9339_v31 = vld [vmem:[%s11759_s5 + $0x948] ss:$16 sps:$4 sm:$0xff]  }
 0x294   : > { %6887 = vmatpush1.bf16.msra.mxu0 %v9252_v32  ;;  %7420 = vmatpush1.bf16.msra.mxu1 %v9255_v33  ;;  %v9344_v32 = vld [vmem:[%s11759_s5 + $0x964] ss:$16 sps:$4 sm:$0xff]   ;;  %v9347_v33 = vld [vmem:[%s11759_s5 + $0x96c] ss:$16 sps:$4 sm:$0xff]  }
 0x295   : > { %6888 = vmatprep.subr.bf16.mxu0 %v9260_v36  ;;  %7421 = vmatprep.subr.bf16.mxu1 %v9263_v38  ;;  %v9342_v36 = vld [vmem:[%s11759_s5 + $0x960] ss:$16 sps:$4 sm:$0xff]   ;;  %v9345_v38 = vld [vmem:[%s11759_s5 + $0x968] ss:$16 sps:$4 sm:$0xff]  }
 0x298   : > { %6889 = vmatpush1.bf16.msra.mxu0 %v9258_v20  ;;  %7422 = vmatpush1.bf16.msra.mxu1 %v9261_v39  ;;  %v9350_v20 = vld [vmem:[%s11759_s5 + $0x984] ss:$16 sps:$4 sm:$0xff]   ;;  %v9353_v39 = vld [vmem:[%s11759_s5 + $0x98c] ss:$16 sps:$4 sm:$0xff]  }
 0x299   : > { %6890 = vmatprep.subr.bf16.mxu0 %v9266_v28  ;;  %7423 = vmatprep.subr.bf16.mxu1 %v9269_v40  ;;  %v9348_v28 = vld [vmem:[%s11759_s5 + $0x980] ss:$16 sps:$4 sm:$0xff]   ;;  %v9351_v40 = vld [vmem:[%s11759_s5 + $0x988] ss:$16 sps:$4 sm:$0xff]  }
 0x29c   : > { %6891 = vmatpush1.bf16.msra.mxu0 %v9264_v41  ;;  %7424 = vmatpush1.bf16.msra.mxu1 %v9267_v42  ;;  %v9356_v41 = vld [vmem:[%s11759_s5 + $0x9a4] ss:$16 sps:$4 sm:$0xff]   ;;  %v9359_v42 = vld [vmem:[%s11759_s5 + $0x9ac] ss:$16 sps:$4 sm:$0xff]  }
 0x29d   : > { %6892 = vmatprep.subr.bf16.mxu0 %v9272_v43  ;;  %7425 = vmatprep.subr.bf16.mxu1 %v9275_v45  ;;  %v9354_v43 = vld [vmem:[%s11759_s5 + $0x9a0] ss:$16 sps:$4 sm:$0xff]   ;;  %v9357_v45 = vld [vmem:[%s11759_s5 + $0x9a8] ss:$16 sps:$4 sm:$0xff]  }
 0x2a0   : > { %6893 = vmatpush1.bf16.msra.mxu0 %v9270_v46  ;;  %7426 = vmatpush1.bf16.msra.mxu1 %v9273_v47  ;;  %v9362_v46 = vld [vmem:[%s11759_s5 + $0x9c4] ss:$16 sps:$4 sm:$0xff]   ;;  %v9365_v47 = vld [vmem:[%s11759_s5 + $0x9cc] ss:$16 sps:$4 sm:$0xff]  }
 0x2a1   : > { %6903 = vmatprep.subr.bf16.mxu0 %v9278_v48  ;;  %7436 = vmatprep.subr.bf16.mxu1 %v9281_v49  ;;  %v9360_v48 = vld [vmem:[%s11759_s5 + $0x9c0] ss:$16 sps:$4 sm:$0xff]   ;;  %v9363_v49 = vld [vmem:[%s11759_s5 + $0x9c8] ss:$16 sps:$4 sm:$0xff]  }
 0x2a3   : > { %6895 = vmatmul.mubr.bf16.vlgmr.msra.gmra.mrb[0].mxu0 %v2676_v51  ;;  %7428 = vmatmul.mubr.bf16.vlgmr.msra.gmra.mrb[0].mxu1 %v2676_v51  ;;  %v9366_v51 = vld [vmem:[%s11759_s5 + $0x9e0] ss:$16 sps:$4 sm:$0xff]  }
 0x2a4   : > { %6904 = vmatpush1.bf16.msra.mxu0 %v9276_v35  ;;  %7437 = vmatpush1.bf16.msra.mxu1 %v9279_v52  ;;  %v9371_v35 = vld [vmem:[%s11759_s5 + $0x9ec] ss:$16 sps:$4 sm:$0xff]   ;;  %v9369_v52 = vld [vmem:[%s11759_s5 + $0x9e8] ss:$16 sps:$4 sm:$0xff]  }
 0x2a5   : > { %6905 = vmatprep.subr.bf16.mxu0 %v9284_v44  ;;  %7438 = vmatprep.subr.bf16.mxu1 %v9287_v53  ;;  %v9374_v44 = vld [vmem:[%s11759_s5 + $0xa04] ss:$16 sps:$4 sm:$0xff]   ;;  %v9377_v53 = vld [vmem:[%s11759_s5 + $0xa0c] ss:$16 sps:$4 sm:$0xff]  }
 0x2a6   : > { %6935 = vmatprep.mubr.bf16.mxu0 %v12077_v54  ;;  %7468 = vmatprep.mubr.bf16.mxu1 %v12077_v54 }
 0x2a8   : > { %6906 = vmatpush1.bf16.msra.mxu0 %v9282_v34  ;;  %7439 = vmatpush1.bf16.msra.mxu1 %v9285_v55  ;;  %v12143_v34 = vrot.slane %v12059_v37, %v11764_v24  ;;  %v9372_v55 = vld [vmem:[%s11759_s5 + $0xa00] ss:$16 sps:$4 sm:$0xff]  }
 0x2a9   : > { %6907 = vmatprep.subr.bf16.mxu0 %v9290_v56  ;;  %7440 = vmatprep.subr.bf16.mxu1 %v9293_v57  ;;  %v9375_v56 = vld [vmem:[%s11759_s5 + $0xa08] ss:$16 sps:$4 sm:$0xff]   ;;  %v9380_v57 = vld [vmem:[%s11759_s5 + $0xa24] ss:$16 sps:$4 sm:$0xff]   ;;  %v9378_v37 = vld [vmem:[%s11759_s5 + $0xa20] ss:$16 sps:$4 sm:$0xff]  }
 0x2ac   : > { %6908 = vmatpush1.bf16.msra.mxu0 %v9288_v58  ;;  %7441 = vmatpush1.bf16.msra.mxu1 %v9291_v59  ;;  %v9383_v58 = vld [vmem:[%s11759_s5 + $0xa2c] ss:$16 sps:$4 sm:$0xff]   ;;  %v2726_v59 = vcombine.high %v12077_v54, %v12077_v54  ;;  %v9384_v54 = vld [vmem:[%s11759_s5 + $0xa40] ss:$16 sps:$4 sm:$0xff]  }
 0x2ad   : > { %6909 = vmatprep.subr.bf16.mxu0 %v9296_v60  ;;  %7442 = vmatprep.subr.bf16.mxu1 %v9299_v61  ;;  %v9381_v60 = vld [vmem:[%s11759_s5 + $0xa28] ss:$16 sps:$4 sm:$0xff]   ;;  %v9386_v61 = vld [vmem:[%s11759_s5 + $0xa44] ss:$16 sps:$4 sm:$0xff]  }
 0x2b0   : > { %6910 = vmatpush1.bf16.msra.mxu0 %v9294_v62  ;;  %7443 = vmatpush1.bf16.msra.mxu1 %v9297_v63  ;;  %v9389_v62 = vld [vmem:[%s11759_s5 + $0xa4c] ss:$16 sps:$4 sm:$0xff]   ;;  %v9387_v63 = vld [vmem:[%s11759_s5 + $0xa48] ss:$16 sps:$4 sm:$0xff]  }
 0x2b1   : > { %6911 = vmatprep.subr.bf16.mxu0 %v9302_v0  ;;  %7444 = vmatprep.subr.bf16.mxu1 %v9305_v1  ;;  %v9392_v0 = vld [vmem:[%s11759_s5 + $0xa64] ss:$16 sps:$4 sm:$0xff]   ;;  %v9395_v1 = vld [vmem:[%s11759_s5 + $0xa6c] ss:$16 sps:$4 sm:$0xff]  }
 0x2b4   : > { %6912 = vmatpush1.bf16.msra.mxu0 %v9300_v2  ;;  %7445 = vmatpush1.bf16.msra.mxu1 %v9303_v3  ;;  %v9390_v2 = vld [vmem:[%s11759_s5 + $0xa60] ss:$16 sps:$4 sm:$0xff]   ;;  %v9393_v3 = vld [vmem:[%s11759_s5 + $0xa68] ss:$16 sps:$4 sm:$0xff]  }
 0x2b5   : > { %6913 = vmatprep.subr.bf16.mxu0 %v9308_v4  ;;  %7446 = vmatprep.subr.bf16.mxu1 %v9311_v5  ;;  %v9398_v4 = vld [vmem:[%s11759_s5 + $0xa84] ss:$16 sps:$4 sm:$0xff]   ;;  %v9401_v5 = vld [vmem:[%s11759_s5 + $0xa8c] ss:$16 sps:$4 sm:$0xff]  }
 0x2b8   : > { %6914 = vmatpush1.bf16.msra.mxu0 %v9306_v6  ;;  %7447 = vmatpush1.bf16.msra.mxu1 %v9309_v7  ;;  %v9396_v6 = vld [vmem:[%s11759_s5 + $0xa80] ss:$16 sps:$4 sm:$0xff]   ;;  %v9399_v7 = vld [vmem:[%s11759_s5 + $0xa88] ss:$16 sps:$4 sm:$0xff]  }
 0x2b9   : > { %6915 = vmatprep.subr.bf16.mxu0 %v9314_v8  ;;  %7448 = vmatprep.subr.bf16.mxu1 %v9317_v9  ;;  %v9404_v8 = vld [vmem:[%s11759_s5 + $0xaa4] ss:$16 sps:$4 sm:$0xff]   ;;  %v9407_v9 = vld [vmem:[%s11759_s5 + $0xaac] ss:$16 sps:$4 sm:$0xff]  }
 0x2bc   : > { %6916 = vmatpush1.bf16.msra.mxu0 %v9312_v10  ;;  %7449 = vmatpush1.bf16.msra.mxu1 %v9315_v11  ;;  %v9402_v10 = vld [vmem:[%s11759_s5 + $0xaa0] ss:$16 sps:$4 sm:$0xff]   ;;  %v9405_v11 = vld [vmem:[%s11759_s5 + $0xaa8] ss:$16 sps:$4 sm:$0xff]  }
 0x2bd   : > { %6917 = vmatprep.subr.bf16.mxu0 %v9320_v12  ;;  %7450 = vmatprep.subr.bf16.mxu1 %v9323_v13  ;;  %v9410_v12 = vld [vmem:[%s11759_s5 + $0xac4] ss:$16 sps:$4 sm:$0xff]   ;;  %v9413_v13 = vld [vmem:[%s11759_s5 + $0xacc] ss:$16 sps:$4 sm:$0xff]  }
 0x2c0   : > { %6918 = vmatpush1.bf16.msra.mxu0 %v9318_v14  ;;  %7451 = vmatpush1.bf16.msra.mxu1 %v9321_v15  ;;  %v9408_v14 = vld [vmem:[%s11759_s5 + $0xac0] ss:$16 sps:$4 sm:$0xff]   ;;  %v9411_v15 = vld [vmem:[%s11759_s5 + $0xac8] ss:$16 sps:$4 sm:$0xff]  }
 0x2c1   : > { %6919 = vmatprep.subr.bf16.mxu0 %v9326_v16  ;;  %7452 = vmatprep.subr.bf16.mxu1 %v9329_v17  ;;  %v9416_v16 = vld [vmem:[%s11759_s5 + $0xae4] ss:$16 sps:$4 sm:$0xff]   ;;  %v9419_v17 = vld [vmem:[%s11759_s5 + $0xaec] ss:$16 sps:$4 sm:$0xff]  }
 0x2c4   : > { %6920 = vmatpush1.bf16.msra.mxu0 %v9324_v18  ;;  %7453 = vmatpush1.bf16.msra.mxu1 %v9327_v21  ;;  %v9414_v18 = vld [vmem:[%s11759_s5 + $0xae0] ss:$16 sps:$4 sm:$0xff]   ;;  %v9417_v21 = vld [vmem:[%s11759_s5 + $0xae8] ss:$16 sps:$4 sm:$0xff]  }
 0x2c5   : > { %6921 = vmatprep.subr.bf16.mxu0 %v9332_v22  ;;  %7454 = vmatprep.subr.bf16.mxu1 %v9335_v23  ;;  %v9422_v22 = vld [vmem:[%s11759_s5 + $0xb04] ss:$16 sps:$4 sm:$0xff]   ;;  %v9425_v23 = vld [vmem:[%s11759_s5 + $0xb0c] ss:$16 sps:$4 sm:$0xff]  }
 0x2c8   : > { %6922 = vmatpush1.bf16.msra.mxu0 %v9330_v25  ;;  %7455 = vmatpush1.bf16.msra.mxu1 %v9333_v26  ;;  %v9420_v25 = vld [vmem:[%s11759_s5 + $0xb00] ss:$16 sps:$4 sm:$0xff]   ;;  %v9423_v26 = vld [vmem:[%s11759_s5 + $0xb08] ss:$16 sps:$4 sm:$0xff]  }
 0x2c9   : > { %6923 = vmatprep.subr.bf16.mxu0 %v9338_v27  ;;  %7456 = vmatprep.subr.bf16.mxu1 %v9341_v29  ;;  %v9428_v27 = vld [vmem:[%s11759_s5 + $0xb24] ss:$16 sps:$4 sm:$0xff]   ;;  %v9431_v29 = vld [vmem:[%s11759_s5 + $0xb2c] ss:$16 sps:$4 sm:$0xff]  }
 0x2cc   : > { %6924 = vmatpush1.bf16.msra.mxu0 %v9336_v30  ;;  %7457 = vmatpush1.bf16.msra.mxu1 %v9339_v31  ;;  %v9426_v30 = vld [vmem:[%s11759_s5 + $0xb20] ss:$16 sps:$4 sm:$0xff]   ;;  %v9429_v31 = vld [vmem:[%s11759_s5 + $0xb28] ss:$16 sps:$4 sm:$0xff]  }
 0x2cd   : > { %6925 = vmatprep.subr.bf16.mxu0 %v9344_v32  ;;  %7458 = vmatprep.subr.bf16.mxu1 %v9347_v33  ;;  %v9434_v32 = vld [vmem:[%s11759_s5 + $0xb44] ss:$16 sps:$4 sm:$0xff]   ;;  %v9437_v33 = vld [vmem:[%s11759_s5 + $0xb4c] ss:$16 sps:$4 sm:$0xff]  }
 0x2d0   : > { %6926 = vmatpush1.bf16.msra.mxu0 %v9342_v36  ;;  %7459 = vmatpush1.bf16.msra.mxu1 %v9345_v38  ;;  %v9432_v36 = vld [vmem:[%s11759_s5 + $0xb40] ss:$16 sps:$4 sm:$0xff]   ;;  %v9435_v38 = vld [vmem:[%s11759_s5 + $0xb48] ss:$16 sps:$4 sm:$0xff]  }
 0x2d1   : > { %6927 = vmatprep.subr.bf16.mxu0 %v9350_v20  ;;  %7460 = vmatprep.subr.bf16.mxu1 %v9353_v39  ;;  %v9440_v20 = vld [vmem:[%s11759_s5 + $0xb64] ss:$16 sps:$4 sm:$0xff]   ;;  %v9443_v39 = vld [vmem:[%s11759_s5 + $0xb6c] ss:$16 sps:$4 sm:$0xff]  }
 0x2d4   : > { %6928 = vmatpush1.bf16.msra.mxu0 %v9348_v28  ;;  %7461 = vmatpush1.bf16.msra.mxu1 %v9351_v40  ;;  %v9438_v28 = vld [vmem:[%s11759_s5 + $0xb60] ss:$16 sps:$4 sm:$0xff]   ;;  %v9441_v40 = vld [vmem:[%s11759_s5 + $0xb68] ss:$16 sps:$4 sm:$0xff]  }
 0x2d5   : > { %6929 = vmatprep.subr.bf16.mxu0 %v9356_v41  ;;  %7462 = vmatprep.subr.bf16.mxu1 %v9359_v42  ;;  %v9446_v41 = vld [vmem:[%s11759_s5 + $0xb84] ss:$16 sps:$4 sm:$0xff]   ;;  %v9449_v42 = vld [vmem:[%s11759_s5 + $0xb8c] ss:$16 sps:$4 sm:$0xff]  }
 0x2d8   : > { %6930 = vmatpush1.bf16.msra.mxu0 %v9354_v43  ;;  %7463 = vmatpush1.bf16.msra.mxu1 %v9357_v45  ;;  %v9444_v43 = vld [vmem:[%s11759_s5 + $0xb80] ss:$16 sps:$4 sm:$0xff]   ;;  %v9447_v45 = vld [vmem:[%s11759_s5 + $0xb88] ss:$16 sps:$4 sm:$0xff]  }
 0x2d9   : > { %6931 = vmatprep.subr.bf16.mxu0 %v9362_v46  ;;  %7464 = vmatprep.subr.bf16.mxu1 %v9365_v47  ;;  %v9452_v46 = vld [vmem:[%s11759_s5 + $0xba4] ss:$16 sps:$4 sm:$0xff]   ;;  %v9455_v47 = vld [vmem:[%s11759_s5 + $0xbac] ss:$16 sps:$4 sm:$0xff]  }
 0x2dc   : > { %6932 = vmatpush1.bf16.msra.mxu0 %v9360_v48  ;;  %7465 = vmatpush1.bf16.msra.mxu1 %v9363_v49  ;;  %v9450_v48 = vld [vmem:[%s11759_s5 + $0xba0] ss:$16 sps:$4 sm:$0xff]   ;;  %v9453_v49 = vld [vmem:[%s11759_s5 + $0xba8] ss:$16 sps:$4 sm:$0xff]  }
 0x2dd   : > { %6933 = vmatprep.subr.bf16.mxu0 %v9368_v50  ;;  %7466 = vmatprep.subr.bf16.mxu1 %v9371_v35  ;;  %v9458_v50 = vld [vmem:[%s11759_s5 + $0xbc4] ss:$16 sps:$4 sm:$0xff]   ;;  %v9461_v35 = vld [vmem:[%s11759_s5 + $0xbcc] ss:$16 sps:$4 sm:$0xff]  }
 0x2e0   : > { %6934 = vmatpush1.bf16.msra.mxu0 %v9366_v51  ;;  %7467 = vmatpush1.bf16.msra.mxu1 %v9369_v52  ;;  %v10070_v51 = vld [vmem:[%s12720_s0 + $0x8] sm:$0xff] }
 0x2e1   : > { %6944 = vmatprep.subr.bf16.mxu0 %v9374_v44  ;;  %7477 = vmatprep.subr.bf16.mxu1 %v9377_v53  ;;  %v2679_v52 = vcombine.high %v10070_v51, %v10070_v51  ;;  %v9456_v44 = vld [vmem:[%s11759_s5 + $0xbc0] ss:$16 sps:$4 sm:$0xff]   ;;  %v9459_v53 = vld [vmem:[%s11759_s5 + $0xbc8] ss:$16 sps:$4 sm:$0xff]  }
 0x2e2   : > { %v9540_v51 = vld [vmem:[%s11759_s5 + $0xd80] ss:$16 sps:$4 sm:$0xff]  }
 0x2e3   : > { %6936 = vmatmul.mubr.bf16.vlgmr.msra.gmra.mrb[0].mxu0 %v12143_v34  ;;  %7469 = vmatmul.mubr.bf16.vlgmr.msra.gmra.mrb[0].mxu1 %v12143_v34 }
 0x2e4   : > { %6945 = vmatpush1.bf16.msra.mxu0 %v9372_v55  ;;  %7478 = vmatpush1.bf16.msra.mxu1 %v9375_v56  ;;  %v9464_v55 = vld [vmem:[%s11759_s5 + $0xbe4] ss:$16 sps:$4 sm:$0xff]   ;;  %v9467_v56 = vld [vmem:[%s11759_s5 + $0xbec] ss:$16 sps:$4 sm:$0xff]  }
 0x2e5   : > { %6946 = vmatprep.subr.bf16.mxu0 %v9380_v57  ;;  %7479 = vmatprep.subr.bf16.mxu1 %v9383_v58  ;;  %v12213_v57 = vrot.slane %v2679_v52, %v11764_v24  ;;  %v9462_v58 = vld [vmem:[%s11759_s5 + $0xbe0] ss:$16 sps:$4 sm:$0xff]   ;;  %v9543_v52 = vld [vmem:[%s11759_s5 + $0xd88] ss:$16 sps:$4 sm:$0xff]  }
 0x2e6   : > { %6976 = vmatprep.mubr.bf16.mxu0 %v2726_v59  ;;  %7509 = vmatprep.mubr.bf16.mxu1 %v2726_v59  ;;  %v9465_v59 = vld [vmem:[%s11759_s5 + $0xbe8] ss:$16 sps:$4 sm:$0xff]  }
 0x2e8   : > { %6947 = vmatpush1.bf16.msra.mxu0 %v9378_v37  ;;  %7480 = vmatpush1.bf16.msra.mxu1 %v9381_v60  ;;  %v9470_v37 = vld [vmem:[%s11759_s5 + $0xc04] ss:$16 sps:$4 sm:$0xff]   ;;  %v9473_v60 = vld [vmem:[%s11759_s5 + $0xc0c] ss:$16 sps:$4 sm:$0xff]  }
 0x2e9   : > { %6948 = vmatprep.subr.bf16.mxu0 %v9386_v61  ;;  %7481 = vmatprep.subr.bf16.mxu1 %v9389_v62  ;;  %v2695_v61 = vcombine.high %v12213_v57, %v12213_v57  ;;  %v2724_v62 = vcombine.high %v12143_v34, %v12143_v34  ;;  %v9474_v34 = vld [vmem:[%s11759_s5 + $0xc20] ss:$16 sps:$4 sm:$0xff]  }
 0x2ec   : > { %6949 = vmatpush1.bf16.msra.mxu0 %v9384_v54  ;;  %7482 = vmatpush1.bf16.msra.mxu1 %v9387_v63  ;;  %v9468_v54 = vld [vmem:[%s11759_s5 + $0xc00] ss:$16 sps:$4 sm:$0xff]   ;;  %v9471_v63 = vld [vmem:[%s11759_s5 + $0xc08] ss:$16 sps:$4 sm:$0xff]  }
 0x2ed   : > { %6950 = vmatprep.subr.bf16.mxu0 %v9392_v0  ;;  %7483 = vmatprep.subr.bf16.mxu1 %v9395_v1  ;;  %v9476_v0 = vld [vmem:[%s11759_s5 + $0xc24] ss:$16 sps:$4 sm:$0xff]   ;;  %v9479_v1 = vld [vmem:[%s11759_s5 + $0xc2c] ss:$16 sps:$4 sm:$0xff]  }
 0x2f0   : > { %6951 = vmatpush1.bf16.msra.mxu0 %v9390_v2  ;;  %7484 = vmatpush1.bf16.msra.mxu1 %v9393_v3  ;;  %v12228_v2 = vrot.slane %v2695_v61, %v11764_v24  ;;  %v9477_v3 = vld [vmem:[%s11759_s5 + $0xc28] ss:$16 sps:$4 sm:$0xff]   ;;  %v9560_v61 = vld [vmem:[%s11759_s5 + $0xde4] ss:$16 sps:$4 sm:$0xff]  }
 0x2f1   : > { %6952 = vmatprep.subr.bf16.mxu0 %v9398_v4  ;;  %7485 = vmatprep.subr.bf16.mxu1 %v9401_v5  ;;  %v9482_v4 = vld [vmem:[%s11759_s5 + $0xc44] ss:$16 sps:$4 sm:$0xff]   ;;  %v9485_v5 = vld [vmem:[%s11759_s5 + $0xc4c] ss:$16 sps:$4 sm:$0xff]  }
 0x2f4   : > { %6953 = vmatpush1.bf16.msra.mxu0 %v9396_v6  ;;  %7486 = vmatpush1.bf16.msra.mxu1 %v9399_v7  ;;  %v9480_v6 = vld [vmem:[%s11759_s5 + $0xc40] ss:$16 sps:$4 sm:$0xff]   ;;  %v9483_v7 = vld [vmem:[%s11759_s5 + $0xc48] ss:$16 sps:$4 sm:$0xff]  }
 0x2f5   : > { %6954 = vmatprep.subr.bf16.mxu0 %v9404_v8  ;;  %7487 = vmatprep.subr.bf16.mxu1 %v9407_v9  ;;  %v9488_v8 = vld [vmem:[%s11759_s5 + $0xc64] ss:$16 sps:$4 sm:$0xff]   ;;  %v9491_v9 = vld [vmem:[%s11759_s5 + $0xc6c] ss:$16 sps:$4 sm:$0xff]  }
 0x2f8   : > { %6955 = vmatpush1.bf16.msra.mxu0 %v9402_v10  ;;  %7488 = vmatpush1.bf16.msra.mxu1 %v9405_v11  ;;  %v9486_v10 = vld [vmem:[%s11759_s5 + $0xc60] ss:$16 sps:$4 sm:$0xff]   ;;  %v9489_v11 = vld [vmem:[%s11759_s5 + $0xc68] ss:$16 sps:$4 sm:$0xff]  }
 0x2f9   : > { %6956 = vmatprep.subr.bf16.mxu0 %v9410_v12  ;;  %7489 = vmatprep.subr.bf16.mxu1 %v9413_v13  ;;  %v9494_v12 = vld [vmem:[%s11759_s5 + $0xc84] ss:$16 sps:$4 sm:$0xff]   ;;  %v9497_v13 = vld [vmem:[%s11759_s5 + $0xc8c] ss:$16 sps:$4 sm:$0xff]  }
 0x2fc   : > { %6957 = vmatpush1.bf16.msra.mxu0 %v9408_v14  ;;  %7490 = vmatpush1.bf16.msra.mxu1 %v9411_v15  ;;  %v9492_v14 = vld [vmem:[%s11759_s5 + $0xc80] ss:$16 sps:$4 sm:$0xff]   ;;  %v9495_v15 = vld [vmem:[%s11759_s5 + $0xc88] ss:$16 sps:$4 sm:$0xff]  }
 0x2fd   : > { %6958 = vmatprep.subr.bf16.mxu0 %v9416_v16  ;;  %7491 = vmatprep.subr.bf16.mxu1 %v9419_v17  ;;  %v9500_v16 = vld [vmem:[%s11759_s5 + $0xca4] ss:$16 sps:$4 sm:$0xff]   ;;  %v9503_v17 = vld [vmem:[%s11759_s5 + $0xcac] ss:$16 sps:$4 sm:$0xff]  }
 0x300   : > { %6959 = vmatpush1.bf16.msra.mxu0 %v9414_v18  ;;  %7492 = vmatpush1.bf16.msra.mxu1 %v9417_v21  ;;  %v9498_v18 = vld [vmem:[%s11759_s5 + $0xca0] ss:$16 sps:$4 sm:$0xff]   ;;  %v9501_v21 = vld [vmem:[%s11759_s5 + $0xca8] ss:$16 sps:$4 sm:$0xff]  }
 0x301   : > { %6960 = vmatprep.subr.bf16.mxu0 %v9422_v22  ;;  %7493 = vmatprep.subr.bf16.mxu1 %v9425_v23  ;;  %v9506_v22 = vld [vmem:[%s11759_s5 + $0xcc4] ss:$16 sps:$4 sm:$0xff]   ;;  %v9509_v23 = vld [vmem:[%s11759_s5 + $0xccc] ss:$16 sps:$4 sm:$0xff]  }
 0x304   : > { %6961 = vmatpush1.bf16.msra.mxu0 %v9420_v25  ;;  %7494 = vmatpush1.bf16.msra.mxu1 %v9423_v26  ;;  %v9504_v25 = vld [vmem:[%s11759_s5 + $0xcc0] ss:$16 sps:$4 sm:$0xff]   ;;  %v9507_v26 = vld [vmem:[%s11759_s5 + $0xcc8] ss:$16 sps:$4 sm:$0xff]  }
 0x305   : > { %6962 = vmatprep.subr.bf16.mxu0 %v9428_v27  ;;  %7495 = vmatprep.subr.bf16.mxu1 %v9431_v29  ;;  %v9512_v27 = vld [vmem:[%s11759_s5 + $0xce4] ss:$16 sps:$4 sm:$0xff]   ;;  %v9515_v29 = vld [vmem:[%s11759_s5 + $0xcec] ss:$16 sps:$4 sm:$0xff]  }
 0x308   : > { %6963 = vmatpush1.bf16.msra.mxu0 %v9426_v30  ;;  %7496 = vmatpush1.bf16.msra.mxu1 %v9429_v31  ;;  %v9510_v30 = vld [vmem:[%s11759_s5 + $0xce0] ss:$16 sps:$4 sm:$0xff]   ;;  %v9513_v31 = vld [vmem:[%s11759_s5 + $0xce8] ss:$16 sps:$4 sm:$0xff]  }
 0x309   : > { %6964 = vmatprep.subr.bf16.mxu0 %v9434_v32  ;;  %7497 = vmatprep.subr.bf16.mxu1 %v9437_v33  ;;  %v9518_v32 = vld [vmem:[%s11759_s5 + $0xd04] ss:$16 sps:$4 sm:$0xff]   ;;  %v9521_v33 = vld [vmem:[%s11759_s5 + $0xd0c] ss:$16 sps:$4 sm:$0xff]  }
 0x30c   : > { %6965 = vmatpush1.bf16.msra.mxu0 %v9432_v36  ;;  %7498 = vmatpush1.bf16.msra.mxu1 %v9435_v38  ;;  %v9516_v36 = vld [vmem:[%s11759_s5 + $0xd00] ss:$16 sps:$4 sm:$0xff]   ;;  %v9519_v38 = vld [vmem:[%s11759_s5 + $0xd08] ss:$16 sps:$4 sm:$0xff]  }
 0x30d   : > { %6966 = vmatprep.subr.bf16.mxu0 %v9440_v20  ;;  %7499 = vmatprep.subr.bf16.mxu1 %v9443_v39  ;;  %v9524_v20 = vld [vmem:[%s11759_s5 + $0xd24] ss:$16 sps:$4 sm:$0xff]   ;;  %v9527_v39 = vld [vmem:[%s11759_s5 + $0xd2c] ss:$16 sps:$4 sm:$0xff]  }
 0x310   : > { %6967 = vmatpush1.bf16.msra.mxu0 %v9438_v28  ;;  %7500 = vmatpush1.bf16.msra.mxu1 %v9441_v40  ;;  %v9522_v28 = vld [vmem:[%s11759_s5 + $0xd20] ss:$16 sps:$4 sm:$0xff]   ;;  %v9525_v40 = vld [vmem:[%s11759_s5 + $0xd28] ss:$16 sps:$4 sm:$0xff]  }
 0x311   : > { %6968 = vmatprep.subr.bf16.mxu0 %v9446_v41  ;;  %7501 = vmatprep.subr.bf16.mxu1 %v9449_v42  ;;  %v9530_v41 = vld [vmem:[%s11759_s5 + $0xd44] ss:$16 sps:$4 sm:$0xff]   ;;  %v9533_v42 = vld [vmem:[%s11759_s5 + $0xd4c] ss:$16 sps:$4 sm:$0xff]  }
 0x314   : > { %6969 = vmatpush1.bf16.msra.mxu0 %v9444_v43  ;;  %7502 = vmatpush1.bf16.msra.mxu1 %v9447_v45  ;;  %v9528_v43 = vld [vmem:[%s11759_s5 + $0xd40] ss:$16 sps:$4 sm:$0xff]   ;;  %v9531_v45 = vld [vmem:[%s11759_s5 + $0xd48] ss:$16 sps:$4 sm:$0xff]  }
 0x315   : > { %6970 = vmatprep.subr.bf16.mxu0 %v9452_v46  ;;  %7503 = vmatprep.subr.bf16.mxu1 %v9455_v47  ;;  %v9536_v46 = vld [vmem:[%s11759_s5 + $0xd64] ss:$16 sps:$4 sm:$0xff]   ;;  %v9539_v47 = vld [vmem:[%s11759_s5 + $0xd6c] ss:$16 sps:$4 sm:$0xff]  }
 0x318   : > { %6971 = vmatpush1.bf16.msra.mxu0 %v9450_v48  ;;  %7504 = vmatpush1.bf16.msra.mxu1 %v9453_v49  ;;  %v9534_v48 = vld [vmem:[%s11759_s5 + $0xd60] ss:$16 sps:$4 sm:$0xff]   ;;  %v9537_v49 = vld [vmem:[%s11759_s5 + $0xd68] ss:$16 sps:$4 sm:$0xff]  }
 0x319   : > { %6972 = vmatprep.subr.bf16.mxu0 %v9458_v50  ;;  %7505 = vmatprep.subr.bf16.mxu1 %v9461_v35  ;;  %v9542_v50 = vld [vmem:[%s11759_s5 + $0xd84] ss:$16 sps:$4 sm:$0xff]   ;;  %v9545_v35 = vld [vmem:[%s11759_s5 + $0xd8c] ss:$16 sps:$4 sm:$0xff]  }
 0x31c   : > { %6973 = vmatpush1.bf16.msra.mxu0 %v9456_v44  ;;  %7506 = vmatpush1.bf16.msra.mxu1 %v9459_v53  ;;  %v9548_v44 = vld [vmem:[%s11759_s5 + $0xda4] ss:$16 sps:$4 sm:$0xff]   ;;  %v9551_v53 = vld [vmem:[%s11759_s5 + $0xdac] ss:$16 sps:$4 sm:$0xff]  }
 0x31d   : > { %6974 = vmatprep.subr.bf16.mxu0 %v9464_v55  ;;  %7507 = vmatprep.subr.bf16.mxu1 %v9467_v56  ;;  %v9546_v55 = vld [vmem:[%s11759_s5 + $0xda0] ss:$16 sps:$4 sm:$0xff]   ;;  %v9549_v56 = vld [vmem:[%s11759_s5 + $0xda8] ss:$16 sps:$4 sm:$0xff]  }
 0x320   : > { %6975 = vmatpush1.bf16.msra.mxu0 %v9462_v58  ;;  %7508 = vmatpush1.bf16.msra.mxu1 %v9465_v59  ;;  %v9554_v58 = vld [vmem:[%s11759_s5 + $0xdc4] ss:$16 sps:$4 sm:$0xff]   ;;  %v9557_v59 = vld [vmem:[%s11759_s5 + $0xdcc] ss:$16 sps:$4 sm:$0xff]  }
 0x321   : > { %6985 = vmatprep.subr.bf16.mxu0 %v9470_v37  ;;  %7518 = vmatprep.subr.bf16.mxu1 %v9473_v60  ;;  %v9552_v37 = vld [vmem:[%s11759_s5 + $0xdc0] ss:$16 sps:$4 sm:$0xff]   ;;  %v9555_v60 = vld [vmem:[%s11759_s5 + $0xdc8] ss:$16 sps:$4 sm:$0xff]  }
 0x323   : > { %6977 = vmatmul.mubr.bf16.vlgmr.msra.gmra.mrb[0].mxu0 %v2724_v62  ;;  %7510 = vmatmul.mubr.bf16.vlgmr.msra.gmra.mrb[0].mxu1 %v2724_v62  ;;  %v9563_v62 = vld [vmem:[%s11759_s5 + $0xdec] ss:$16 sps:$4 sm:$0xff]  }
 0x324   : > { %6986 = vmatpush1.bf16.msra.mxu0 %v9468_v54  ;;  %7519 = vmatpush1.bf16.msra.mxu1 %v9471_v63  ;;  %v9558_v54 = vld [vmem:[%s11759_s5 + $0xde0] ss:$16 sps:$4 sm:$0xff]   ;;  %v9561_v63 = vld [vmem:[%s11759_s5 + $0xde8] ss:$16 sps:$4 sm:$0xff]  }
 0x325   : > { %6987 = vmatprep.subr.bf16.mxu0 %v9476_v0  ;;  %7520 = vmatprep.subr.bf16.mxu1 %v9479_v1  ;;  %v9567_v0 = vld [vmem:[%s11759_s5 + $0xe04] ss:$16 sps:$4 sm:$0xff]   ;;  %v9570_v1 = vld [vmem:[%s11759_s5 + $0xe0c] ss:$16 sps:$4 sm:$0xff]  }
 0x326   : > { %7017 = vmatprep.mubr.bf16.mxu0 %v12228_v2  ;;  %7550 = vmatprep.mubr.bf16.mxu1 %v12228_v2 }
 0x328   : > { %6988 = vmatpush1.bf16.msra.mxu0 %v9474_v34  ;;  %7521 = vmatpush1.bf16.msra.mxu1 %v9477_v3  ;;  %v12294_v34 = vrot.slane %v12213_v57, %v11764_v24  ;;  %v9565_v3 = vld [vmem:[%s11759_s5 + $0xe00] ss:$16 sps:$4 sm:$0xff]  }
 0x329   : > { %6989 = vmatprep.subr.bf16.mxu0 %v9482_v4  ;;  %7522 = vmatprep.subr.bf16.mxu1 %v9485_v5  ;;  %v9568_v4 = vld [vmem:[%s11759_s5 + $0xe08] ss:$16 sps:$4 sm:$0xff]   ;;  %v9573_v5 = vld [vmem:[%s11759_s5 + $0xe24] ss:$16 sps:$4 sm:$0xff]   ;;  %v9571_v57 = vld [vmem:[%s11759_s5 + $0xe20] ss:$16 sps:$4 sm:$0xff]  }
 0x32c   : > { %6990 = vmatpush1.bf16.msra.mxu0 %v9480_v6  ;;  %7523 = vmatpush1.bf16.msra.mxu1 %v9483_v7  ;;  %v9576_v6 = vld [vmem:[%s11759_s5 + $0xe2c] ss:$16 sps:$4 sm:$0xff]   ;;  %v2727_v7 = vcombine.high %v12228_v2, %v12228_v2  ;;  %v9577_v2 = vld [vmem:[%s11759_s5 + $0xe40] ss:$16 sps:$4 sm:$0xff]  }
 0x32d   : > { %6991 = vmatprep.subr.bf16.mxu0 %v9488_v8  ;;  %7524 = vmatprep.subr.bf16.mxu1 %v9491_v9  ;;  %v9574_v8 = vld [vmem:[%s11759_s5 + $0xe28] ss:$16 sps:$4 sm:$0xff]   ;;  %v9579_v9 = vld [vmem:[%s11759_s5 + $0xe44] ss:$16 sps:$4 sm:$0xff]  }
 0x330   : > { %6992 = vmatpush1.bf16.msra.mxu0 %v9486_v10  ;;  %7525 = vmatpush1.bf16.msra.mxu1 %v9489_v11  ;;  %v9582_v10 = vld [vmem:[%s11759_s5 + $0xe4c] ss:$16 sps:$4 sm:$0xff]   ;;  %v9580_v11 = vld [vmem:[%s11759_s5 + $0xe48] ss:$16 sps:$4 sm:$0xff]  }
 0x331   : > { %6993 = vmatprep.subr.bf16.mxu0 %v9494_v12  ;;  %7526 = vmatprep.subr.bf16.mxu1 %v9497_v13  ;;  %v9585_v12 = vld [vmem:[%s11759_s5 + $0xe64] ss:$16 sps:$4 sm:$0xff]   ;;  %v9588_v13 = vld [vmem:[%s11759_s5 + $0xe6c] ss:$16 sps:$4 sm:$0xff]  }
 0x334   : > { %6994 = vmatpush1.bf16.msra.mxu0 %v9492_v14  ;;  %7527 = vmatpush1.bf16.msra.mxu1 %v9495_v15  ;;  %v9583_v14 = vld [vmem:[%s11759_s5 + $0xe60] ss:$16 sps:$4 sm:$0xff]   ;;  %v9586_v15 = vld [vmem:[%s11759_s5 + $0xe68] ss:$16 sps:$4 sm:$0xff]  }
 0x335   : > { %6995 = vmatprep.subr.bf16.mxu0 %v9500_v16  ;;  %7528 = vmatprep.subr.bf16.mxu1 %v9503_v17  ;;  %v9591_v16 = vld [vmem:[%s11759_s5 + $0xe84] ss:$16 sps:$4 sm:$0xff]   ;;  %v9594_v17 = vld [vmem:[%s11759_s5 + $0xe8c] ss:$16 sps:$4 sm:$0xff]  }
 0x338   : > { %6996 = vmatpush1.bf16.msra.mxu0 %v9498_v18  ;;  %7529 = vmatpush1.bf16.msra.mxu1 %v9501_v21  ;;  %v9589_v18 = vld [vmem:[%s11759_s5 + $0xe80] ss:$16 sps:$4 sm:$0xff]   ;;  %v9592_v21 = vld [vmem:[%s11759_s5 + $0xe88] ss:$16 sps:$4 sm:$0xff]  }
 0x339   : > { %6997 = vmatprep.subr.bf16.mxu0 %v9506_v22  ;;  %7530 = vmatprep.subr.bf16.mxu1 %v9509_v23  ;;  %v9597_v22 = vld [vmem:[%s11759_s5 + $0xea4] ss:$16 sps:$4 sm:$0xff]   ;;  %v9600_v23 = vld [vmem:[%s11759_s5 + $0xeac] ss:$16 sps:$4 sm:$0xff]  }
 0x33c   : > { %6998 = vmatpush1.bf16.msra.mxu0 %v9504_v25  ;;  %7531 = vmatpush1.bf16.msra.mxu1 %v9507_v26  ;;  %v9595_v25 = vld [vmem:[%s11759_s5 + $0xea0] ss:$16 sps:$4 sm:$0xff]   ;;  %v9598_v26 = vld [vmem:[%s11759_s5 + $0xea8] ss:$16 sps:$4 sm:$0xff]  }
 0x33d   : > { %6999 = vmatprep.subr.bf16.mxu0 %v9512_v27  ;;  %7532 = vmatprep.subr.bf16.mxu1 %v9515_v29  ;;  %v9603_v27 = vld [vmem:[%s11759_s5 + $0xec4] ss:$16 sps:$4 sm:$0xff]   ;;  %v9606_v29 = vld [vmem:[%s11759_s5 + $0xecc] ss:$16 sps:$4 sm:$0xff]  }
 0x340   : > { %7000 = vmatpush1.bf16.msra.mxu0 %v9510_v30  ;;  %7533 = vmatpush1.bf16.msra.mxu1 %v9513_v31  ;;  %v9601_v30 = vld [vmem:[%s11759_s5 + $0xec0] ss:$16 sps:$4 sm:$0xff]   ;;  %v9604_v31 = vld [vmem:[%s11759_s5 + $0xec8] ss:$16 sps:$4 sm:$0xff]  }
 0x341   : > { %7001 = vmatprep.subr.bf16.mxu0 %v9518_v32  ;;  %7534 = vmatprep.subr.bf16.mxu1 %v9521_v33  ;;  %v9609_v32 = vld [vmem:[%s11759_s5 + $0xee4] ss:$16 sps:$4 sm:$0xff]   ;;  %v9612_v33 = vld [vmem:[%s11759_s5 + $0xeec] ss:$16 sps:$4 sm:$0xff]  }
 0x344   : > { %7002 = vmatpush1.bf16.msra.mxu0 %v9516_v36  ;;  %7535 = vmatpush1.bf16.msra.mxu1 %v9519_v38  ;;  %v9607_v36 = vld [vmem:[%s11759_s5 + $0xee0] ss:$16 sps:$4 sm:$0xff]   ;;  %v9610_v38 = vld [vmem:[%s11759_s5 + $0xee8] ss:$16 sps:$4 sm:$0xff]  }
 0x345   : > { %7003 = vmatprep.subr.bf16.mxu0 %v9524_v20  ;;  %7536 = vmatprep.subr.bf16.mxu1 %v9527_v39  ;;  %v9615_v20 = vld [vmem:[%s11759_s5 + $0xf04] ss:$16 sps:$4 sm:$0xff]   ;;  %v9618_v39 = vld [vmem:[%s11759_s5 + $0xf0c] ss:$16 sps:$4 sm:$0xff]  }
 0x348   : > { %7004 = vmatpush1.bf16.msra.mxu0 %v9522_v28  ;;  %7537 = vmatpush1.bf16.msra.mxu1 %v9525_v40  ;;  %v9613_v28 = vld [vmem:[%s11759_s5 + $0xf00] ss:$16 sps:$4 sm:$0xff]   ;;  %v9616_v40 = vld [vmem:[%s11759_s5 + $0xf08] ss:$16 sps:$4 sm:$0xff]  }
 0x349   : > { %7005 = vmatprep.subr.bf16.mxu0 %v9530_v41  ;;  %7538 = vmatprep.subr.bf16.mxu1 %v9533_v42  ;;  %v9621_v41 = vld [vmem:[%s11759_s5 + $0xf24] ss:$16 sps:$4 sm:$0xff]   ;;  %v9624_v42 = vld [vmem:[%s11759_s5 + $0xf2c] ss:$16 sps:$4 sm:$0xff]  }
 0x34c   : > { %7006 = vmatpush1.bf16.msra.mxu0 %v9528_v43  ;;  %7539 = vmatpush1.bf16.msra.mxu1 %v9531_v45  ;;  %v9619_v43 = vld [vmem:[%s11759_s5 + $0xf20] ss:$16 sps:$4 sm:$0xff]   ;;  %v9622_v45 = vld [vmem:[%s11759_s5 + $0xf28] ss:$16 sps:$4 sm:$0xff]  }
 0x34d   : > { %7007 = vmatprep.subr.bf16.mxu0 %v9536_v46  ;;  %7540 = vmatprep.subr.bf16.mxu1 %v9539_v47  ;;  %v9627_v46 = vld [vmem:[%s11759_s5 + $0xf44] ss:$16 sps:$4 sm:$0xff]   ;;  %v9630_v47 = vld [vmem:[%s11759_s5 + $0xf4c] ss:$16 sps:$4 sm:$0xff]  }
 0x350   : > { %7008 = vmatpush1.bf16.msra.mxu0 %v9534_v48  ;;  %7541 = vmatpush1.bf16.msra.mxu1 %v9537_v49  ;;  %v9625_v48 = vld [vmem:[%s11759_s5 + $0xf40] ss:$16 sps:$4 sm:$0xff]   ;;  %v9628_v49 = vld [vmem:[%s11759_s5 + $0xf48] ss:$16 sps:$4 sm:$0xff]  }
 0x351   : > { %7009 = vmatprep.subr.bf16.mxu0 %v9542_v50  ;;  %7542 = vmatprep.subr.bf16.mxu1 %v9545_v35  ;;  %v9633_v50 = vld [vmem:[%s11759_s5 + $0xf64] ss:$16 sps:$4 sm:$0xff]   ;;  %v9636_v35 = vld [vmem:[%s11759_s5 + $0xf6c] ss:$16 sps:$4 sm:$0xff]  }
 0x354   : > { %7010 = vmatpush1.bf16.msra.mxu0 %v9540_v51  ;;  %7543 = vmatpush1.bf16.msra.mxu1 %v9543_v52  ;;  %v9631_v51 = vld [vmem:[%s11759_s5 + $0xf60] ss:$16 sps:$4 sm:$0xff]   ;;  %v9634_v52 = vld [vmem:[%s11759_s5 + $0xf68] ss:$16 sps:$4 sm:$0xff]  }
 0x355   : > { %7011 = vmatprep.subr.bf16.mxu0 %v9548_v44  ;;  %7544 = vmatprep.subr.bf16.mxu1 %v9551_v53  ;;  %v9639_v44 = vld [vmem:[%s11759_s5 + $0xf84] ss:$16 sps:$4 sm:$0xff]   ;;  %v9642_v53 = vld [vmem:[%s11759_s5 + $0xf8c] ss:$16 sps:$4 sm:$0xff]  }
 0x358   : > { %7012 = vmatpush1.bf16.msra.mxu0 %v9546_v55  ;;  %7545 = vmatpush1.bf16.msra.mxu1 %v9549_v56  ;;  %v9637_v55 = vld [vmem:[%s11759_s5 + $0xf80] ss:$16 sps:$4 sm:$0xff]   ;;  %v9640_v56 = vld [vmem:[%s11759_s5 + $0xf88] ss:$16 sps:$4 sm:$0xff]  }
 0x359   : > { %7013 = vmatprep.subr.bf16.mxu0 %v9554_v58  ;;  %7546 = vmatprep.subr.bf16.mxu1 %v9557_v59  ;;  %v9645_v58 = vld [vmem:[%s11759_s5 + $0xfa4] ss:$16 sps:$4 sm:$0xff]   ;;  %v9648_v59 = vld [vmem:[%s11759_s5 + $0xfac] ss:$16 sps:$4 sm:$0xff]  }
 0x35c   : > { %7014 = vmatpush1.bf16.msra.mxu0 %v9552_v37  ;;  %7547 = vmatpush1.bf16.msra.mxu1 %v9555_v60  ;;  %v9643_v37 = vld [vmem:[%s11759_s5 + $0xfa0] ss:$16 sps:$4 sm:$0xff]   ;;  %v9646_v60 = vld [vmem:[%s11759_s5 + $0xfa8] ss:$16 sps:$4 sm:$0xff]  }
 0x35d   : > { %7015 = vmatprep.subr.bf16.mxu0 %v9560_v61  ;;  %7548 = vmatprep.subr.bf16.mxu1 %v9563_v62  ;;  %v9651_v61 = vld [vmem:[%s11759_s5 + $0xfc4] ss:$16 sps:$4 sm:$0xff]   ;;  %v9654_v62 = vld [vmem:[%s11759_s5 + $0xfcc] ss:$16 sps:$4 sm:$0xff]  }
 0x360   : > { %7016 = vmatpush1.bf16.msra.mxu0 %v9558_v54  ;;  %7549 = vmatpush1.bf16.msra.mxu1 %v9561_v63  ;;  %v12359_v54 = vld [vmem:[%s12720_s0 + $0x10] sm:$0xff] }
 0x361   : > { %7026 = vmatprep.subr.bf16.mxu0 %v9567_v0  ;;  %7559 = vmatprep.subr.bf16.mxu1 %v9570_v1  ;;  %v9649_v63 = vld [vmem:[%s11759_s5 + $0xfc0] ss:$16 sps:$4 sm:$0xff]   ;;  %v9652_v0 = vld [vmem:[%s11759_s5 + $0xfc8] ss:$16 sps:$4 sm:$0xff]   ;;  %v9657_v1 = vld [vmem:[%s11759_s5 + $0xfe4] ss:$16 sps:$4 sm:$0xff]  }
 0x363   : > { %7018 = vmatmul.mubr.bf16.vlgmr.msra.gmra.mrb[0].mxu0 %v12294_v34  ;;  %7551 = vmatmul.mubr.bf16.vlgmr.msra.gmra.mrb[0].mxu1 %v12294_v34 }
 0x364   : > { %7027 = vmatpush1.bf16.msra.mxu0 %v9565_v3  ;;  %7560 = vmatpush1.bf16.msra.mxu1 %v9568_v4  ;;  %v9660_v3 = vld [vmem:[%s11759_s5 + $0xfec] ss:$16 sps:$4 sm:$0xff]   ;;  %v12367_v4 = vrot.slane %v12359_v54, %v11764_v24 }
 0x365   : > { %7028 = vmatprep.subr.bf16.mxu0 %v9573_v5  ;;  %7561 = vmatprep.subr.bf16.mxu1 %v9576_v6  ;;  %v9655_v5 = vld [vmem:[%s11759_s5 + $0xfe0] ss:$16 sps:$4 sm:$0xff]   ;;  %v9658_v6 = vld [vmem:[%s11759_s5 + $0xfe8] ss:$16 sps:$4 sm:$0xff]  }
 0x366   : > { %7058 = vmatprep.mubr.bf16.mxu0 %v2727_v7  ;;  %7591 = vmatprep.mubr.bf16.mxu1 %v2727_v7  ;;  %v9663_v7 = vld [vmem:[%s11759_s5 + $0x1004] ss:$16 sps:$4 sm:$0xff]  }
 0x368   : > { %7029 = vmatpush1.bf16.msra.mxu0 %v9571_v57  ;;  %7562 = vmatpush1.bf16.msra.mxu1 %v9574_v8  ;;  %v9666_v57 = vld [vmem:[%s11759_s5 + $0x100c] ss:$16 sps:$4 sm:$0xff]   ;;  %v2743_v8 = vcombine.high %v12367_v4, %v12367_v4 }
 0x369   : > { %7030 = vmatprep.subr.bf16.mxu0 %v9579_v9  ;;  %7563 = vmatprep.subr.bf16.mxu1 %v9582_v10  ;;  %v2725_v9 = vcombine.high %v12294_v34, %v12294_v34  ;;  %v9661_v10 = vld [vmem:[%s11759_s5 + $0x1000] ss:$16 sps:$4 sm:$0xff]  }
 0x36a   : > { %v9667_v34 = vld [vmem:[%s11759_s5 + $0x1020] ss:$16 sps:$4 sm:$0xff]  }
 0x36c   : > { %7031 = vmatpush1.bf16.msra.mxu0 %v9577_v2  ;;  %7564 = vmatpush1.bf16.msra.mxu1 %v9580_v11  ;;  %v9664_v2 = vld [vmem:[%s11759_s5 + $0x1008] ss:$16 sps:$4 sm:$0xff]   ;;  %v9669_v11 = vld [vmem:[%s11759_s5 + $0x1024] ss:$16 sps:$4 sm:$0xff]  }
 0x36d   : > { %7032 = vmatprep.subr.bf16.mxu0 %v9585_v12  ;;  %7565 = vmatprep.subr.bf16.mxu1 %v9588_v13  ;;  %v9672_v12 = vld [vmem:[%s11759_s5 + $0x102c] ss:$16 sps:$4 sm:$0xff]   ;;  %v12382_v13 = vrot.slane %v2743_v8, %v11764_v24  ;;  %v9748_v8 = vld [vmem:[%s11759_s5 + $0x11c8] ss:$16 sps:$4 sm:$0xff]  }
 0x370   : > { %7033 = vmatpush1.bf16.msra.mxu0 %v9583_v14  ;;  %7566 = vmatpush1.bf16.msra.mxu1 %v9586_v15  ;;  %v9670_v14 = vld [vmem:[%s11759_s5 + $0x1028] ss:$16 sps:$4 sm:$0xff]   ;;  %v9675_v15 = vld [vmem:[%s11759_s5 + $0x1044] ss:$16 sps:$4 sm:$0xff]  }
 0x371   : > { %7034 = vmatprep.subr.bf16.mxu0 %v9591_v16  ;;  %7567 = vmatprep.subr.bf16.mxu1 %v9594_v17  ;;  %v9678_v16 = vld [vmem:[%s11759_s5 + $0x104c] ss:$16 sps:$4 sm:$0xff]   ;;  %v9673_v17 = vld [vmem:[%s11759_s5 + $0x1040] ss:$16 sps:$4 sm:$0xff]  }
 0x374   : > { %7035 = vmatpush1.bf16.msra.mxu0 %v9589_v18  ;;  %7568 = vmatpush1.bf16.msra.mxu1 %v9592_v21  ;;  %v9676_v18 = vld [vmem:[%s11759_s5 + $0x1048] ss:$16 sps:$4 sm:$0xff]   ;;  %v9681_v21 = vld [vmem:[%s11759_s5 + $0x1064] ss:$16 sps:$4 sm:$0xff]  }
 0x375   : > { %7036 = vmatprep.subr.bf16.mxu0 %v9597_v22  ;;  %7569 = vmatprep.subr.bf16.mxu1 %v9600_v23  ;;  %v9684_v22 = vld [vmem:[%s11759_s5 + $0x106c] ss:$16 sps:$4 sm:$0xff]   ;;  %v9679_v23 = vld [vmem:[%s11759_s5 + $0x1060] ss:$16 sps:$4 sm:$0xff]  }
 0x378   : > { %7037 = vmatpush1.bf16.msra.mxu0 %v9595_v25  ;;  %7570 = vmatpush1.bf16.msra.mxu1 %v9598_v26  ;;  %v9682_v25 = vld [vmem:[%s11759_s5 + $0x1068] ss:$16 sps:$4 sm:$0xff]   ;;  %v9687_v26 = vld [vmem:[%s11759_s5 + $0x1084] ss:$16 sps:$4 sm:$0xff]  }
 0x379   : > { %7038 = vmatprep.subr.bf16.mxu0 %v9603_v27  ;;  %7571 = vmatprep.subr.bf16.mxu1 %v9606_v29  ;;  %v9690_v27 = vld [vmem:[%s11759_s5 + $0x108c] ss:$16 sps:$4 sm:$0xff]   ;;  %v9685_v29 = vld [vmem:[%s11759_s5 + $0x1080] ss:$16 sps:$4 sm:$0xff]  }
 0x37c   : > { %7039 = vmatpush1.bf16.msra.mxu0 %v9601_v30  ;;  %7572 = vmatpush1.bf16.msra.mxu1 %v9604_v31  ;;  %v9688_v30 = vld [vmem:[%s11759_s5 + $0x1088] ss:$16 sps:$4 sm:$0xff]   ;;  %v9693_v31 = vld [vmem:[%s11759_s5 + $0x10a4] ss:$16 sps:$4 sm:$0xff]  }
 0x37d   : > { %7040 = vmatprep.subr.bf16.mxu0 %v9609_v32  ;;  %7573 = vmatprep.subr.bf16.mxu1 %v9612_v33  ;;  %v9696_v32 = vld [vmem:[%s11759_s5 + $0x10ac] ss:$16 sps:$4 sm:$0xff]   ;;  %v9691_v33 = vld [vmem:[%s11759_s5 + $0x10a0] ss:$16 sps:$4 sm:$0xff]  }
 0x380   : > { %7041 = vmatpush1.bf16.msra.mxu0 %v9607_v36  ;;  %7574 = vmatpush1.bf16.msra.mxu1 %v9610_v38  ;;  %v9694_v36 = vld [vmem:[%s11759_s5 + $0x10a8] ss:$16 sps:$4 sm:$0xff]   ;;  %v9699_v38 = vld [vmem:[%s11759_s5 + $0x10c4] ss:$16 sps:$4 sm:$0xff]  }
 0x381   : > { %7042 = vmatprep.subr.bf16.mxu0 %v9615_v20  ;;  %7575 = vmatprep.subr.bf16.mxu1 %v9618_v39  ;;  %v9702_v20 = vld [vmem:[%s11759_s5 + $0x10cc] ss:$16 sps:$4 sm:$0xff]   ;;  %v9697_v39 = vld [vmem:[%s11759_s5 + $0x10c0] ss:$16 sps:$4 sm:$0xff]  }
 0x384   : > { %7043 = vmatpush1.bf16.msra.mxu0 %v9613_v28  ;;  %7576 = vmatpush1.bf16.msra.mxu1 %v9616_v40  ;;  %v9700_v28 = vld [vmem:[%s11759_s5 + $0x10c8] ss:$16 sps:$4 sm:$0xff]   ;;  %v9705_v40 = vld [vmem:[%s11759_s5 + $0x10e4] ss:$16 sps:$4 sm:$0xff]  }
 0x385   : > { %7044 = vmatprep.subr.bf16.mxu0 %v9621_v41  ;;  %7577 = vmatprep.subr.bf16.mxu1 %v9624_v42  ;;  %v9708_v41 = vld [vmem:[%s11759_s5 + $0x10ec] ss:$16 sps:$4 sm:$0xff]   ;;  %v9703_v42 = vld [vmem:[%s11759_s5 + $0x10e0] ss:$16 sps:$4 sm:$0xff]  }
 0x388   : > { %7045 = vmatpush1.bf16.msra.mxu0 %v9619_v43  ;;  %7578 = vmatpush1.bf16.msra.mxu1 %v9622_v45  ;;  %v9706_v43 = vld [vmem:[%s11759_s5 + $0x10e8] ss:$16 sps:$4 sm:$0xff]   ;;  %v9711_v45 = vld [vmem:[%s11759_s5 + $0x1104] ss:$16 sps:$4 sm:$0xff]  }
 0x389   : > { %7046 = vmatprep.subr.bf16.mxu0 %v9627_v46  ;;  %7579 = vmatprep.subr.bf16.mxu1 %v9630_v47  ;;  %v9714_v46 = vld [vmem:[%s11759_s5 + $0x110c] ss:$16 sps:$4 sm:$0xff]   ;;  %v9709_v47 = vld [vmem:[%s11759_s5 + $0x1100] ss:$16 sps:$4 sm:$0xff]  }
 0x38c   : > { %7047 = vmatpush1.bf16.msra.mxu0 %v9625_v48  ;;  %7580 = vmatpush1.bf16.msra.mxu1 %v9628_v49  ;;  %v9712_v48 = vld [vmem:[%s11759_s5 + $0x1108] ss:$16 sps:$4 sm:$0xff]   ;;  %v9717_v49 = vld [vmem:[%s11759_s5 + $0x1124] ss:$16 sps:$4 sm:$0xff]  }
 0x38d   : > { %7048 = vmatprep.subr.bf16.mxu0 %v9633_v50  ;;  %7581 = vmatprep.subr.bf16.mxu1 %v9636_v35  ;;  %v9720_v50 = vld [vmem:[%s11759_s5 + $0x112c] ss:$16 sps:$4 sm:$0xff]   ;;  %v9715_v35 = vld [vmem:[%s11759_s5 + $0x1120] ss:$16 sps:$4 sm:$0xff]  }
 0x390   : > { %7049 = vmatpush1.bf16.msra.mxu0 %v9631_v51  ;;  %7582 = vmatpush1.bf16.msra.mxu1 %v9634_v52  ;;  %v9718_v51 = vld [vmem:[%s11759_s5 + $0x1128] ss:$16 sps:$4 sm:$0xff]   ;;  %v9723_v52 = vld [vmem:[%s11759_s5 + $0x1144] ss:$16 sps:$4 sm:$0xff]  }
 0x391   : > { %7050 = vmatprep.subr.bf16.mxu0 %v9639_v44  ;;  %7583 = vmatprep.subr.bf16.mxu1 %v9642_v53  ;;  %v9726_v44 = vld [vmem:[%s11759_s5 + $0x114c] ss:$16 sps:$4 sm:$0xff]   ;;  %v9721_v53 = vld [vmem:[%s11759_s5 + $0x1140] ss:$16 sps:$4 sm:$0xff]  }
 0x394   : > { %7051 = vmatpush1.bf16.msra.mxu0 %v9637_v55  ;;  %7584 = vmatpush1.bf16.msra.mxu1 %v9640_v56  ;;  %v9724_v55 = vld [vmem:[%s11759_s5 + $0x1148] ss:$16 sps:$4 sm:$0xff]   ;;  %v9729_v56 = vld [vmem:[%s11759_s5 + $0x1164] ss:$16 sps:$4 sm:$0xff]  }
 0x395   : > { %7052 = vmatprep.subr.bf16.mxu0 %v9645_v58  ;;  %7585 = vmatprep.subr.bf16.mxu1 %v9648_v59  ;;  %v9732_v58 = vld [vmem:[%s11759_s5 + $0x116c] ss:$16 sps:$4 sm:$0xff]   ;;  %v9727_v59 = vld [vmem:[%s11759_s5 + $0x1160] ss:$16 sps:$4 sm:$0xff]  }
 0x398   : > { %7053 = vmatpush1.bf16.msra.mxu0 %v9643_v37  ;;  %7586 = vmatpush1.bf16.msra.mxu1 %v9646_v60  ;;  %v9730_v37 = vld [vmem:[%s11759_s5 + $0x1168] ss:$16 sps:$4 sm:$0xff]   ;;  %v9735_v60 = vld [vmem:[%s11759_s5 + $0x1184] ss:$16 sps:$4 sm:$0xff]  }
 0x399   : > { %7054 = vmatprep.subr.bf16.mxu0 %v9651_v61  ;;  %7587 = vmatprep.subr.bf16.mxu1 %v9654_v62  ;;  %v9738_v61 = vld [vmem:[%s11759_s5 + $0x118c] ss:$16 sps:$4 sm:$0xff]   ;;  %v9733_v62 = vld [vmem:[%s11759_s5 + $0x1180] ss:$16 sps:$4 sm:$0xff]  }
 0x39c   : > { %7055 = vmatpush1.bf16.msra.mxu0 %v9649_v63  ;;  %7588 = vmatpush1.bf16.msra.mxu1 %v9652_v0  ;;  %v9736_v63 = vld [vmem:[%s11759_s5 + $0x1188] ss:$16 sps:$4 sm:$0xff]   ;;  %v9741_v0 = vld [vmem:[%s11759_s5 + $0x11a4] ss:$16 sps:$4 sm:$0xff]  }
 0x39d   : > { %7056 = vmatprep.subr.bf16.mxu0 %v9657_v1  ;;  %7589 = vmatprep.subr.bf16.mxu1 %v9660_v3  ;;  %v9744_v1 = vld [vmem:[%s11759_s5 + $0x11ac] ss:$16 sps:$4 sm:$0xff]   ;;  %v9739_v3 = vld [vmem:[%s11759_s5 + $0x11a0] ss:$16 sps:$4 sm:$0xff]  }
 0x3a0   : > { %7057 = vmatpush1.bf16.msra.mxu0 %v9655_v5  ;;  %7590 = vmatpush1.bf16.msra.mxu1 %v9658_v6  ;;  %v9742_v5 = vld [vmem:[%s11759_s5 + $0x11a8] ss:$16 sps:$4 sm:$0xff]   ;;  %v9747_v6 = vld [vmem:[%s11759_s5 + $0x11c4] ss:$16 sps:$4 sm:$0xff]  }
 0x3a1   : > { %7067 = vmatprep.subr.bf16.mxu0 %v9663_v7  ;;  %7600 = vmatprep.subr.bf16.mxu1 %v9666_v57  ;;  %v9750_v7 = vld [vmem:[%s11759_s5 + $0x11cc] ss:$16 sps:$4 sm:$0xff]   ;;  %v9745_v57 = vld [vmem:[%s11759_s5 + $0x11c0] ss:$16 sps:$4 sm:$0xff]  }
 0x3a3   : > { %7059 = vmatmul.mubr.bf16.vlgmr.msra.gmra.mrb[0].mxu0 %v2725_v9  ;;  %7592 = vmatmul.mubr.bf16.vlgmr.msra.gmra.mrb[0].mxu1 %v2725_v9  ;;  %v9753_v9 = vld [vmem:[%s11759_s5 + $0x11e4] ss:$16 sps:$4 sm:$0xff]  }
 0x3a4   : > { %7068 = vmatpush1.bf16.msra.mxu0 %v9661_v10  ;;  %7601 = vmatpush1.bf16.msra.mxu1 %v9664_v2  ;;  %v9756_v10 = vld [vmem:[%s11759_s5 + $0x11ec] ss:$16 sps:$4 sm:$0xff]   ;;  %v9751_v2 = vld [vmem:[%s11759_s5 + $0x11e0] ss:$16 sps:$4 sm:$0xff]  }
 0x3a5   : > { %7069 = vmatprep.subr.bf16.mxu0 %v9669_v11  ;;  %7602 = vmatprep.subr.bf16.mxu1 %v9672_v12  ;;  %v9754_v11 = vld [vmem:[%s11759_s5 + $0x11e8] ss:$16 sps:$4 sm:$0xff]   ;;  %v9759_v12 = vld [vmem:[%s11759_s5 + $0x1204] ss:$16 sps:$4 sm:$0xff]  }
 0x3a6   : > { %7099 = vmatprep.mubr.bf16.mxu0 %v12382_v13  ;;  %7632 = vmatprep.mubr.bf16.mxu1 %v12382_v13 }
 0x3a8   : > { %7070 = vmatpush1.bf16.msra.mxu0 %v9667_v34  ;;  %7603 = vmatpush1.bf16.msra.mxu1 %v9670_v14  ;;  %v9762_v34 = vld [vmem:[%s11759_s5 + $0x120c] ss:$16 sps:$4 sm:$0xff]   ;;  %v12448_v14 = vrot.slane %v12367_v4, %v11764_v24  ;;  %v9763_v4 = vld [vmem:[%s11759_s5 + $0x1220] ss:$16 sps:$4 sm:$0xff]  }
 0x3a9   : > { %7071 = vmatprep.subr.bf16.mxu0 %v9675_v15  ;;  %7604 = vmatprep.subr.bf16.mxu1 %v9678_v16  ;;  %v9757_v15 = vld [vmem:[%s11759_s5 + $0x1200] ss:$16 sps:$4 sm:$0xff]   ;;  %v9760_v16 = vld [vmem:[%s11759_s5 + $0x1208] ss:$16 sps:$4 sm:$0xff]  }
 0x3ac   : > { %7072 = vmatpush1.bf16.msra.mxu0 %v9673_v17  ;;  %7605 = vmatpush1.bf16.msra.mxu1 %v9676_v18  ;;  %v9765_v17 = vld [vmem:[%s11759_s5 + $0x1224] ss:$16 sps:$4 sm:$0xff]   ;;  %v9768_v18 = vld [vmem:[%s11759_s5 + $0x122c] ss:$16 sps:$4 sm:$0xff]  }
 0x3ad   : > { %7073 = vmatprep.subr.bf16.mxu0 %v9681_v21  ;;  %7606 = vmatprep.subr.bf16.mxu1 %v9684_v22  ;;  %v2775_v21 = vcombine.high %v12382_v13, %v12382_v13  ;;  %v9766_v22 = vld [vmem:[%s11759_s5 + $0x1228] ss:$16 sps:$4 sm:$0xff]   ;;  %v9769_v13 = vld [vmem:[%s11759_s5 + $0x1240] ss:$16 sps:$4 sm:$0xff]  }
 0x3b0   : > { %7074 = vmatpush1.bf16.msra.mxu0 %v9679_v23  ;;  %7607 = vmatpush1.bf16.msra.mxu1 %v9682_v25  ;;  %v9771_v23 = vld [vmem:[%s11759_s5 + $0x1244] ss:$16 sps:$4 sm:$0xff]   ;;  %v9774_v25 = vld [vmem:[%s11759_s5 + $0x124c] ss:$16 sps:$4 sm:$0xff]  }
 0x3b1   : > { %7075 = vmatprep.subr.bf16.mxu0 %v9687_v26  ;;  %7608 = vmatprep.subr.bf16.mxu1 %v9690_v27  ;;  %v9772_v26 = vld [vmem:[%s11759_s5 + $0x1248] ss:$16 sps:$4 sm:$0xff]   ;;  %v9777_v27 = vld [vmem:[%s11759_s5 + $0x1264] ss:$16 sps:$4 sm:$0xff]  }
 0x3b4   : > { %7076 = vmatpush1.bf16.msra.mxu0 %v9685_v29  ;;  %7609 = vmatpush1.bf16.msra.mxu1 %v9688_v30  ;;  %v9780_v29 = vld [vmem:[%s11759_s5 + $0x126c] ss:$16 sps:$4 sm:$0xff]   ;;  %v9775_v30 = vld [vmem:[%s11759_s5 + $0x1260] ss:$16 sps:$4 sm:$0xff]  }
 0x3b5   : > { %7077 = vmatprep.subr.bf16.mxu0 %v9693_v31  ;;  %7610 = vmatprep.subr.bf16.mxu1 %v9696_v32  ;;  %v9778_v31 = vld [vmem:[%s11759_s5 + $0x1268] ss:$16 sps:$4 sm:$0xff]   ;;  %v9783_v32 = vld [vmem:[%s11759_s5 + $0x1284] ss:$16 sps:$4 sm:$0xff]  }
 0x3b8   : > { %7078 = vmatpush1.bf16.msra.mxu0 %v9691_v33  ;;  %7611 = vmatpush1.bf16.msra.mxu1 %v9694_v36  ;;  %v9786_v33 = vld [vmem:[%s11759_s5 + $0x128c] ss:$16 sps:$4 sm:$0xff]   ;;  %v9781_v36 = vld [vmem:[%s11759_s5 + $0x1280] ss:$16 sps:$4 sm:$0xff]  }
 0x3b9   : > { %7079 = vmatprep.subr.bf16.mxu0 %v9699_v38  ;;  %7612 = vmatprep.subr.bf16.mxu1 %v9702_v20  ;;  %v9784_v38 = vld [vmem:[%s11759_s5 + $0x1288] ss:$16 sps:$4 sm:$0xff]   ;;  %v9789_v20 = vld [vmem:[%s11759_s5 + $0x12a4] ss:$16 sps:$4 sm:$0xff]  }
 0x3bc   : > { %7080 = vmatpush1.bf16.msra.mxu0 %v9697_v39  ;;  %7613 = vmatpush1.bf16.msra.mxu1 %v9700_v28  ;;  %v9792_v39 = vld [vmem:[%s11759_s5 + $0x12ac] ss:$16 sps:$4 sm:$0xff]   ;;  %v9787_v28 = vld [vmem:[%s11759_s5 + $0x12a0] ss:$16 sps:$4 sm:$0xff]  }
 0x3bd   : > { %7081 = vmatprep.subr.bf16.mxu0 %v9705_v40  ;;  %7614 = vmatprep.subr.bf16.mxu1 %v9708_v41  ;;  %v9790_v40 = vld [vmem:[%s11759_s5 + $0x12a8] ss:$16 sps:$4 sm:$0xff]   ;;  %v9795_v41 = vld [vmem:[%s11759_s5 + $0x12c4] ss:$16 sps:$4 sm:$0xff]  }
 0x3c0   : > { %7082 = vmatpush1.bf16.msra.mxu0 %v9703_v42  ;;  %7615 = vmatpush1.bf16.msra.mxu1 %v9706_v43  ;;  %v9798_v42 = vld [vmem:[%s11759_s5 + $0x12cc] ss:$16 sps:$4 sm:$0xff]   ;;  %v9793_v43 = vld [vmem:[%s11759_s5 + $0x12c0] ss:$16 sps:$4 sm:$0xff]  }
 0x3c1   : > { %7083 = vmatprep.subr.bf16.mxu0 %v9711_v45  ;;  %7616 = vmatprep.subr.bf16.mxu1 %v9714_v46  ;;  %v9796_v45 = vld [vmem:[%s11759_s5 + $0x12c8] ss:$16 sps:$4 sm:$0xff]   ;;  %v9801_v46 = vld [vmem:[%s11759_s5 + $0x12e4] ss:$16 sps:$4 sm:$0xff]  }
 0x3c4   : > { %7084 = vmatpush1.bf16.msra.mxu0 %v9709_v47  ;;  %7617 = vmatpush1.bf16.msra.mxu1 %v9712_v48  ;;  %v9804_v47 = vld [vmem:[%s11759_s5 + $0x12ec] ss:$16 sps:$4 sm:$0xff]   ;;  %v9799_v48 = vld [vmem:[%s11759_s5 + $0x12e0] ss:$16 sps:$4 sm:$0xff]  }
 0x3c5   : > { %7085 = vmatprep.subr.bf16.mxu0 %v9717_v49  ;;  %7618 = vmatprep.subr.bf16.mxu1 %v9720_v50  ;;  %v9802_v49 = vld [vmem:[%s11759_s5 + $0x12e8] ss:$16 sps:$4 sm:$0xff]   ;;  %v9807_v50 = vld [vmem:[%s11759_s5 + $0x1304] ss:$16 sps:$4 sm:$0xff]  }
 0x3c8   : > { %7086 = vmatpush1.bf16.msra.mxu0 %v9715_v35  ;;  %7619 = vmatpush1.bf16.msra.mxu1 %v9718_v51  ;;  %v9810_v35 = vld [vmem:[%s11759_s5 + $0x130c] ss:$16 sps:$4 sm:$0xff]   ;;  %v9805_v51 = vld [vmem:[%s11759_s5 + $0x1300] ss:$16 sps:$4 sm:$0xff]  }
 0x3c9   : > { %7087 = vmatprep.subr.bf16.mxu0 %v9723_v52  ;;  %7620 = vmatprep.subr.bf16.mxu1 %v9726_v44  ;;  %v9808_v52 = vld [vmem:[%s11759_s5 + $0x1308] ss:$16 sps:$4 sm:$0xff]   ;;  %v9813_v44 = vld [vmem:[%s11759_s5 + $0x1324] ss:$16 sps:$4 sm:$0xff]  }
 0x3cc   : > { %7088 = vmatpush1.bf16.msra.mxu0 %v9721_v53  ;;  %7621 = vmatpush1.bf16.msra.mxu1 %v9724_v55  ;;  %v9816_v53 = vld [vmem:[%s11759_s5 + $0x132c] ss:$16 sps:$4 sm:$0xff]   ;;  %v9811_v55 = vld [vmem:[%s11759_s5 + $0x1320] ss:$16 sps:$4 sm:$0xff]  }
 0x3cd   : > { %7089 = vmatprep.subr.bf16.mxu0 %v9729_v56  ;;  %7622 = vmatprep.subr.bf16.mxu1 %v9732_v58  ;;  %v9814_v56 = vld [vmem:[%s11759_s5 + $0x1328] ss:$16 sps:$4 sm:$0xff]   ;;  %v9819_v58 = vld [vmem:[%s11759_s5 + $0x1344] ss:$16 sps:$4 sm:$0xff]  }
 0x3d0   : > { %7090 = vmatpush1.bf16.msra.mxu0 %v9727_v59  ;;  %7623 = vmatpush1.bf16.msra.mxu1 %v9730_v37  ;;  %v9822_v59 = vld [vmem:[%s11759_s5 + $0x134c] ss:$16 sps:$4 sm:$0xff]   ;;  %v9817_v37 = vld [vmem:[%s11759_s5 + $0x1340] ss:$16 sps:$4 sm:$0xff]  }
 0x3d1   : > { %7091 = vmatprep.subr.bf16.mxu0 %v9735_v60  ;;  %7624 = vmatprep.subr.bf16.mxu1 %v9738_v61  ;;  %v9820_v60 = vld [vmem:[%s11759_s5 + $0x1348] ss:$16 sps:$4 sm:$0xff]   ;;  %v9825_v61 = vld [vmem:[%s11759_s5 + $0x1364] ss:$16 sps:$4 sm:$0xff]  }
 0x3d4   : > { %7092 = vmatpush1.bf16.msra.mxu0 %v9733_v62  ;;  %7625 = vmatpush1.bf16.msra.mxu1 %v9736_v63  ;;  %v9828_v62 = vld [vmem:[%s11759_s5 + $0x136c] ss:$16 sps:$4 sm:$0xff]   ;;  %v9823_v63 = vld [vmem:[%s11759_s5 + $0x1360] ss:$16 sps:$4 sm:$0xff]  }
 0x3d5   : > { %7093 = vmatprep.subr.bf16.mxu0 %v9741_v0  ;;  %7626 = vmatprep.subr.bf16.mxu1 %v9744_v1  ;;  %v9826_v0 = vld [vmem:[%s11759_s5 + $0x1368] ss:$16 sps:$4 sm:$0xff]   ;;  %v9831_v1 = vld [vmem:[%s11759_s5 + $0x1384] ss:$16 sps:$4 sm:$0xff]  }
 0x3d8   : > { %7094 = vmatpush1.bf16.msra.mxu0 %v9739_v3  ;;  %7627 = vmatpush1.bf16.msra.mxu1 %v9742_v5  ;;  %v9834_v3 = vld [vmem:[%s11759_s5 + $0x138c] ss:$16 sps:$4 sm:$0xff]   ;;  %v9829_v5 = vld [vmem:[%s11759_s5 + $0x1380] ss:$16 sps:$4 sm:$0xff]  }
 0x3d9   : > { %7095 = vmatprep.subr.bf16.mxu0 %v9747_v6  ;;  %7628 = vmatprep.subr.bf16.mxu1 %v9750_v7  ;;  %v9832_v6 = vld [vmem:[%s11759_s5 + $0x1388] ss:$16 sps:$4 sm:$0xff]   ;;  %v9837_v7 = vld [vmem:[%s11759_s5 + $0x13a4] ss:$16 sps:$4 sm:$0xff]  }
 0x3dc   : > { %7096 = vmatpush1.bf16.msra.mxu0 %v9745_v57  ;;  %7629 = vmatpush1.bf16.msra.mxu1 %v9748_v8  ;;  %v9840_v57 = vld [vmem:[%s11759_s5 + $0x13ac] ss:$16 sps:$4 sm:$0xff]   ;;  %v9835_v8 = vld [vmem:[%s11759_s5 + $0x13a0] ss:$16 sps:$4 sm:$0xff]  }
 0x3dd   : > { %7097 = vmatprep.subr.bf16.mxu0 %v9753_v9  ;;  %7630 = vmatprep.subr.bf16.mxu1 %v9756_v10  ;;  %v9838_v9 = vld [vmem:[%s11759_s5 + $0x13a8] ss:$16 sps:$4 sm:$0xff]   ;;  %v9843_v10 = vld [vmem:[%s11759_s5 + $0x13c4] ss:$16 sps:$4 sm:$0xff]  }
 0x3e0   : > { %7098 = vmatpush1.bf16.msra.mxu0 %v9751_v2  ;;  %7631 = vmatpush1.bf16.msra.mxu1 %v9754_v11  ;;  %v9846_v2 = vld [vmem:[%s11759_s5 + $0x13cc] ss:$16 sps:$4 sm:$0xff]   ;;  %v2728_v11 = vcombine.high %v12359_v54, %v12359_v54  ;;  %v9847_v54 = vld [vmem:[%s11759_s5 + $0x13e0] ss:$16 sps:$4 sm:$0xff]  }
 0x3e1   : > { %7108 = vmatprep.subr.bf16.mxu0 %v9759_v12  ;;  %7641 = vmatprep.subr.bf16.mxu1 %v9762_v34  ;;  %v9841_v12 = vld [vmem:[%s11759_s5 + $0x13c0] ss:$16 sps:$4 sm:$0xff]   ;;  %v9844_v34 = vld [vmem:[%s11759_s5 + $0x13c8] ss:$16 sps:$4 sm:$0xff]  }
 0x3e3   : > { %7100 = vmatmul.mubr.bf16.vlgmr.msra.gmra.mrb[0].mxu0 %v12448_v14  ;;  %7633 = vmatmul.mubr.bf16.vlgmr.msra.gmra.mrb[0].mxu1 %v12448_v14 }
 0x3e4   : > { %7109 = vmatpush1.bf16.msra.mxu0 %v9757_v15  ;;  %7642 = vmatpush1.bf16.msra.mxu1 %v9760_v16  ;;  %v9849_v15 = vld [vmem:[%s11759_s5 + $0x13e4] ss:$16 sps:$4 sm:$0xff]   ;;  %v9852_v16 = vld [vmem:[%s11759_s5 + $0x13ec] ss:$16 sps:$4 sm:$0xff]  }
 0x3e5   : > { %7110 = vmatprep.subr.bf16.mxu0 %v9765_v17  ;;  %7643 = vmatprep.subr.bf16.mxu1 %v9768_v18  ;;  %v12517_v17 = vrot.slane %v2728_v11, %v11764_v24  ;;  %v9850_v18 = vld [vmem:[%s11759_s5 + $0x13e8] ss:$16 sps:$4 sm:$0xff]  }
 0x3e6   : > { %7140 = vmatprep.mubr.bf16.mxu0 %v2775_v21  ;;  %7673 = vmatprep.mubr.bf16.mxu1 %v2775_v21  ;;  %v9855_v21 = vld [vmem:[%s11759_s5 + $0x1404] ss:$16 sps:$4 sm:$0xff]   ;;  %v9928_v11 = vld [vmem:[%s11759_s5 + $0x1588] ss:$16 sps:$4 sm:$0xff]  }
 0x3e8   : > { %7111 = vmatpush1.bf16.msra.mxu0 %v9763_v4  ;;  %7644 = vmatpush1.bf16.msra.mxu1 %v9766_v22  ;;  %v9858_v4 = vld [vmem:[%s11759_s5 + $0x140c] ss:$16 sps:$4 sm:$0xff]   ;;  %v2744_v22 = vcombine.high %v12517_v17, %v12517_v17 }
 0x3e9   : > { %7112 = vmatprep.subr.bf16.mxu0 %v9771_v23  ;;  %7645 = vmatprep.subr.bf16.mxu1 %v9774_v25  ;;  %v2773_v23 = vcombine.high %v12448_v14, %v12448_v14  ;;  %v9853_v25 = vld [vmem:[%s11759_s5 + $0x1400] ss:$16 sps:$4 sm:$0xff]  }
 0x3ea   : > { %v9859_v14 = vld [vmem:[%s11759_s5 + $0x1420] ss:$16 sps:$4 sm:$0xff]  }
 0x3ec   : > { %7113 = vmatpush1.bf16.msra.mxu0 %v9769_v13  ;;  %7646 = vmatpush1.bf16.msra.mxu1 %v9772_v26  ;;  %v9856_v13 = vld [vmem:[%s11759_s5 + $0x1408] ss:$16 sps:$4 sm:$0xff]   ;;  %v9861_v26 = vld [vmem:[%s11759_s5 + $0x1424] ss:$16 sps:$4 sm:$0xff]  }
 0x3ed   : > { %7114 = vmatprep.subr.bf16.mxu0 %v9777_v27  ;;  %7647 = vmatprep.subr.bf16.mxu1 %v9780_v29  ;;  %v9864_v27 = vld [vmem:[%s11759_s5 + $0x142c] ss:$16 sps:$4 sm:$0xff]   ;;  %v12532_v29 = vrot.slane %v2744_v22, %v11764_v24  ;;  %v9945_v22 = vld [vmem:[%s11759_s5 + $0x15e4] ss:$16 sps:$4 sm:$0xff]  }
 0x3f0   : > { %7115 = vmatpush1.bf16.msra.mxu0 %v9775_v30  ;;  %7648 = vmatpush1.bf16.msra.mxu1 %v9778_v31  ;;  %v9862_v30 = vld [vmem:[%s11759_s5 + $0x1428] ss:$16 sps:$4 sm:$0xff]   ;;  %v9867_v31 = vld [vmem:[%s11759_s5 + $0x1444] ss:$16 sps:$4 sm:$0xff]  }
 0x3f1   : > { %7116 = vmatprep.subr.bf16.mxu0 %v9783_v32  ;;  %7649 = vmatprep.subr.bf16.mxu1 %v9786_v33  ;;  %v9870_v32 = vld [vmem:[%s11759_s5 + $0x144c] ss:$16 sps:$4 sm:$0xff]   ;;  %v9865_v33 = vld [vmem:[%s11759_s5 + $0x1440] ss:$16 sps:$4 sm:$0xff]  }
 0x3f4   : > { %7117 = vmatpush1.bf16.msra.mxu0 %v9781_v36  ;;  %7650 = vmatpush1.bf16.msra.mxu1 %v9784_v38  ;;  %v9868_v36 = vld [vmem:[%s11759_s5 + $0x1448] ss:$16 sps:$4 sm:$0xff]   ;;  %v9873_v38 = vld [vmem:[%s11759_s5 + $0x1464] ss:$16 sps:$4 sm:$0xff]  }
 0x3f5   : > { %7118 = vmatprep.subr.bf16.mxu0 %v9789_v20  ;;  %7651 = vmatprep.subr.bf16.mxu1 %v9792_v39  ;;  %v9876_v20 = vld [vmem:[%s11759_s5 + $0x146c] ss:$16 sps:$4 sm:$0xff]   ;;  %v9871_v39 = vld [vmem:[%s11759_s5 + $0x1460] ss:$16 sps:$4 sm:$0xff]  }
 0x3f8   : > { %7119 = vmatpush1.bf16.msra.mxu0 %v9787_v28  ;;  %7652 = vmatpush1.bf16.msra.mxu1 %v9790_v40  ;;  %v9874_v28 = vld [vmem:[%s11759_s5 + $0x1468] ss:$16 sps:$4 sm:$0xff]   ;;  %v9879_v40 = vld [vmem:[%s11759_s5 + $0x1484] ss:$16 sps:$4 sm:$0xff]  }
 0x3f9   : > { %7120 = vmatprep.subr.bf16.mxu0 %v9795_v41  ;;  %7653 = vmatprep.subr.bf16.mxu1 %v9798_v42  ;;  %v9882_v41 = vld [vmem:[%s11759_s5 + $0x148c] ss:$16 sps:$4 sm:$0xff]   ;;  %v9877_v42 = vld [vmem:[%s11759_s5 + $0x1480] ss:$16 sps:$4 sm:$0xff]  }
 0x3fc   : > { %7121 = vmatpush1.bf16.msra.mxu0 %v9793_v43  ;;  %7654 = vmatpush1.bf16.msra.mxu1 %v9796_v45  ;;  %v9880_v43 = vld [vmem:[%s11759_s5 + $0x1488] ss:$16 sps:$4 sm:$0xff]   ;;  %v9885_v45 = vld [vmem:[%s11759_s5 + $0x14a4] ss:$16 sps:$4 sm:$0xff]  }
 0x3fd   : > { %7122 = vmatprep.subr.bf16.mxu0 %v9801_v46  ;;  %7655 = vmatprep.subr.bf16.mxu1 %v9804_v47  ;;  %v9888_v46 = vld [vmem:[%s11759_s5 + $0x14ac] ss:$16 sps:$4 sm:$0xff]   ;;  %v9883_v47 = vld [vmem:[%s11759_s5 + $0x14a0] ss:$16 sps:$4 sm:$0xff]  }
 0x400   : > { %7123 = vmatpush1.bf16.msra.mxu0 %v9799_v48  ;;  %7656 = vmatpush1.bf16.msra.mxu1 %v9802_v49  ;;  %v9886_v48 = vld [vmem:[%s11759_s5 + $0x14a8] ss:$16 sps:$4 sm:$0xff]   ;;  %v9891_v49 = vld [vmem:[%s11759_s5 + $0x14c4] ss:$16 sps:$4 sm:$0xff]  }
 0x401   : > { %7124 = vmatprep.subr.bf16.mxu0 %v9807_v50  ;;  %7657 = vmatprep.subr.bf16.mxu1 %v9810_v35  ;;  %v9894_v50 = vld [vmem:[%s11759_s5 + $0x14cc] ss:$16 sps:$4 sm:$0xff]   ;;  %v9889_v35 = vld [vmem:[%s11759_s5 + $0x14c0] ss:$16 sps:$4 sm:$0xff]  }
 0x404   : > { %7125 = vmatpush1.bf16.msra.mxu0 %v9805_v51  ;;  %7658 = vmatpush1.bf16.msra.mxu1 %v9808_v52  ;;  %v9892_v51 = vld [vmem:[%s11759_s5 + $0x14c8] ss:$16 sps:$4 sm:$0xff]   ;;  %v9897_v52 = vld [vmem:[%s11759_s5 + $0x14e4] ss:$16 sps:$4 sm:$0xff]  }
 0x405   : > { %7126 = vmatprep.subr.bf16.mxu0 %v9813_v44  ;;  %7659 = vmatprep.subr.bf16.mxu1 %v9816_v53  ;;  %v9900_v44 = vld [vmem:[%s11759_s5 + $0x14ec] ss:$16 sps:$4 sm:$0xff]   ;;  %v9895_v53 = vld [vmem:[%s11759_s5 + $0x14e0] ss:$16 sps:$4 sm:$0xff]  }
 0x408   : > { %7127 = vmatpush1.bf16.msra.mxu0 %v9811_v55  ;;  %7660 = vmatpush1.bf16.msra.mxu1 %v9814_v56  ;;  %v9898_v55 = vld [vmem:[%s11759_s5 + $0x14e8] ss:$16 sps:$4 sm:$0xff]   ;;  %v9903_v56 = vld [vmem:[%s11759_s5 + $0x1504] ss:$16 sps:$4 sm:$0xff]  }
 0x409   : > { %7128 = vmatprep.subr.bf16.mxu0 %v9819_v58  ;;  %7661 = vmatprep.subr.bf16.mxu1 %v9822_v59  ;;  %v9906_v58 = vld [vmem:[%s11759_s5 + $0x150c] ss:$16 sps:$4 sm:$0xff]   ;;  %v9901_v59 = vld [vmem:[%s11759_s5 + $0x1500] ss:$16 sps:$4 sm:$0xff]  }
 0x40c   : > { %7129 = vmatpush1.bf16.msra.mxu0 %v9817_v37  ;;  %7662 = vmatpush1.bf16.msra.mxu1 %v9820_v60  ;;  %v9904_v37 = vld [vmem:[%s11759_s5 + $0x1508] ss:$16 sps:$4 sm:$0xff]   ;;  %v9909_v60 = vld [vmem:[%s11759_s5 + $0x1524] ss:$16 sps:$4 sm:$0xff]  }
 0x40d   : > { %7130 = vmatprep.subr.bf16.mxu0 %v9825_v61  ;;  %7663 = vmatprep.subr.bf16.mxu1 %v9828_v62  ;;  %v9912_v61 = vld [vmem:[%s11759_s5 + $0x152c] ss:$16 sps:$4 sm:$0xff]   ;;  %v9907_v62 = vld [vmem:[%s11759_s5 + $0x1520] ss:$16 sps:$4 sm:$0xff]  }
 0x410   : > { %7131 = vmatpush1.bf16.msra.mxu0 %v9823_v63  ;;  %7664 = vmatpush1.bf16.msra.mxu1 %v9826_v0  ;;  %v9910_v63 = vld [vmem:[%s11759_s5 + $0x1528] ss:$16 sps:$4 sm:$0xff]   ;;  %v9915_v0 = vld [vmem:[%s11759_s5 + $0x1544] ss:$16 sps:$4 sm:$0xff]  }
 0x411   : > { %7132 = vmatprep.subr.bf16.mxu0 %v9831_v1  ;;  %7665 = vmatprep.subr.bf16.mxu1 %v9834_v3  ;;  %v9918_v1 = vld [vmem:[%s11759_s5 + $0x154c] ss:$16 sps:$4 sm:$0xff]   ;;  %v9913_v3 = vld [vmem:[%s11759_s5 + $0x1540] ss:$16 sps:$4 sm:$0xff]  }
 0x414   : > { %7133 = vmatpush1.bf16.msra.mxu0 %v9829_v5  ;;  %7666 = vmatpush1.bf16.msra.mxu1 %v9832_v6  ;;  %v9916_v5 = vld [vmem:[%s11759_s5 + $0x1548] ss:$16 sps:$4 sm:$0xff]   ;;  %v9921_v6 = vld [vmem:[%s11759_s5 + $0x1564] ss:$16 sps:$4 sm:$0xff]  }
 0x415   : > { %7134 = vmatprep.subr.bf16.mxu0 %v9837_v7  ;;  %7667 = vmatprep.subr.bf16.mxu1 %v9840_v57  ;;  %v9924_v7 = vld [vmem:[%s11759_s5 + $0x156c] ss:$16 sps:$4 sm:$0xff]   ;;  %v9919_v57 = vld [vmem:[%s11759_s5 + $0x1560] ss:$16 sps:$4 sm:$0xff]  }
 0x418   : > { %7135 = vmatpush1.bf16.msra.mxu0 %v9835_v8  ;;  %7668 = vmatpush1.bf16.msra.mxu1 %v9838_v9  ;;  %v9922_v8 = vld [vmem:[%s11759_s5 + $0x1568] ss:$16 sps:$4 sm:$0xff]   ;;  %v9927_v9 = vld [vmem:[%s11759_s5 + $0x1584] ss:$16 sps:$4 sm:$0xff]  }
 0x419   : > { %7136 = vmatprep.subr.bf16.mxu0 %v9843_v10  ;;  %7669 = vmatprep.subr.bf16.mxu1 %v9846_v2  ;;  %v9930_v10 = vld [vmem:[%s11759_s5 + $0x158c] ss:$16 sps:$4 sm:$0xff]   ;;  %v9925_v2 = vld [vmem:[%s11759_s5 + $0x1580] ss:$16 sps:$4 sm:$0xff]  }
 0x41c   : > { %7137 = vmatpush1.bf16.msra.mxu0 %v9841_v12  ;;  %7670 = vmatpush1.bf16.msra.mxu1 %v9844_v34  ;;  %v9933_v12 = vld [vmem:[%s11759_s5 + $0x15a4] ss:$16 sps:$4 sm:$0xff]   ;;  %v9936_v34 = vld [vmem:[%s11759_s5 + $0x15ac] ss:$16 sps:$4 sm:$0xff]  }
 0x41d   : > { %7138 = vmatprep.subr.bf16.mxu0 %v9849_v15  ;;  %7671 = vmatprep.subr.bf16.mxu1 %v9852_v16  ;;  %v9931_v15 = vld [vmem:[%s11759_s5 + $0x15a0] ss:$16 sps:$4 sm:$0xff]   ;;  %v9934_v16 = vld [vmem:[%s11759_s5 + $0x15a8] ss:$16 sps:$4 sm:$0xff]  }
 0x420   : > { %7139 = vmatpush1.bf16.msra.mxu0 %v9847_v54  ;;  %7672 = vmatpush1.bf16.msra.mxu1 %v9850_v18  ;;  %v9939_v54 = vld [vmem:[%s11759_s5 + $0x15c4] ss:$16 sps:$4 sm:$0xff]   ;;  %v9942_v18 = vld [vmem:[%s11759_s5 + $0x15cc] ss:$16 sps:$4 sm:$0xff]  }
 0x421   : > { %7149 = vmatprep.subr.bf16.mxu0 %v9855_v21  ;;  %7682 = vmatprep.subr.bf16.mxu1 %v9858_v4  ;;  %v9937_v21 = vld [vmem:[%s11759_s5 + $0x15c0] ss:$16 sps:$4 sm:$0xff]   ;;  %v9940_v4 = vld [vmem:[%s11759_s5 + $0x15c8] ss:$16 sps:$4 sm:$0xff]  }
 0x423   : > { %7141 = vmatmul.mubr.bf16.vlgmr.msra.gmra.mrb[0].mxu0 %v2773_v23  ;;  %7674 = vmatmul.mubr.bf16.vlgmr.msra.gmra.mrb[0].mxu1 %v2773_v23  ;;  %v9948_v23 = vld [vmem:[%s11759_s5 + $0x15ec] ss:$16 sps:$4 sm:$0xff]  }
 0x424   : > { %7150 = vmatpush1.bf16.msra.mxu0 %v9853_v25  ;;  %7683 = vmatpush1.bf16.msra.mxu1 %v9856_v13  ;;  %v9943_v25 = vld [vmem:[%s11759_s5 + $0x15e0] ss:$16 sps:$4 sm:$0xff]   ;;  %v9946_v13 = vld [vmem:[%s11759_s5 + $0x15e8] ss:$16 sps:$4 sm:$0xff]  }
 0x425   : > { %7151 = vmatprep.subr.bf16.mxu0 %v9861_v26  ;;  %7684 = vmatprep.subr.bf16.mxu1 %v9864_v27  ;;  %v9952_v26 = vld [vmem:[%s11759_s5 + $0x1604] ss:$16 sps:$4 sm:$0xff]   ;;  %v9955_v27 = vld [vmem:[%s11759_s5 + $0x160c] ss:$16 sps:$4 sm:$0xff]  }
 0x426   : > { %7181 = vmatprep.mubr.bf16.mxu0 %v12532_v29  ;;  %7714 = vmatprep.mubr.bf16.mxu1 %v12532_v29 }
 0x428   : > { %7152 = vmatpush1.bf16.msra.mxu0 %v9859_v14  ;;  %7685 = vmatpush1.bf16.msra.mxu1 %v9862_v30  ;;  %v12598_v14 = vrot.slane %v12517_v17, %v11764_v24  ;;  %v9950_v30 = vld [vmem:[%s11759_s5 + $0x1600] ss:$16 sps:$4 sm:$0xff]  }
 0x429   : > { %7153 = vmatprep.subr.bf16.mxu0 %v9867_v31  ;;  %7686 = vmatprep.subr.bf16.mxu1 %v9870_v32  ;;  %v9953_v31 = vld [vmem:[%s11759_s5 + $0x1608] ss:$16 sps:$4 sm:$0xff]   ;;  %v9958_v32 = vld [vmem:[%s11759_s5 + $0x1624] ss:$16 sps:$4 sm:$0xff]   ;;  %v9956_v17 = vld [vmem:[%s11759_s5 + $0x1620] ss:$16 sps:$4 sm:$0xff]  }
 0x42c   : > { %7154 = vmatpush1.bf16.msra.mxu0 %v9865_v33  ;;  %7687 = vmatpush1.bf16.msra.mxu1 %v9868_v36  ;;  %v9961_v33 = vld [vmem:[%s11759_s5 + $0x162c] ss:$16 sps:$4 sm:$0xff]   ;;  %v2776_v36 = vcombine.high %v12532_v29, %v12532_v29  ;;  %v9962_v29 = vld [vmem:[%s11759_s5 + $0x1640] ss:$16 sps:$4 sm:$0xff]  }
 0x42d   : > { %7155 = vmatprep.subr.bf16.mxu0 %v9873_v38  ;;  %7688 = vmatprep.subr.bf16.mxu1 %v9876_v20  ;;  %v9959_v38 = vld [vmem:[%s11759_s5 + $0x1628] ss:$16 sps:$4 sm:$0xff]   ;;  %v9964_v20 = vld [vmem:[%s11759_s5 + $0x1644] ss:$16 sps:$4 sm:$0xff]  }
 0x430   : > { %7156 = vmatpush1.bf16.msra.mxu0 %v9871_v39  ;;  %7689 = vmatpush1.bf16.msra.mxu1 %v9874_v28  ;;  %v9967_v39 = vld [vmem:[%s11759_s5 + $0x164c] ss:$16 sps:$4 sm:$0xff]   ;;  %v9965_v28 = vld [vmem:[%s11759_s5 + $0x1648] ss:$16 sps:$4 sm:$0xff]  }
 0x431   : > { %7157 = vmatprep.subr.bf16.mxu0 %v9879_v40  ;;  %7690 = vmatprep.subr.bf16.mxu1 %v9882_v41  ;;  %v9970_v40 = vld [vmem:[%s11759_s5 + $0x1664] ss:$16 sps:$4 sm:$0xff]   ;;  %v9973_v41 = vld [vmem:[%s11759_s5 + $0x166c] ss:$16 sps:$4 sm:$0xff]  }
 0x434   : > { %7158 = vmatpush1.bf16.msra.mxu0 %v9877_v42  ;;  %7691 = vmatpush1.bf16.msra.mxu1 %v9880_v43  ;;  %v9968_v42 = vld [vmem:[%s11759_s5 + $0x1660] ss:$16 sps:$4 sm:$0xff]   ;;  %v9971_v43 = vld [vmem:[%s11759_s5 + $0x1668] ss:$16 sps:$4 sm:$0xff]  }
 0x435   : > { %7159 = vmatprep.subr.bf16.mxu0 %v9885_v45  ;;  %7692 = vmatprep.subr.bf16.mxu1 %v9888_v46  ;;  %v9976_v45 = vld [vmem:[%s11759_s5 + $0x1684] ss:$16 sps:$4 sm:$0xff]   ;;  %v9979_v46 = vld [vmem:[%s11759_s5 + $0x168c] ss:$16 sps:$4 sm:$0xff]  }
 0x438   : > { %7160 = vmatpush1.bf16.msra.mxu0 %v9883_v47  ;;  %7693 = vmatpush1.bf16.msra.mxu1 %v9886_v48  ;;  %v9974_v47 = vld [vmem:[%s11759_s5 + $0x1680] ss:$16 sps:$4 sm:$0xff]   ;;  %v9977_v48 = vld [vmem:[%s11759_s5 + $0x1688] ss:$16 sps:$4 sm:$0xff]  }
 0x439   : > { %7161 = vmatprep.subr.bf16.mxu0 %v9891_v49  ;;  %7694 = vmatprep.subr.bf16.mxu1 %v9894_v50  ;;  %v9982_v49 = vld [vmem:[%s11759_s5 + $0x16a4] ss:$16 sps:$4 sm:$0xff]   ;;  %v9985_v50 = vld [vmem:[%s11759_s5 + $0x16ac] ss:$16 sps:$4 sm:$0xff]  }
 0x43c   : > { %7162 = vmatpush1.bf16.msra.mxu0 %v9889_v35  ;;  %7695 = vmatpush1.bf16.msra.mxu1 %v9892_v51  ;;  %v9980_v35 = vld [vmem:[%s11759_s5 + $0x16a0] ss:$16 sps:$4 sm:$0xff]   ;;  %v9983_v51 = vld [vmem:[%s11759_s5 + $0x16a8] ss:$16 sps:$4 sm:$0xff]  }
 0x43d   : > { %7163 = vmatprep.subr.bf16.mxu0 %v9897_v52  ;;  %7696 = vmatprep.subr.bf16.mxu1 %v9900_v44  ;;  %v9988_v52 = vld [vmem:[%s11759_s5 + $0x16c4] ss:$16 sps:$4 sm:$0xff]   ;;  %v9991_v44 = vld [vmem:[%s11759_s5 + $0x16cc] ss:$16 sps:$4 sm:$0xff]  }
 0x440   : > { %7164 = vmatpush1.bf16.msra.mxu0 %v9895_v53  ;;  %7697 = vmatpush1.bf16.msra.mxu1 %v9898_v55  ;;  %v9986_v53 = vld [vmem:[%s11759_s5 + $0x16c0] ss:$16 sps:$4 sm:$0xff]   ;;  %v9989_v55 = vld [vmem:[%s11759_s5 + $0x16c8] ss:$16 sps:$4 sm:$0xff]  }
 0x441   : > { %7165 = vmatprep.subr.bf16.mxu0 %v9903_v56  ;;  %7698 = vmatprep.subr.bf16.mxu1 %v9906_v58  ;;  %v9994_v56 = vld [vmem:[%s11759_s5 + $0x16e4] ss:$16 sps:$4 sm:$0xff]   ;;  %v9997_v58 = vld [vmem:[%s11759_s5 + $0x16ec] ss:$16 sps:$4 sm:$0xff]  }
 0x444   : > { %7166 = vmatpush1.bf16.msra.mxu0 %v9901_v59  ;;  %7699 = vmatpush1.bf16.msra.mxu1 %v9904_v37  ;;  %v9992_v59 = vld [vmem:[%s11759_s5 + $0x16e0] ss:$16 sps:$4 sm:$0xff]   ;;  %v9995_v37 = vld [vmem:[%s11759_s5 + $0x16e8] ss:$16 sps:$4 sm:$0xff]  }
 0x445   : > { %7167 = vmatprep.subr.bf16.mxu0 %v9909_v60  ;;  %7700 = vmatprep.subr.bf16.mxu1 %v9912_v61  ;;  %v10000_v60 = vld [vmem:[%s11759_s5 + $0x1704] ss:$16 sps:$4 sm:$0xff]   ;;  %v10003_v61 = vld [vmem:[%s11759_s5 + $0x170c] ss:$16 sps:$4 sm:$0xff]  }
 0x448   : > { %7168 = vmatpush1.bf16.msra.mxu0 %v9907_v62  ;;  %7701 = vmatpush1.bf16.msra.mxu1 %v9910_v63  ;;  %v9998_v62 = vld [vmem:[%s11759_s5 + $0x1700] ss:$16 sps:$4 sm:$0xff]   ;;  %v10001_v63 = vld [vmem:[%s11759_s5 + $0x1708] ss:$16 sps:$4 sm:$0xff]  }
 0x449   : > { %7169 = vmatprep.subr.bf16.mxu0 %v9915_v0  ;;  %7702 = vmatprep.subr.bf16.mxu1 %v9918_v1  ;;  %v10006_v0 = vld [vmem:[%s11759_s5 + $0x1724] ss:$16 sps:$4 sm:$0xff]   ;;  %v10009_v1 = vld [vmem:[%s11759_s5 + $0x172c] ss:$16 sps:$4 sm:$0xff]  }
 0x44c   : > { %7170 = vmatpush1.bf16.msra.mxu0 %v9913_v3  ;;  %7703 = vmatpush1.bf16.msra.mxu1 %v9916_v5  ;;  %v10004_v3 = vld [vmem:[%s11759_s5 + $0x1720] ss:$16 sps:$4 sm:$0xff]   ;;  %v10007_v5 = vld [vmem:[%s11759_s5 + $0x1728] ss:$16 sps:$4 sm:$0xff]  }
 0x44d   : > { %7171 = vmatprep.subr.bf16.mxu0 %v9921_v6  ;;  %7704 = vmatprep.subr.bf16.mxu1 %v9924_v7  ;;  %v10012_v6 = vld [vmem:[%s11759_s5 + $0x1744] ss:$16 sps:$4 sm:$0xff]   ;;  %v10015_v7 = vld [vmem:[%s11759_s5 + $0x174c] ss:$16 sps:$4 sm:$0xff]  }
 0x450   : > { %7172 = vmatpush1.bf16.msra.mxu0 %v9919_v57  ;;  %7705 = vmatpush1.bf16.msra.mxu1 %v9922_v8  ;;  %v10010_v57 = vld [vmem:[%s11759_s5 + $0x1740] ss:$16 sps:$4 sm:$0xff]   ;;  %v10013_v8 = vld [vmem:[%s11759_s5 + $0x1748] ss:$16 sps:$4 sm:$0xff]  }
 0x451   : > { %7173 = vmatprep.subr.bf16.mxu0 %v9927_v9  ;;  %7706 = vmatprep.subr.bf16.mxu1 %v9930_v10  ;;  %v10018_v9 = vld [vmem:[%s11759_s5 + $0x1764] ss:$16 sps:$4 sm:$0xff]   ;;  %v10021_v10 = vld [vmem:[%s11759_s5 + $0x176c] ss:$16 sps:$4 sm:$0xff]  }
 0x454   : > { %7174 = vmatpush1.bf16.msra.mxu0 %v9925_v2  ;;  %7707 = vmatpush1.bf16.msra.mxu1 %v9928_v11  ;;  %v10016_v2 = vld [vmem:[%s11759_s5 + $0x1760] ss:$16 sps:$4 sm:$0xff]   ;;  %v10019_v11 = vld [vmem:[%s11759_s5 + $0x1768] ss:$16 sps:$4 sm:$0xff]  }
 0x455   : > { %7175 = vmatprep.subr.bf16.mxu0 %v9933_v12  ;;  %7708 = vmatprep.subr.bf16.mxu1 %v9936_v34  ;;  %v10024_v12 = vld [vmem:[%s11759_s5 + $0x1784] ss:$16 sps:$4 sm:$0xff]   ;;  %v10027_v34 = vld [vmem:[%s11759_s5 + $0x178c] ss:$16 sps:$4 sm:$0xff]  }
 0x458   : > { %7176 = vmatpush1.bf16.msra.mxu0 %v9931_v15  ;;  %7709 = vmatpush1.bf16.msra.mxu1 %v9934_v16  ;;  %v10022_v15 = vld [vmem:[%s11759_s5 + $0x1780] ss:$16 sps:$4 sm:$0xff]   ;;  %v10025_v16 = vld [vmem:[%s11759_s5 + $0x1788] ss:$16 sps:$4 sm:$0xff]  }
 0x459   : > { %7177 = vmatprep.subr.bf16.mxu0 %v9939_v54  ;;  %7710 = vmatprep.subr.bf16.mxu1 %v9942_v18  ;;  %v10030_v54 = vld [vmem:[%s11759_s5 + $0x17a4] ss:$16 sps:$4 sm:$0xff]   ;;  %v10033_v18 = vld [vmem:[%s11759_s5 + $0x17ac] ss:$16 sps:$4 sm:$0xff]  }
 0x45c   : > { %7178 = vmatpush1.bf16.msra.mxu0 %v9937_v21  ;;  %7711 = vmatpush1.bf16.msra.mxu1 %v9940_v4  ;;  %v10028_v21 = vld [vmem:[%s11759_s5 + $0x17a0] ss:$16 sps:$4 sm:$0xff]   ;;  %v10031_v4 = vld [vmem:[%s11759_s5 + $0x17a8] ss:$16 sps:$4 sm:$0xff]  }
 0x45d   : > { %7179 = vmatprep.subr.bf16.mxu0 %v9945_v22  ;;  %7712 = vmatprep.subr.bf16.mxu1 %v9948_v23  ;;  %v10036_v22 = vld [vmem:[%s11759_s5 + $0x17c4] ss:$16 sps:$4 sm:$0xff]   ;;  %v10039_v23 = vld [vmem:[%s11759_s5 + $0x17cc] ss:$16 sps:$4 sm:$0xff]  }
 0x460   : > { %7180 = vmatpush1.bf16.msra.mxu0 %v9943_v25  ;;  %7713 = vmatpush1.bf16.msra.mxu1 %v9946_v13  ;;  %v10034_v25 = vld [vmem:[%s11759_s5 + $0x17c0] ss:$16 sps:$4 sm:$0xff]   ;;  %v10037_v13 = vld [vmem:[%s11759_s5 + $0x17c8] ss:$16 sps:$4 sm:$0xff]  }
 0x461   : > { %7190 = vmatprep.subr.bf16.mxu0 %v9952_v26  ;;  %7723 = vmatprep.subr.bf16.mxu1 %v9955_v27  ;;  %v10042_v26 = vld [vmem:[%s11759_s5 + $0x17e4] ss:$16 sps:$4 sm:$0xff]   ;;  %v10045_v27 = vld [vmem:[%s11759_s5 + $0x17ec] ss:$16 sps:$4 sm:$0xff]  }
 0x463   : > { %7182 = vmatmul.mubr.bf16.vlgmr.msra.gmra.mrb[0].mxu0 %v12598_v14  ;;  %7715 = vmatmul.mubr.bf16.vlgmr.msra.gmra.mrb[0].mxu1 %v12598_v14 }
 0x464   : > { %7191 = vmatpush1.bf16.msra.mxu0 %v9950_v30  ;;  %7724 = vmatpush1.bf16.msra.mxu1 %v9953_v31  ;;  %v10040_v30 = vld [vmem:[%s11759_s5 + $0x17e0] ss:$16 sps:$4 sm:$0xff]   ;;  %v10043_v31 = vld [vmem:[%s11759_s5 + $0x17e8] ss:$16 sps:$4 sm:$0xff]  }
 0x465   : > { %7192 = vmatprep.subr.bf16.mxu0 %v9958_v32  ;;  %7725 = vmatprep.subr.bf16.mxu1 %v9961_v33  ;;  %v10048_v32 = vld [vmem:[%s11759_s5 + $0x1804] ss:$16 sps:$4 sm:$0xff]   ;;  %v10051_v33 = vld [vmem:[%s11759_s5 + $0x180c] ss:$16 sps:$4 sm:$0xff]  }
 0x466   : > { %7222 = vmatprep.mubr.bf16.mxu0 %v2776_v36  ;;  %7755 = vmatprep.mubr.bf16.mxu1 %v2776_v36  ;;  %v2774_v36 = vcombine.high %v12598_v14, %v12598_v14  ;;  %v10055_v14 = vld [vmem:[%s11759_s5 + $0x1828] ss:$16 sps:$4 sm:$0xff]  }
 0x468   : > { %7193 = vmatpush1.bf16.msra.mxu0 %v9956_v17  ;;  %7726 = vmatpush1.bf16.msra.mxu1 %v9959_v38  ;;  %v10046_v17 = vld [vmem:[%s11759_s5 + $0x1800] ss:$16 sps:$4 sm:$0xff]   ;;  %v10049_v38 = vld [vmem:[%s11759_s5 + $0x1808] ss:$16 sps:$4 sm:$0xff]  }
 0x469   : > { %7194 = vmatprep.subr.bf16.mxu0 %v9964_v20  ;;  %7727 = vmatprep.subr.bf16.mxu1 %v9967_v39  ;;  %v10054_v20 = vld [vmem:[%s11759_s5 + $0x1824] ss:$16 sps:$4 sm:$0xff]   ;;  %v10057_v39 = vld [vmem:[%s11759_s5 + $0x182c] ss:$16 sps:$4 sm:$0xff]  }
 0x46c   : > { %7195 = vmatpush1.bf16.msra.mxu0 %v9962_v29  ;;  %7728 = vmatpush1.bf16.msra.mxu1 %v9965_v28  ;;  %v10052_v29 = vld [vmem:[%s11759_s5 + $0x1820] ss:$16 sps:$4 sm:$0xff]   ;;  %v10060_v28 = vld [vmem:[%s11759_s5 + $0x1844] ss:$16 sps:$4 sm:$0xff]  }
 0x46d   : > { %7196 = vmatprep.subr.bf16.mxu0 %v9970_v40  ;;  %7729 = vmatprep.subr.bf16.mxu1 %v9973_v41  ;;  %v10063_v40 = vld [vmem:[%s11759_s5 + $0x184c] ss:$16 sps:$4 sm:$0xff]   ;;  %v10113_v41 = vmov 0  }
 0x470   : > { %7197 = vmatpush1.bf16.msra.mxu0 %v9968_v42  ;;  %7730 = vmatpush1.bf16.msra.mxu1 %v9971_v43  ;;  %v10058_v42 = vld [vmem:[%s11759_s5 + $0x1840] ss:$16 sps:$4 sm:$0xff]   ;;  %v10061_v43 = vld [vmem:[%s11759_s5 + $0x1848] ss:$16 sps:$4 sm:$0xff]  }
 0x471   : > { %7198 = vmatprep.subr.bf16.mxu0 %v9976_v45  ;;  %7731 = vmatprep.subr.bf16.mxu1 %v9979_v46  ;;  %v10066_v45 = vld [vmem:[%s11759_s5 + $0x1864] ss:$16 sps:$4 sm:$0xff]   ;;  %v10069_v46 = vld [vmem:[%s11759_s5 + $0x186c] ss:$16 sps:$4 sm:$0xff]  }
 0x474   : > { %7199 = vmatpush1.bf16.msra.mxu0 %v9974_v47  ;;  %7732 = vmatpush1.bf16.msra.mxu1 %v9977_v48  ;;  %v10064_v47 = vld [vmem:[%s11759_s5 + $0x1860] ss:$16 sps:$4 sm:$0xff]   ;;  %v10067_v48 = vld [vmem:[%s11759_s5 + $0x1868] ss:$16 sps:$4 sm:$0xff]  }
 0x475   : > { %7200 = vmatprep.subr.bf16.mxu0 %v9982_v49  ;;  %7733 = vmatprep.subr.bf16.mxu1 %v9985_v50  ;;  %v7954_v49 = vld.sshfl [vmem:[%s12720_s0 + $0x18] sm:$0x1 pattern:$0x75316420] }
 0x476   : > { %v2790_v50 = vrot.slane %v7954_v49, %v11764_v24 }
 0x478   : > { %7201 = vmatpush1.bf16.msra.mxu0 %v9980_v35  ;;  %7734 = vmatpush1.bf16.msra.mxu1 %v9983_v51  ;;  %v2608_v35 = vsub.s32 0, %v11752_v19  ;;  %v2616_v51 = vsub.s32 2, %v11752_v19 }
 0x479   : > { %7202 = vmatprep.subr.bf16.mxu0 %v9988_v52  ;;  %7735 = vmatprep.subr.bf16.mxu1 %v9991_v44  ;;  %v2604_v52 = vld [vmem:[%s1804_s23] sm:$0xf]  ;;  %v2612_v44 = vsub.s32 1, %v11752_v19 }
 0x47c   : > { %7203 = vmatpush1.bf16.msra.mxu0 %v9986_v53  ;;  %7736 = vmatpush1.bf16.msra.mxu1 %v9989_v55  ;;  %v2620_v53 = vsub.s32 3, %v11752_v19  ;;  %v2609_v55 = vrot.slane %v2604_v52, %v2608_v35 }
 0x47d   : > { %7204 = vmatprep.subr.bf16.mxu0 %v9994_v56  ;;  %7737 = vmatprep.subr.bf16.mxu1 %v9997_v58  ;;  %v2617_v56 = vrot.slane %v2604_v52, %v2616_v51  ;;  %v2613_v58 = vrot.slane %v2604_v52, %v2612_v44 }
 0x480   : > { %7205 = vmatpush1.bf16.msra.mxu0 %v9992_v59  ;;  %7738 = vmatpush1.bf16.msra.mxu1 %v9995_v37  ;;  %v2621_v59 = vrot.slane %v2604_v52, %v2620_v53 }
 0x481   : > { %7206 = vmatprep.subr.bf16.mxu0 %v10000_v60  ;;  %7739 = vmatprep.subr.bf16.mxu1 %v10003_v61 }
 0x484   : > { %7207 = vmatpush1.bf16.msra.mxu0 %v9998_v62  ;;  %7740 = vmatpush1.bf16.msra.mxu1 %v10001_v63 }
 0x485   : > { %7208 = vmatprep.subr.bf16.mxu0 %v10006_v0  ;;  %7741 = vmatprep.subr.bf16.mxu1 %v10009_v1 }
 0x488   : > { %7209 = vmatpush1.bf16.msra.mxu0 %v10004_v3  ;;  %7742 = vmatpush1.bf16.msra.mxu1 %v10007_v5 }
 0x489   : > { %7210 = vmatprep.subr.bf16.mxu0 %v10012_v6  ;;  %7743 = vmatprep.subr.bf16.mxu1 %v10015_v7 }
 0x48c   : > { %7211 = vmatpush1.bf16.msra.mxu0 %v10010_v57  ;;  %7744 = vmatpush1.bf16.msra.mxu1 %v10013_v8 }
 0x48d   : > { %7212 = vmatprep.subr.bf16.mxu0 %v10018_v9  ;;  %7745 = vmatprep.subr.bf16.mxu1 %v10021_v10 }
 0x490   : > { %7213 = vmatpush1.bf16.msra.mxu0 %v10016_v2  ;;  %7746 = vmatpush1.bf16.msra.mxu1 %v10019_v11 }
 0x491   : > { %7214 = vmatprep.subr.bf16.mxu0 %v10024_v12  ;;  %7747 = vmatprep.subr.bf16.mxu1 %v10027_v34 }
 0x494   : > { %7215 = vmatpush1.bf16.msra.mxu0 %v10022_v15  ;;  %7748 = vmatpush1.bf16.msra.mxu1 %v10025_v16 }
 0x495   : > { %7216 = vmatprep.subr.bf16.mxu0 %v10030_v54  ;;  %7749 = vmatprep.subr.bf16.mxu1 %v10033_v18 }
 0x498   : > { %7217 = vmatpush1.bf16.msra.mxu0 %v10028_v21  ;;  %7750 = vmatpush1.bf16.msra.mxu1 %v10031_v4 }
 0x499   : > { %7218 = vmatprep.subr.bf16.mxu0 %v10036_v22  ;;  %7751 = vmatprep.subr.bf16.mxu1 %v10039_v23 }
 0x49c   : > { %7219 = vmatpush1.bf16.msra.mxu0 %v10034_v25  ;;  %7752 = vmatpush1.bf16.msra.mxu1 %v10037_v13 }
 0x49d   : > { %7220 = vmatprep.subr.bf16.mxu0 %v10042_v26  ;;  %7753 = vmatprep.subr.bf16.mxu1 %v10045_v27 }
 0x4a0   : > { %7221 = vmatpush1.bf16.msra.mxu0 %v10040_v30  ;;  %7754 = vmatpush1.bf16.msra.mxu1 %v10043_v31 }
 0x4a1   : > { %7231 = vmatprep.subr.bf16.mxu0 %v10048_v32  ;;  %7764 = vmatprep.subr.bf16.mxu1 %v10051_v33 }
 0x4a3   : > { %7223 = vmatmul.mubr.bf16.vlgmr.msra.gmra.mrb[0].mxu0 %v2774_v36  ;;  %7756 = vmatmul.mubr.bf16.vlgmr.msra.gmra.mrb[0].mxu1 %v2774_v36 }
 0x4a4   : > { %7232 = vmatpush1.bf16.msra.mxu0 %v10046_v17  ;;  %7765 = vmatpush1.bf16.msra.mxu1 %v10049_v38 }
 0x4a5   : > { %7233 = vmatprep.subr.bf16.mxu0 %v10054_v20  ;;  %7766 = vmatprep.subr.bf16.mxu1 %v10057_v39 }
 0x4a6   : > { %7263 = vmatprep.mubr.bf16.mxu0 %v10113_v41  ;;  %7796 = vmatprep.mubr.bf16.mxu1 %v10113_v41 }
 0x4a8   : > { %7234 = vmatpush1.bf16.msra.mxu0 %v10052_v29  ;;  %7767 = vmatpush1.bf16.msra.mxu1 %v10055_v14 }
 0x4a9   : > { %7235 = vmatprep.subr.bf16.mxu0 %v10060_v28  ;;  %7768 = vmatprep.subr.bf16.mxu1 %v10063_v40 }
 0x4ac   : > { %7236 = vmatpush1.bf16.msra.mxu0 %v10058_v42  ;;  %7769 = vmatpush1.bf16.msra.mxu1 %v10061_v43 }
 0x4ad   : > { %7237 = vmatprep.subr.bf16.mxu0 %v10066_v45  ;;  %7770 = vmatprep.subr.bf16.mxu1 %v10069_v46 }
 0x4b0   : > { %7238 = vmatpush1.bf16.msra.mxu0 %v10064_v47  ;;  %7771 = vmatpush1.bf16.msra.mxu1 %v10067_v48 }
 0x4b3   : > { %8739 = vmatmul.mubr.msk.bf16.vlgmr.msra.gmra.mrb[0].mxu0 %vm6735_vm0, %v2790_v50  ;;  %8740 = vmatmul.mubr.msk.bf16.vlgmr.msra.gmra.mrb[0].mxu1 %vm6735_vm0, %v2790_v50 }
 0x586   : > { %v7265_v37 = vpop.f32.mrb[0].mxu0  ;;  %v7798_v60 = vpop.f32.mrb[0].mxu1 }
 0x587   : > { %v8747_v61 = vadd.f32 %v7265_v37, %v2609_v55  ;;  %v8749_v62 = vadd.f32 %v7798_v60, %v2617_v56  ;;  %v7267_v63 = vpop.f32.mrb[1].mxu0  ;;  %v7800_v0 = vpop.f32.mrb[1].mxu1 }
 0x588   : > { %v8748_v1 = vadd.f32 %v7267_v63, %v2613_v58  ;;  %v8750_v3 = vadd.f32 %v7800_v0, %v2621_v59  ;;  %v7269_v5 = vpop.f32.mrb[2].mxu0  ;;  %v7802_v6 = vpop.f32.mrb[2].mxu1 }
 0x589   : > { %v7270_v7 = vpop.f32.mrb[3].mxu0  ;;  %v7803_v57 = vpop.f32.mrb[3].mxu1 }
 0x58a   : > { %v8741_v8 = vpack.c.bf16 %v8748_v1, %v8747_v61  ;;  %v8742_v9 = vpack.c.bf16 %v8750_v3, %v8749_v62 }
 0x58c   : > { %v7821_v19 = vrot.slane %v8741_v8, %v11764_v24  ;;  %v7828_v10 = vrot.slane %v8742_v9, %v11764_v24 }
 0x58e   : > { %v7829_v2 = vcombine.low %v7821_v19, %v7828_v10 }
 0x590   : > { %8743 = vst.sshfl [vmem:[%s1813_s25] sm:$0x55 pattern:$0x73625140] %v7829_v2 }
 0x591 PF: > { %s13_s16 = sadd.s32 1, %s10110_s16   ;;  %s12724_s12 = smov %s10098_s13 }
 0x592   : > { %p10_p10 = scmp.ge.s32.totalorder %s13_s16, 4   ;;  %s12725_s13 = smov %s10169_s20 }
 0x593   : > { %s12726_s14 = smov %s10106_s15  ;;  %s12727_s15 = smov %s12729_s17 }
 0x594   :  { %12 = sbr.rel (!%p10_p10) target bundleno = 3 (0x3), region = 96 }

</bundles_post_ra>
